<compile_context>
chip_gen: v6e
topology: v6e:2x2x1
jax: 0.10.0
libtpu: 0.0.40
codegen_flags: <defaults>
</compile_context>

<pallas_src>
import functools

import jax
import jax.numpy as jnp
from jax import lax
from jax.experimental import pallas as pl
from jax.experimental.pallas import tpu as pltpu

IN_CH = 3
CONV_CH = (8, 16, 32, 64)
FC_DIMS = (32, 16, 7)          # fc1 out, fc2 out, fc3 out (emotion classes)


def _round_up(x, m):
    return (x + m - 1) // m * m


def _geometry(h, w, bg):
    """Static per-block geometry.

    Blocks 2-4 keep their zero-padded, row-flattened, batch-stacked input in a VMEM
    buffer of bg*L rows.  Per sample:
      rows [0, T)                       : zeros (top padding)
      row  T + y*S + x,  x in [0, W)    : valid pixels of image row y  (x in [W,S) stay 0)
      rows [T + H*S, L)                 : zeros (bottom padding)
    so a 3x3 / pad-1 conv becomes 9 shifted 2-D slices of one buffer.  S, T, L are
    multiples of 16/8 so pooled-row stores and pooling slices are sublane aligned.
    """
    assert h % 16 == 0 and w % 16 == 0, "4x MaxPool2d(2) needs H, W divisible by 16"
    blocks = []
    cins = (IN_CH,) + CONV_CH[:-1]
    hh, ww = h, w
    for k in range(4):
        cin, cout = cins[k], CONV_CH[k]
        if k == 0:
            # block 1 is fed XLA-built im2col patches -> plain (H*W)-row layout.
            s_, t_, l_ = ww, 0, hh * ww
            m_ = bg * hh * ww
        else:
            s_ = _round_up(ww + 2, 16)                     # padded row stride (even, aligned)
            t_ = _round_up(s_ + 1, 8)                      # top padding rows
            l_ = _round_up(t_ + (hh + 2) * s_ + 1, 2 * s_)  # per-sample buffer rows
            m_ = (bg - 1) * l_ + hh * s_                   # conv-output rows for the group
        blocks.append(dict(H=hh, W=ww, Cin=cin, Cout=cout, S=s_, T=t_, L=l_, M=m_))
        hh, ww = hh // 2, ww // 2
    return blocks


# ------------------------------ kernel helpers --------------------------------
def _conv3x3(src_ref, w_ref, b_ref, y_ref, d):
    """3x3 pad-1 conv (+bias+ReLU): 9 shifted-slice MXU matmuls accumulated in a value,
    then ONE store of the (M, Cout) activation."""
    s_, t_, m_ = d["S"], d["T"], d["M"]
    acc = None
    for tap in range(9):
        dy, dx = divmod(tap, 3)
        start = t_ - s_ - 1 + dy * s_ + dx
        part = jnp.dot(src_ref[pl.ds(start, m_), :], w_ref[tap],
                       preferred_element_type=jnp.float32)
        acc = part if acc is None else acc + part
    y_ref[...] = jnp.maximum(acc + b_ref[...], 0.0)


def _pool_rows(y_ref, d):
    """2x2 max-pool: stride-2 sublane loads for the horizontal pairs, then one
    vectorized vertical max over 2-image-row chunks.  Returns (chunks, S/2, C)."""
    rows, ch = y_ref.shape
    half = rows // 2
    hmax = jnp.maximum(y_ref[pl.ds(0, half, stride=2), :],
                       y_ref[pl.ds(1, half, stride=2), :])
    s_ = d["S"]
    hw = s_ // 2
    hc = hmax.reshape(half // s_, s_, ch)                  # S is a multiple of 8
    return jnp.maximum(hc[:, :hw, :], hc[:, hw:, :])


def _pool_to(y_ref, d_src, d_dst, dst_ref, bg):
    """Write the pooled rows straight into the next block's padded flat input (bf16).
    Destination offsets are multiples of 8 by construction of (L, T, S)."""
    v = _pool_rows(y_ref, d_src)
    cps = d_src["L"] // (2 * d_src["S"])                   # pooled row-chunks per sample
    ho, wo = d_src["H"] // 2, d_src["W"] // 2
    for s in range(bg):
        for yo in range(ho):
            dst = s * d_dst["L"] + d_dst["T"] + yo * d_dst["S"]
            dst_ref[pl.ds(dst, wo), :] = v[s * cps + yo, :wo, :].astype(dst_ref.dtype)


def _pool_to_features(y_ref, d, feats_ref, bg):
    """Block-4 2x2 max-pool followed by AdaptiveAvgPool2d(1): (bg, C) feature rows."""
    v = _pool_rows(y_ref, d)
    cps = d["L"] // (2 * d["S"])
    ho, wo = d["H"] // 2, d["W"] // 2
    inv = 1.0 / float(ho * wo)
    for s in range(bg):
        tot = None
        for yo in range(ho):
            part = jnp.sum(v[s * cps + yo, :wo, :], axis=0, keepdims=True)
            tot = part if tot is None else tot + part
        feats_ref[pl.ds(s, 1), :] = tot * inv


# ------------------------------ fused kernel ----------------------------------
def _fused_kernel(geom, bg,
                  patches_ref,
                  cw1, cb1, cw2, cb2, cw3, cb3, cw4, cb4,
                  fw1, fb1, fw2, fb2, fw3, fb3,
                  out_ref,
                  y1, p2, y2, p3, y3, p4, y4, feats):
    d1, d2, d3, d4 = geom

    # The zero borders / junk columns of the padded buffers never change between steps:
    # zero them only on the first step of the sequential axis (per core).
    @pl.when(pl.program_id(1) == 0)
    def _zero_pad_buffers():
        p2[...] = jnp.zeros(p2.shape, p2.dtype)
        p3[...] = jnp.zeros(p3.shape, p3.dtype)
        p4[...] = jnp.zeros(p4.shape, p4.dtype)

    # conv block 1: XLA-prebuilt im2col patches -> single K-packed MXU matmul.
    a1 = jnp.dot(patches_ref[...], cw1[...], preferred_element_type=jnp.float32)
    y1[...] = jnp.maximum(a1 + cb1[...], 0.0)
    _pool_to(y1, d1, d2, p2, bg)

    # conv blocks 2-4: 9 shifted-slice matmuls each, value accumulation, one store.
    _conv3x3(p2, cw2, cb2, y2, d2)
    _pool_to(y2, d2, d3, p3, bg)
    _conv3x3(p3, cw3, cb3, y3, d3)
    _pool_to(y3, d3, d4, p4, bg)
    _conv3x3(p4, cw4, cb4, y4, d4)

    # x.register_hook(...) is backward-only -> nothing to do in the forward pass.
    _pool_to_features(y4, d4, feats, bg)

    # avgpool+flatten -> fc1 -> ReLU -> dropout(eval=identity) -> fc2 -> ReLU -> fc3
    f = feats[...]
    h = jnp.maximum(jnp.dot(f, fw1[...], preferred_element_type=jnp.float32) + fb1[...], 0.0)
    h = jnp.maximum(jnp.dot(h, fw2[...], preferred_element_type=jnp.float32) + fb2[...], 0.0)
    logits = jnp.dot(h, fw3[...], preferred_element_type=jnp.float32) + fb3[...]
    out_ref[...] = logits.astype(out_ref.dtype)


# ------------------------------ wrapper ----------------------------------------
_W_ORDER = ("cw1", "cb1", "cw2", "cb2", "cw3", "cb3", "cw4", "cb4",
            "fw1", "fb1", "fw2", "fb2", "fw3", "fb3")


def _zero_index(ndim, i, j):
    return (0,) * ndim


def forward(kparams, x_nchw, batch_group=None):
    """Forward pass of CustomEmotionModel3Grad (eval mode) as one fused pallas_call."""
    x = jnp.transpose(x_nchw, (0, 2, 3, 1)).astype(jnp.bfloat16)     # NCHW -> NHWC, bf16
    n, h, w, c = x.shape
    assert c == IN_CH

    # Batch tiling: bg samples per grid step; keep the grid even (>=2 steps) so v7x's
    # two TensorCores both get work, and cap bg at 8.
    bg = batch_group if batch_group is not None else max(1, min(8, -(-n // 2)))
    groups = -(-n // bg)
    gpc = -(-groups // 2)                 # sequential steps per core
    groups_pad = 2 * gpc
    n_pad = groups_pad * bg
    if n_pad != n:
        x = jnp.pad(x, ((0, n_pad - n), (0, 0), (0, 0), (0, 0)))

    geom = _geometry(h, w, bg)
    d1, d2, d3, d4 = geom

    # XLA-side im2col for conv block 1 only (~55 KB/sample in bf16): gives the kernel a
    # lane-dense input and a single K=9*Cin matmul for the largest-M block.
    xp = jnp.pad(x, ((0, 0), (1, 1), (1, 1), (0, 0)))
    pats = jnp.concatenate(
        [xp[:, dy:dy + h, dx:dx + w, :] for dy in range(3) for dx in range(3)], axis=-1)
    k1 = 9 * IN_CH
    k1p = _round_up(k1, 16)
    pats = jnp.pad(pats, ((0, 0), (0, 0), (0, 0), (0, k1p - k1)))
    pats = pats.reshape(n_pad * h * w, k1p)

    flat_w = [kparams[k] for k in _W_ORDER]
    w_specs = [pl.BlockSpec(p.shape, functools.partial(_zero_index, p.ndim))
               for p in flat_w]

    m1 = bg * h * w
    in_specs = [pl.BlockSpec((m1, k1p), lambda i, j: (i * gpc + j, 0))] + w_specs
    out_spec = pl.BlockSpec((None, bg, FC_DIMS[-1]), lambda i, j: (i * gpc + j, 0, 0))

    scratch = [
        pltpu.VMEM((d1["M"], d1["Cout"]), jnp.float32),        # y1: conv1 + ReLU
        pltpu.VMEM((bg * d2["L"], d2["Cin"]), jnp.bfloat16),    # p2: padded input of block 2
        pltpu.VMEM((d2["M"], d2["Cout"]), jnp.float32),         # y2
        pltpu.VMEM((bg * d3["L"], d3["Cin"]), jnp.bfloat16),    # p3
        pltpu.VMEM((d3["M"], d3["Cout"]), jnp.float32),         # y3
        pltpu.VMEM((bg * d4["L"], d4["Cin"]), jnp.bfloat16),    # p4
        pltpu.VMEM((d4["M"], d4["Cout"]), jnp.float32),         # y4
        pltpu.VMEM((bg, CONV_CH[-1]), jnp.float32),             # per-sample features
    ]

    out = pl.pallas_call(
        functools.partial(_fused_kernel, geom, bg),
        out_shape=jax.ShapeDtypeStruct((groups_pad, bg, FC_DIMS[-1]), jnp.float32),
        grid_spec=pltpu.PrefetchScalarGridSpec(
            num_scalar_prefetch=0,
            grid=(2, gpc),
            in_specs=in_specs,
            out_specs=out_spec,
            scratch_shapes=scratch),
        compiler_params=pltpu.CompilerParams(
            dimension_semantics=("parallel", "arbitrary")),
    )(pats, *flat_w)
    return out.reshape(n_pad, FC_DIMS[-1])[:n]


# ------------------------------ parameters -------------------------------------
def prepare_params(params):
    """One-time (outside jit) conversion of HWIO conv / (in,out) fc params into the
    kernel's layouts: conv1 as a (9*Cin padded, Cout) bf16 im2col matrix, conv2-4 as
    (9, Cin, Cout) bf16 slabs, fc weights in f32."""
    kp = {}
    w1, b1 = params["conv"][0]
    k1 = 9 * IN_CH
    k1p = _round_up(k1, 16)
    w1m = jnp.asarray(w1, jnp.float32).reshape(k1, CONV_CH[0])
    kp["cw1"] = jnp.pad(w1m, ((0, k1p - k1), (0, 0))).astype(jnp.bfloat16)
    kp["cb1"] = jnp.asarray(b1, jnp.float32).reshape(1, -1)
    for i in range(1, 4):
        w, b = params["conv"][i]
        kp["cw%d" % (i + 1)] = jnp.asarray(w, jnp.float32).reshape(
            9, w.shape[2], w.shape[3]).astype(jnp.bfloat16)
        kp["cb%d" % (i + 1)] = jnp.asarray(b, jnp.float32).reshape(1, -1)
    for i, name in enumerate(("fc1", "fc2", "fc3"), start=1):
        w, b = params[name]
        kp["fw%d" % i] = jnp.asarray(w, jnp.float32)
        kp["fb%d" % i] = jnp.asarray(b, jnp.float32).reshape(1, -1)
    return kp


def init_params(key):
    params = {"conv": []}
    chans = (IN_CH,) + CONV_CH
    keys = jax.random.split(key, 14)
    for i in range(4):
        cin, cout = chans[i], chans[i + 1]
        w = jax.random.normal(keys[2 * i], (3, 3, cin, cout), jnp.float32) * (2.0 / (9 * cin)) ** 0.5
        b = jax.random.normal(keys[2 * i + 1], (cout,), jnp.float32) * 0.01
        params["conv"].append((w, b))
    dims = (CONV_CH[-1],) + FC_DIMS
    for i, name in enumerate(("fc1", "fc2", "fc3")):
        din, dout = dims[i], dims[i + 1]
        w = jax.random.normal(keys[8 + 2 * i], (din, dout), jnp.float32) * (2.0 / din) ** 0.5
        b = jax.random.normal(keys[9 + 2 * i], (dout,), jnp.float32) * 0.01
        params[name] = (w, b)
    return params


# ------------------------------ pure-JAX reference -----------------------------
def _reference_forward(params, x_nchw):
    """f32 reference applying the same bf16 roundings the kernel uses (inputs, conv
    weights, pooled activations feeding a conv)."""
    x = jnp.transpose(x_nchw, (0, 2, 3, 1)).astype(jnp.bfloat16).astype(jnp.float32)
    for i, (w, b) in enumerate(params["conv"]):
        wq = jnp.asarray(w, jnp.float32).astype(jnp.bfloat16).astype(jnp.float32)
        x = lax.conv_general_dilated(
            x, wq, (1, 1), "SAME",
            dimension_numbers=("NHWC", "HWIO", "NHWC"),
            precision=lax.Precision.HIGHEST)
        x = jnp.maximum(x + jnp.asarray(b, jnp.float32), 0.0)
        x = lax.reduce_window(x, -jnp.inf, lax.max, (1, 2, 2, 1), (1, 2, 2, 1), "VALID")
        if i < 3:
            x = x.astype(jnp.bfloat16).astype(jnp.float32)
    f = jnp.mean(x, axis=(1, 2))
    for i, name in enumerate(("fc1", "fc2", "fc3")):
        w, b = params[name]
        f = jnp.dot(f, w, precision=lax.Precision.HIGHEST) + b
        if i < 2:
            f = jnp.maximum(f, 0.0)
    return f


if __name__ == "__main__":
    key = jax.random.PRNGKey(0)
    kx, kp = jax.random.split(key)
    x = jax.random.normal(kx, (2, IN_CH, 32, 32), jnp.float32)   # NCHW like PyTorch
    params = init_params(kp)
    kparams = prepare_params(params)          # weight layout/dtype prep once, outside jit

    fwd = jax.jit(forward)
    out = fwd(kparams, x)
    jax.block_until_ready(out)

    assert out.shape == (2, FC_DIMS[-1]) and out.dtype == jnp.float32
    assert bool(jnp.all(jnp.isfinite(out)))

    ref = _reference_forward(params, x)
    max_err = float(jnp.max(jnp.abs(out - ref)))
    assert max_err < 5e-3, "kernel/reference mismatch: max |diff| = %g" % max_err
    print("KERNEL_OK")
</pallas_src>

<mosaic_0001>
module attributes {stable_mosaic.version = 11 : i64} {
  func.func @_fused_kernel(%arg0: i32, %arg1: i32, %arg2: memref<1024x32xbf16, #tpu.memory_space<vmem>>, %arg3: memref<32x8xbf16, #tpu.memory_space<vmem>>, %arg4: memref<1x8xf32, #tpu.memory_space<vmem>>, %arg5: memref<9x8x16xbf16, #tpu.memory_space<vmem>>, %arg6: memref<1x16xf32, #tpu.memory_space<vmem>>, %arg7: memref<9x16x32xbf16, #tpu.memory_space<vmem>>, %arg8: memref<1x32xf32, #tpu.memory_space<vmem>>, %arg9: memref<9x32x64xbf16, #tpu.memory_space<vmem>>, %arg10: memref<1x64xf32, #tpu.memory_space<vmem>>, %arg11: memref<64x32xf32, #tpu.memory_space<vmem>>, %arg12: memref<1x32xf32, #tpu.memory_space<vmem>>, %arg13: memref<32x16xf32, #tpu.memory_space<vmem>>, %arg14: memref<1x16xf32, #tpu.memory_space<vmem>>, %arg15: memref<16x7xf32, #tpu.memory_space<vmem>>, %arg16: memref<1x7xf32, #tpu.memory_space<vmem>>, %arg17: memref<1x1x7xf32, #tpu.memory_space<vmem>>, %arg18: memref<1024x8xf32, #tpu.memory_space<vmem>>, %arg19: memref<640x8xbf16, #tpu.memory_space<vmem>>, %arg20: memref<512x16xf32, #tpu.memory_space<vmem>>, %arg21: memref<192x16xbf16, #tpu.memory_space<vmem>>, %arg22: memref<128x32xf32, #tpu.memory_space<vmem>>, %arg23: memref<128x32xbf16, #tpu.memory_space<vmem>>, %arg24: memref<64x64xf32, #tpu.memory_space<vmem>>, %arg25: memref<1x64xf32, #tpu.memory_space<vmem>>) attributes {dimension_semantics = [#tpu.dimension_semantics<parallel>, #tpu.dimension_semantics<arbitrary>], iteration_bounds = array<i64: 2, 1>, scalar_prefetch = 0 : i64, scratch_operands = 8 : i64, tpu.core_type = #tpu.core_type<tc>, window_params = [{transform_indices = @transform_0, window_bounds = array<i64: 1024, 32>}, {pipeline_mode = #tpu.pipeline_mode<synchronous>, transform_indices = @transform_1, window_bounds = array<i64: 32, 8>}, {pipeline_mode = #tpu.pipeline_mode<synchronous>, transform_indices = @transform_2, window_bounds = array<i64: 1, 8>}, {pipeline_mode = #tpu.pipeline_mode<synchronous>, transform_indices = @transform_3, window_bounds = array<i64: 9, 8, 16>}, {pipeline_mode = #tpu.pipeline_mode<synchronous>, transform_indices = @transform_4, window_bounds = array<i64: 1, 16>}, {pipeline_mode = #tpu.pipeline_mode<synchronous>, transform_indices = @transform_5, window_bounds = array<i64: 9, 16, 32>}, {pipeline_mode = #tpu.pipeline_mode<synchronous>, transform_indices = @transform_6, window_bounds = array<i64: 1, 32>}, {pipeline_mode = #tpu.pipeline_mode<synchronous>, transform_indices = @transform_7, window_bounds = array<i64: 9, 32, 64>}, {pipeline_mode = #tpu.pipeline_mode<synchronous>, transform_indices = @transform_8, window_bounds = array<i64: 1, 64>}, {pipeline_mode = #tpu.pipeline_mode<synchronous>, transform_indices = @transform_9, window_bounds = array<i64: 64, 32>}, {pipeline_mode = #tpu.pipeline_mode<synchronous>, transform_indices = @transform_10, window_bounds = array<i64: 1, 32>}, {pipeline_mode = #tpu.pipeline_mode<synchronous>, transform_indices = @transform_11, window_bounds = array<i64: 32, 16>}, {pipeline_mode = #tpu.pipeline_mode<synchronous>, transform_indices = @transform_12, window_bounds = array<i64: 1, 16>}, {pipeline_mode = #tpu.pipeline_mode<synchronous>, transform_indices = @transform_13, window_bounds = array<i64: 16, 7>}, {pipeline_mode = #tpu.pipeline_mode<synchronous>, transform_indices = @transform_14, window_bounds = array<i64: 1, 7>}, {transform_indices = @transform_15, window_bounds = array<i64: 1, 1, 7>}]} {
    %c0_i32 = arith.constant 0 : i32
    %0 = arith.cmpi eq, %arg1, %c0_i32 : i32
    %1 = arith.extui %0 : i1 to i32
    %c0_i32_0 = arith.constant 0 : i32
    %2 = arith.cmpi ne, %1, %c0_i32_0 : i32
    scf.if %2 {
      %cst_250 = arith.constant 0.000000e+00 : bf16
      %334 = vector.broadcast %cst_250 : bf16 to vector<640x8xbf16>
      %c0_251 = arith.constant 0 : index
      %c0_252 = arith.constant 0 : index
      %335 = vector.load %arg19[%c0_251, %c0_252] : memref<640x8xbf16, #tpu.memory_space<vmem>>, vector<640x8xbf16>
      tpu.vector_store %arg19[%c0_251, %c0_252], %334 {strides = array<i32>} : memref<640x8xbf16, #tpu.memory_space<vmem>>, vector<640x8xbf16>,
      %cst_253 = arith.constant 0.000000e+00 : bf16
      %336 = vector.broadcast %cst_253 : bf16 to vector<192x16xbf16>
      %c0_254 = arith.constant 0 : index
      %c0_255 = arith.constant 0 : index
      %337 = vector.load %arg21[%c0_254, %c0_255] : memref<192x16xbf16, #tpu.memory_space<vmem>>, vector<192x16xbf16>
      tpu.vector_store %arg21[%c0_254, %c0_255], %336 {strides = array<i32>} : memref<192x16xbf16, #tpu.memory_space<vmem>>, vector<192x16xbf16>,
      %cst_256 = arith.constant 0.000000e+00 : bf16
      %338 = vector.broadcast %cst_256 : bf16 to vector<128x32xbf16>
      %c0_257 = arith.constant 0 : index
      %c0_258 = arith.constant 0 : index
      %339 = vector.load %arg23[%c0_257, %c0_258] : memref<128x32xbf16, #tpu.memory_space<vmem>>, vector<128x32xbf16>
      tpu.vector_store %arg23[%c0_257, %c0_258], %338 {strides = array<i32>} : memref<128x32xbf16, #tpu.memory_space<vmem>>, vector<128x32xbf16>,
    } else {
    }
    %c0 = arith.constant 0 : index
    %c0_1 = arith.constant 0 : index
    %3 = vector.load %arg2[%c0, %c0_1] : memref<1024x32xbf16, #tpu.memory_space<vmem>>, vector<1024x32xbf16>
    %c0_2 = arith.constant 0 : index
    %c0_3 = arith.constant 0 : index
    %4 = vector.load %arg3[%c0_2, %c0_3] : memref<32x8xbf16, #tpu.memory_space<vmem>>, vector<32x8xbf16>
    %cst = arith.constant dense<0.000000e+00> : vector<1024x8xf32>
    %5 = tpu.matmul %3, %4, %cst {dimension_numbers = #tpu.dot_dimension_numbers<[1], [0], [0], [1], [0, 0, 1, 1], [], []>} : vector<1024x32xbf16>, vector<32x8xbf16>, vector<1024x8xf32> -> vector<1024x8xf32>
    %c0_4 = arith.constant 0 : index
    %c0_5 = arith.constant 0 : index
    %6 = vector.load %arg4[%c0_4, %c0_5] : memref<1x8xf32, #tpu.memory_space<vmem>>, vector<1x8xf32>
    %7 = vector.broadcast %6 : vector<1x8xf32> to vector<1024x8xf32>
    %8 = arith.addf %5, %7 : vector<1024x8xf32>
    %cst_6 = arith.constant 0.000000e+00 : f32
    %9 = vector.broadcast %cst_6 : f32 to vector<1024x8xf32>
    %10 = arith.maximumf %8, %9 : vector<1024x8xf32>
    %c0_7 = arith.constant 0 : index
    %c0_8 = arith.constant 0 : index
    %11 = vector.load %arg18[%c0_7, %c0_8] : memref<1024x8xf32, #tpu.memory_space<vmem>>, vector<1024x8xf32>
    tpu.vector_store %arg18[%c0_7, %c0_8], %10 {strides = array<i32>} : memref<1024x8xf32, #tpu.memory_space<vmem>>, vector<1024x8xf32>,
    %c0_9 = arith.constant 0 : index
    %c0_10 = arith.constant 0 : index
    %12 = tpu.strided_load %arg18[%c0_9, %c0_10] {strides = array<i32: 2, 1>} : memref<1024x8xf32, #tpu.memory_space<vmem>>, vector<512x8xf32>
    %c1 = arith.constant 1 : index
    %c0_11 = arith.constant 0 : index
    %13 = tpu.strided_load %arg18[%c1, %c0_11] {strides = array<i32: 2, 1>} : memref<1024x8xf32, #tpu.memory_space<vmem>>, vector<512x8xf32>
    %14 = arith.maximumf %12, %13 : vector<512x8xf32>
    %15 = vector.shape_cast %14 : vector<512x8xf32> to vector<16x32x8xf32>
    %16 = vector.extract_strided_slice %15 {offsets = [0, 0, 0], sizes = [16, 16, 8], strides = [1, 1, 1]} : vector<16x32x8xf32> to vector<16x16x8xf32>
    %17 = vector.extract_strided_slice %15 {offsets = [0, 16, 0], sizes = [16, 16, 8], strides = [1, 1, 1]} : vector<16x32x8xf32> to vector<16x16x8xf32>
    %18 = arith.maximumf %16, %17 : vector<16x16x8xf32>
    %19 = vector.extract_strided_slice %18 {offsets = [0, 0, 0], sizes = [1, 16, 8], strides = [1, 1, 1]} : vector<16x16x8xf32> to vector<1x16x8xf32>
    %20 = vector.shape_cast %19 : vector<1x16x8xf32> to vector<16x8xf32>
    %21 = arith.truncf %20 : vector<16x8xf32> to vector<16x8xbf16>
    %c40 = arith.constant 40 : index
    %c0_12 = arith.constant 0 : index
    %22 = vector.load %arg19[%c40, %c0_12] : memref<640x8xbf16, #tpu.memory_space<vmem>>, vector<16x8xbf16>
    tpu.vector_store %arg19[%c40, %c0_12], %21 {strides = array<i32>} : memref<640x8xbf16, #tpu.memory_space<vmem>>, vector<16x8xbf16>,
    %23 = vector.extract_strided_slice %18 {offsets = [1, 0, 0], sizes = [1, 16, 8], strides = [1, 1, 1]} : vector<16x16x8xf32> to vector<1x16x8xf32>
    %24 = vector.shape_cast %23 : vector<1x16x8xf32> to vector<16x8xf32>
    %25 = arith.truncf %24 : vector<16x8xf32> to vector<16x8xbf16>
    %c72 = arith.constant 72 : index
    %c0_13 = arith.constant 0 : index
    %26 = vector.load %arg19[%c72, %c0_13] : memref<640x8xbf16, #tpu.memory_space<vmem>>, vector<16x8xbf16>
    tpu.vector_store %arg19[%c72, %c0_13], %25 {strides = array<i32>} : memref<640x8xbf16, #tpu.memory_space<vmem>>, vector<16x8xbf16>,
    %27 = vector.extract_strided_slice %18 {offsets = [2, 0, 0], sizes = [1, 16, 8], strides = [1, 1, 1]} : vector<16x16x8xf32> to vector<1x16x8xf32>
    %28 = vector.shape_cast %27 : vector<1x16x8xf32> to vector<16x8xf32>
    %29 = arith.truncf %28 : vector<16x8xf32> to vector<16x8xbf16>
    %c104 = arith.constant 104 : index
    %c0_14 = arith.constant 0 : index
    %30 = vector.load %arg19[%c104, %c0_14] : memref<640x8xbf16, #tpu.memory_space<vmem>>, vector<16x8xbf16>
    tpu.vector_store %arg19[%c104, %c0_14], %29 {strides = array<i32>} : memref<640x8xbf16, #tpu.memory_space<vmem>>, vector<16x8xbf16>,
    %31 = vector.extract_strided_slice %18 {offsets = [3, 0, 0], sizes = [1, 16, 8], strides = [1, 1, 1]} : vector<16x16x8xf32> to vector<1x16x8xf32>
    %32 = vector.shape_cast %31 : vector<1x16x8xf32> to vector<16x8xf32>
    %33 = arith.truncf %32 : vector<16x8xf32> to vector<16x8xbf16>
    %c136 = arith.constant 136 : index
    %c0_15 = arith.constant 0 : index
    %34 = vector.load %arg19[%c136, %c0_15] : memref<640x8xbf16, #tpu.memory_space<vmem>>, vector<16x8xbf16>
    tpu.vector_store %arg19[%c136, %c0_15], %33 {strides = array<i32>} : memref<640x8xbf16, #tpu.memory_space<vmem>>, vector<16x8xbf16>,
    %35 = vector.extract_strided_slice %18 {offsets = [4, 0, 0], sizes = [1, 16, 8], strides = [1, 1, 1]} : vector<16x16x8xf32> to vector<1x16x8xf32>
    %36 = vector.shape_cast %35 : vector<1x16x8xf32> to vector<16x8xf32>
    %37 = arith.truncf %36 : vector<16x8xf32> to vector<16x8xbf16>
    %c168 = arith.constant 168 : index
    %c0_16 = arith.constant 0 : index
    %38 = vector.load %arg19[%c168, %c0_16] : memref<640x8xbf16, #tpu.memory_space<vmem>>, vector<16x8xbf16>
    tpu.vector_store %arg19[%c168, %c0_16], %37 {strides = array<i32>} : memref<640x8xbf16, #tpu.memory_space<vmem>>, vector<16x8xbf16>,
    %39 = vector.extract_strided_slice %18 {offsets = [5, 0, 0], sizes = [1, 16, 8], strides = [1, 1, 1]} : vector<16x16x8xf32> to vector<1x16x8xf32>
    %40 = vector.shape_cast %39 : vector<1x16x8xf32> to vector<16x8xf32>
    %41 = arith.truncf %40 : vector<16x8xf32> to vector<16x8xbf16>
    %c200 = arith.constant 200 : index
    %c0_17 = arith.constant 0 : index
    %42 = vector.load %arg19[%c200, %c0_17] : memref<640x8xbf16, #tpu.memory_space<vmem>>, vector<16x8xbf16>
    tpu.vector_store %arg19[%c200, %c0_17], %41 {strides = array<i32>} : memref<640x8xbf16, #tpu.memory_space<vmem>>, vector<16x8xbf16>,
    %43 = vector.extract_strided_slice %18 {offsets = [6, 0, 0], sizes = [1, 16, 8], strides = [1, 1, 1]} : vector<16x16x8xf32> to vector<1x16x8xf32>
    %44 = vector.shape_cast %43 : vector<1x16x8xf32> to vector<16x8xf32>
    %45 = arith.truncf %44 : vector<16x8xf32> to vector<16x8xbf16>
    %c232 = arith.constant 232 : index
    %c0_18 = arith.constant 0 : index
    %46 = vector.load %arg19[%c232, %c0_18] : memref<640x8xbf16, #tpu.memory_space<vmem>>, vector<16x8xbf16>
    tpu.vector_store %arg19[%c232, %c0_18], %45 {strides = array<i32>} : memref<640x8xbf16, #tpu.memory_space<vmem>>, vector<16x8xbf16>,
    %47 = vector.extract_strided_slice %18 {offsets = [7, 0, 0], sizes = [1, 16, 8], strides = [1, 1, 1]} : vector<16x16x8xf32> to vector<1x16x8xf32>
    %48 = vector.shape_cast %47 : vector<1x16x8xf32> to vector<16x8xf32>
    %49 = arith.truncf %48 : vector<16x8xf32> to vector<16x8xbf16>
    %c264 = arith.constant 264 : index
    %c0_19 = arith.constant 0 : index
    %50 = vector.load %arg19[%c264, %c0_19] : memref<640x8xbf16, #tpu.memory_space<vmem>>, vector<16x8xbf16>
    tpu.vector_store %arg19[%c264, %c0_19], %49 {strides = array<i32>} : memref<640x8xbf16, #tpu.memory_space<vmem>>, vector<16x8xbf16>,
    %51 = vector.extract_strided_slice %18 {offsets = [8, 0, 0], sizes = [1, 16, 8], strides = [1, 1, 1]} : vector<16x16x8xf32> to vector<1x16x8xf32>
    %52 = vector.shape_cast %51 : vector<1x16x8xf32> to vector<16x8xf32>
    %53 = arith.truncf %52 : vector<16x8xf32> to vector<16x8xbf16>
    %c296 = arith.constant 296 : index
    %c0_20 = arith.constant 0 : index
    %54 = vector.load %arg19[%c296, %c0_20] : memref<640x8xbf16, #tpu.memory_space<vmem>>, vector<16x8xbf16>
    tpu.vector_store %arg19[%c296, %c0_20], %53 {strides = array<i32>} : memref<640x8xbf16, #tpu.memory_space<vmem>>, vector<16x8xbf16>,
    %55 = vector.extract_strided_slice %18 {offsets = [9, 0, 0], sizes = [1, 16, 8], strides = [1, 1, 1]} : vector<16x16x8xf32> to vector<1x16x8xf32>
    %56 = vector.shape_cast %55 : vector<1x16x8xf32> to vector<16x8xf32>
    %57 = arith.truncf %56 : vector<16x8xf32> to vector<16x8xbf16>
    %c328 = arith.constant 328 : index
    %c0_21 = arith.constant 0 : index
    %58 = vector.load %arg19[%c328, %c0_21] : memref<640x8xbf16, #tpu.memory_space<vmem>>, vector<16x8xbf16>
    tpu.vector_store %arg19[%c328, %c0_21], %57 {strides = array<i32>} : memref<640x8xbf16, #tpu.memory_space<vmem>>, vector<16x8xbf16>,
    %59 = vector.extract_strided_slice %18 {offsets = [10, 0, 0], sizes = [1, 16, 8], strides = [1, 1, 1]} : vector<16x16x8xf32> to vector<1x16x8xf32>
    %60 = vector.shape_cast %59 : vector<1x16x8xf32> to vector<16x8xf32>
    %61 = arith.truncf %60 : vector<16x8xf32> to vector<16x8xbf16>
    %c360 = arith.constant 360 : index
    %c0_22 = arith.constant 0 : index
    %62 = vector.load %arg19[%c360, %c0_22] : memref<640x8xbf16, #tpu.memory_space<vmem>>, vector<16x8xbf16>
    tpu.vector_store %arg19[%c360, %c0_22], %61 {strides = array<i32>} : memref<640x8xbf16, #tpu.memory_space<vmem>>, vector<16x8xbf16>,
    %63 = vector.extract_strided_slice %18 {offsets = [11, 0, 0], sizes = [1, 16, 8], strides = [1, 1, 1]} : vector<16x16x8xf32> to vector<1x16x8xf32>
    %64 = vector.shape_cast %63 : vector<1x16x8xf32> to vector<16x8xf32>
    %65 = arith.truncf %64 : vector<16x8xf32> to vector<16x8xbf16>
    %c392 = arith.constant 392 : index
    %c0_23 = arith.constant 0 : index
    %66 = vector.load %arg19[%c392, %c0_23] : memref<640x8xbf16, #tpu.memory_space<vmem>>, vector<16x8xbf16>
    tpu.vector_store %arg19[%c392, %c0_23], %65 {strides = array<i32>} : memref<640x8xbf16, #tpu.memory_space<vmem>>, vector<16x8xbf16>,
    %67 = vector.extract_strided_slice %18 {offsets = [12, 0, 0], sizes = [1, 16, 8], strides = [1, 1, 1]} : vector<16x16x8xf32> to vector<1x16x8xf32>
    %68 = vector.shape_cast %67 : vector<1x16x8xf32> to vector<16x8xf32>
    %69 = arith.truncf %68 : vector<16x8xf32> to vector<16x8xbf16>
    %c424 = arith.constant 424 : index
    %c0_24 = arith.constant 0 : index
    %70 = vector.load %arg19[%c424, %c0_24] : memref<640x8xbf16, #tpu.memory_space<vmem>>, vector<16x8xbf16>
    tpu.vector_store %arg19[%c424, %c0_24], %69 {strides = array<i32>} : memref<640x8xbf16, #tpu.memory_space<vmem>>, vector<16x8xbf16>,
    %71 = vector.extract_strided_slice %18 {offsets = [13, 0, 0], sizes = [1, 16, 8], strides = [1, 1, 1]} : vector<16x16x8xf32> to vector<1x16x8xf32>
    %72 = vector.shape_cast %71 : vector<1x16x8xf32> to vector<16x8xf32>
    %73 = arith.truncf %72 : vector<16x8xf32> to vector<16x8xbf16>
    %c456 = arith.constant 456 : index
    %c0_25 = arith.constant 0 : index
    %74 = vector.load %arg19[%c456, %c0_25] : memref<640x8xbf16, #tpu.memory_space<vmem>>, vector<16x8xbf16>
    tpu.vector_store %arg19[%c456, %c0_25], %73 {strides = array<i32>} : memref<640x8xbf16, #tpu.memory_space<vmem>>, vector<16x8xbf16>,
    %75 = vector.extract_strided_slice %18 {offsets = [14, 0, 0], sizes = [1, 16, 8], strides = [1, 1, 1]} : vector<16x16x8xf32> to vector<1x16x8xf32>
    %76 = vector.shape_cast %75 : vector<1x16x8xf32> to vector<16x8xf32>
    %77 = arith.truncf %76 : vector<16x8xf32> to vector<16x8xbf16>
    %c488 = arith.constant 488 : index
    %c0_26 = arith.constant 0 : index
    %78 = vector.load %arg19[%c488, %c0_26] : memref<640x8xbf16, #tpu.memory_space<vmem>>, vector<16x8xbf16>
    tpu.vector_store %arg19[%c488, %c0_26], %77 {strides = array<i32>} : memref<640x8xbf16, #tpu.memory_space<vmem>>, vector<16x8xbf16>,
    %79 = vector.extract_strided_slice %18 {offsets = [15, 0, 0], sizes = [1, 16, 8], strides = [1, 1, 1]} : vector<16x16x8xf32> to vector<1x16x8xf32>
    %80 = vector.shape_cast %79 : vector<1x16x8xf32> to vector<16x8xf32>
    %81 = arith.truncf %80 : vector<16x8xf32> to vector<16x8xbf16>
    %c520 = arith.constant 520 : index
    %c0_27 = arith.constant 0 : index
    %82 = vector.load %arg19[%c520, %c0_27] : memref<640x8xbf16, #tpu.memory_space<vmem>>, vector<16x8xbf16>
    tpu.vector_store %arg19[%c520, %c0_27], %81 {strides = array<i32>} : memref<640x8xbf16, #tpu.memory_space<vmem>>, vector<16x8xbf16>,
    %c7 = arith.constant 7 : index
    %c0_28 = arith.constant 0 : index
    %83 = vector.load %arg19[%c7, %c0_28] : memref<640x8xbf16, #tpu.memory_space<vmem>>, vector<512x8xbf16>
    %c0_29 = arith.constant 0 : index
    %c0_30 = arith.constant 0 : index
    %c0_31 = arith.constant 0 : index
    %84 = vector.load %arg5[%c0_29, %c0_30, %c0_31] : memref<9x8x16xbf16, #tpu.memory_space<vmem>>, vector<1x8x16xbf16>
    %85 = vector.shape_cast %84 : vector<1x8x16xbf16> to vector<8x16xbf16>
    %cst_32 = arith.constant dense<0.000000e+00> : vector<512x16xf32>
    %86 = tpu.matmul %83, %85, %cst_32 {dimension_numbers = #tpu.dot_dimension_numbers<[1], [0], [0], [1], [0, 0, 1, 1], [], []>} : vector<512x8xbf16>, vector<8x16xbf16>, vector<512x16xf32> -> vector<512x16xf32>
    %c8 = arith.constant 8 : index
    %c0_33 = arith.constant 0 : index
    %87 = vector.load %arg19[%c8, %c0_33] : memref<640x8xbf16, #tpu.memory_space<vmem>>, vector<512x8xbf16>
    %c1_34 = arith.constant 1 : index
    %c0_35 = arith.constant 0 : index
    %c0_36 = arith.constant 0 : index
    %88 = vector.load %arg5[%c1_34, %c0_35, %c0_36] : memref<9x8x16xbf16, #tpu.memory_space<vmem>>, vector<1x8x16xbf16>
    %89 = vector.shape_cast %88 : vector<1x8x16xbf16> to vector<8x16xbf16>
    %cst_37 = arith.constant dense<0.000000e+00> : vector<512x16xf32>
    %90 = tpu.matmul %87, %89, %cst_37 {dimension_numbers = #tpu.dot_dimension_numbers<[1], [0], [0], [1], [0, 0, 1, 1], [], []>} : vector<512x8xbf16>, vector<8x16xbf16>, vector<512x16xf32> -> vector<512x16xf32>
    %91 = arith.addf %86, %90 : vector<512x16xf32>
    %c9 = arith.constant 9 : index
    %c0_38 = arith.constant 0 : index
    %92 = vector.load %arg19[%c9, %c0_38] : memref<640x8xbf16, #tpu.memory_space<vmem>>, vector<512x8xbf16>
    %c2 = arith.constant 2 : index
    %c0_39 = arith.constant 0 : index
    %c0_40 = arith.constant 0 : index
    %93 = vector.load %arg5[%c2, %c0_39, %c0_40] : memref<9x8x16xbf16, #tpu.memory_space<vmem>>, vector<1x8x16xbf16>
    %94 = vector.shape_cast %93 : vector<1x8x16xbf16> to vector<8x16xbf16>
    %cst_41 = arith.constant dense<0.000000e+00> : vector<512x16xf32>
    %95 = tpu.matmul %92, %94, %cst_41 {dimension_numbers = #tpu.dot_dimension_numbers<[1], [0], [0], [1], [0, 0, 1, 1], [], []>} : vector<512x8xbf16>, vector<8x16xbf16>, vector<512x16xf32> -> vector<512x16xf32>
    %96 = arith.addf %91, %95 : vector<512x16xf32>
    %c39 = arith.constant 39 : index
    %c0_42 = arith.constant 0 : index
    %97 = vector.load %arg19[%c39, %c0_42] : memref<640x8xbf16, #tpu.memory_space<vmem>>, vector<512x8xbf16>
    %c3 = arith.constant 3 : index
    %c0_43 = arith.constant 0 : index
    %c0_44 = arith.constant 0 : index
    %98 = vector.load %arg5[%c3, %c0_43, %c0_44] : memref<9x8x16xbf16, #tpu.memory_space<vmem>>, vector<1x8x16xbf16>
    %99 = vector.shape_cast %98 : vector<1x8x16xbf16> to vector<8x16xbf16>
    %cst_45 = arith.constant dense<0.000000e+00> : vector<512x16xf32>
    %100 = tpu.matmul %97, %99, %cst_45 {dimension_numbers = #tpu.dot_dimension_numbers<[1], [0], [0], [1], [0, 0, 1, 1], [], []>} : vector<512x8xbf16>, vector<8x16xbf16>, vector<512x16xf32> -> vector<512x16xf32>
    %101 = arith.addf %96, %100 : vector<512x16xf32>
    %c40_46 = arith.constant 40 : index
    %c0_47 = arith.constant 0 : index
    %102 = vector.load %arg19[%c40_46, %c0_47] : memref<640x8xbf16, #tpu.memory_space<vmem>>, vector<512x8xbf16>
    %c4 = arith.constant 4 : index
    %c0_48 = arith.constant 0 : index
    %c0_49 = arith.constant 0 : index
    %103 = vector.load %arg5[%c4, %c0_48, %c0_49] : memref<9x8x16xbf16, #tpu.memory_space<vmem>>, vector<1x8x16xbf16>
    %104 = vector.shape_cast %103 : vector<1x8x16xbf16> to vector<8x16xbf16>
    %cst_50 = arith.constant dense<0.000000e+00> : vector<512x16xf32>
    %105 = tpu.matmul %102, %104, %cst_50 {dimension_numbers = #tpu.dot_dimension_numbers<[1], [0], [0], [1], [0, 0, 1, 1], [], []>} : vector<512x8xbf16>, vector<8x16xbf16>, vector<512x16xf32> -> vector<512x16xf32>
    %106 = arith.addf %101, %105 : vector<512x16xf32>
    %c41 = arith.constant 41 : index
    %c0_51 = arith.constant 0 : index
    %107 = vector.load %arg19[%c41, %c0_51] : memref<640x8xbf16, #tpu.memory_space<vmem>>, vector<512x8xbf16>
    %c5 = arith.constant 5 : index
    %c0_52 = arith.constant 0 : index
    %c0_53 = arith.constant 0 : index
    %108 = vector.load %arg5[%c5, %c0_52, %c0_53] : memref<9x8x16xbf16, #tpu.memory_space<vmem>>, vector<1x8x16xbf16>
    %109 = vector.shape_cast %108 : vector<1x8x16xbf16> to vector<8x16xbf16>
    %cst_54 = arith.constant dense<0.000000e+00> : vector<512x16xf32>
    %110 = tpu.matmul %107, %109, %cst_54 {dimension_numbers = #tpu.dot_dimension_numbers<[1], [0], [0], [1], [0, 0, 1, 1], [], []>} : vector<512x8xbf16>, vector<8x16xbf16>, vector<512x16xf32> -> vector<512x16xf32>
    %111 = arith.addf %106, %110 : vector<512x16xf32>
    %c71 = arith.constant 71 : index
    %c0_55 = arith.constant 0 : index
    %112 = vector.load %arg19[%c71, %c0_55] : memref<640x8xbf16, #tpu.memory_space<vmem>>, vector<512x8xbf16>
    %c6 = arith.constant 6 : index
    %c0_56 = arith.constant 0 : index
    %c0_57 = arith.constant 0 : index
    %113 = vector.load %arg5[%c6, %c0_56, %c0_57] : memref<9x8x16xbf16, #tpu.memory_space<vmem>>, vector<1x8x16xbf16>
    %114 = vector.shape_cast %113 : vector<1x8x16xbf16> to vector<8x16xbf16>
    %cst_58 = arith.constant dense<0.000000e+00> : vector<512x16xf32>
    %115 = tpu.matmul %112, %114, %cst_58 {dimension_numbers = #tpu.dot_dimension_numbers<[1], [0], [0], [1], [0, 0, 1, 1], [], []>} : vector<512x8xbf16>, vector<8x16xbf16>, vector<512x16xf32> -> vector<512x16xf32>
    %116 = arith.addf %111, %115 : vector<512x16xf32>
    %c72_59 = arith.constant 72 : index
    %c0_60 = arith.constant 0 : index
    %117 = vector.load %arg19[%c72_59, %c0_60] : memref<640x8xbf16, #tpu.memory_space<vmem>>, vector<512x8xbf16>
    %c7_61 = arith.constant 7 : index
    %c0_62 = arith.constant 0 : index
    %c0_63 = arith.constant 0 : index
    %118 = vector.load %arg5[%c7_61, %c0_62, %c0_63] : memref<9x8x16xbf16, #tpu.memory_space<vmem>>, vector<1x8x16xbf16>
    %119 = vector.shape_cast %118 : vector<1x8x16xbf16> to vector<8x16xbf16>
    %cst_64 = arith.constant dense<0.000000e+00> : vector<512x16xf32>
    %120 = tpu.matmul %117, %119, %cst_64 {dimension_numbers = #tpu.dot_dimension_numbers<[1], [0], [0], [1], [0, 0, 1, 1], [], []>} : vector<512x8xbf16>, vector<8x16xbf16>, vector<512x16xf32> -> vector<512x16xf32>
    %121 = arith.addf %116, %120 : vector<512x16xf32>
    %c73 = arith.constant 73 : index
    %c0_65 = arith.constant 0 : index
    %122 = vector.load %arg19[%c73, %c0_65] : memref<640x8xbf16, #tpu.memory_space<vmem>>, vector<512x8xbf16>
    %c8_66 = arith.constant 8 : index
    %c0_67 = arith.constant 0 : index
    %c0_68 = arith.constant 0 : index
    %123 = vector.load %arg5[%c8_66, %c0_67, %c0_68] : memref<9x8x16xbf16, #tpu.memory_space<vmem>>, vector<1x8x16xbf16>
    %124 = vector.shape_cast %123 : vector<1x8x16xbf16> to vector<8x16xbf16>
    %cst_69 = arith.constant dense<0.000000e+00> : vector<512x16xf32>
    %125 = tpu.matmul %122, %124, %cst_69 {dimension_numbers = #tpu.dot_dimension_numbers<[1], [0], [0], [1], [0, 0, 1, 1], [], []>} : vector<512x8xbf16>, vector<8x16xbf16>, vector<512x16xf32> -> vector<512x16xf32>
    %126 = arith.addf %121, %125 : vector<512x16xf32>
    %c0_70 = arith.constant 0 : index
    %c0_71 = arith.constant 0 : index
    %127 = vector.load %arg6[%c0_70, %c0_71] : memref<1x16xf32, #tpu.memory_space<vmem>>, vector<1x16xf32>
    %128 = vector.broadcast %127 : vector<1x16xf32> to vector<512x16xf32>
    %129 = arith.addf %126, %128 : vector<512x16xf32>
    %cst_72 = arith.constant 0.000000e+00 : f32
    %130 = vector.broadcast %cst_72 : f32 to vector<512x16xf32>
    %131 = arith.maximumf %129, %130 : vector<512x16xf32>
    %c0_73 = arith.constant 0 : index
    %c0_74 = arith.constant 0 : index
    %132 = vector.load %arg20[%c0_73, %c0_74] : memref<512x16xf32, #tpu.memory_space<vmem>>, vector<512x16xf32>
    tpu.vector_store %arg20[%c0_73, %c0_74], %131 {strides = array<i32>} : memref<512x16xf32, #tpu.memory_space<vmem>>, vector<512x16xf32>,
    %c0_75 = arith.constant 0 : index
    %c0_76 = arith.constant 0 : index
    %133 = tpu.strided_load %arg20[%c0_75, %c0_76] {strides = array<i32: 2, 1>} : memref<512x16xf32, #tpu.memory_space<vmem>>, vector<256x16xf32>
    %c1_77 = arith.constant 1 : index
    %c0_78 = arith.constant 0 : index
    %134 = tpu.strided_load %arg20[%c1_77, %c0_78] {strides = array<i32: 2, 1>} : memref<512x16xf32, #tpu.memory_space<vmem>>, vector<256x16xf32>
    %135 = arith.maximumf %133, %134 : vector<256x16xf32>
    %136 = vector.shape_cast %135 : vector<256x16xf32> to vector<8x32x16xf32>
    %137 = vector.extract_strided_slice %136 {offsets = [0, 0, 0], sizes = [8, 16, 16], strides = [1, 1, 1]} : vector<8x32x16xf32> to vector<8x16x16xf32>
    %138 = vector.extract_strided_slice %136 {offsets = [0, 16, 0], sizes = [8, 16, 16], strides = [1, 1, 1]} : vector<8x32x16xf32> to vector<8x16x16xf32>
    %139 = arith.maximumf %137, %138 : vector<8x16x16xf32>
    %140 = vector.extract_strided_slice %139 {offsets = [0, 0, 0], sizes = [1, 8, 16], strides = [1, 1, 1]} : vector<8x16x16xf32> to vector<1x8x16xf32>
    %141 = vector.shape_cast %140 : vector<1x8x16xf32> to vector<8x16xf32>
    %142 = arith.truncf %141 : vector<8x16xf32> to vector<8x16xbf16>
    %c24 = arith.constant 24 : index
    %c0_79 = arith.constant 0 : index
    %143 = vector.load %arg21[%c24, %c0_79] : memref<192x16xbf16, #tpu.memory_space<vmem>>, vector<8x16xbf16>
    tpu.vector_store %arg21[%c24, %c0_79], %142 {strides = array<i32>} : memref<192x16xbf16, #tpu.memory_space<vmem>>, vector<8x16xbf16>,
    %144 = vector.extract_strided_slice %139 {offsets = [1, 0, 0], sizes = [1, 8, 16], strides = [1, 1, 1]} : vector<8x16x16xf32> to vector<1x8x16xf32>
    %145 = vector.shape_cast %144 : vector<1x8x16xf32> to vector<8x16xf32>
    %146 = arith.truncf %145 : vector<8x16xf32> to vector<8x16xbf16>
    %c40_80 = arith.constant 40 : index
    %c0_81 = arith.constant 0 : index
    %147 = vector.load %arg21[%c40_80, %c0_81] : memref<192x16xbf16, #tpu.memory_space<vmem>>, vector<8x16xbf16>
    tpu.vector_store %arg21[%c40_80, %c0_81], %146 {strides = array<i32>} : memref<192x16xbf16, #tpu.memory_space<vmem>>, vector<8x16xbf16>,
    %148 = vector.extract_strided_slice %139 {offsets = [2, 0, 0], sizes = [1, 8, 16], strides = [1, 1, 1]} : vector<8x16x16xf32> to vector<1x8x16xf32>
    %149 = vector.shape_cast %148 : vector<1x8x16xf32> to vector<8x16xf32>
    %150 = arith.truncf %149 : vector<8x16xf32> to vector<8x16xbf16>
    %c56 = arith.constant 56 : index
    %c0_82 = arith.constant 0 : index
    %151 = vector.load %arg21[%c56, %c0_82] : memref<192x16xbf16, #tpu.memory_space<vmem>>, vector<8x16xbf16>
    tpu.vector_store %arg21[%c56, %c0_82], %150 {strides = array<i32>} : memref<192x16xbf16, #tpu.memory_space<vmem>>, vector<8x16xbf16>,
    %152 = vector.extract_strided_slice %139 {offsets = [3, 0, 0], sizes = [1, 8, 16], strides = [1, 1, 1]} : vector<8x16x16xf32> to vector<1x8x16xf32>
    %153 = vector.shape_cast %152 : vector<1x8x16xf32> to vector<8x16xf32>
    %154 = arith.truncf %153 : vector<8x16xf32> to vector<8x16xbf16>
    %c72_83 = arith.constant 72 : index
    %c0_84 = arith.constant 0 : index
    %155 = vector.load %arg21[%c72_83, %c0_84] : memref<192x16xbf16, #tpu.memory_space<vmem>>, vector<8x16xbf16>
    tpu.vector_store %arg21[%c72_83, %c0_84], %154 {strides = array<i32>} : memref<192x16xbf16, #tpu.memory_space<vmem>>, vector<8x16xbf16>,
    %156 = vector.extract_strided_slice %139 {offsets = [4, 0, 0], sizes = [1, 8, 16], strides = [1, 1, 1]} : vector<8x16x16xf32> to vector<1x8x16xf32>
    %157 = vector.shape_cast %156 : vector<1x8x16xf32> to vector<8x16xf32>
    %158 = arith.truncf %157 : vector<8x16xf32> to vector<8x16xbf16>
    %c88 = arith.constant 88 : index
    %c0_85 = arith.constant 0 : index
    %159 = vector.load %arg21[%c88, %c0_85] : memref<192x16xbf16, #tpu.memory_space<vmem>>, vector<8x16xbf16>
    tpu.vector_store %arg21[%c88, %c0_85], %158 {strides = array<i32>} : memref<192x16xbf16, #tpu.memory_space<vmem>>, vector<8x16xbf16>,
    %160 = vector.extract_strided_slice %139 {offsets = [5, 0, 0], sizes = [1, 8, 16], strides = [1, 1, 1]} : vector<8x16x16xf32> to vector<1x8x16xf32>
    %161 = vector.shape_cast %160 : vector<1x8x16xf32> to vector<8x16xf32>
    %162 = arith.truncf %161 : vector<8x16xf32> to vector<8x16xbf16>
    %c104_86 = arith.constant 104 : index
    %c0_87 = arith.constant 0 : index
    %163 = vector.load %arg21[%c104_86, %c0_87] : memref<192x16xbf16, #tpu.memory_space<vmem>>, vector<8x16xbf16>
    tpu.vector_store %arg21[%c104_86, %c0_87], %162 {strides = array<i32>} : memref<192x16xbf16, #tpu.memory_space<vmem>>, vector<8x16xbf16>,
    %164 = vector.extract_strided_slice %139 {offsets = [6, 0, 0], sizes = [1, 8, 16], strides = [1, 1, 1]} : vector<8x16x16xf32> to vector<1x8x16xf32>
    %165 = vector.shape_cast %164 : vector<1x8x16xf32> to vector<8x16xf32>
    %166 = arith.truncf %165 : vector<8x16xf32> to vector<8x16xbf16>
    %c120 = arith.constant 120 : index
    %c0_88 = arith.constant 0 : index
    %167 = vector.load %arg21[%c120, %c0_88] : memref<192x16xbf16, #tpu.memory_space<vmem>>, vector<8x16xbf16>
    tpu.vector_store %arg21[%c120, %c0_88], %166 {strides = array<i32>} : memref<192x16xbf16, #tpu.memory_space<vmem>>, vector<8x16xbf16>,
    %168 = vector.extract_strided_slice %139 {offsets = [7, 0, 0], sizes = [1, 8, 16], strides = [1, 1, 1]} : vector<8x16x16xf32> to vector<1x8x16xf32>
    %169 = vector.shape_cast %168 : vector<1x8x16xf32> to vector<8x16xf32>
    %170 = arith.truncf %169 : vector<8x16xf32> to vector<8x16xbf16>
    %c136_89 = arith.constant 136 : index
    %c0_90 = arith.constant 0 : index
    %171 = vector.load %arg21[%c136_89, %c0_90] : memref<192x16xbf16, #tpu.memory_space<vmem>>, vector<8x16xbf16>
    tpu.vector_store %arg21[%c136_89, %c0_90], %170 {strides = array<i32>} : memref<192x16xbf16, #tpu.memory_space<vmem>>, vector<8x16xbf16>,
    %c7_91 = arith.constant 7 : index
    %c0_92 = arith.constant 0 : index
    %172 = vector.load %arg21[%c7_91, %c0_92] : memref<192x16xbf16, #tpu.memory_space<vmem>>, vector<128x16xbf16>
    %c0_93 = arith.constant 0 : index
    %c0_94 = arith.constant 0 : index
    %c0_95 = arith.constant 0 : index
    %173 = vector.load %arg7[%c0_93, %c0_94, %c0_95] : memref<9x16x32xbf16, #tpu.memory_space<vmem>>, vector<1x16x32xbf16>
    %174 = vector.shape_cast %173 : vector<1x16x32xbf16> to vector<16x32xbf16>
    %cst_96 = arith.constant dense<0.000000e+00> : vector<128x32xf32>
    %175 = tpu.matmul %172, %174, %cst_96 {dimension_numbers = #tpu.dot_dimension_numbers<[1], [0], [0], [1], [0, 0, 1, 1], [], []>} : vector<128x16xbf16>, vector<16x32xbf16>, vector<128x32xf32> -> vector<128x32xf32>
    %c8_97 = arith.constant 8 : index
    %c0_98 = arith.constant 0 : index
    %176 = vector.load %arg21[%c8_97, %c0_98] : memref<192x16xbf16, #tpu.memory_space<vmem>>, vector<128x16xbf16>
    %c1_99 = arith.constant 1 : index
    %c0_100 = arith.constant 0 : index
    %c0_101 = arith.constant 0 : index
    %177 = vector.load %arg7[%c1_99, %c0_100, %c0_101] : memref<9x16x32xbf16, #tpu.memory_space<vmem>>, vector<1x16x32xbf16>
    %178 = vector.shape_cast %177 : vector<1x16x32xbf16> to vector<16x32xbf16>
    %cst_102 = arith.constant dense<0.000000e+00> : vector<128x32xf32>
    %179 = tpu.matmul %176, %178, %cst_102 {dimension_numbers = #tpu.dot_dimension_numbers<[1], [0], [0], [1], [0, 0, 1, 1], [], []>} : vector<128x16xbf16>, vector<16x32xbf16>, vector<128x32xf32> -> vector<128x32xf32>
    %180 = arith.addf %175, %179 : vector<128x32xf32>
    %c9_103 = arith.constant 9 : index
    %c0_104 = arith.constant 0 : index
    %181 = vector.load %arg21[%c9_103, %c0_104] : memref<192x16xbf16, #tpu.memory_space<vmem>>, vector<128x16xbf16>
    %c2_105 = arith.constant 2 : index
    %c0_106 = arith.constant 0 : index
    %c0_107 = arith.constant 0 : index
    %182 = vector.load %arg7[%c2_105, %c0_106, %c0_107] : memref<9x16x32xbf16, #tpu.memory_space<vmem>>, vector<1x16x32xbf16>
    %183 = vector.shape_cast %182 : vector<1x16x32xbf16> to vector<16x32xbf16>
    %cst_108 = arith.constant dense<0.000000e+00> : vector<128x32xf32>
    %184 = tpu.matmul %181, %183, %cst_108 {dimension_numbers = #tpu.dot_dimension_numbers<[1], [0], [0], [1], [0, 0, 1, 1], [], []>} : vector<128x16xbf16>, vector<16x32xbf16>, vector<128x32xf32> -> vector<128x32xf32>
    %185 = arith.addf %180, %184 : vector<128x32xf32>
    %c23 = arith.constant 23 : index
    %c0_109 = arith.constant 0 : index
    %186 = vector.load %arg21[%c23, %c0_109] : memref<192x16xbf16, #tpu.memory_space<vmem>>, vector<128x16xbf16>
    %c3_110 = arith.constant 3 : index
    %c0_111 = arith.constant 0 : index
    %c0_112 = arith.constant 0 : index
    %187 = vector.load %arg7[%c3_110, %c0_111, %c0_112] : memref<9x16x32xbf16, #tpu.memory_space<vmem>>, vector<1x16x32xbf16>
    %188 = vector.shape_cast %187 : vector<1x16x32xbf16> to vector<16x32xbf16>
    %cst_113 = arith.constant dense<0.000000e+00> : vector<128x32xf32>
    %189 = tpu.matmul %186, %188, %cst_113 {dimension_numbers = #tpu.dot_dimension_numbers<[1], [0], [0], [1], [0, 0, 1, 1], [], []>} : vector<128x16xbf16>, vector<16x32xbf16>, vector<128x32xf32> -> vector<128x32xf32>
    %190 = arith.addf %185, %189 : vector<128x32xf32>
    %c24_114 = arith.constant 24 : index
    %c0_115 = arith.constant 0 : index
    %191 = vector.load %arg21[%c24_114, %c0_115] : memref<192x16xbf16, #tpu.memory_space<vmem>>, vector<128x16xbf16>
    %c4_116 = arith.constant 4 : index
    %c0_117 = arith.constant 0 : index
    %c0_118 = arith.constant 0 : index
    %192 = vector.load %arg7[%c4_116, %c0_117, %c0_118] : memref<9x16x32xbf16, #tpu.memory_space<vmem>>, vector<1x16x32xbf16>
    %193 = vector.shape_cast %192 : vector<1x16x32xbf16> to vector<16x32xbf16>
    %cst_119 = arith.constant dense<0.000000e+00> : vector<128x32xf32>
    %194 = tpu.matmul %191, %193, %cst_119 {dimension_numbers = #tpu.dot_dimension_numbers<[1], [0], [0], [1], [0, 0, 1, 1], [], []>} : vector<128x16xbf16>, vector<16x32xbf16>, vector<128x32xf32> -> vector<128x32xf32>
    %195 = arith.addf %190, %194 : vector<128x32xf32>
    %c25 = arith.constant 25 : index
    %c0_120 = arith.constant 0 : index
    %196 = vector.load %arg21[%c25, %c0_120] : memref<192x16xbf16, #tpu.memory_space<vmem>>, vector<128x16xbf16>
    %c5_121 = arith.constant 5 : index
    %c0_122 = arith.constant 0 : index
    %c0_123 = arith.constant 0 : index
    %197 = vector.load %arg7[%c5_121, %c0_122, %c0_123] : memref<9x16x32xbf16, #tpu.memory_space<vmem>>, vector<1x16x32xbf16>
    %198 = vector.shape_cast %197 : vector<1x16x32xbf16> to vector<16x32xbf16>
    %cst_124 = arith.constant dense<0.000000e+00> : vector<128x32xf32>
    %199 = tpu.matmul %196, %198, %cst_124 {dimension_numbers = #tpu.dot_dimension_numbers<[1], [0], [0], [1], [0, 0, 1, 1], [], []>} : vector<128x16xbf16>, vector<16x32xbf16>, vector<128x32xf32> -> vector<128x32xf32>
    %200 = arith.addf %195, %199 : vector<128x32xf32>
    %c39_125 = arith.constant 39 : index
    %c0_126 = arith.constant 0 : index
    %201 = vector.load %arg21[%c39_125, %c0_126] : memref<192x16xbf16, #tpu.memory_space<vmem>>, vector<128x16xbf16>
    %c6_127 = arith.constant 6 : index
    %c0_128 = arith.constant 0 : index
    %c0_129 = arith.constant 0 : index
    %202 = vector.load %arg7[%c6_127, %c0_128, %c0_129] : memref<9x16x32xbf16, #tpu.memory_space<vmem>>, vector<1x16x32xbf16>
    %203 = vector.shape_cast %202 : vector<1x16x32xbf16> to vector<16x32xbf16>
    %cst_130 = arith.constant dense<0.000000e+00> : vector<128x32xf32>
    %204 = tpu.matmul %201, %203, %cst_130 {dimension_numbers = #tpu.dot_dimension_numbers<[1], [0], [0], [1], [0, 0, 1, 1], [], []>} : vector<128x16xbf16>, vector<16x32xbf16>, vector<128x32xf32> -> vector<128x32xf32>
    %205 = arith.addf %200, %204 : vector<128x32xf32>
    %c40_131 = arith.constant 40 : index
    %c0_132 = arith.constant 0 : index
    %206 = vector.load %arg21[%c40_131, %c0_132] : memref<192x16xbf16, #tpu.memory_space<vmem>>, vector<128x16xbf16>
    %c7_133 = arith.constant 7 : index
    %c0_134 = arith.constant 0 : index
    %c0_135 = arith.constant 0 : index
    %207 = vector.load %arg7[%c7_133, %c0_134, %c0_135] : memref<9x16x32xbf16, #tpu.memory_space<vmem>>, vector<1x16x32xbf16>
    %208 = vector.shape_cast %207 : vector<1x16x32xbf16> to vector<16x32xbf16>
    %cst_136 = arith.constant dense<0.000000e+00> : vector<128x32xf32>
    %209 = tpu.matmul %206, %208, %cst_136 {dimension_numbers = #tpu.dot_dimension_numbers<[1], [0], [0], [1], [0, 0, 1, 1], [], []>} : vector<128x16xbf16>, vector<16x32xbf16>, vector<128x32xf32> -> vector<128x32xf32>
    %210 = arith.addf %205, %209 : vector<128x32xf32>
    %c41_137 = arith.constant 41 : index
    %c0_138 = arith.constant 0 : index
    %211 = vector.load %arg21[%c41_137, %c0_138] : memref<192x16xbf16, #tpu.memory_space<vmem>>, vector<128x16xbf16>
    %c8_139 = arith.constant 8 : index
    %c0_140 = arith.constant 0 : index
    %c0_141 = arith.constant 0 : index
    %212 = vector.load %arg7[%c8_139, %c0_140, %c0_141] : memref<9x16x32xbf16, #tpu.memory_space<vmem>>, vector<1x16x32xbf16>
    %213 = vector.shape_cast %212 : vector<1x16x32xbf16> to vector<16x32xbf16>
    %cst_142 = arith.constant dense<0.000000e+00> : vector<128x32xf32>
    %214 = tpu.matmul %211, %213, %cst_142 {dimension_numbers = #tpu.dot_dimension_numbers<[1], [0], [0], [1], [0, 0, 1, 1], [], []>} : vector<128x16xbf16>, vector<16x32xbf16>, vector<128x32xf32> -> vector<128x32xf32>
    %215 = arith.addf %210, %214 : vector<128x32xf32>
    %c0_143 = arith.constant 0 : index
    %c0_144 = arith.constant 0 : index
    %216 = vector.load %arg8[%c0_143, %c0_144] : memref<1x32xf32, #tpu.memory_space<vmem>>, vector<1x32xf32>
    %217 = vector.broadcast %216 : vector<1x32xf32> to vector<128x32xf32>
    %218 = arith.addf %215, %217 : vector<128x32xf32>
    %cst_145 = arith.constant 0.000000e+00 : f32
    %219 = vector.broadcast %cst_145 : f32 to vector<128x32xf32>
    %220 = arith.maximumf %218, %219 : vector<128x32xf32>
    %c0_146 = arith.constant 0 : index
    %c0_147 = arith.constant 0 : index
    %221 = vector.load %arg22[%c0_146, %c0_147] : memref<128x32xf32, #tpu.memory_space<vmem>>, vector<128x32xf32>
    tpu.vector_store %arg22[%c0_146, %c0_147], %220 {strides = array<i32>} : memref<128x32xf32, #tpu.memory_space<vmem>>, vector<128x32xf32>,
    %c0_148 = arith.constant 0 : index
    %c0_149 = arith.constant 0 : index
    %222 = tpu.strided_load %arg22[%c0_148, %c0_149] {strides = array<i32: 2, 1>} : memref<128x32xf32, #tpu.memory_space<vmem>>, vector<64x32xf32>
    %c1_150 = arith.constant 1 : index
    %c0_151 = arith.constant 0 : index
    %223 = tpu.strided_load %arg22[%c1_150, %c0_151] {strides = array<i32: 2, 1>} : memref<128x32xf32, #tpu.memory_space<vmem>>, vector<64x32xf32>
    %224 = arith.maximumf %222, %223 : vector<64x32xf32>
    %225 = vector.shape_cast %224 : vector<64x32xf32> to vector<4x16x32xf32>
    %226 = vector.extract_strided_slice %225 {offsets = [0, 0, 0], sizes = [4, 8, 32], strides = [1, 1, 1]} : vector<4x16x32xf32> to vector<4x8x32xf32>
    %227 = vector.extract_strided_slice %225 {offsets = [0, 8, 0], sizes = [4, 8, 32], strides = [1, 1, 1]} : vector<4x16x32xf32> to vector<4x8x32xf32>
    %228 = arith.maximumf %226, %227 : vector<4x8x32xf32>
    %229 = vector.extract_strided_slice %228 {offsets = [0, 0, 0], sizes = [1, 4, 32], strides = [1, 1, 1]} : vector<4x8x32xf32> to vector<1x4x32xf32>
    %230 = vector.shape_cast %229 : vector<1x4x32xf32> to vector<4x32xf32>
    %231 = arith.truncf %230 : vector<4x32xf32> to vector<4x32xbf16>
    %c24_152 = arith.constant 24 : index
    %c0_153 = arith.constant 0 : index
    %232 = vector.load %arg23[%c24_152, %c0_153] : memref<128x32xbf16, #tpu.memory_space<vmem>>, vector<4x32xbf16>
    tpu.vector_store %arg23[%c24_152, %c0_153], %231 {strides = array<i32>} : memref<128x32xbf16, #tpu.memory_space<vmem>>, vector<4x32xbf16>,
    %233 = vector.extract_strided_slice %228 {offsets = [1, 0, 0], sizes = [1, 4, 32], strides = [1, 1, 1]} : vector<4x8x32xf32> to vector<1x4x32xf32>
    %234 = vector.shape_cast %233 : vector<1x4x32xf32> to vector<4x32xf32>
    %235 = arith.truncf %234 : vector<4x32xf32> to vector<4x32xbf16>
    %c40_154 = arith.constant 40 : index
    %c0_155 = arith.constant 0 : index
    %236 = vector.load %arg23[%c40_154, %c0_155] : memref<128x32xbf16, #tpu.memory_space<vmem>>, vector<4x32xbf16>
    tpu.vector_store %arg23[%c40_154, %c0_155], %235 {strides = array<i32>} : memref<128x32xbf16, #tpu.memory_space<vmem>>, vector<4x32xbf16>,
    %237 = vector.extract_strided_slice %228 {offsets = [2, 0, 0], sizes = [1, 4, 32], strides = [1, 1, 1]} : vector<4x8x32xf32> to vector<1x4x32xf32>
    %238 = vector.shape_cast %237 : vector<1x4x32xf32> to vector<4x32xf32>
    %239 = arith.truncf %238 : vector<4x32xf32> to vector<4x32xbf16>
    %c56_156 = arith.constant 56 : index
    %c0_157 = arith.constant 0 : index
    %240 = vector.load %arg23[%c56_156, %c0_157] : memref<128x32xbf16, #tpu.memory_space<vmem>>, vector<4x32xbf16>
    tpu.vector_store %arg23[%c56_156, %c0_157], %239 {strides = array<i32>} : memref<128x32xbf16, #tpu.memory_space<vmem>>, vector<4x32xbf16>,
    %241 = vector.extract_strided_slice %228 {offsets = [3, 0, 0], sizes = [1, 4, 32], strides = [1, 1, 1]} : vector<4x8x32xf32> to vector<1x4x32xf32>
    %242 = vector.shape_cast %241 : vector<1x4x32xf32> to vector<4x32xf32>
    %243 = arith.truncf %242 : vector<4x32xf32> to vector<4x32xbf16>
    %c72_158 = arith.constant 72 : index
    %c0_159 = arith.constant 0 : index
    %244 = vector.load %arg23[%c72_158, %c0_159] : memref<128x32xbf16, #tpu.memory_space<vmem>>, vector<4x32xbf16>
    tpu.vector_store %arg23[%c72_158, %c0_159], %243 {strides = array<i32>} : memref<128x32xbf16, #tpu.memory_space<vmem>>, vector<4x32xbf16>,
    %c7_160 = arith.constant 7 : index
    %c0_161 = arith.constant 0 : index
    %245 = vector.load %arg23[%c7_160, %c0_161] : memref<128x32xbf16, #tpu.memory_space<vmem>>, vector<64x32xbf16>
    %c0_162 = arith.constant 0 : index
    %c0_163 = arith.constant 0 : index
    %c0_164 = arith.constant 0 : index
    %246 = vector.load %arg9[%c0_162, %c0_163, %c0_164] : memref<9x32x64xbf16, #tpu.memory_space<vmem>>, vector<1x32x64xbf16>
    %247 = vector.shape_cast %246 : vector<1x32x64xbf16> to vector<32x64xbf16>
    %cst_165 = arith.constant dense<0.000000e+00> : vector<64x64xf32>
    %248 = tpu.matmul %245, %247, %cst_165 {dimension_numbers = #tpu.dot_dimension_numbers<[1], [0], [0], [1], [0, 0, 1, 1], [], []>} : vector<64x32xbf16>, vector<32x64xbf16>, vector<64x64xf32> -> vector<64x64xf32>
    %c8_166 = arith.constant 8 : index
    %c0_167 = arith.constant 0 : index
    %249 = vector.load %arg23[%c8_166, %c0_167] : memref<128x32xbf16, #tpu.memory_space<vmem>>, vector<64x32xbf16>
    %c1_168 = arith.constant 1 : index
    %c0_169 = arith.constant 0 : index
    %c0_170 = arith.constant 0 : index
    %250 = vector.load %arg9[%c1_168, %c0_169, %c0_170] : memref<9x32x64xbf16, #tpu.memory_space<vmem>>, vector<1x32x64xbf16>
    %251 = vector.shape_cast %250 : vector<1x32x64xbf16> to vector<32x64xbf16>
    %cst_171 = arith.constant dense<0.000000e+00> : vector<64x64xf32>
    %252 = tpu.matmul %249, %251, %cst_171 {dimension_numbers = #tpu.dot_dimension_numbers<[1], [0], [0], [1], [0, 0, 1, 1], [], []>} : vector<64x32xbf16>, vector<32x64xbf16>, vector<64x64xf32> -> vector<64x64xf32>
    %253 = arith.addf %248, %252 : vector<64x64xf32>
    %c9_172 = arith.constant 9 : index
    %c0_173 = arith.constant 0 : index
    %254 = vector.load %arg23[%c9_172, %c0_173] : memref<128x32xbf16, #tpu.memory_space<vmem>>, vector<64x32xbf16>
    %c2_174 = arith.constant 2 : index
    %c0_175 = arith.constant 0 : index
    %c0_176 = arith.constant 0 : index
    %255 = vector.load %arg9[%c2_174, %c0_175, %c0_176] : memref<9x32x64xbf16, #tpu.memory_space<vmem>>, vector<1x32x64xbf16>
    %256 = vector.shape_cast %255 : vector<1x32x64xbf16> to vector<32x64xbf16>
    %cst_177 = arith.constant dense<0.000000e+00> : vector<64x64xf32>
    %257 = tpu.matmul %254, %256, %cst_177 {dimension_numbers = #tpu.dot_dimension_numbers<[1], [0], [0], [1], [0, 0, 1, 1], [], []>} : vector<64x32xbf16>, vector<32x64xbf16>, vector<64x64xf32> -> vector<64x64xf32>
    %258 = arith.addf %253, %257 : vector<64x64xf32>
    %c23_178 = arith.constant 23 : index
    %c0_179 = arith.constant 0 : index
    %259 = vector.load %arg23[%c23_178, %c0_179] : memref<128x32xbf16, #tpu.memory_space<vmem>>, vector<64x32xbf16>
    %c3_180 = arith.constant 3 : index
    %c0_181 = arith.constant 0 : index
    %c0_182 = arith.constant 0 : index
    %260 = vector.load %arg9[%c3_180, %c0_181, %c0_182] : memref<9x32x64xbf16, #tpu.memory_space<vmem>>, vector<1x32x64xbf16>
    %261 = vector.shape_cast %260 : vector<1x32x64xbf16> to vector<32x64xbf16>
    %cst_183 = arith.constant dense<0.000000e+00> : vector<64x64xf32>
    %262 = tpu.matmul %259, %261, %cst_183 {dimension_numbers = #tpu.dot_dimension_numbers<[1], [0], [0], [1], [0, 0, 1, 1], [], []>} : vector<64x32xbf16>, vector<32x64xbf16>, vector<64x64xf32> -> vector<64x64xf32>
    %263 = arith.addf %258, %262 : vector<64x64xf32>
    %c24_184 = arith.constant 24 : index
    %c0_185 = arith.constant 0 : index
    %264 = vector.load %arg23[%c24_184, %c0_185] : memref<128x32xbf16, #tpu.memory_space<vmem>>, vector<64x32xbf16>
    %c4_186 = arith.constant 4 : index
    %c0_187 = arith.constant 0 : index
    %c0_188 = arith.constant 0 : index
    %265 = vector.load %arg9[%c4_186, %c0_187, %c0_188] : memref<9x32x64xbf16, #tpu.memory_space<vmem>>, vector<1x32x64xbf16>
    %266 = vector.shape_cast %265 : vector<1x32x64xbf16> to vector<32x64xbf16>
    %cst_189 = arith.constant dense<0.000000e+00> : vector<64x64xf32>
    %267 = tpu.matmul %264, %266, %cst_189 {dimension_numbers = #tpu.dot_dimension_numbers<[1], [0], [0], [1], [0, 0, 1, 1], [], []>} : vector<64x32xbf16>, vector<32x64xbf16>, vector<64x64xf32> -> vector<64x64xf32>
    %268 = arith.addf %263, %267 : vector<64x64xf32>
    %c25_190 = arith.constant 25 : index
    %c0_191 = arith.constant 0 : index
    %269 = vector.load %arg23[%c25_190, %c0_191] : memref<128x32xbf16, #tpu.memory_space<vmem>>, vector<64x32xbf16>
    %c5_192 = arith.constant 5 : index
    %c0_193 = arith.constant 0 : index
    %c0_194 = arith.constant 0 : index
    %270 = vector.load %arg9[%c5_192, %c0_193, %c0_194] : memref<9x32x64xbf16, #tpu.memory_space<vmem>>, vector<1x32x64xbf16>
    %271 = vector.shape_cast %270 : vector<1x32x64xbf16> to vector<32x64xbf16>
    %cst_195 = arith.constant dense<0.000000e+00> : vector<64x64xf32>
    %272 = tpu.matmul %269, %271, %cst_195 {dimension_numbers = #tpu.dot_dimension_numbers<[1], [0], [0], [1], [0, 0, 1, 1], [], []>} : vector<64x32xbf16>, vector<32x64xbf16>, vector<64x64xf32> -> vector<64x64xf32>
    %273 = arith.addf %268, %272 : vector<64x64xf32>
    %c39_196 = arith.constant 39 : index
    %c0_197 = arith.constant 0 : index
    %274 = vector.load %arg23[%c39_196, %c0_197] : memref<128x32xbf16, #tpu.memory_space<vmem>>, vector<64x32xbf16>
    %c6_198 = arith.constant 6 : index
    %c0_199 = arith.constant 0 : index
    %c0_200 = arith.constant 0 : index
    %275 = vector.load %arg9[%c6_198, %c0_199, %c0_200] : memref<9x32x64xbf16, #tpu.memory_space<vmem>>, vector<1x32x64xbf16>
    %276 = vector.shape_cast %275 : vector<1x32x64xbf16> to vector<32x64xbf16>
    %cst_201 = arith.constant dense<0.000000e+00> : vector<64x64xf32>
    %277 = tpu.matmul %274, %276, %cst_201 {dimension_numbers = #tpu.dot_dimension_numbers<[1], [0], [0], [1], [0, 0, 1, 1], [], []>} : vector<64x32xbf16>, vector<32x64xbf16>, vector<64x64xf32> -> vector<64x64xf32>
    %278 = arith.addf %273, %277 : vector<64x64xf32>
    %c40_202 = arith.constant 40 : index
    %c0_203 = arith.constant 0 : index
    %279 = vector.load %arg23[%c40_202, %c0_203] : memref<128x32xbf16, #tpu.memory_space<vmem>>, vector<64x32xbf16>
    %c7_204 = arith.constant 7 : index
    %c0_205 = arith.constant 0 : index
    %c0_206 = arith.constant 0 : index
    %280 = vector.load %arg9[%c7_204, %c0_205, %c0_206] : memref<9x32x64xbf16, #tpu.memory_space<vmem>>, vector<1x32x64xbf16>
    %281 = vector.shape_cast %280 : vector<1x32x64xbf16> to vector<32x64xbf16>
    %cst_207 = arith.constant dense<0.000000e+00> : vector<64x64xf32>
    %282 = tpu.matmul %279, %281, %cst_207 {dimension_numbers = #tpu.dot_dimension_numbers<[1], [0], [0], [1], [0, 0, 1, 1], [], []>} : vector<64x32xbf16>, vector<32x64xbf16>, vector<64x64xf32> -> vector<64x64xf32>
    %283 = arith.addf %278, %282 : vector<64x64xf32>
    %c41_208 = arith.constant 41 : index
    %c0_209 = arith.constant 0 : index
    %284 = vector.load %arg23[%c41_208, %c0_209] : memref<128x32xbf16, #tpu.memory_space<vmem>>, vector<64x32xbf16>
    %c8_210 = arith.constant 8 : index
    %c0_211 = arith.constant 0 : index
    %c0_212 = arith.constant 0 : index
    %285 = vector.load %arg9[%c8_210, %c0_211, %c0_212] : memref<9x32x64xbf16, #tpu.memory_space<vmem>>, vector<1x32x64xbf16>
    %286 = vector.shape_cast %285 : vector<1x32x64xbf16> to vector<32x64xbf16>
    %cst_213 = arith.constant dense<0.000000e+00> : vector<64x64xf32>
    %287 = tpu.matmul %284, %286, %cst_213 {dimension_numbers = #tpu.dot_dimension_numbers<[1], [0], [0], [1], [0, 0, 1, 1], [], []>} : vector<64x32xbf16>, vector<32x64xbf16>, vector<64x64xf32> -> vector<64x64xf32>
    %288 = arith.addf %283, %287 : vector<64x64xf32>
    %c0_214 = arith.constant 0 : index
    %c0_215 = arith.constant 0 : index
    %289 = vector.load %arg10[%c0_214, %c0_215] : memref<1x64xf32, #tpu.memory_space<vmem>>, vector<1x64xf32>
    %290 = vector.broadcast %289 : vector<1x64xf32> to vector<64x64xf32>
    %291 = arith.addf %288, %290 : vector<64x64xf32>
    %cst_216 = arith.constant 0.000000e+00 : f32
    %292 = vector.broadcast %cst_216 : f32 to vector<64x64xf32>
    %293 = arith.maximumf %291, %292 : vector<64x64xf32>
    %c0_217 = arith.constant 0 : index
    %c0_218 = arith.constant 0 : index
    %294 = vector.load %arg24[%c0_217, %c0_218] : memref<64x64xf32, #tpu.memory_space<vmem>>, vector<64x64xf32>
    tpu.vector_store %arg24[%c0_217, %c0_218], %293 {strides = array<i32>} : memref<64x64xf32, #tpu.memory_space<vmem>>, vector<64x64xf32>,
    %c0_219 = arith.constant 0 : index
    %c0_220 = arith.constant 0 : index
    %295 = tpu.strided_load %arg24[%c0_219, %c0_220] {strides = array<i32: 2, 1>} : memref<64x64xf32, #tpu.memory_space<vmem>>, vector<32x64xf32>
    %c1_221 = arith.constant 1 : index
    %c0_222 = arith.constant 0 : index
    %296 = tpu.strided_load %arg24[%c1_221, %c0_222] {strides = array<i32: 2, 1>} : memref<64x64xf32, #tpu.memory_space<vmem>>, vector<32x64xf32>
    %297 = arith.maximumf %295, %296 : vector<32x64xf32>
    %298 = vector.shape_cast %297 : vector<32x64xf32> to vector<2x16x64xf32>
    %299 = vector.extract_strided_slice %298 {offsets = [0, 0, 0], sizes = [2, 8, 64], strides = [1, 1, 1]} : vector<2x16x64xf32> to vector<2x8x64xf32>
    %300 = vector.extract_strided_slice %298 {offsets = [0, 8, 0], sizes = [2, 8, 64], strides = [1, 1, 1]} : vector<2x16x64xf32> to vector<2x8x64xf32>
    %301 = arith.maximumf %299, %300 : vector<2x8x64xf32>
    %302 = vector.extract_strided_slice %301 {offsets = [0, 0, 0], sizes = [1, 2, 64], strides = [1, 1, 1]} : vector<2x8x64xf32> to vector<1x2x64xf32>
    %303 = vector.shape_cast %302 : vector<1x2x64xf32> to vector<2x64xf32>
    %cst_223 = arith.constant dense<0.000000e+00> : vector<64xf32>
    %304 = vector.multi_reduction <add>, %303, %cst_223 [0] : vector<2x64xf32> to vector<64xf32>
    %305 = vector.shape_cast %304 : vector<64xf32> to vector<1x64xf32>
    %306 = vector.extract_strided_slice %301 {offsets = [1, 0, 0], sizes = [1, 2, 64], strides = [1, 1, 1]} : vector<2x8x64xf32> to vector<1x2x64xf32>
    %307 = vector.shape_cast %306 : vector<1x2x64xf32> to vector<2x64xf32>
    %cst_224 = arith.constant dense<0.000000e+00> : vector<64xf32>
    %308 = vector.multi_reduction <add>, %307, %cst_224 [0] : vector<2x64xf32> to vector<64xf32>
    %309 = vector.shape_cast %308 : vector<64xf32> to vector<1x64xf32>
    %310 = arith.addf %305, %309 : vector<1x64xf32>
    %cst_225 = arith.constant 2.500000e-01 : f32
    %311 = vector.broadcast %cst_225 : f32 to vector<1x64xf32>
    %312 = arith.mulf %310, %311 : vector<1x64xf32>
    %c0_226 = arith.constant 0 : index
    %c0_227 = arith.constant 0 : index
    %313 = vector.load %arg25[%c0_226, %c0_227] : memref<1x64xf32, #tpu.memory_space<vmem>>, vector<1x64xf32>
    tpu.vector_store %arg25[%c0_226, %c0_227], %312 {strides = array<i32>} : memref<1x64xf32, #tpu.memory_space<vmem>>, vector<1x64xf32>,
    %c0_228 = arith.constant 0 : index
    %c0_229 = arith.constant 0 : index
    %314 = vector.load %arg25[%c0_228, %c0_229] : memref<1x64xf32, #tpu.memory_space<vmem>>, vector<1x64xf32>
    %c0_230 = arith.constant 0 : index
    %c0_231 = arith.constant 0 : index
    %315 = vector.load %arg11[%c0_230, %c0_231] : memref<64x32xf32, #tpu.memory_space<vmem>>, vector<64x32xf32>
    %cst_232 = arith.constant dense<0.000000e+00> : vector<1x32xf32>
    %316 = tpu.matmul %314, %315, %cst_232 {dimension_numbers = #tpu.dot_dimension_numbers<[1], [0], [0], [1], [0, 0, 1, 1], [], []>} : vector<1x64xf32>, vector<64x32xf32>, vector<1x32xf32> -> vector<1x32xf32>
    %c0_233 = arith.constant 0 : index
    %c0_234 = arith.constant 0 : index
    %317 = vector.load %arg12[%c0_233, %c0_234] : memref<1x32xf32, #tpu.memory_space<vmem>>, vector<1x32xf32>
    %318 = arith.addf %316, %317 : vector<1x32xf32>
    %cst_235 = arith.constant 0.000000e+00 : f32
    %319 = vector.broadcast %cst_235 : f32 to vector<1x32xf32>
    %320 = arith.maximumf %318, %319 : vector<1x32xf32>
    %c0_236 = arith.constant 0 : index
    %c0_237 = arith.constant 0 : index
    %321 = vector.load %arg13[%c0_236, %c0_237] : memref<32x16xf32, #tpu.memory_space<vmem>>, vector<32x16xf32>
    %cst_238 = arith.constant dense<0.000000e+00> : vector<1x16xf32>
    %322 = tpu.matmul %320, %321, %cst_238 {dimension_numbers = #tpu.dot_dimension_numbers<[1], [0], [0], [1], [0, 0, 1, 1], [], []>} : vector<1x32xf32>, vector<32x16xf32>, vector<1x16xf32> -> vector<1x16xf32>
    %c0_239 = arith.constant 0 : index
    %c0_240 = arith.constant 0 : index
    %323 = vector.load %arg14[%c0_239, %c0_240] : memref<1x16xf32, #tpu.memory_space<vmem>>, vector<1x16xf32>
    %324 = arith.addf %322, %323 : vector<1x16xf32>
    %cst_241 = arith.constant 0.000000e+00 : f32
    %325 = vector.broadcast %cst_241 : f32 to vector<1x16xf32>
    %326 = arith.maximumf %324, %325 : vector<1x16xf32>
    %c0_242 = arith.constant 0 : index
    %c0_243 = arith.constant 0 : index
    %327 = vector.load %arg15[%c0_242, %c0_243] : memref<16x7xf32, #tpu.memory_space<vmem>>, vector<16x7xf32>
    %cst_244 = arith.constant dense<0.000000e+00> : vector<1x7xf32>
    %328 = tpu.matmul %326, %327, %cst_244 {dimension_numbers = #tpu.dot_dimension_numbers<[1], [0], [0], [1], [0, 0, 1, 1], [], []>} : vector<1x16xf32>, vector<16x7xf32>, vector<1x7xf32> -> vector<1x7xf32>
    %c0_245 = arith.constant 0 : index
    %c0_246 = arith.constant 0 : index
    %329 = vector.load %arg16[%c0_245, %c0_246] : memref<1x7xf32, #tpu.memory_space<vmem>>, vector<1x7xf32>
    %330 = arith.addf %328, %329 : vector<1x7xf32>
    %c0_247 = arith.constant 0 : index
    %c0_248 = arith.constant 0 : index
    %c0_249 = arith.constant 0 : index
    %331 = vector.load %arg17[%c0_247, %c0_248, %c0_249] : memref<1x1x7xf32, #tpu.memory_space<vmem>>, vector<1x1x7xf32>
    %332 = vector.shape_cast %331 : vector<1x1x7xf32> to vector<1x7xf32>
    %333 = vector.shape_cast %330 : vector<1x7xf32> to vector<1x1x7xf32>
    tpu.vector_store %arg17[%c0_247, %c0_248, %c0_249], %333 {strides = array<i32>} : memref<1x1x7xf32, #tpu.memory_space<vmem>>, vector<1x1x7xf32>,
    return
  }
  func.func @transform_0(%arg0: i32, %arg1: i32) -> (i32, i32) {
    %c1_i32 = arith.constant 1 : i32
    %0 = arith.muli %arg0, %c1_i32 : i32
    %1 = arith.addi %0, %arg1 : i32
    %c0_i32 = arith.constant 0 : i32
    %c0_i32_0 = arith.constant 0 : i32
    return %1, %c0_i32 : i32, i32
  }
  func.func @transform_1(%arg0: i32, %arg1: i32) -> (i32, i32) {
    %c0_i32 = arith.constant 0 : i32
    %c0_i32_0 = arith.constant 0 : i32
    %c0_i32_1 = arith.constant 0 : i32
    return %c0_i32, %c0_i32_0 : i32, i32
  }
  func.func @transform_2(%arg0: i32, %arg1: i32) -> (i32, i32) {
    %c0_i32 = arith.constant 0 : i32
    %c0_i32_0 = arith.constant 0 : i32
    %c0_i32_1 = arith.constant 0 : i32
    return %c0_i32, %c0_i32_0 : i32, i32
  }
  func.func @transform_3(%arg0: i32, %arg1: i32) -> (i32, i32, i32) {
    %c0_i32 = arith.constant 0 : i32
    %c0_i32_0 = arith.constant 0 : i32
    %c0_i32_1 = arith.constant 0 : i32
    %c0_i32_2 = arith.constant 0 : i32
    return %c0_i32, %c0_i32_0, %c0_i32_1 : i32, i32, i32
  }
  func.func @transform_4(%arg0: i32, %arg1: i32) -> (i32, i32) {
    %c0_i32 = arith.constant 0 : i32
    %c0_i32_0 = arith.constant 0 : i32
    %c0_i32_1 = arith.constant 0 : i32
    return %c0_i32, %c0_i32_0 : i32, i32
  }
  func.func @transform_5(%arg0: i32, %arg1: i32) -> (i32, i32, i32) {
    %c0_i32 = arith.constant 0 : i32
    %c0_i32_0 = arith.constant 0 : i32
    %c0_i32_1 = arith.constant 0 : i32
    %c0_i32_2 = arith.constant 0 : i32
    return %c0_i32, %c0_i32_0, %c0_i32_1 : i32, i32, i32
  }
  func.func @transform_6(%arg0: i32, %arg1: i32) -> (i32, i32) {
    %c0_i32 = arith.constant 0 : i32
    %c0_i32_0 = arith.constant 0 : i32
    %c0_i32_1 = arith.constant 0 : i32
    return %c0_i32, %c0_i32_0 : i32, i32
  }
  func.func @transform_7(%arg0: i32, %arg1: i32) -> (i32, i32, i32) {
    %c0_i32 = arith.constant 0 : i32
    %c0_i32_0 = arith.constant 0 : i32
    %c0_i32_1 = arith.constant 0 : i32
    %c0_i32_2 = arith.constant 0 : i32
    return %c0_i32, %c0_i32_0, %c0_i32_1 : i32, i32, i32
  }
  func.func @transform_8(%arg0: i32, %arg1: i32) -> (i32, i32) {
    %c0_i32 = arith.constant 0 : i32
    %c0_i32_0 = arith.constant 0 : i32
    %c0_i32_1 = arith.constant 0 : i32
    return %c0_i32, %c0_i32_0 : i32, i32
  }
  func.func @transform_9(%arg0: i32, %arg1: i32) -> (i32, i32) {
    %c0_i32 = arith.constant 0 : i32
    %c0_i32_0 = arith.constant 0 : i32
    %c0_i32_1 = arith.constant 0 : i32
    return %c0_i32, %c0_i32_0 : i32, i32
  }
  func.func @transform_10(%arg0: i32, %arg1: i32) -> (i32, i32) {
    %c0_i32 = arith.constant 0 : i32
    %c0_i32_0 = arith.constant 0 : i32
    %c0_i32_1 = arith.constant 0 : i32
    return %c0_i32, %c0_i32_0 : i32, i32
  }
  func.func @transform_11(%arg0: i32, %arg1: i32) -> (i32, i32) {
    %c0_i32 = arith.constant 0 : i32
    %c0_i32_0 = arith.constant 0 : i32
    %c0_i32_1 = arith.constant 0 : i32
    return %c0_i32, %c0_i32_0 : i32, i32
  }
  func.func @transform_12(%arg0: i32, %arg1: i32) -> (i32, i32) {
    %c0_i32 = arith.constant 0 : i32
    %c0_i32_0 = arith.constant 0 : i32
    %c0_i32_1 = arith.constant 0 : i32
    return %c0_i32, %c0_i32_0 : i32, i32
  }
  func.func @transform_13(%arg0: i32, %arg1: i32) -> (i32, i32) {
    %c0_i32 = arith.constant 0 : i32
    %c0_i32_0 = arith.constant 0 : i32
    %c0_i32_1 = arith.constant 0 : i32
    return %c0_i32, %c0_i32_0 : i32, i32
  }
  func.func @transform_14(%arg0: i32, %arg1: i32) -> (i32, i32) {
    %c0_i32 = arith.constant 0 : i32
    %c0_i32_0 = arith.constant 0 : i32
    %c0_i32_1 = arith.constant 0 : i32
    return %c0_i32, %c0_i32_0 : i32, i32
  }
  func.func @transform_15(%arg0: i32, %arg1: i32) -> (i32, i32, i32) {
    %c1_i32 = arith.constant 1 : i32
    %0 = arith.muli %arg0, %c1_i32 : i32
    %1 = arith.addi %0, %arg1 : i32
    %c0_i32 = arith.constant 0 : i32
    %c0_i32_0 = arith.constant 0 : i32
    %c0_i32_1 = arith.constant 0 : i32
    return %1, %c0_i32, %c0_i32_0 : i32, i32, i32
  }
}

</mosaic_0001>

<bundles_post_ra>
// kernel: forward.1
= control target key start
LH: loop header
LB: loop body
LE: loop exit
PB: predicated region body
PF: predicated region fallthrough
CT: control target
= control target key end

     0   :  { %s21398_s0 = inlined_call_operand.vmem [shape: bf16[2048,32], index: 0, kind: input, shape index: {}]   ;;  %s21399_s1 = inlined_call_operand.vmem [shape: bf16[32,8], index: 1, kind: input, shape index: {}]   ;;  %s21400_s2 = inlined_call_operand.vmem [shape: f32[1,8], index: 2, kind: input, shape index: {}]   ;;  %s21401_s3 = inlined_call_operand.vmem [shape: bf16[9,8,16], index: 3, kind: input, shape index: {}]   ;;  %s21402_s4 = inlined_call_operand.vmem [shape: f32[1,16], index: 4, kind: input, shape index: {}]   ;;  %s21403_s5 = inlined_call_operand.vmem [shape: bf16[9,16,32], index: 5, kind: input, shape index: {}]   ;;  %s21404_s6 = inlined_call_operand.vmem [shape: f32[1,32], index: 6, kind: input, shape index: {}]   ;;  %s21405_s7 = inlined_call_operand.vmem [shape: bf16[9,32,64], index: 7, kind: input, shape index: {}]   ;;  %s21406_s8 = inlined_call_operand.vmem [shape: f32[1,64], index: 8, kind: input, shape index: {}]   ;;  %s21407_s9 = inlined_call_operand.vmem [shape: f32[64,32], index: 9, kind: input, shape index: {}]   ;;  %s21408_s10 = inlined_call_operand.vmem [shape: f32[1,32], index: 10, kind: input, shape index: {}]   ;;  %s21409_s11 = inlined_call_operand.vmem [shape: f32[32,16], index: 11, kind: input, shape index: {}]   ;;  %s21410_s12 = inlined_call_operand.vmem [shape: f32[1,16], index: 12, kind: input, shape index: {}]   ;;  %s21411_s13 = inlined_call_operand.vmem [shape: f32[16,7], index: 13, kind: input, shape index: {}]   ;;  %s21412_s14 = inlined_call_operand.vmem [shape: f32[1,7], index: 14, kind: input, shape index: {}]   ;;  %s21413_s15 = inlined_call_operand.hbm [shape: f32[2,1,7], index: 15, kind: output, shape index: {}]  }
   0x1   :  { %21427 = sst [smem:[#allocation103_spill]] %s21398_s0 }
   0x2   :  { %21428 = sst [smem:[#allocation104_spill]] %s21399_s1 }
   0x3   :  { %21429 = sst [smem:[#allocation105_spill]] %s21400_s2 }
   0x4   :  { %21430 = sst [smem:[#allocation106_spill]] %s21401_s3 }
   0x5   :  { %21431 = sst [smem:[#allocation107_spill]] %s21413_s15 }
   0x6   :  { %20 = vsyncpa [#allocation11], 0 }
   0x7   :  { %22 = vsyncpa [#allocation11 + $0x1], 0  ;;  %s17438_s18 = smov 0   ;;  %s17440_s19 = smov 0  }
   0x8   :  { %s17442_s20 = smov 0   ;;  %s17444_s21 = smov 0  }
   0x9   :  { %s17446_s22 = smov 0   ;;  %s17448_s23 = smov 0  }
   0xa LB: > { %21432 = sst [smem:[#allocation13_spill]] %s17332_s18  ;;  %s13970_s24 = sadd.s32 4294967295, %s17352_s23   ;;  %s17352_s23 = sphi %s17448_s23, %s28_s23   ;;  %s17348_s22 = sphi %s17446_s22, %s21772_s22   ;;  %s17344_s21 = sphi %s17444_s21, %s21771_s21   ;;  %s17340_s20 = sphi %s17442_s20, %s21775_s20   ;;  %s17336_s19 = sphi %s17440_s19, %s21774_s19   ;;  %s17332_s18 = sphi %s17438_s18, %s21773_s18  }
   0xb   : > { %21433 = sst [smem:[#allocation14_spill]] %s17348_s22  ;;  %s13971_s25 = sadd.s32 4294967294, %s17352_s23  }
   0xc   : > { %s40_s26 = sadd.s32 1, %s17348_s22  ;;  %s371_s27 = sadd.s32 1, %s17340_s20 }
   0xd   : > { %p42_p0 = scmp.ge.s32.totalorder %s40_s26, 2  ;;  %p381_p1 = scmp.ne.s32.totalorder %s17340_s20, %s17336_s19 }
   0xe   : > { %p382_p2 = scmp.eq.s32.totalorder %s13970_s24, 1  ;;  %p387_p3 = scmp.ne.s32.totalorder %s17336_s19, %s17332_s18 }
   0xf   : > { %s21777_s26 = smov (%p42_p0, %s40_s26), 0  ;;  %p388_p5 = scmp.eq.s32.totalorder %s13971_s25, 1 }
  0x10   : > { %21434 = sst [smem:[#allocation15_spill]] %s21777_s26  ;;  %p17478_p4 = por %p382_p2, %p381_p1 }
  0x11   : > { %s368_s29 = ssub.s32 %s17348_s22, %s21777_s26  ;;  %p13974_p6 = scmp.ge.s32.totalorder %s17352_s23, 1 }
  0x12   : > { %p369_p7 = scmp.eq.s32.totalorder %s368_s29, 0  ;;  %p17485_p8 = por %p388_p5, %p387_p3 }
  0x13   : > { %p459_p9 = scmp.lt.s32.totalorder %s17352_s23, 3 }
  0x14   : > { %s17491_s16 = scalar_select %p369_p7, %s17340_s20, %s371_s27  }
  0x15   : > { %p460_p10 = pnand %p13974_p6, %p459_p9 }
  0x17   : > { %463 = sbr.rel (%p460_p10) target bundleno = 2654 (0xa5e), region = 80 }
  0x1c   : > { %s21437_s1 = sld [smem:[#allocation104_spill]]  ;;  %s13975_s18 = sshll.u32 %s17344_s21, 7  ;;  %vm1115_vm0 = vcmask 261120   ;;  %vm521_vm1 = vcmask 60416   ;;  %v21418_v29 = vmov 0   ;;  %vm2946_vm2 = vcmask 1043456  }
  0x1d   : > { %p509_p11 = scmp.lt.s32.totalorder %s13975_s18, 255  ;;  %s21438_s0 = sld [smem:[#allocation103_spill]]  ;;  %531 = vst.msk [vmem:[#allocation3 + $0x24] sm:$0xf] %vm521_vm1, %v21418_v29  ;;  %522 = vst.msk [vmem:[#allocation3] sm:$0xf] %vm521_vm1, %v21418_v29 }
  0x1e   : > { %523 = vst.msk [vmem:[#allocation3 + $0x4] sm:$0xf] %vm521_vm1, %v21418_v29  ;;  %524 = vst.msk [vmem:[#allocation3 + $0x8] sm:$0xf] %vm521_vm1, %v21418_v29  ;;  %s21439_s3 = sld [smem:[#allocation106_spill]]  ;;  %vm1981_vm3 = vcmask 64512  }
  0x1f   : > { %s21779_s18 = smov (!%p509_p11, %s13975_s18), 255  ;;  %525 = vst.msk [vmem:[#allocation3 + $0xc] sm:$0xf] %vm521_vm1, %v21418_v29  ;;  %526 = vst.msk [vmem:[#allocation3 + $0x10] sm:$0xf] %vm521_vm1, %v21418_v29  ;;  %s21440_s2 = sld [smem:[#allocation105_spill]] }
  0x20   : > { %s13976_s29 = sshll.u32 %s21779_s18, 2  ;;  %527 = vst.msk [vmem:[#allocation3 + $0x14] sm:$0xf] %vm521_vm1, %v21418_v29  ;;  %528 = vst.msk [vmem:[#allocation3 + $0x18] sm:$0xf] %vm521_vm1, %v21418_v29  ;;  %vm602_vm6 = vcmask 125952  }
  0x21   : > { %529 = vst.msk [vmem:[#allocation3 + $0x1c] sm:$0xf] %vm521_vm1, %v21418_v29  ;;  %530 = vst.msk [vmem:[#allocation3 + $0x20] sm:$0xf] %vm521_vm1, %v21418_v29  ;;  %vm3274_vm4 = vsmask.f32 4352 }
  0x22   : > { %v16689_v0 = vld [vmem:[%s21437_s1 + $0x8] sm:$0xff]   ;;  %v16690_v1 = vld [vmem:[%s21437_s1] sm:$0xff]   ;;  %532 = vst.msk [vmem:[#allocation3 + $0x28] sm:$0xf] %vm521_vm1, %v21418_v29  ;;  %533 = vst.msk [vmem:[#allocation3 + $0x2c] sm:$0xf] %vm521_vm1, %v21418_v29 }
  0x23   : > { %15589 = vmatprep.subr.bf16.mxu0 %v16689_v0  ;;  %s17503_s22 = scalar_lea.vmem %s21438_s0, %s13976_s29  ;;  %534 = vst.msk [vmem:[#allocation3 + $0x30] sm:$0xf] %vm521_vm1, %v21418_v29  ;;  %535 = vst.msk [vmem:[#allocation3 + $0x34] sm:$0xf] %vm521_vm1, %v21418_v29  ;;  %vm4189_vm5 = vsmask.f32 7424 }
  0x24   : > { %15590 = vmatpush3.bf16.msra.mxu0 %v16689_v0  ;;  %v16691_v2 = vld [vmem:[%s17503_s22] sm:$0xff]   ;;  %v16692_v3 = vld [vmem:[%s17503_s22 + $0x8] sm:$0xff]   ;;  %v16693_v4 = vld [vmem:[%s17503_s22 + $0x10] sm:$0xff]   ;;  %536 = vst.msk [vmem:[#allocation3 + $0x38] sm:$0xf] %vm521_vm1, %v21418_v29  ;;  %vm9849_vm7 = vcmask 130048  }
  0x25   : > { %15591 = vmatprep.subr.bf16.mxu0 %v16690_v1  ;;  %15593 = vmatprep.mubr.msk.bf16.mxu0 %vm1115_vm0, %v16691_v2  ;;  %v16694_v5 = vld [vmem:[%s17503_s22 + $0x18] sm:$0xff]   ;;  %v16695_v6 = vld [vmem:[%s17503_s22 + $0x20] sm:$0xff]   ;;  %v16696_v7 = vld [vmem:[%s17503_s22 + $0x28] sm:$0xff]   ;;  %537 = vst.msk [vmem:[#allocation3 + $0x3c] sm:$0xf] %vm521_vm1, %v21418_v29  ;;  %vm627_vm8 = vcmask 257024  }
  0x26   : > { %v16697_v8 = vld [vmem:[%s17503_s22 + $0x30] sm:$0xff]   ;;  %v16698_v9 = vld [vmem:[%s17503_s22 + $0x38] sm:$0xff]   ;;  %v16699_v10 = vld [vmem:[%s17503_s22 + $0x40] sm:$0xff]   ;;  %538 = vst.msk [vmem:[#allocation3 + $0x40] sm:$0xf] %vm521_vm1, %v21418_v29  ;;  %vm12226_vm9 = vcmask 254976  }
  0x27   : > { %v16700_v11 = vld [vmem:[%s17503_s22 + $0x48] sm:$0xff]   ;;  %v16701_v12 = vld [vmem:[%s17503_s22 + $0x50] sm:$0xff]   ;;  %v16702_v13 = vld [vmem:[%s17503_s22 + $0x58] sm:$0xff]   ;;  %539 = vst.msk [vmem:[#allocation3 + $0x44] sm:$0xf] %vm521_vm1, %v21418_v29  ;;  %vm17356_vm10 = vmmov 0  }
  0x28   : > { %15592 = vmatpush3.bf16.msra.mxu0 %v16690_v1  ;;  %v16703_v14 = vld [vmem:[%s17503_s22 + $0x60] sm:$0xff]   ;;  %v16704_v15 = vld [vmem:[%s17503_s22 + $0x68] sm:$0xff]   ;;  %v16705_v16 = vld [vmem:[%s17503_s22 + $0x70] sm:$0xff]   ;;  %540 = vst.msk [vmem:[#allocation3 + $0x48] sm:$0xf] %vm521_vm1, %v21418_v29  ;;  %vm13602_vm11 = vcmask 523264  }
  0x29   : > { %v16706_v17 = vld [vmem:[%s17503_s22 + $0x78] sm:$0xff]   ;;  %v16707_v18 = vld [vmem:[%s17503_s22 + $0x80] sm:$0xff]   ;;  %v16708_v19 = vld [vmem:[%s17503_s22 + $0x88] sm:$0xff]   ;;  %541 = vst.msk [vmem:[#allocation3 + $0x4c] sm:$0xf] %vm521_vm1, %v21418_v29  ;;  %vm13632_vm12 = vcmask 517120  }
  0x2a   : > { %v16709_v20 = vld [vmem:[%s17503_s22 + $0x90] sm:$0xff]   ;;  %v16710_v21 = vld [vmem:[%s17503_s22 + $0x98] sm:$0xff]   ;;  %v16711_v22 = vld [vmem:[%s17503_s22 + $0xa0] sm:$0xff]   ;;  %542 = vst.msk [vmem:[#allocation3 + $0x50] sm:$0xf] %vm521_vm1, %v21418_v29  ;;  %vm13649_vm13 = vcmask 516096  }
  0x2b   : > { %15594 = vmatmul.mubr.msk.bf16.vlgmr.msra.gmra.mxu0 %vm1115_vm0, %v16692_v3  ;;  %v16712_v23 = vld [vmem:[%s17503_s22 + $0xa8] sm:$0xff]   ;;  %v16713_v24 = vld [vmem:[%s17503_s22 + $0xb0] sm:$0xff]   ;;  %v16714_v25 = vld [vmem:[%s17503_s22 + $0xb8] sm:$0xff]   ;;  %543 = vst.msk [vmem:[#allocation3 + $0x54] sm:$0xf] %vm521_vm1, %v21418_v29  ;;  %s505_s15 = sand.u32 1, %s17336_s19  }
  0x2c   : > { %15597 = vmatprep.mubr.msk.bf16.mxu0 %vm1115_vm0, %v16693_v4  ;;  %v16715_v26 = vld [vmem:[%s17503_s22 + $0xc0] sm:$0xff]   ;;  %v17556_v27 = vld [vmem:[%s17503_s22 + $0xc8] sm:$0xff]   ;;  %v17559_v28 = vld [vmem:[%s17503_s22 + $0xd0] sm:$0xff]   ;;  %544 = vst.msk [vmem:[#allocation3 + $0x58] sm:$0xf] %vm521_vm1, %v21418_v29  ;;  %s15039_s17 = sshll.u32 %s17344_s21, 4 }
  0x2d   : > { %545 = vst.msk [vmem:[#allocation3 + $0x5c] sm:$0xf] %vm521_vm1, %v21418_v29  ;;  %546 = vst.msk [vmem:[#allocation3 + $0x60] sm:$0xf] %vm521_vm1, %v21418_v29  ;;  %v16718_v30 = vld [vmem:[%s17503_s22 + $0xd8] sm:$0xff]   ;;  %v16719_v31 = vld [vmem:[%s17503_s22 + $0xe0] sm:$0xff]  }
  0x2e   : > { %547 = vst.msk [vmem:[#allocation3 + $0x64] sm:$0xf] %vm521_vm1, %v21418_v29  ;;  %548 = vst.msk [vmem:[#allocation3 + $0x68] sm:$0xf] %vm521_vm1, %v21418_v29  ;;  %v14140_v32 = vld [vmem:[%s21439_s3 + $0x4] sm:$0xf] }
  0x2f   : > { %549 = vst.msk [vmem:[#allocation3 + $0x6c] sm:$0xf] %vm521_vm1, %v21418_v29  ;;  %550 = vst.msk [vmem:[#allocation3 + $0x70] sm:$0xf] %vm521_vm1, %v21418_v29  ;;  %16622 = vmatprep.subr.msk.bf16.mxu1 %vm2946_vm2, %v14140_v32  ;;  %v2948_v33 = vsel %vm2946_vm2, %v14140_v32, 0  ;;  %v16720_v41 = vld [vmem:[%s17503_s22 + $0xe8] sm:$0xff]  }
  0x30   : > { %551 = vst.msk [vmem:[#allocation3 + $0x74] sm:$0xf] %vm521_vm1, %v21418_v29  ;;  %552 = vst.msk [vmem:[#allocation3 + $0x78] sm:$0xf] %vm521_vm1, %v21418_v29  ;;  %v2623_v34 = vld [vmem:[#allocation3 + $0x4] sm:$0xf]  ;;  %15722 = vmatpush3.bf16.msra.mxu1 %v2948_v33 }
  0x31   : > { %553 = vst.msk [vmem:[#allocation3 + $0x7c] sm:$0xf] %vm521_vm1, %v21418_v29  ;;  %554 = vst.msk [vmem:[#allocation3 + $0x80] sm:$0xf] %vm521_vm1, %v21418_v29  ;;  %v2624_v35 = vld [vmem:[#allocation3 + $0x8] sm:$0xf] }
  0x32   : > { %555 = vst.msk [vmem:[#allocation3 + $0x84] sm:$0xf] %vm521_vm1, %v21418_v29  ;;  %556 = vst.msk [vmem:[#allocation3 + $0x88] sm:$0xf] %vm521_vm1, %v21418_v29  ;;  %v2625_v36 = vld [vmem:[#allocation3 + $0xc] sm:$0xf]  ;;  %v14141_v38 = vcombine.low %v2623_v34, %v2624_v35 }
  0x33   : > { %15598 = vmatmul.mubr.msk.bf16.gmra.mxu0 %vm1115_vm0, %v16694_v5  ;;  %557 = vst.msk [vmem:[#allocation3 + $0x8c] sm:$0xf] %vm521_vm1, %v21418_v29  ;;  %558 = vst.msk [vmem:[#allocation3 + $0x90] sm:$0xf] %vm521_vm1, %v21418_v29  ;;  %v17720_v37 = vld [vmem:[#allocation3 + $0x10] sm:$0xf]  ;;  %v17726_v40 = vcombine.low %v2624_v35, %v2625_v36 }
  0x34   : > { %15601 = vmatprep.mubr.msk.bf16.mxu0 %vm1115_vm0, %v16695_v6  ;;  %559 = vst.msk [vmem:[#allocation3 + $0x94] sm:$0xf] %vm521_vm1, %v21418_v29  ;;  %560 = vst.msk [vmem:[#allocation3 + $0x98] sm:$0xf] %vm521_vm1, %v21418_v29  ;;  %v14142_v39 = vcombine.low %v2625_v36, %v17720_v37  ;;  %15723 = vmatprep.mubr.msk.bf16.mxu1 %vm1981_vm3, %v14141_v38  ;;  %v16721_v42 = vld [vmem:[%s17503_s22 + $0xf0] sm:$0xff]   ;;  %v16722_v43 = vld [vmem:[%s17503_s22 + $0xf8] sm:$0xff]  }
  0x35   : > { %561 = vst.msk [vmem:[#allocation3 + $0x9c] sm:$0xf] %vm521_vm1, %v21418_v29  ;;  %562 = vst.msk [vmem:[#allocation3 + $0xa0] sm:$0xf] %vm521_vm1, %v21418_v29  ;;  %v16723_v44 = vld [vmem:[%s17503_s22 + $0x100] sm:$0xff]   ;;  %v16724_v45 = vld [vmem:[%s17503_s22 + $0x108] sm:$0xff]  }
  0x36   : > { %563 = vst.msk [vmem:[#allocation3 + $0xa4] sm:$0xf] %vm521_vm1, %v21418_v29  ;;  %564 = vst.msk [vmem:[#allocation3 + $0xa8] sm:$0xf] %vm521_vm1, %v21418_v29  ;;  %15724 = vmatmul.mubr.msk.bf16.vlgmr.msra.gmra.mxu1 %vm1981_vm3, %v14142_v39  ;;  %v16725_v46 = vld [vmem:[%s17503_s22 + $0x110] sm:$0xff]   ;;  %v16726_v47 = vld [vmem:[%s17503_s22 + $0x118] sm:$0xff]  }
  0x37   : > { %565 = vst.msk [vmem:[#allocation3 + $0xac] sm:$0xf] %vm521_vm1, %v21418_v29  ;;  %566 = vst.msk [vmem:[#allocation3 + $0xb0] sm:$0xf] %vm521_vm1, %v21418_v29  ;;  %v14336_v48 = vld [vmem:[%s21439_s3 + $0xc] sm:$0xf] }
  0x38   : > { %567 = vst.msk [vmem:[#allocation3 + $0xb4] sm:$0xf] %vm521_vm1, %v21418_v29  ;;  %568 = vst.msk [vmem:[#allocation3 + $0xb8] sm:$0xf] %vm521_vm1, %v21418_v29  ;;  %v16727_v49 = vld [vmem:[%s17503_s22 + $0x120] sm:$0xff]   ;;  %16625 = vmatprep.subr.msk.bf16.mxu0 %vm2946_vm2, %v14336_v48  ;;  %v5525_v50 = vsel %vm2946_vm2, %v14336_v48, 0 }
  0x39   : > { %569 = vst.msk [vmem:[#allocation3 + $0xbc] sm:$0xf] %vm521_vm1, %v21418_v29  ;;  %570 = vst.msk [vmem:[#allocation3 + $0xc0] sm:$0xf] %vm521_vm1, %v21418_v29  ;;  %15920 = vmatpush3.bf16.msra.mxu0 %v5525_v50  ;;  %v16728_v51 = vld [vmem:[%s17503_s22 + $0x128] sm:$0xff]   ;;  %v16729_v52 = vld [vmem:[%s17503_s22 + $0x130] sm:$0xff]  }
  0x3a   : > { %571 = vst.msk [vmem:[#allocation3 + $0xc4] sm:$0xf] %vm521_vm1, %v21418_v29  ;;  %572 = vst.msk [vmem:[#allocation3 + $0xc8] sm:$0xf] %vm521_vm1, %v21418_v29  ;;  %v16730_v53 = vld [vmem:[%s17503_s22 + $0x138] sm:$0xff]   ;;  %v16731_v54 = vld [vmem:[%s17503_s22 + $0x140] sm:$0xff]  }
  0x3b   : > { %15602 = vmatmul.mubr.msk.bf16.gmra.mxu0 %vm1115_vm0, %v16696_v7  ;;  %573 = vst.msk [vmem:[#allocation3 + $0xcc] sm:$0xf] %vm521_vm1, %v21418_v29  ;;  %574 = vst.msk [vmem:[#allocation3 + $0xd0] sm:$0xf] %vm521_vm1, %v21418_v29  ;;  %v16732_v55 = vld [vmem:[%s17503_s22 + $0x148] sm:$0xff]   ;;  %v16733_v56 = vld [vmem:[%s17503_s22 + $0x150] sm:$0xff]  }
  0x3c   : > { %15605 = vmatprep.mubr.msk.bf16.mxu0 %vm1115_vm0, %v16697_v8  ;;  %575 = vst.msk [vmem:[#allocation3 + $0xd4] sm:$0xf] %vm521_vm1, %v21418_v29  ;;  %576 = vst.msk [vmem:[#allocation3 + $0xd8] sm:$0xf] %vm521_vm1, %v21418_v29  ;;  %v16734_v57 = vld [vmem:[%s17503_s22 + $0x158] sm:$0xff]   ;;  %v16735_v58 = vld [vmem:[%s17503_s22 + $0x160] sm:$0xff]  }
  0x3d   : > { %577 = vst.msk [vmem:[#allocation3 + $0xdc] sm:$0xf] %vm521_vm1, %v21418_v29  ;;  %578 = vst.msk [vmem:[#allocation3 + $0xe0] sm:$0xf] %vm521_vm1, %v21418_v29  ;;  %v16736_v59 = vld [vmem:[%s17503_s22 + $0x168] sm:$0xff]   ;;  %v16737_v60 = vld [vmem:[%s17503_s22 + $0x170] sm:$0xff]  }
  0x3e   : > { %579 = vst.msk [vmem:[#allocation3 + $0xe4] sm:$0xf] %vm521_vm1, %v21418_v29  ;;  %580 = vst.msk [vmem:[#allocation3 + $0xe8] sm:$0xf] %vm521_vm1, %v21418_v29  ;;  %v16738_v61 = vld [vmem:[%s17503_s22 + $0x178] sm:$0xff]   ;;  %v16739_v62 = vld [vmem:[%s17503_s22 + $0x180] sm:$0xff]  }
  0x3f   : > { %581 = vst.msk [vmem:[#allocation3 + $0xec] sm:$0xf] %vm521_vm1, %v21418_v29  ;;  %582 = vst.msk [vmem:[#allocation3 + $0xf0] sm:$0xf] %vm521_vm1, %v21418_v29  ;;  %v16740_v63 = vld [vmem:[%s17503_s22 + $0x188] sm:$0xff]   ;;  %v16741_v0 = vld [vmem:[%s17503_s22 + $0x190] sm:$0xff]  }
  0x40   : > { %583 = vst.msk [vmem:[#allocation3 + $0xf4] sm:$0xf] %vm521_vm1, %v21418_v29  ;;  %584 = vst.msk [vmem:[#allocation3 + $0xf8] sm:$0xf] %vm521_vm1, %v21418_v29  ;;  %v17779_v1 = vld [vmem:[%s21440_s2] ss:$0 sm:$0xff] }
  0x41   : > { %585 = vst.msk [vmem:[#allocation3 + $0xfc] sm:$0xf] %vm521_vm1, %v21418_v29  ;;  %586 = vst.msk [vmem:[#allocation3 + $0x100] sm:$0xf] %vm521_vm1, %v21418_v29  ;;  %v16742_v8 = vld [vmem:[%s17503_s22 + $0x198] sm:$0xff]   ;;  %s506_s24 = scalar_lea.vmem [#allocation10], %s505_s15 }
  0x42   : > { %587 = vst.msk [vmem:[#allocation3 + $0x104] sm:$0xf] %vm521_vm1, %v21418_v29  ;;  %588 = vst.msk [vmem:[#allocation3 + $0x108] sm:$0xf] %vm521_vm1, %v21418_v29  ;;  %v16746_v38 = vld [vmem:[%s17503_s22 + $0x1b8] sm:$0xff]   ;;  %s13906_s25 = sshll.u32 %s506_s24, 4  ;;  %s13907_s25 = int_to_ptr.vmem [resolvable:$true] %s13906_s25 }
  0x43   : > { %15606 = vmatmul.mubr.msk.bf16.gmra.mxu0 %vm1115_vm0, %v16698_v9  ;;  %589 = vst.msk [vmem:[#allocation3 + $0x10c] sm:$0xf] %vm521_vm1, %v21418_v29  ;;  %590 = vst.msk [vmem:[#allocation3 + $0x110] sm:$0xf] %vm521_vm1, %v21418_v29  ;;  %vm13890_vm14 = vcmask 49152   ;;  %s17357_s21 = smov [#allocation10]  }
  0x44   : > { %15609 = vmatprep.mubr.msk.bf16.mxu0 %vm1115_vm0, %v16699_v10  ;;  %591 = vst.msk [vmem:[#allocation3 + $0x114] sm:$0xf] %vm521_vm1, %v21418_v29  ;;  %592 = vst.msk [vmem:[#allocation3 + $0x118] sm:$0xf] %vm521_vm1, %v21418_v29  ;;  %s17280_s18 = sshll.u32 %s17357_s21, 4  ;;  %s17281_s18 = int_to_ptr.vmem [resolvable:$false] %s17280_s18 }
  0x45   : > { %593 = vst.msk [vmem:[#allocation3 + $0x11c] sm:$0xf] %vm521_vm1, %v21418_v29  ;;  %594 = vst.msk [vmem:[#allocation3 + $0x120] sm:$0xf] %vm521_vm1, %v21418_v29  ;;  %s17282_s26 = scalar_lea.vmem %s17281_s18, 32  ;;  %p17283_p1 = scmp.lt.s32.totalorder %s13907_s25, %s17281_s18 }
  0x46   : > { %595 = vst.msk [vmem:[#allocation3 + $0x124] sm:$0xf] %vm521_vm1, %v21418_v29 }
  0x4b   : > { %15610 = vmatmul.mubr.msk.bf16.gmra.mxu0 %vm1115_vm0, %v16700_v11  ;;  %v16743_v11 = vld [vmem:[%s17503_s22 + $0x1a0] sm:$0xff]  }
  0x4c   : > { %15613 = vmatprep.mubr.msk.bf16.mxu0 %vm1115_vm0, %v16701_v12 }
  0x53   : > { %15614 = vmatmul.mubr.msk.bf16.gmra.mxu0 %vm1115_vm0, %v16702_v13 }
  0x54   : > { %15617 = vmatprep.mubr.msk.bf16.mxu0 %vm1115_vm0, %v16703_v14 }
  0x5b   : > { %15618 = vmatmul.mubr.msk.bf16.gmra.mxu0 %vm1115_vm0, %v16704_v15 }
  0x5c   : > { %15621 = vmatprep.mubr.msk.bf16.mxu0 %vm1115_vm0, %v16705_v16 }
  0x63   : > { %15622 = vmatmul.mubr.msk.bf16.gmra.mxu0 %vm1115_vm0, %v16706_v17 }
  0x64   : > { %15625 = vmatprep.mubr.msk.bf16.mxu0 %vm1115_vm0, %v16707_v18 }
  0x6b   : > { %15626 = vmatmul.mubr.msk.bf16.gmra.mxu0 %vm1115_vm0, %v16708_v19 }
  0x6c   : > { %15629 = vmatprep.mubr.msk.bf16.mxu0 %vm1115_vm0, %v16709_v20 }
  0x73   : > { %15630 = vmatmul.mubr.msk.bf16.gmra.mxu0 %vm1115_vm0, %v16710_v21 }
  0x74   : > { %15633 = vmatprep.mubr.msk.bf16.mxu0 %vm1115_vm0, %v16711_v22  ;;  %v16744_v22 = vld [vmem:[%s17503_s22 + $0x1a8] sm:$0xff]  }
  0x7b   : > { %15634 = vmatmul.mubr.msk.bf16.gmra.mxu0 %vm1115_vm0, %v16712_v23 }
  0x7c   : > { %15637 = vmatprep.mubr.msk.bf16.mxu0 %vm1115_vm0, %v16713_v24 }
  0x83   : > { %15638 = vmatmul.mubr.msk.bf16.gmra.mxu0 %vm1115_vm0, %v16714_v25  ;;  %v16745_v25 = vld [vmem:[%s17503_s22 + $0x1b0] sm:$0xff]  }
  0x84   : > { %15641 = vmatprep.mubr.msk.bf16.mxu0 %vm1115_vm0, %v16715_v26 }
  0x8b   : > { %15642 = vmatmul.mubr.msk.bf16.gmra.mxu0 %vm1115_vm0, %v17556_v27 }
  0x8c   : > { %15645 = vmatprep.mubr.msk.bf16.mxu0 %vm1115_vm0, %v17559_v28 }
  0x93   : > { %15646 = vmatmul.mubr.msk.bf16.gmra.mxu0 %vm1115_vm0, %v16718_v30 }
  0x94   : > { %15649 = vmatprep.mubr.msk.bf16.mxu0 %vm1115_vm0, %v16719_v31 }
  0x9b   : > { %15650 = vmatmul.mubr.msk.bf16.gmra.mxu0 %vm1115_vm0, %v16720_v41 }
  0x9c   : > { %15653 = vmatprep.mubr.msk.bf16.mxu0 %vm1115_vm0, %v16721_v42  ;;  %v16747_v42 = vld [vmem:[%s17503_s22 + $0x1c0] sm:$0xff]  }
  0xa3   : > { %15654 = vmatmul.mubr.msk.bf16.gmra.mxu0 %vm1115_vm0, %v16722_v43 }
  0xa4   : > { %15657 = vmatprep.mubr.msk.bf16.mxu0 %vm1115_vm0, %v16723_v44 }
  0xab   : > { %15658 = vmatmul.mubr.msk.bf16.gmra.mxu0 %vm1115_vm0, %v16724_v45 }
  0xac   : > { %15661 = vmatprep.mubr.msk.bf16.mxu0 %vm1115_vm0, %v16725_v46 }
  0xb3   : > { %15662 = vmatmul.mubr.msk.bf16.gmra.mxu0 %vm1115_vm0, %v16726_v47 }
  0xb4   : > { %15665 = vmatprep.mubr.msk.bf16.mxu0 %vm1115_vm0, %v16727_v49 }
  0xbb   : > { %15666 = vmatmul.mubr.msk.bf16.gmra.mxu0 %vm1115_vm0, %v16728_v51 }
  0xbc   : > { %15669 = vmatprep.mubr.msk.bf16.mxu0 %vm1115_vm0, %v16729_v52 }
  0xc3   : > { %15670 = vmatmul.mubr.msk.bf16.gmra.mxu0 %vm1115_vm0, %v16730_v53 }
  0xc4   : > { %15673 = vmatprep.mubr.msk.bf16.mxu0 %vm1115_vm0, %v16731_v54 }
  0xcb   : > { %15674 = vmatmul.mubr.msk.bf16.gmra.mxu0 %vm1115_vm0, %v16732_v55 }
  0xcc   : > { %15677 = vmatprep.mubr.msk.bf16.mxu0 %vm1115_vm0, %v16733_v56 }
  0xd3   : > { %15678 = vmatmul.mubr.msk.bf16.gmra.mxu0 %vm1115_vm0, %v16734_v57 }
  0xd4   : > { %15681 = vmatprep.mubr.msk.bf16.mxu0 %vm1115_vm0, %v16735_v58 }
  0xdb   : > { %15682 = vmatmul.mubr.msk.bf16.gmra.mxu0 %vm1115_vm0, %v16736_v59 }
  0xdc   : > { %15685 = vmatprep.mubr.msk.bf16.mxu0 %vm1115_vm0, %v16737_v60 }
  0xe3   : > { %15686 = vmatmul.mubr.msk.bf16.gmra.mxu0 %vm1115_vm0, %v16738_v61 }
  0xe4   : > { %15689 = vmatprep.mubr.msk.bf16.mxu0 %vm1115_vm0, %v16739_v62 }
  0xeb   : > { %v15595_v2 = vpop.f32.mrf.mxu0  ;;  %15690 = vmatmul.mubr.msk.bf16.gmra.mxu0 %vm1115_vm0, %v16740_v63 }
  0xec   : > { %v1351_v3 = vadd.f32 %v15595_v2, %v17779_v1  ;;  %15693 = vmatprep.mubr.msk.bf16.mxu0 %vm1115_vm0, %v16741_v0 }
  0xed   : > { %v1342_v4 = vpop.f32.mrf.mxu0 }
  0xee   : > { %v1855_v5 = vmax.f32 %v1351_v3, 0.0  ;;  %v1343_v6 = vadd.f32 %v17779_v1, %v1342_v4  ;;  %v16748_v3 = vld [vmem:[%s17503_s22 + $0x1c8] sm:$0xff]  }
  0xef   : > { %v15596_v7 = vpop.f32.mrf.mxu0 }
  0xf0   : > { %1984 = vst.msk [vmem:[#allocation2 + $0x10] sm:$0xff] %vm1981_vm3, %v1855_v5  ;;  %v1853_v9 = vmax.f32 %v1343_v6, 0.0  ;;  %v1354_v10 = vadd.f32 %v15596_v7, %v17779_v1 }
  0xf1   : > { %v1345_v12 = vpop.f32.mrf.mxu0 }
  0xf2   : > { %1982 = vst.msk [vmem:[#allocation2] sm:$0xff] %vm1981_vm3, %v1853_v9  ;;  %v1856_v13 = vmax.f32 %v1354_v10, 0.0  ;;  %v1346_v14 = vadd.f32 %v17779_v1, %v1345_v12  ;;  %v3284_v10 = vshrl.u32 %v17726_v40, 16 }
  0xf3   : > { %v15599_v15 = vpop.f32.mrf.mxu0  ;;  %15694 = vmatmul.mubr.msk.bf16.gmra.mxu0 %vm1115_vm0, %v16742_v8  ;;  %v16749_v8 = vld [vmem:[%s17503_s22 + $0x1d0] sm:$0xff]  }
  0xf4   : > { %1985 = vst.msk [vmem:[#allocation2 + $0x18] sm:$0xff] %vm1981_vm3, %v1856_v13  ;;  %v1854_v16 = vmax.f32 %v1346_v14, 0.0  ;;  %v1367_v17 = vadd.f32 %v15599_v15, %v17779_v1  ;;  %15697 = vmatprep.mubr.msk.bf16.mxu0 %vm1115_vm0, %v16743_v11  ;;  %v3287_v14 = vshll.u32 %v17726_v40, 16 }
  0xf5   : > { %v1358_v18 = vpop.f32.mrf.mxu0 }
  0xf6   : > { %1983 = vst.msk [vmem:[#allocation2 + $0x8] sm:$0xff] %vm1981_vm3, %v1854_v16  ;;  %v1859_v19 = vmax.f32 %v1367_v17, 0.0  ;;  %v1359_v20 = vadd.f32 %v17779_v1, %v1358_v18  ;;  %v2687_v18 = vld [vmem:[%s21439_s3] sm:$0xf] }
  0xf7   : > { %v15600_v21 = vpop.f32.mrf.mxu0  ;;  %16623 = vmatprep.subr.msk.bf16.mxu1 %vm2946_vm2, %v2687_v18  ;;  %v3668_v40 = vsel %vm2946_vm2, %v2687_v18, 0 }
  0xf8   : > { %1988 = vst.msk [vmem:[#allocation2 + $0x30] sm:$0xff] %vm1981_vm3, %v1859_v19  ;;  %v1857_v23 = vmax.f32 %v1359_v20, 0.0  ;;  %v1370_v24 = vadd.f32 %v15600_v21, %v17779_v1  ;;  %15788 = vmatpush3.bf16.msra.mxu1 %v3668_v40 }
  0xf9   : > { %v1361_v26 = vpop.f32.mrf.mxu0 }
  0xfa   : > { %1986 = vst.msk [vmem:[#allocation2 + $0x20] sm:$0xff] %vm1981_vm3, %v1857_v23  ;;  %v1860_v27 = vmax.f32 %v1370_v24, 0.0  ;;  %v1362_v28 = vadd.f32 %v17779_v1, %v1361_v26  ;;  %v3286_v23 = vrot.slane %v3284_v10, 3  ;;  %v3289_v24 = vrot.slane %v3287_v14, 4 }
  0xfb   : > { %v15603_v30 = vpop.f32.mrf.mxu0  ;;  %15698 = vmatmul.mubr.msk.bf16.gmra.mxu0 %vm1115_vm0, %v16744_v22  ;;  %v2112_v43 = vld [vmem:[#allocation2 + $0x10] ss:$2 sm:$0xff]  ;;  %v2240_v44 = vld [vmem:[#allocation2 + $0x11] ss:$2 sm:$0xff] }
  0xfc   : > { %1989 = vst.msk [vmem:[#allocation2 + $0x38] sm:$0xff] %vm1981_vm3, %v1860_v27  ;;  %v1858_v31 = vmax.f32 %v1362_v28, 0.0  ;;  %v1383_v32 = vadd.f32 %v15603_v30, %v17779_v1  ;;  %15701 = vmatprep.mubr.msk.bf16.mxu0 %vm1115_vm0, %v16745_v25  ;;  %v2366_v53 = vmax.f32 %v2112_v43, %v2240_v44  ;;  %v16750_v22 = vld [vmem:[%s17503_s22 + $0x1d8] sm:$0xff]   ;;  %v17843_v28 = vld [vmem:[#allocation3 + $0x20] sm:$0xf] }
  0xfd   : > { %v1374_v33 = vpop.f32.mrf.mxu0  ;;  %v2110_v46 = vld [vmem:[#allocation2] ss:$2 sm:$0xff]  ;;  %v2238_v47 = vld [vmem:[#allocation2 + $0x1] ss:$2 sm:$0xff] }
  0xfe   : > { %1987 = vst.msk [vmem:[#allocation2 + $0x28] sm:$0xff] %vm1981_vm3, %v1858_v31  ;;  %v1863_v34 = vmax.f32 %v1383_v32, 0.0  ;;  %v1375_v35 = vadd.f32 %v17779_v1, %v1374_v33  ;;  %v2365_v57 = vmax.f32 %v2110_v46, %v2238_v47 }
  0xff   : > { %v15604_v36 = vpop.f32.mrf.mxu0 }
 0x100   : > { %1992 = vst.msk [vmem:[#allocation2 + $0x50] sm:$0xff] %vm1981_vm3, %v1863_v34  ;;  %v1861_v39 = vmax.f32 %v1375_v35, 0.0  ;;  %v1386_v41 = vadd.f32 %v15604_v36, %v17779_v1  ;;  %v16756_v34 = vld [vmem:[%s17503_s22 + $0x1e0] sm:$0xff]   ;;  %v4902_v35 = vld [vmem:[#allocation3 + $0x10] sm:$0x8] }
 0x101   : > { %v1377_v45 = vpop.f32.mrf.mxu0  ;;  %v4905_v36 = vld [vmem:[#allocation3 + $0x1c] sm:$0xf] }
 0x102   : > { %1990 = vst.msk [vmem:[#allocation2 + $0x40] sm:$0xff] %vm1981_vm3, %v1861_v39  ;;  %v1864_v48 = vmax.f32 %v1386_v41, 0.0  ;;  %v1378_v49 = vadd.f32 %v17779_v1, %v1377_v45  ;;  %v2629_v41 = vld [vmem:[#allocation3 + $0x1c] sm:$0xf] }
 0x103   : > { %v2116_v50 = vld [vmem:[#allocation2 + $0x30] ss:$2 sm:$0xff]  ;;  %v2244_v51 = vld [vmem:[#allocation2 + $0x31] ss:$2 sm:$0xff]  ;;  %v15607_v52 = vpop.f32.mrf.mxu0  ;;  %15702 = vmatmul.mubr.msk.bf16.gmra.mxu0 %vm1115_vm0, %v16746_v38 }
 0x104   : > { %v2368_v54 = vmax.f32 %v2116_v50, %v2244_v51  ;;  %1993 = vst.msk [vmem:[#allocation2 + $0x58] sm:$0xff] %vm1981_vm3, %v1864_v48  ;;  %v1862_v55 = vmax.f32 %v1378_v49, 0.0  ;;  %v1399_v56 = vadd.f32 %v15607_v52, %v17779_v1  ;;  %15705 = vmatprep.mubr.msk.bf16.mxu0 %vm1115_vm0, %v16747_v42  ;;  %v14144_v51 = vcombine.low %v2629_v41, %v17843_v28 }
 0x105   : > { %v2114_v58 = vld [vmem:[#allocation2 + $0x20] ss:$2 sm:$0xff]  ;;  %v2242_v59 = vld [vmem:[#allocation2 + $0x21] ss:$2 sm:$0xff]  ;;  %v1390_v60 = vpop.f32.mrf.mxu0  ;;  %v17852_v52 = vor.u32 %v3289_v24, %v3286_v23 }
 0x106   : > { %v2430_v61 = vmax.f32 %v2366_v53, %v2368_v54  ;;  %v2367_v62 = vmax.f32 %v2114_v58, %v2242_v59  ;;  %1991 = vst.msk [vmem:[#allocation2 + $0x48] sm:$0xff] %vm1981_vm3, %v1862_v55  ;;  %v1867_v63 = vmax.f32 %v1399_v56, 0.0  ;;  %v1391_v0 = vadd.f32 %v17779_v1, %v1390_v60 }
 0x107   : > { %v15608_v2 = vpop.f32.mrf.mxu0 }
 0x108   : > { %v15043_v4 = vpack.c.bf16 %v2430_v61, %v2430_v61  ;;  %v2429_v5 = vmax.f32 %v2365_v57, %v2367_v62  ;;  %1996 = vst.msk [vmem:[#allocation2 + $0x70] sm:$0xff] %vm1981_vm3, %v1867_v63  ;;  %v1865_v6 = vmax.f32 %v1391_v0, 0.0  ;;  %v1402_v7 = vadd.f32 %v15608_v2, %v17779_v1 }
 0x109   : > { %v1393_v9 = vpop.f32.mrf.mxu0 }
 0x10a   : > { %v15042_v11 = vpack.c.bf16 %v2429_v5, %v2429_v5  ;;  %1994 = vst.msk [vmem:[#allocation2 + $0x60] sm:$0xff] %vm1981_vm3, %v1865_v6  ;;  %v1868_v12 = vmax.f32 %v1402_v7, 0.0  ;;  %v1394_v13 = vadd.f32 %v17779_v1, %v1393_v9 }
 0x10b   : > { %2471 = vst.msk [vmem:[#allocation3 + $0x18] sm:$0xf] %vm521_vm1, %v15043_v4  ;;  %v15611_v15 = vpop.f32.mrf.mxu0  ;;  %15706 = vmatmul.mubr.msk.bf16.gmra.mxu0 %vm1115_vm0, %v16748_v3  ;;  %v2120_v25 = vld [vmem:[#allocation2 + $0x50] ss:$2 sm:$0xff]  ;;  %v2248_v26 = vld [vmem:[#allocation2 + $0x51] ss:$2 sm:$0xff] }
 0x10c   : > { %1997 = vst.msk [vmem:[#allocation2 + $0x78] sm:$0xff] %vm1981_vm3, %v1868_v12  ;;  %v1866_v16 = vmax.f32 %v1394_v13, 0.0  ;;  %v1415_v17 = vadd.f32 %v15611_v15, %v17779_v1  ;;  %15709 = vmatprep.mubr.msk.bf16.mxu0 %vm1115_vm0, %v16749_v8  ;;  %v2370_v45 = vmax.f32 %v2120_v25, %v2248_v26  ;;  %v16757_v8 = vld [vmem:[%s17503_s22 + $0x1e8] sm:$0xff]   ;;  %v16758_v15 = vld [vmem:[%s17503_s22 + $0x1f0] sm:$0xff]  }
 0x10d   : > { %2470 = vst.msk [vmem:[#allocation3 + $0x14] sm:$0xf] %vm521_vm1, %v15042_v11  ;;  %v1406_v19 = vpop.f32.mrf.mxu0  ;;  %v2118_v30 = vld [vmem:[#allocation2 + $0x40] ss:$2 sm:$0xff]  ;;  %v2246_v31 = vld [vmem:[#allocation2 + $0x41] ss:$2 sm:$0xff] }
 0x10e   : > { %1995 = vst.msk [vmem:[#allocation2 + $0x68] sm:$0xff] %vm1981_vm3, %v1866_v16  ;;  %v1871_v20 = vmax.f32 %v1415_v17, 0.0  ;;  %v1407_v21 = vadd.f32 %v17779_v1, %v1406_v19  ;;  %v2369_v46 = vmax.f32 %v2118_v30, %v2246_v31 }
 0x10f   : > { %v15612_v27 = vpop.f32.mrf.mxu0 }
 0x110   : > { %2000 = vst.msk [vmem:[#allocation2 + $0x90] sm:$0xff] %vm1981_vm3, %v1871_v20  ;;  %v1869_v32 = vmax.f32 %v1407_v21, 0.0  ;;  %v1418_v33 = vadd.f32 %v15612_v27, %v17779_v1 }
 0x111   : > { %v1409_v38 = vpop.f32.mrf.mxu0 }
 0x112   : > { %v2628_v39 = vld [vmem:[#allocation3 + $0x18] sm:$0xf]  ;;  %1998 = vst.msk [vmem:[#allocation2 + $0x80] sm:$0xff] %vm1981_vm3, %v1869_v32  ;;  %v1872_v42 = vmax.f32 %v1418_v33, 0.0  ;;  %v1410_v43 = vadd.f32 %v17779_v1, %v1409_v38 }
 0x113   : > { %v4904_v44 = vld [vmem:[#allocation3 + $0x18] sm:$0xf]  ;;  %v15615_v49 = vpop.f32.mrf.mxu0  ;;  %15710 = vmatmul.mubr.msk.bf16.gmra.mxu0 %vm1115_vm0, %v16750_v22  ;;  %v14208_v0 = vcombine.low %v2628_v39, %v2629_v41 }
 0x114   : > { %v2124_v47 = vld [vmem:[#allocation2 + $0x70] ss:$2 sm:$0xff]  ;;  %v2252_v48 = vld [vmem:[#allocation2 + $0x71] ss:$2 sm:$0xff]  ;;  %2001 = vst.msk [vmem:[#allocation2 + $0x98] sm:$0xff] %vm1981_vm3, %v1872_v42  ;;  %v1870_v54 = vmax.f32 %v1410_v43, 0.0  ;;  %v1431_v55 = vadd.f32 %v15615_v49, %v17779_v1  ;;  %15713 = vmatprep.mubr.msk.bf16.mxu0 %vm1115_vm0, %v16756_v34  ;;  %v14338_v63 = vcombine.low %v4904_v44, %v4905_v36 }
 0x115   : > { %v2627_v50 = vld [vmem:[#allocation3 + $0x14] sm:$0xf]  ;;  %v2372_v53 = vmax.f32 %v2124_v47, %v2252_v48  ;;  %v2122_v58 = vld [vmem:[#allocation2 + $0x60] ss:$2 sm:$0xff]  ;;  %v2250_v59 = vld [vmem:[#allocation2 + $0x61] ss:$2 sm:$0xff]  ;;  %v1422_v60 = vpop.f32.mrf.mxu0 }
 0x116   : > { %v14207_v56 = vcombine.low %v17720_v37, %v2627_v50  ;;  %v4903_v57 = vld [vmem:[#allocation3 + $0x14] sm:$0xf]  ;;  %v14143_v61 = vcombine.low %v2627_v50, %v2628_v39  ;;  %v2371_v3 = vmax.f32 %v2122_v58, %v2250_v59  ;;  %1999 = vst.msk [vmem:[#allocation2 + $0x88] sm:$0xff] %vm1981_vm3, %v1870_v54  ;;  %v1875_v4 = vmax.f32 %v1431_v55, 0.0  ;;  %v17880_v42 = vld [vmem:[#allocation3 + $0x2c] sm:$0xf] }
 0x117   : > { %v14337_v62 = vcombine.low %v4902_v35, %v4903_v57  ;;  %v2432_v2 = vmax.f32 %v2370_v45, %v2372_v53  ;;  %v1423_v37 = vadd.f32 %v17779_v1, %v1422_v60  ;;  %v15616_v7 = vpop.f32.mrf.mxu0  ;;  %v5141_v19 = vshrl.u32 %v14338_v63, 16  ;;  %v4909_v35 = vld [vmem:[#allocation3 + $0x2c] sm:$0xf]  ;;  %v17882_v43 = vld [vmem:[#allocation3 + $0x30] sm:$0xf]  ;;  %v16759_v48 = vld [vmem:[%s17503_s22 + $0x1f8] sm:$0xff]  }
 0x118   : > { %v3293_v5 = vshrl.u32 %v14207_v56, 16  ;;  %v3296_v6 = vshll.u32 %v14207_v56, 16  ;;  %15727 = vmatprep.mubr.msk.bf16.mxu1 %vm1981_vm3, %v14143_v61  ;;  %v2431_v12 = vmax.f32 %v2369_v46, %v2371_v3  ;;  %2004 = vst.msk [vmem:[#allocation2 + $0xb0] sm:$0xff] %vm1981_vm3, %v1875_v4  ;;  %v1434_v14 = vadd.f32 %v15616_v7, %v17779_v1  ;;  %v4906_v57 = vld [vmem:[#allocation3 + $0x20] sm:$0xf]  ;;  %s21768_s22 = sld [smem:[#allocation107_spill]] }
 0x119   : > { %v5133_v9 = vshrl.u32 %v14337_v62, 16  ;;  %v5136_v10 = vshll.u32 %v14337_v62, 16  ;;  %v15045_v11 = vpack.c.bf16 %v2432_v2, %v2432_v2  ;;  %15728 = vmatmul.mubr.msk.bf16.gmra.mxu1 %vm1981_vm3, %v14144_v51  ;;  %v1873_v17 = vmax.f32 %v1423_v37, 0.0  ;;  %v1425_v18 = vpop.f32.mrf.mxu0 }
 0x11a   : > { %v3295_v13 = vrot.slane %v3293_v5, 3  ;;  %v3298_v16 = vrot.slane %v3296_v6, 4  ;;  %v5144_v40 = vshll.u32 %v14338_v63, 16  ;;  %v15044_v20 = vpack.c.bf16 %v2431_v12, %v2431_v12 }
 0x11b   : > { %2481 = vst.msk [vmem:[#allocation3 + $0x28] sm:$0xf] %vm521_vm1, %v15045_v11  ;;  %v1876_v21 = vmax.f32 %v1434_v14, 0.0  ;;  %v1426_v22 = vadd.f32 %v17779_v1, %v1425_v18  ;;  %v15619_v24 = vpop.f32.mrf.mxu0  ;;  %15714 = vmatmul.mubr.msk.bf16.gmra.mxu0 %vm1115_vm0, %v16757_v8  ;;  %v5135_v25 = vrot.slane %v5133_v9, 3  ;;  %v5138_v26 = vrot.slane %v5136_v10, 4 }
 0x11c   : > { %v3299_v23 = vor.u32 %v3298_v16, %v3295_v13  ;;  %2002 = vst.msk [vmem:[#allocation2 + $0xa0] sm:$0xff] %vm1981_vm3, %v1873_v17  ;;  %v1447_v30 = vadd.f32 %v15619_v24, %v17779_v1  ;;  %15717 = vmatprep.mubr.msk.bf16.mxu0 %vm1115_vm0, %v16758_v15  ;;  %v3302_v31 = vshrl.u32 %v14208_v0, 16  ;;  %v5143_v33 = vrot.slane %v5141_v19, 3  ;;  %v2128_v45 = vld [vmem:[#allocation2 + $0x90] ss:$2 sm:$0xff] }
 0x11d   : > { %2480 = vst.msk [vmem:[#allocation3 + $0x24] sm:$0xf] %vm521_vm1, %v15044_v20  ;;  %v1874_v27 = vmax.f32 %v1426_v22, 0.0  ;;  %v1438_v32 = vpop.f32.mrf.mxu0  ;;  %v5146_v34 = vrot.slane %v5144_v40, 4  ;;  %v3305_v38 = vshll.u32 %v14208_v0, 16  ;;  %v5139_v49 = vor.u32 %v5138_v26, %v5135_v25 }
 0x11e   : > { %2005 = vst.msk [vmem:[#allocation2 + $0xb8] sm:$0xff] %vm1981_vm3, %v1876_v21  ;;  %v17876_v36 = vsel %vm3274_vm4, %v17852_v52, %v3299_v23  ;;  %v1879_v39 = vmax.f32 %v1447_v30, 0.0  ;;  %v1439_v41 = vadd.f32 %v17779_v1, %v1438_v32  ;;  %v3304_v44 = vrot.slane %v3302_v31, 3  ;;  %v2256_v46 = vld [vmem:[#allocation2 + $0x91] ss:$2 sm:$0xff]  ;;  %s21769_s0 = smov %s21768_s22  ;;  %s21358_s1 = scalar_lea.hbm %s21768_s22, %s15039_s17 }
 0x11f   : > { %2003 = vst.msk [vmem:[#allocation2 + $0xa8] sm:$0xff] %vm1981_vm3, %v1874_v27  ;;  %v15620_v47 = vpop.f32.mrf.mxu0  ;;  %v3307_v50 = vrot.slane %v3305_v38, 4  ;;  %v2126_v51 = vld [vmem:[#allocation2 + $0x80] ss:$2 sm:$0xff]  ;;  %v2254_v53 = vld [vmem:[#allocation2 + $0x81] ss:$2 sm:$0xff]  ;;  %v17887_v58 = vor.u32 %v5146_v34, %v5143_v33  ;;  %v14146_v61 = vcombine.low %v17880_v42, %v17882_v43  ;;  %v2374_v63 = vmax.f32 %v2128_v45, %v2256_v46 }
 0x120   : > { %2008 = vst.msk [vmem:[#allocation2 + $0xd0] sm:$0xff] %vm1981_vm3, %v1879_v39  ;;  %v1877_v54 = vmax.f32 %v1439_v41, 0.0  ;;  %v1450_v55 = vadd.f32 %v15620_v47, %v17779_v1  ;;  %v2373_v4 = vmax.f32 %v2126_v51, %v2254_v53 }
 0x121   : > { %v1441_v56 = vpop.f32.mrf.mxu0  ;;  %v17891_v62 = vor.u32 %v3307_v50, %v3304_v44  ;;  %v5148_v8 = vsel %vm3274_vm4, %v5139_v49, %v17887_v58 }
 0x122   : > { %v2632_v59 = vld [vmem:[#allocation3 + $0x28] sm:$0xf]  ;;  %2006 = vst.msk [vmem:[#allocation2 + $0xc0] sm:$0xff] %vm1981_vm3, %v1877_v54  ;;  %v1880_v0 = vmax.f32 %v1450_v55, 0.0  ;;  %v1442_v2 = vadd.f32 %v17779_v1, %v1441_v56 }
 0x123   : > { %v4908_v60 = vld [vmem:[#allocation3 + $0x28] sm:$0xf]  ;;  %v15623_v37 = vpop.f32.mrf.mxu0  ;;  %15718 = vmatmul.mubr.msk.bf16.gmra.mxu0 %vm1115_vm0, %v16759_v48  ;;  %v17899_v9 = vcombine.low %v2632_v59, %v17880_v42  ;;  %v17903_v10 = vsel %vm3274_vm4, %v3299_v23, %v17891_v62 }
 0x124   : > { %v14340_v3 = vcombine.low %v4908_v60, %v4909_v35  ;;  %v4907_v7 = vld [vmem:[#allocation3 + $0x24] sm:$0xf]  ;;  %2009 = vst.msk [vmem:[#allocation2 + $0xd8] sm:$0xff] %vm1981_vm3, %v1880_v0  ;;  %v1878_v12 = vmax.f32 %v1442_v2, 0.0  ;;  %v1463_v13 = vadd.f32 %v15623_v37, %v17779_v1  ;;  %15921 = vmatprep.mubr.msk.bf16.mxu0 %vm1981_vm3, %v5148_v8  ;;  %v4913_v60 = vld [vmem:[#allocation3 + $0x3c] sm:$0xf] }
 0x125   : > { %v2132_v5 = vld [vmem:[#allocation2 + $0xb0] ss:$2 sm:$0xff]  ;;  %v2260_v6 = vld [vmem:[#allocation2 + $0xb1] ss:$2 sm:$0xff]  ;;  %v14339_v14 = vcombine.low %v4906_v57, %v4907_v7  ;;  %v2631_v15 = vld [vmem:[#allocation3 + $0x24] sm:$0xf]  ;;  %v1454_v18 = vpop.f32.mrf.mxu0 }
 0x126   : > { %v2376_v11 = vmax.f32 %v2132_v5, %v2260_v6  ;;  %v2130_v16 = vld [vmem:[#allocation2 + $0xa0] ss:$2 sm:$0xff]  ;;  %v2258_v17 = vld [vmem:[#allocation2 + $0xa1] ss:$2 sm:$0xff]  ;;  %v14145_v19 = vcombine.low %v2631_v15, %v2632_v59  ;;  %v14209_v40 = vcombine.low %v17843_v28, %v2631_v15  ;;  %v5159_v20 = vshrl.u32 %v14340_v3, 16  ;;  %2007 = vst.msk [vmem:[#allocation2 + $0xc8] sm:$0xff] %vm1981_vm3, %v1878_v12 }
 0x127   : > { %v5162_v21 = vshll.u32 %v14340_v3, 16  ;;  %v2375_v23 = vmax.f32 %v2130_v16, %v2258_v17  ;;  %v1883_v24 = vmax.f32 %v1463_v13, 0.0  ;;  %v5150_v25 = vshrl.u32 %v14339_v14, 16  ;;  %v15624_v30 = vpop.f32.mrf.mxu0  ;;  %v2637_v2 = vld [vmem:[#allocation3 + $0x3c] sm:$0xf] }
 0x128   : > { %v2434_v22 = vmax.f32 %v2374_v63, %v2376_v11  ;;  %v5153_v26 = vshll.u32 %v14339_v14, 16  ;;  %v1455_v27 = vadd.f32 %v17779_v1, %v1454_v18  ;;  %15731 = vmatprep.mubr.msk.bf16.mxu1 %vm1981_vm3, %v14145_v19  ;;  %v5161_v31 = vrot.slane %v5159_v20, 3  ;;  %v17931_v3 = vld [vmem:[#allocation3 + $0x40] sm:$0xf]  ;;  %v4910_v17 = vld [vmem:[#allocation3 + $0x30] sm:$0xf] }
 0x129   : > { %v5164_v32 = vrot.slane %v5162_v21, 4  ;;  %v2433_v34 = vmax.f32 %v2373_v4, %v2375_v23  ;;  %2012 = vst.msk [vmem:[#allocation2 + $0xf0] sm:$0xff] %vm1981_vm3, %v1883_v24  ;;  %v1466_v28 = vadd.f32 %v15624_v30, %v17779_v1  ;;  %v5152_v35 = vrot.slane %v5150_v25, 3  ;;  %15732 = vmatmul.mubr.msk.bf16.gmra.mxu1 %vm1981_vm3, %v14146_v61  ;;  %v1457_v39 = vpop.f32.mrf.mxu0 }
 0x12a   : > { %v15047_v33 = vpack.c.bf16 %v2434_v22, %v2434_v22  ;;  %v1881_v38 = vmax.f32 %v1455_v27, 0.0  ;;  %v5155_v41 = vrot.slane %v5153_v26, 4  ;;  %v1458_v45 = vadd.f32 %v17779_v1, %v1457_v39 }
 0x12b   : > { %v15046_v42 = vpack.c.bf16 %v2433_v34, %v2433_v34  ;;  %v1884_v44 = vmax.f32 %v1466_v28, 0.0  ;;  %v3311_v46 = vshrl.u32 %v14209_v40, 16  ;;  %v15627_v47 = vpop.f32.mrf.mxu0  ;;  %v17918_v49 = vor.u32 %v5164_v32, %v5161_v31  ;;  %v2136_v5 = vld [vmem:[#allocation2 + $0xd0] ss:$2 sm:$0xff]  ;;  %v2264_v6 = vld [vmem:[#allocation2 + $0xd1] ss:$2 sm:$0xff] }
 0x12c   : > { %2491 = vst.msk [vmem:[#allocation3 + $0x38] sm:$0xf] %vm521_vm1, %v15047_v33  ;;  %v5156_v48 = vor.u32 %v5155_v41, %v5152_v35  ;;  %v3314_v50 = vshll.u32 %v14209_v40, 16  ;;  %v3320_v51 = vshrl.u32 %v17899_v9, 16  ;;  %v1882_v53 = vmax.f32 %v1458_v45, 0.0 }
 0x12d   : > { %2010 = vst.msk [vmem:[#allocation2 + $0xe0] sm:$0xff] %vm1981_vm3, %v1881_v38  ;;  %2013 = vst.msk [vmem:[#allocation2 + $0xf8] sm:$0xff] %vm1981_vm3, %v1884_v44  ;;  %v1479_v54 = vadd.f32 %v15627_v47, %v17779_v1  ;;  %v3313_v55 = vrot.slane %v3311_v46, 3  ;;  %v1470_v56 = vpop.f32.mrf.mxu0  ;;  %v3323_v4 = vshll.u32 %v17899_v9, 16  ;;  %v2134_v8 = vld [vmem:[#allocation2 + $0xc0] ss:$2 sm:$0xff]  ;;  %v14148_v21 = vcombine.low %v2637_v2, %v17931_v3 }
 0x12e   : > { %2490 = vst.msk [vmem:[#allocation3 + $0x34] sm:$0xf] %vm521_vm1, %v15046_v42  ;;  %v5157_v57 = vsel %vm3274_vm4, %v17887_v58, %v5156_v48  ;;  %v5166_v59 = vsel %vm3274_vm4, %v5156_v48, %v17918_v49  ;;  %v3316_v61 = vrot.slane %v3314_v50, 4  ;;  %v1471_v0 = vadd.f32 %v17779_v1, %v1470_v56  ;;  %v2262_v11 = vld [vmem:[#allocation2 + $0xc1] ss:$2 sm:$0xff] }
 0x12f   : > { %2011 = vst.msk [vmem:[#allocation2 + $0xe8] sm:$0xff] %vm1981_vm3, %v1882_v53  ;;  %v1887_v63 = vmax.f32 %v1479_v54, 0.0  ;;  %15922 = vmatmul.mubr.msk.bf16.vlgmr.msra.gmra.mxu0 %vm1981_vm3, %v5157_v57  ;;  %v15628_v58 = vpop.f32.mrf.mxu0  ;;  %v3322_v7 = vrot.slane %v3320_v51, 3  ;;  %v3325_v14 = vrot.slane %v3323_v4, 4  ;;  %v2378_v22 = vmax.f32 %v2136_v5, %v2264_v6 }
 0x130   : > { %15925 = vmatprep.mubr.msk.bf16.mxu0 %vm1981_vm3, %v5166_v59  ;;  %v17935_v37 = vor.u32 %v3316_v61, %v3313_v55  ;;  %v1885_v12 = vmax.f32 %v1471_v0, 0.0  ;;  %v1482_v13 = vadd.f32 %v15628_v58, %v17779_v1  ;;  %v2377_v23 = vmax.f32 %v2134_v8, %v2262_v11 }
 0x131   : > { %2016 = vst.msk [vmem:[#allocation2 + $0x110] sm:$0xff] %vm1981_vm3, %v1887_v63  ;;  %v1473_v15 = vpop.f32.mrf.mxu0  ;;  %v17949_v31 = vor.u32 %v3325_v14, %v3322_v7 }
 0x132   : > { %v17942_v18 = vsel %vm3274_vm4, %v17891_v62, %v17935_v37  ;;  %2014 = vst.msk [vmem:[#allocation2 + $0x100] sm:$0xff] %vm1981_vm3, %v1885_v12  ;;  %v1888_v19 = vmax.f32 %v1482_v13, 0.0  ;;  %v1474_v40 = vadd.f32 %v17779_v1, %v1473_v15 }
 0x133   : > { %v2636_v16 = vld [vmem:[#allocation3 + $0x38] sm:$0xf]  ;;  %v15631_v26 = vpop.f32.mrf.mxu0  ;;  %v17966_v6 = vsel %vm3274_vm4, %v17935_v37, %v17949_v31 }
 0x134   : > { %v4912_v9 = vld [vmem:[#allocation3 + $0x38] sm:$0xf]  ;;  %v17947_v30 = vcombine.low %v2636_v16, %v2637_v2  ;;  %2017 = vst.msk [vmem:[#allocation2 + $0x118] sm:$0xff] %vm1981_vm3, %v1888_v19  ;;  %v1886_v32 = vmax.f32 %v1474_v40, 0.0  ;;  %v1495_v33 = vadd.f32 %v15631_v26, %v17779_v1 }
 0x135   : > { %v14342_v20 = vcombine.low %v4912_v9, %v4913_v60  ;;  %v2140_v24 = vld [vmem:[#allocation2 + $0xf0] ss:$2 sm:$0xff]  ;;  %v2268_v25 = vld [vmem:[#allocation2 + $0xf1] ss:$2 sm:$0xff]  ;;  %v1486_v39 = vpop.f32.mrf.mxu0  ;;  %v4917_v9 = vld [vmem:[#allocation3 + $0x4c] sm:$0xf] }
 0x136   : > { %v2635_v27 = vld [vmem:[#allocation3 + $0x34] sm:$0xf]  ;;  %v2380_v62 = vmax.f32 %v2140_v24, %v2268_v25  ;;  %v2138_v35 = vld [vmem:[#allocation2 + $0xe0] ss:$2 sm:$0xff]  ;;  %v2266_v38 = vld [vmem:[#allocation2 + $0xe1] ss:$2 sm:$0xff]  ;;  %v1487_v50 = vadd.f32 %v17779_v1, %v1486_v39 }
 0x137   : > { %v14147_v34 = vcombine.low %v2635_v27, %v2636_v16  ;;  %v4911_v28 = vld [vmem:[#allocation3 + $0x34] sm:$0xf]  ;;  %v14211_v41 = vcombine.low %v17882_v43, %v2635_v27  ;;  %v5177_v44 = vshrl.u32 %v14342_v20, 16  ;;  %v5180_v45 = vshll.u32 %v14342_v20, 16  ;;  %2015 = vst.msk [vmem:[#allocation2 + $0x108] sm:$0xff] %vm1981_vm3, %v1886_v32  ;;  %v15632_v51 = vpop.f32.mrf.mxu0 }
 0x138   : > { %v14341_v42 = vcombine.low %v4910_v17, %v4911_v28  ;;  %v2436_v46 = vmax.f32 %v2378_v22, %v2380_v62  ;;  %v2379_v47 = vmax.f32 %v2138_v35, %v2266_v38  ;;  %v1891_v48 = vmax.f32 %v1495_v33, 0.0  ;;  %v2641_v22 = vld [vmem:[#allocation3 + $0x4c] sm:$0xf]  ;;  %v4914_v35 = vld [vmem:[#allocation3 + $0x40] sm:$0xf] }
 0x139   : > { %15735 = vmatprep.mubr.msk.bf16.mxu1 %vm1981_vm3, %v14147_v34  ;;  %v5179_v55 = vrot.slane %v5177_v44, 3  ;;  %v5182_v56 = vrot.slane %v5180_v45, 4  ;;  %v1889_v59 = vmax.f32 %v1487_v50, 0.0  ;;  %v1498_v60 = vadd.f32 %v15632_v51, %v17779_v1  ;;  %v1489_v61 = vpop.f32.mrf.mxu0 }
 0x13a   : > { %v5168_v53 = vshrl.u32 %v14341_v42, 16  ;;  %v5171_v54 = vshll.u32 %v14341_v42, 16  ;;  %15736 = vmatmul.mubr.msk.bf16.gmra.mxu1 %vm1981_vm3, %v14148_v21  ;;  %v15049_v43 = vpack.c.bf16 %v2436_v46, %v2436_v46  ;;  %v2435_v57 = vmax.f32 %v2377_v23, %v2379_v47  ;;  %2020 = vst.msk [vmem:[#allocation2 + $0x130] sm:$0xff] %vm1981_vm3, %v1891_v48  ;;  %v17981_v23 = vld [vmem:[#allocation3 + $0x50] sm:$0xf] }
 0x13b   : > { %2018 = vst.msk [vmem:[#allocation2 + $0x120] sm:$0xff] %vm1981_vm3, %v1889_v59  ;;  %v1892_v4 = vmax.f32 %v1498_v60, 0.0  ;;  %v1490_v5 = vadd.f32 %v17779_v1, %v1489_v61  ;;  %v15635_v58 = vpop.f32.mrf.mxu0  ;;  %v17968_v8 = vor.u32 %v5182_v56, %v5179_v55  ;;  %v3329_v11 = vshrl.u32 %v14211_v41, 16  ;;  %v2144_v24 = vld [vmem:[#allocation2 + $0x110] ss:$2 sm:$0xff] }
 0x13c   : > { %v5170_v63 = vrot.slane %v5168_v53, 3  ;;  %v5173_v0 = vrot.slane %v5171_v54, 4  ;;  %2501 = vst.msk [vmem:[#allocation3 + $0x48] sm:$0xf] %vm521_vm1, %v15049_v43  ;;  %v15048_v2 = vpack.c.bf16 %v2435_v57, %v2435_v57  ;;  %v3332_v12 = vshll.u32 %v14211_v41, 16 }
 0x13d   : > { %2021 = vst.msk [vmem:[#allocation2 + $0x138] sm:$0xff] %vm1981_vm3, %v1892_v4  ;;  %v1890_v13 = vmax.f32 %v1490_v5, 0.0  ;;  %v1511_v14 = vadd.f32 %v15635_v58, %v17779_v1  ;;  %v3338_v15 = vshrl.u32 %v17947_v30, 16  ;;  %v1502_v16 = vpop.f32.mrf.mxu0  ;;  %v3331_v19 = vrot.slane %v3329_v11, 3  ;;  %v2272_v25 = vld [vmem:[#allocation2 + $0x111] ss:$2 sm:$0xff] }
 0x13e   : > { %v5174_v7 = vor.u32 %v5173_v0, %v5170_v63  ;;  %2500 = vst.msk [vmem:[#allocation3 + $0x44] sm:$0xf] %vm521_vm1, %v15048_v2  ;;  %v3334_v40 = vrot.slane %v3332_v12, 4  ;;  %v1503_v21 = vadd.f32 %v17779_v1, %v1502_v16  ;;  %v3341_v62 = vshll.u32 %v17947_v30, 16  ;;  %v2142_v32 = vld [vmem:[#allocation2 + $0x100] ss:$2 sm:$0xff] }
 0x13f   : > { %2019 = vst.msk [vmem:[#allocation2 + $0x128] sm:$0xff] %vm1981_vm3, %v1890_v13  ;;  %v1895_v20 = vmax.f32 %v1511_v14, 0.0  ;;  %v3340_v27 = vrot.slane %v3338_v15, 3  ;;  %v2270_v33 = vld [vmem:[#allocation2 + $0x101] ss:$2 sm:$0xff]  ;;  %v14150_v47 = vcombine.low %v2641_v22, %v17981_v23  ;;  %v2382_v48 = vmax.f32 %v2144_v24, %v2272_v25 }
 0x140   : > { %v5175_v37 = vsel %vm3274_vm4, %v17918_v49, %v5174_v7  ;;  %v5184_v17 = vsel %vm3274_vm4, %v5174_v7, %v17968_v8  ;;  %v15636_v49 = vpop.f32.mrf.mxu0  ;;  %v17984_v26 = vor.u32 %v3334_v40, %v3331_v19  ;;  %v1893_v34 = vmax.f32 %v1503_v21, 0.0 }
 0x141   : > { %15926 = vmatmul.mubr.msk.bf16.gmra.mxu0 %vm1981_vm3, %v5175_v37  ;;  %2024 = vst.msk [vmem:[#allocation2 + $0x150] sm:$0xff] %vm1981_vm3, %v1895_v20  ;;  %v1514_v28 = vadd.f32 %v15636_v49, %v17779_v1  ;;  %v3343_v44 = vrot.slane %v3341_v62, 4  ;;  %v2381_v50 = vmax.f32 %v2142_v32, %v2270_v33 }
 0x142   : > { %15929 = vmatprep.mubr.msk.bf16.mxu0 %vm1981_vm3, %v5184_v17  ;;  %v1505_v38 = vpop.f32.mrf.mxu0  ;;  %v17992_v42 = vsel %vm3274_vm4, %v17949_v31, %v17984_v26  ;;  %2022 = vst.msk [vmem:[#allocation2 + $0x140] sm:$0xff] %vm1981_vm3, %v1893_v34 }
 0x143   : > { %v2640_v39 = vld [vmem:[#allocation3 + $0x48] sm:$0xf]  ;;  %v1896_v30 = vmax.f32 %v1514_v28, 0.0  ;;  %v1506_v45 = vadd.f32 %v17779_v1, %v1505_v38  ;;  %v17999_v43 = vor.u32 %v3343_v44, %v3340_v27 }
 0x144   : > { %v4916_v41 = vld [vmem:[#allocation3 + $0x48] sm:$0xf]  ;;  %v2148_v51 = vld [vmem:[#allocation2 + $0x130] ss:$2 sm:$0xff]  ;;  %v2276_v53 = vld [vmem:[#allocation2 + $0x131] ss:$2 sm:$0xff]  ;;  %v15639_v54 = vpop.f32.mrf.mxu0  ;;  %v17997_v56 = vcombine.low %v2640_v39, %v2641_v22 }
 0x145   : > { %v14344_v46 = vcombine.low %v4916_v41, %v4917_v9  ;;  %v2639_v55 = vld [vmem:[#allocation3 + $0x44] sm:$0xf]  ;;  %v2384_v31 = vmax.f32 %v2148_v51, %v2276_v53  ;;  %2025 = vst.msk [vmem:[#allocation2 + $0x158] sm:$0xff] %vm1981_vm3, %v1896_v30  ;;  %v1894_v57 = vmax.f32 %v1506_v45, 0.0  ;;  %v1527_v59 = vadd.f32 %v15639_v54, %v17779_v1  ;;  %v4921_v45 = vld [vmem:[#allocation3 + $0x5c] sm:$0xf] }
 0x146   : > { %v14149_v60 = vcombine.low %v2639_v55, %v2640_v39  ;;  %v4915_v61 = vld [vmem:[#allocation3 + $0x44] sm:$0xf]  ;;  %v1518_v2 = vpop.f32.mrf.mxu0  ;;  %v14213_v4 = vcombine.low %v17931_v3, %v2639_v55  ;;  %v18016_v62 = vsel %vm3274_vm4, %v17984_v26, %v17999_v43  ;;  %v3356_v41 = vshrl.u32 %v17997_v56, 16  ;;  %v2645_v51 = vld [vmem:[#allocation3 + $0x5c] sm:$0xf] }
 0x147   : > { %v2146_v63 = vld [vmem:[#allocation2 + $0x120] ss:$2 sm:$0xff]  ;;  %v2274_v0 = vld [vmem:[#allocation2 + $0x121] ss:$2 sm:$0xff]  ;;  %v14343_v5 = vcombine.low %v4914_v35, %v4915_v61  ;;  %v5195_v58 = vshrl.u32 %v14344_v46, 16  ;;  %v5198_v7 = vshll.u32 %v14344_v46, 16  ;;  %v2438_v11 = vmax.f32 %v2382_v48, %v2384_v31 }
 0x148   : > { %v2383_v12 = vmax.f32 %v2146_v63, %v2274_v0  ;;  %2023 = vst.msk [vmem:[#allocation2 + $0x148] sm:$0xff] %vm1981_vm3, %v1894_v57  ;;  %v1899_v13 = vmax.f32 %v1527_v59, 0.0  ;;  %v1519_v14 = vadd.f32 %v17779_v1, %v1518_v2  ;;  %15739 = vmatprep.mubr.msk.bf16.mxu1 %vm1981_vm3, %v14149_v60  ;;  %v15640_v15 = vpop.f32.mrf.mxu0  ;;  %v3347_v28 = vshrl.u32 %v14213_v4, 16  ;;  %v18031_v53 = vld [vmem:[#allocation3 + $0x60] sm:$0xf] }
 0x149   : > { %v5186_v16 = vshrl.u32 %v14343_v5, 16  ;;  %v5189_v37 = vshll.u32 %v14343_v5, 16  ;;  %v5197_v17 = vrot.slane %v5195_v58, 3  ;;  %v5200_v9 = vrot.slane %v5198_v7, 4  ;;  %15740 = vmatmul.mubr.msk.bf16.gmra.mxu1 %vm1981_vm3, %v14150_v47  ;;  %v18041_v63 = vld [vmem:[%s21440_s2] ss:$0 sm:$0xff] }
 0x14a   : > { %v15051_v3 = vpack.c.bf16 %v2438_v11, %v2438_v11  ;;  %v2437_v19 = vmax.f32 %v2381_v50, %v2383_v12  ;;  %2028 = vst.msk [vmem:[#allocation2 + $0x170] sm:$0xff] %vm1981_vm3, %v1899_v13  ;;  %v1897_v40 = vmax.f32 %v1519_v14, 0.0  ;;  %v1530_v20 = vadd.f32 %v15640_v15, %v17779_v1  ;;  %v1521_v21 = vpop.f32.mrf.mxu0  ;;  %v4918_v2 = vld [vmem:[#allocation3 + $0x50] sm:$0xf] }
 0x14b   : > { %v5188_v22 = vrot.slane %v5186_v16, 3  ;;  %v5191_v24 = vrot.slane %v5189_v37, 4  ;;  %v1522_v27 = vadd.f32 %v17779_v1, %v1521_v21  ;;  %v18018_v34 = vor.u32 %v5200_v9, %v5197_v17 }
 0x14c   : > { %2511 = vst.msk [vmem:[#allocation3 + $0x58] sm:$0xf] %vm521_vm1, %v15051_v3  ;;  %v15050_v25 = vpack.c.bf16 %v2437_v19, %v2437_v19  ;;  %v1900_v49 = vmax.f32 %v1530_v20, 0.0  ;;  %v15643_v32 = vpop.f32.mrf.mxu0  ;;  %v3350_v35 = vshll.u32 %v14213_v4, 16  ;;  %v3349_v46 = vrot.slane %v3347_v28, 3 }
 0x14d   : > { %2026 = vst.msk [vmem:[#allocation2 + $0x160] sm:$0xff] %vm1981_vm3, %v1897_v40  ;;  %v5192_v33 = vor.u32 %v5191_v24, %v5188_v22  ;;  %v1898_v38 = vmax.f32 %v1522_v27, 0.0  ;;  %v1543_v39 = vadd.f32 %v15643_v32, %v17779_v1  ;;  %v2152_v54 = vld [vmem:[#allocation2 + $0x150] ss:$2 sm:$0xff]  ;;  %v2280_v55 = vld [vmem:[#allocation2 + $0x151] ss:$2 sm:$0xff]  ;;  %v14152_v14 = vcombine.low %v2645_v51, %v18031_v53 }
 0x14e   : > { %2510 = vst.msk [vmem:[#allocation3 + $0x54] sm:$0xf] %vm521_vm1, %v15050_v25  ;;  %v1534_v44 = vpop.f32.mrf.mxu0  ;;  %v3352_v47 = vrot.slane %v3350_v35, 4  ;;  %v3358_v57 = vrot.slane %v3356_v41, 3  ;;  %v3359_v59 = vshll.u32 %v17997_v56, 16  ;;  %v2386_v15 = vmax.f32 %v2152_v54, %v2280_v55 }
 0x14f   : > { %2029 = vst.msk [vmem:[#allocation2 + $0x178] sm:$0xff] %vm1981_vm3, %v1900_v49  ;;  %v5193_v26 = vsel %vm3274_vm4, %v17968_v8, %v5192_v33  ;;  %v5202_v30 = vsel %vm3274_vm4, %v5192_v33, %v18018_v34  ;;  %2027 = vst.msk [vmem:[#allocation2 + $0x168] sm:$0xff] %vm1981_vm3, %v1898_v38  ;;  %v1903_v48 = vmax.f32 %v1543_v39, 0.0  ;;  %v1535_v50 = vadd.f32 %v17779_v1, %v1534_v44  ;;  %v2150_v60 = vld [vmem:[#allocation2 + $0x140] ss:$2 sm:$0xff] }
 0x150   : > { %15930 = vmatmul.mubr.msk.bf16.gmra.mxu0 %vm1981_vm3, %v5193_v26  ;;  %v15644_v8 = vpop.f32.mrf.mxu0  ;;  %v18034_v31 = vor.u32 %v3352_v47, %v3349_v46  ;;  %v2278_v61 = vld [vmem:[#allocation2 + $0x141] ss:$2 sm:$0xff]  ;;  %v3361_v7 = vrot.slane %v3359_v59, 4 }
 0x151   : > { %15933 = vmatprep.mubr.msk.bf16.mxu0 %vm1981_vm3, %v5202_v30  ;;  %2032 = vst.msk [vmem:[#allocation2 + $0x190] sm:$0xff] %vm1981_vm3, %v1903_v48  ;;  %v1901_v1 = vmax.f32 %v1535_v50, 0.0  ;;  %v1546_v0 = vadd.f32 %v18041_v63, %v15644_v8  ;;  %v2385_v16 = vmax.f32 %v2150_v60, %v2278_v61 }
 0x152   : > { %v1537_v4 = vpop.f32.mrf.mxu0  ;;  %v18047_v56 = vsel %vm3274_vm4, %v17999_v43, %v18034_v31  ;;  %v18054_v40 = vor.u32 %v3361_v7, %v3358_v57 }
 0x153   : > { %v2644_v5 = vld [vmem:[#allocation3 + $0x58] sm:$0xf]  ;;  %2030 = vst.msk [vmem:[#allocation2 + $0x180] sm:$0xff] %vm1981_vm3, %v1901_v1  ;;  %v1904_v11 = vmax.f32 %v1546_v0, 0.0  ;;  %v1538_v12 = vadd.f32 %v18041_v63, %v1537_v4 }
 0x154   : > { %v4920_v58 = vld [vmem:[#allocation3 + $0x58] sm:$0xf]  ;;  %v15647_v9 = vpop.f32.mrf.mxu0  ;;  %v18052_v19 = vcombine.low %v2644_v5, %v2645_v51  ;;  %v18071_v61 = vsel %vm3274_vm4, %v18034_v31, %v18054_v40 }
 0x155   : > { %v14346_v13 = vcombine.low %v4920_v58, %v4921_v45  ;;  %v2643_v3 = vld [vmem:[#allocation3 + $0x54] sm:$0xf]  ;;  %2033 = vst.msk [vmem:[#allocation2 + $0x198] sm:$0xff] %vm1981_vm3, %v1904_v11  ;;  %v1902_v20 = vmax.f32 %v1538_v12, 0.0  ;;  %v1559_v21 = vadd.f32 %v18041_v63, %v15647_v9  ;;  %v4925_v9 = vld [vmem:[#allocation3 + $0x6c] sm:$0xf] }
 0x156   : > { %v2156_v37 = vld [vmem:[#allocation2 + $0x170] ss:$2 sm:$0xff]  ;;  %v2284_v17 = vld [vmem:[#allocation2 + $0x171] ss:$2 sm:$0xff]  ;;  %v14151_v22 = vcombine.low %v2643_v3, %v2644_v5  ;;  %v2154_v25 = vld [vmem:[#allocation2 + $0x160] ss:$2 sm:$0xff]  ;;  %v1550_v27 = vpop.f32.mrf.mxu0  ;;  %v14215_v32 = vcombine.low %v17981_v23, %v2643_v3 }
 0x157   : > { %v2388_v43 = vmax.f32 %v2156_v37, %v2284_v17  ;;  %v4919_v24 = vld [vmem:[#allocation3 + $0x54] sm:$0xf]  ;;  %v2282_v49 = vld [vmem:[#allocation2 + $0x161] ss:$2 sm:$0xff]  ;;  %v5213_v28 = vshrl.u32 %v14346_v13, 16  ;;  %v5216_v35 = vshll.u32 %v14346_v13, 16  ;;  %v1551_v44 = vadd.f32 %v18041_v63, %v1550_v27 }
 0x158   : > { %v14345_v33 = vcombine.low %v4918_v2, %v4919_v24  ;;  %v2387_v39 = vmax.f32 %v2154_v25, %v2282_v49  ;;  %2031 = vst.msk [vmem:[#allocation2 + $0x188] sm:$0xff] %vm1981_vm3, %v1902_v20  ;;  %v1907_v41 = vmax.f32 %v1559_v21, 0.0  ;;  %15743 = vmatprep.mubr.msk.bf16.mxu1 %vm1981_vm3, %v14151_v22  ;;  %v15648_v26 = vpop.f32.mrf.mxu0  ;;  %v3365_v4 = vshrl.u32 %v14215_v32, 16  ;;  %v18086_v3 = vld [vmem:[#allocation3 + $0x70] sm:$0xf] }
 0x159   : > { %v2440_v38 = vmax.f32 %v2386_v15, %v2388_v43  ;;  %v5215_v46 = vrot.slane %v5213_v28, 3  ;;  %v5218_v47 = vrot.slane %v5216_v35, 4  ;;  %15744 = vmatmul.mubr.msk.bf16.gmra.mxu1 %vm1981_vm3, %v14152_v14  ;;  %v1905_v50 = vmax.f32 %v1551_v44, 0.0 }
 0x15a   : > { %v5204_v30 = vshrl.u32 %v14345_v33, 16  ;;  %v5207_v45 = vshll.u32 %v14345_v33, 16  ;;  %v2439_v48 = vmax.f32 %v2385_v16, %v2387_v39  ;;  %2036 = vst.msk [vmem:[#allocation2 + $0x1b0] sm:$0xff] %vm1981_vm3, %v1907_v41  ;;  %v1562_v51 = vadd.f32 %v18041_v63, %v15648_v26  ;;  %v1553_v54 = vpop.f32.mrf.mxu0  ;;  %v2622_v16 = vld [vmem:[#allocation3] sm:$0x8] }
 0x15b   : > { %v15053_v23 = vpack.c.bf16 %v2440_v38, %v2440_v38  ;;  %2034 = vst.msk [vmem:[#allocation2 + $0x1a0] sm:$0xff] %vm1981_vm3, %v1905_v50  ;;  %v1554_v60 = vadd.f32 %v18041_v63, %v1553_v54  ;;  %v18073_v2 = vor.u32 %v5218_v47, %v5215_v46  ;;  %v3368_v5 = vshll.u32 %v14215_v32, 16  ;;  %v4922_v32 = vld [vmem:[#allocation3 + $0x60] sm:$0xf]  ;;  %v2649_v33 = vld [vmem:[#allocation3 + $0x6c] sm:$0xf] }
 0x15c   : > { %v5206_v55 = vrot.slane %v5204_v30, 3  ;;  %v5209_v8 = vrot.slane %v5207_v45, 4  ;;  %v15052_v57 = vpack.c.bf16 %v2439_v48, %v2439_v48  ;;  %v1908_v59 = vmax.f32 %v1562_v51, 0.0  ;;  %v15651_v1 = vpop.f32.mrf.mxu0  ;;  %v2160_v43 = vld [vmem:[#allocation2 + $0x190] ss:$2 sm:$0xff] }
 0x15d   : > { %2521 = vst.msk [vmem:[#allocation3 + $0x68] sm:$0xf] %vm521_vm1, %v15053_v23  ;;  %v1906_v58 = vmax.f32 %v1554_v60, 0.0  ;;  %v1575_v7 = vadd.f32 %v18041_v63, %v15651_v1  ;;  %v3374_v11 = vshrl.u32 %v18052_v19, 16  ;;  %v3367_v14 = vrot.slane %v3365_v4, 3 }
 0x15e   : > { %v5210_v0 = vor.u32 %v5209_v8, %v5206_v55  ;;  %2520 = vst.msk [vmem:[#allocation3 + $0x64] sm:$0xf] %vm521_vm1, %v15052_v57  ;;  %v1566_v12 = vpop.f32.mrf.mxu0  ;;  %v3370_v15 = vrot.slane %v3368_v5, 4  ;;  %v2288_v20 = vld [vmem:[#allocation2 + $0x191] ss:$2 sm:$0xff]  ;;  %v3377_v22 = vshll.u32 %v18052_v19, 16 }
 0x15f   : > { %2037 = vst.msk [vmem:[#allocation2 + $0x1b8] sm:$0xff] %vm1981_vm3, %v1908_v59  ;;  %2035 = vst.msk [vmem:[#allocation2 + $0x1a8] sm:$0xff] %vm1981_vm3, %v1906_v58  ;;  %v1911_v37 = vmax.f32 %v1575_v7, 0.0  ;;  %v1567_v17 = vadd.f32 %v18041_v63, %v1566_v12  ;;  %v2158_v24 = vld [vmem:[#allocation2 + $0x180] ss:$2 sm:$0xff]  ;;  %v3376_v41 = vrot.slane %v3374_v11, 3  ;;  %v2390_v47 = vmax.f32 %v2160_v43, %v2288_v20 }
 0x160   : > { %v5211_v31 = vsel %vm3274_vm4, %v18018_v34, %v5210_v0  ;;  %v5220_v13 = vsel %vm3274_vm4, %v5210_v0, %v18073_v2  ;;  %v15652_v34 = vpop.f32.mrf.mxu0  ;;  %v18089_v21 = vor.u32 %v3370_v15, %v3367_v14  ;;  %v2286_v25 = vld [vmem:[#allocation2 + $0x181] ss:$2 sm:$0xff]  ;;  %v3379_v44 = vrot.slane %v3377_v22, 4 }
 0x161   : > { %15934 = vmatmul.mubr.msk.bf16.gmra.mxu0 %vm1981_vm3, %v5211_v31  ;;  %2040 = vst.msk [vmem:[#allocation2 + $0x1d0] sm:$0xff] %vm1981_vm3, %v1911_v37  ;;  %v1909_v49 = vmax.f32 %v1567_v17, 0.0  ;;  %v1578_v27 = vadd.f32 %v18041_v63, %v15652_v34  ;;  %v17149_v45 = vld [vmem:[#allocation3 + $0x4] sm:$0xf]  ;;  %v2389_v23 = vmax.f32 %v2158_v24, %v2286_v25 }
 0x162   : > { %15937 = vmatprep.mubr.msk.bf16.mxu0 %vm1981_vm3, %v5220_v13  ;;  %v1569_v28 = vpop.f32.mrf.mxu0  ;;  %v18097_v39 = vsel %vm3274_vm4, %v18054_v40, %v18089_v21  ;;  %v18101_v46 = vcombine.low %v2622_v16, %v17149_v45  ;;  %v14154_v40 = vcombine.low %v2649_v33, %v18086_v3  ;;  %v18106_v11 = vor.u32 %v3379_v44, %v3376_v41 }
 0x163   : > { %2038 = vst.msk [vmem:[#allocation2 + $0x1c0] sm:$0xff] %vm1981_vm3, %v1909_v49  ;;  %v1912_v19 = vmax.f32 %v1578_v27, 0.0  ;;  %v1570_v26 = vadd.f32 %v18041_v63, %v1569_v28 }
 0x164   : > { %v2648_v35 = vld [vmem:[#allocation3 + $0x68] sm:$0xf]  ;;  %v15655_v51 = vpop.f32.mrf.mxu0  ;;  %v18121_v44 = vsel %vm3274_vm4, %v18089_v21, %v18106_v11 }
 0x165   : > { %v4924_v38 = vld [vmem:[#allocation3 + $0x68] sm:$0xf]  ;;  %v2647_v54 = vld [vmem:[#allocation3 + $0x64] sm:$0xf]  ;;  %2041 = vst.msk [vmem:[#allocation2 + $0x1d8] sm:$0xff] %vm1981_vm3, %v1912_v19  ;;  %v1910_v8 = vmax.f32 %v1570_v26, 0.0  ;;  %v1591_v57 = vadd.f32 %v18041_v63, %v15655_v51 }
 0x166   : > { %v14348_v30 = vcombine.low %v4924_v38, %v4925_v9  ;;  %v2164_v48 = vld [vmem:[#allocation2 + $0x1b0] ss:$2 sm:$0xff]  ;;  %v2292_v50 = vld [vmem:[#allocation2 + $0x1b1] ss:$2 sm:$0xff]  ;;  %v14153_v59 = vcombine.low %v2647_v54, %v2648_v35  ;;  %v4923_v60 = vld [vmem:[#allocation3 + $0x64] sm:$0xf]  ;;  %v1582_v4 = vpop.f32.mrf.mxu0  ;;  %v14217_v24 = vcombine.low %v18031_v53, %v2647_v54 }
 0x167   : > { %v2392_v55 = vmax.f32 %v2164_v48, %v2292_v50  ;;  %v2162_v1 = vld [vmem:[#allocation2 + $0x1a0] ss:$2 sm:$0xff]  ;;  %v2290_v0 = vld [vmem:[#allocation2 + $0x1a1] ss:$2 sm:$0xff]  ;;  %v14347_v5 = vcombine.low %v4922_v32, %v4923_v60  ;;  %2039 = vst.msk [vmem:[#allocation2 + $0x1c8] sm:$0xff] %vm1981_vm3, %v1910_v8  ;;  %v1915_v13 = vmax.f32 %v1591_v57, 0.0  ;;  %v1583_v14 = vadd.f32 %v18041_v63, %v1582_v4 }
 0x168   : > { %v5231_v58 = vshrl.u32 %v14348_v30, 16  ;;  %v5234_v7 = vshll.u32 %v14348_v30, 16  ;;  %v2391_v31 = vmax.f32 %v2162_v1, %v2290_v0  ;;  %15747 = vmatprep.mubr.msk.bf16.mxu1 %vm1981_vm3, %v14153_v59  ;;  %v15656_v15 = vpop.f32.mrf.mxu0  ;;  %v14218_v32 = vcombine.low %v2648_v35, %v2649_v33 }
 0x169   : > { %v2442_v12 = vmax.f32 %v2390_v47, %v2392_v55  ;;  %v5222_v16 = vshrl.u32 %v14347_v5, 16  ;;  %v5225_v37 = vshll.u32 %v14347_v5, 16  ;;  %15748 = vmatmul.mubr.msk.bf16.gmra.mxu1 %vm1981_vm3, %v14154_v40  ;;  %2044 = vst.msk [vmem:[#allocation2 + $0x1f0] sm:$0xff] %vm1981_vm3, %v1915_v13  ;;  %v1913_v34 = vmax.f32 %v1583_v14, 0.0  ;;  %v18136_v55 = vld [vmem:[#allocation3 + $0x80] sm:$0xf] }
 0x16a   : > { %v5233_v17 = vrot.slane %v5231_v58, 3  ;;  %v5236_v9 = vrot.slane %v5234_v7, 4  ;;  %v2441_v20 = vmax.f32 %v2389_v23, %v2391_v31  ;;  %v1594_v22 = vadd.f32 %v18041_v63, %v15656_v15  ;;  %v1585_v25 = vpop.f32.mrf.mxu0  ;;  %v4929_v23 = vld [vmem:[#allocation3 + $0x7c] sm:$0xf] }
 0x16b   : > { %v15055_v43 = vpack.c.bf16 %v2442_v12, %v2442_v12  ;;  %v5224_v49 = vrot.slane %v5222_v16, 3  ;;  %v5227_v27 = vrot.slane %v5225_v37, 4  ;;  %2042 = vst.msk [vmem:[#allocation2 + $0x1e0] sm:$0xff] %vm1981_vm3, %v1913_v34  ;;  %v1586_v41 = vadd.f32 %v18041_v63, %v1585_v25  ;;  %v4926_v12 = vld [vmem:[#allocation3 + $0x70] sm:$0xf] }
 0x16c   : > { %v15054_v28 = vpack.c.bf16 %v2441_v20, %v2441_v20  ;;  %v1916_v38 = vmax.f32 %v1594_v22, 0.0  ;;  %v15659_v19 = vpop.f32.mrf.mxu0  ;;  %v18123_v53 = vor.u32 %v5236_v9, %v5233_v17  ;;  %v3276_v30 = vshrl.u32 %v18101_v46, 16  ;;  %v2168_v51 = vld [vmem:[#allocation2 + $0x1d0] ss:$2 sm:$0xff]  ;;  %v2296_v57 = vld [vmem:[#allocation2 + $0x1d1] ss:$2 sm:$0xff] }
 0x16d   : > { %2531 = vst.msk [vmem:[#allocation3 + $0x78] sm:$0xf] %vm521_vm1, %v15055_v43  ;;  %v5228_v26 = vor.u32 %v5227_v27, %v5224_v49  ;;  %v1914_v33 = vmax.f32 %v1586_v41, 0.0  ;;  %v1607_v35 = vadd.f32 %v18041_v63, %v15659_v19  ;;  %v3383_v48 = vshrl.u32 %v14217_v24, 16  ;;  %v18142_v31 = vld [vmem:[#allocation3 + $0x7c] sm:$0xf] }
 0x16e   : > { %2530 = vst.msk [vmem:[#allocation3 + $0x74] sm:$0xf] %vm521_vm1, %v15054_v28  ;;  %v1598_v45 = vpop.f32.mrf.mxu0  ;;  %v3386_v50 = vshll.u32 %v14217_v24, 16  ;;  %v3392_v8 = vshrl.u32 %v14218_v32, 16  ;;  %v3395_v1 = vshll.u32 %v14218_v32, 16  ;;  %v3279_v0 = vshll.u32 %v18101_v46, 16 }
 0x16f   : > { %2045 = vst.msk [vmem:[#allocation2 + $0x1f8] sm:$0xff] %vm1981_vm3, %v1916_v38  ;;  %v5229_v47 = vsel %vm3274_vm4, %v18073_v2, %v5228_v26  ;;  %v5238_v21 = vsel %vm3274_vm4, %v5228_v26, %v18123_v53  ;;  %2043 = vst.msk [vmem:[#allocation2 + $0x1e8] sm:$0xff] %vm1981_vm3, %v1914_v33  ;;  %v1919_v54 = vmax.f32 %v1607_v35, 0.0  ;;  %v1599_v40 = vadd.f32 %v18041_v63, %v1598_v45  ;;  %v2166_v4 = vld [vmem:[#allocation2 + $0x1c0] ss:$2 sm:$0xff] }
 0x170   : > { %15938 = vmatmul.mubr.msk.bf16.gmra.mxu0 %vm1981_vm3, %v5229_v47  ;;  %v15660_v2 = vpop.f32.mrf.mxu0  ;;  %v3385_v59 = vrot.slane %v3383_v48, 3  ;;  %v3388_v60 = vrot.slane %v3386_v50, 4  ;;  %v2294_v5 = vld [vmem:[#allocation2 + $0x1c1] ss:$2 sm:$0xff]  ;;  %v18144_v13 = vrot.slane %v3276_v30, 3  ;;  %v3394_v17 = vrot.slane %v3392_v8, 3 }
 0x171   : > { %15941 = vmatprep.mubr.msk.bf16.mxu0 %vm1981_vm3, %v5238_v21  ;;  %2048 = vst.msk [vmem:[#allocation2 + $0x210] sm:$0xff] %vm1981_vm3, %v1919_v54  ;;  %v1917_v58 = vmax.f32 %v1599_v40, 0.0  ;;  %v1610_v7 = vadd.f32 %v18041_v63, %v15660_v2  ;;  %v3397_v20 = vrot.slane %v3395_v1, 4  ;;  %v2394_v34 = vmax.f32 %v2168_v51, %v2296_v57 }
 0x172   : > { %v1601_v14 = vpop.f32.mrf.mxu0  ;;  %v3389_v37 = vor.u32 %v3388_v60, %v3385_v59  ;;  %v2393_v22 = vmax.f32 %v2166_v4, %v2294_v5  ;;  %v14156_v32 = vcombine.low %v18142_v31, %v18136_v55 }
 0x173   : > { %2046 = vst.msk [vmem:[#allocation2 + $0x200] sm:$0xff] %vm1981_vm3, %v1917_v58  ;;  %v1920_v46 = vmax.f32 %v1610_v7, 0.0  ;;  %v1602_v9 = vadd.f32 %v18041_v63, %v1601_v14  ;;  %v3281_v14 = vrot.slane %v3279_v0, 4 }
 0x174   : > { %v2652_v15 = vld [vmem:[#allocation3 + $0x78] sm:$0xf]  ;;  %v15663_v49 = vpop.f32.mrf.mxu0  ;;  %v18152_v28 = vsel %vm3274_vm4, %v18106_v11, %v3389_v37 }
 0x175   : > { %v4928_v16 = vld [vmem:[#allocation3 + $0x78] sm:$0xf]  ;;  %v2651_v27 = vld [vmem:[#allocation3 + $0x74] sm:$0xf]  ;;  %2049 = vst.msk [vmem:[#allocation2 + $0x218] sm:$0xff] %vm1981_vm3, %v1920_v46  ;;  %v1918_v41 = vmax.f32 %v1602_v9, 0.0  ;;  %v1623_v19 = vadd.f32 %v18041_v63, %v15663_v49 }
 0x176   : > { %v14350_v43 = vcombine.low %v4928_v16, %v4929_v23  ;;  %v2172_v24 = vld [vmem:[#allocation2 + $0x1f0] ss:$2 sm:$0xff]  ;;  %v2300_v25 = vld [vmem:[#allocation2 + $0x1f1] ss:$2 sm:$0xff]  ;;  %v14155_v26 = vcombine.low %v2651_v27, %v2652_v15  ;;  %v2170_v33 = vld [vmem:[#allocation2 + $0x1e0] ss:$2 sm:$0xff]  ;;  %v1614_v45 = vpop.f32.mrf.mxu0  ;;  %v18157_v47 = vcombine.low %v18086_v3, %v2651_v27 }
 0x177   : > { %v2396_v38 = vmax.f32 %v2172_v24, %v2300_v25  ;;  %v4927_v30 = vld [vmem:[#allocation3 + $0x74] sm:$0xf]  ;;  %v2298_v35 = vld [vmem:[#allocation2 + $0x1e1] ss:$2 sm:$0xff]  ;;  %2047 = vst.msk [vmem:[#allocation2 + $0x208] sm:$0xff] %vm1981_vm3, %v1918_v41  ;;  %v1923_v51 = vmax.f32 %v1623_v19, 0.0  ;;  %v1615_v54 = vadd.f32 %v18041_v63, %v1614_v45  ;;  %v18173_v24 = vcombine.low %v2652_v15, %v18142_v31 }
 0x178   : > { %v14349_v21 = vcombine.low %v4926_v12, %v4927_v30  ;;  %v5249_v23 = vshrl.u32 %v14350_v43, 16  ;;  %v5252_v48 = vshll.u32 %v14350_v43, 16  ;;  %v2395_v11 = vmax.f32 %v2170_v33, %v2298_v35  ;;  %15751 = vmatprep.mubr.msk.bf16.mxu1 %vm1981_vm3, %v14155_v26  ;;  %v15664_v40 = vpop.f32.mrf.mxu0  ;;  %v4933_v15 = vld [vmem:[#allocation3 + $0x8c] sm:$0xf]  ;;  %v18190_v41 = vld [vmem:[#allocation3 + $0x90] sm:$0xf] }
 0x179   : > { %v2444_v50 = vmax.f32 %v2394_v34, %v2396_v38  ;;  %15752 = vmatmul.mubr.msk.bf16.gmra.mxu1 %vm1981_vm3, %v14156_v32  ;;  %2052 = vst.msk [vmem:[#allocation2 + $0x230] sm:$0xff] %vm1981_vm3, %v1923_v51  ;;  %v1921_v1 = vmax.f32 %v1615_v54, 0.0  ;;  %v1626_v4 = vadd.f32 %v18041_v63, %v15664_v40  ;;  %v18165_v12 = vor.u32 %v3397_v20, %v3394_v17  ;;  %v4930_v54 = vld [vmem:[#allocation3 + $0x80] sm:$0xf] }
 0x17a   : > { %v5240_v8 = vshrl.u32 %v14349_v21, 16  ;;  %v5243_v57 = vshll.u32 %v14349_v21, 16  ;;  %v5251_v2 = vrot.slane %v5249_v23, 3  ;;  %v5254_v59 = vrot.slane %v5252_v48, 4  ;;  %v1617_v5 = vpop.f32.mrf.mxu0 }
 0x17b   : > { %v15057_v3 = vpack.c.bf16 %v2444_v50, %v2444_v50  ;;  %v2443_v60 = vmax.f32 %v2393_v22, %v2395_v11  ;;  %2050 = vst.msk [vmem:[#allocation2 + $0x220] sm:$0xff] %vm1981_vm3, %v1921_v1  ;;  %v1924_v46 = vmax.f32 %v1626_v4, 0.0  ;;  %v1618_v9 = vadd.f32 %v18041_v63, %v1617_v5  ;;  %v2657_v50 = vld [vmem:[#allocation3 + $0x8c] sm:$0xf] }
 0x17c   : > { %v5242_v58 = vrot.slane %v5240_v8, 3  ;;  %v5245_v7 = vrot.slane %v5243_v57, 4  ;;  %v15667_v43 = vpop.f32.mrf.mxu0  ;;  %v18170_v22 = vor.u32 %v5254_v59, %v5251_v2  ;;  %v18177_v17 = vsel %vm3274_vm4, %v3389_v37, %v18165_v12  ;;  %v2176_v32 = vld [vmem:[#allocation2 + $0x210] ss:$2 sm:$0xff]  ;;  %v2304_v26 = vld [vmem:[#allocation2 + $0x211] ss:$2 sm:$0xff] }
 0x17d   : > { %2541 = vst.msk [vmem:[#allocation3 + $0x88] sm:$0xf] %vm521_vm1, %v15057_v3  ;;  %v15056_v16 = vpack.c.bf16 %v2443_v60, %v2443_v60  ;;  %v1922_v0 = vmax.f32 %v1618_v9, 0.0  ;;  %v1639_v20 = vadd.f32 %v18041_v63, %v15667_v43  ;;  %v3401_v25 = vshrl.u32 %v18157_v47, 16 }
 0x17e   : > { %v5246_v34 = vor.u32 %v5245_v7, %v5242_v58  ;;  %2053 = vst.msk [vmem:[#allocation2 + $0x238] sm:$0xff] %vm1981_vm3, %v1924_v46  ;;  %v1630_v49 = vpop.f32.mrf.mxu0  ;;  %v3282_v19 = vor.u32 %v3281_v14, %v18144_v13  ;;  %v3404_v35 = vshll.u32 %v18157_v47, 16  ;;  %v3410_v45 = vshrl.u32 %v18173_v24, 16  ;;  %v2174_v21 = vld [vmem:[#allocation2 + $0x200] ss:$2 sm:$0xff] }
 0x17f   : > { %2540 = vst.msk [vmem:[#allocation3 + $0x84] sm:$0xf] %vm521_vm1, %v15056_v16  ;;  %v1927_v37 = vmax.f32 %v1639_v20, 0.0  ;;  %v1631_v38 = vadd.f32 %v18041_v63, %v1630_v49  ;;  %v3403_v33 = vrot.slane %v3401_v25, 3  ;;  %v2302_v23 = vld [vmem:[#allocation2 + $0x201] ss:$2 sm:$0xff]  ;;  %v2398_v1 = vmax.f32 %v2176_v32, %v2304_v26 }
 0x180   : > { %v5247_v27 = vsel %vm3274_vm4, %v18123_v53, %v5246_v34  ;;  %v5256_v31 = vsel %vm3274_vm4, %v5246_v34, %v18170_v22  ;;  %2051 = vst.msk [vmem:[#allocation2 + $0x228] sm:$0xff] %vm1981_vm3, %v1922_v0  ;;  %v14270_v53 = vld [vmem:[%s21439_s3 + $0x8] sm:$0xf]  ;;  %v15668_v30 = vpop.f32.mrf.mxu0  ;;  %v18204_v11 = vsel %vm3274_vm4, %v3282_v19, %v17852_v52  ;;  %v3406_v8 = vrot.slane %v3404_v35, 4 }
 0x181   : > { %15942 = vmatmul.mubr.msk.bf16.gmra.mxu0 %vm1981_vm3, %v5247_v27  ;;  %16624 = vmatprep.subr.msk.bf16.mxu1 %vm2946_vm2, %v14270_v53  ;;  %2056 = vst.msk [vmem:[#allocation2 + $0x250] sm:$0xff] %vm1981_vm3, %v1927_v37  ;;  %v1925_v13 = vmax.f32 %v1631_v38, 0.0  ;;  %v1642_v48 = vadd.f32 %v18041_v63, %v15668_v30  ;;  %v3413_v47 = vshll.u32 %v18173_v24, 16  ;;  %v3412_v60 = vrot.slane %v3410_v45, 3 }
 0x182   : > { %15945 = vmatprep.mubr.msk.bf16.mxu0 %vm1981_vm3, %v5256_v31  ;;  %v1633_v51 = vpop.f32.mrf.mxu0  ;;  %v2397_v4 = vmax.f32 %v2174_v21, %v2302_v23  ;;  %v14158_v14 = vcombine.low %v2657_v50, %v18190_v41  ;;  %v18210_v16 = vor.u32 %v3406_v8, %v3403_v33 }
 0x183   : > { %2054 = vst.msk [vmem:[#allocation2 + $0x240] sm:$0xff] %vm1981_vm3, %v1925_v13  ;;  %v1928_v57 = vmax.f32 %v1642_v48, 0.0  ;;  %v1634_v2 = vadd.f32 %v18041_v63, %v1633_v51 }
 0x184   : > { %v4932_v40 = vld [vmem:[#allocation3 + $0x88] sm:$0xf]  ;;  %v15671_v52 = vpop.f32.mrf.mxu0 }
 0x185   : > { %v2656_v59 = vld [vmem:[#allocation3 + $0x88] sm:$0xf]  ;;  %v14352_v3 = vcombine.low %v4932_v40, %v4933_v15  ;;  %v2180_v5 = vld [vmem:[#allocation2 + $0x230] ss:$2 sm:$0xff]  ;;  %v2308_v58 = vld [vmem:[#allocation2 + $0x231] ss:$2 sm:$0xff]  ;;  %v1655_v43 = vadd.f32 %v18041_v63, %v15671_v52  ;;  %v18224_v40 = vsel %vm3274_vm4, %v18165_v12, %v18210_v16 }
 0x186   : > { %v2655_v7 = vld [vmem:[#allocation3 + $0x84] sm:$0xf]  ;;  %v2400_v46 = vmax.f32 %v2180_v5, %v2308_v58  ;;  %2057 = vst.msk [vmem:[#allocation2 + $0x258] sm:$0xff] %vm1981_vm3, %v1928_v57  ;;  %v1926_v9 = vmax.f32 %v1634_v2, 0.0  ;;  %v1646_v25 = vpop.f32.mrf.mxu0 }
 0x187   : > { %v14157_v34 = vcombine.low %v2655_v7, %v2656_v59  ;;  %v4931_v24 = vld [vmem:[#allocation3 + $0x84] sm:$0xf]  ;;  %v14221_v49 = vcombine.low %v18136_v55, %v2655_v7  ;;  %v5267_v31 = vshrl.u32 %v14352_v3, 16  ;;  %v5270_v15 = vshll.u32 %v14352_v3, 16 }
 0x188   : > { %v2178_v0 = vld [vmem:[#allocation2 + $0x220] ss:$2 sm:$0xff]  ;;  %v2306_v20 = vld [vmem:[#allocation2 + $0x221] ss:$2 sm:$0xff]  ;;  %v14351_v27 = vcombine.low %v4930_v54, %v4931_v24  ;;  %v2446_v32 = vmax.f32 %v2398_v1, %v2400_v46  ;;  %2055 = vst.msk [vmem:[#allocation2 + $0x248] sm:$0xff] %vm1981_vm3, %v1926_v9  ;;  %v1931_v38 = vmax.f32 %v1655_v43, 0.0  ;;  %v1647_v19 = vadd.f32 %v18041_v63, %v1646_v25  ;;  %v15672_v53 = vpop.f32.mrf.mxu0 }
 0x189   : > { %v2399_v37 = vmax.f32 %v2178_v0, %v2306_v20  ;;  %15755 = vmatprep.mubr.msk.bf16.mxu1 %vm1981_vm3, %v14157_v34  ;;  %v5269_v33 = vrot.slane %v5267_v31, 3  ;;  %v5272_v35 = vrot.slane %v5270_v15, 4  ;;  %v1658_v23 = vadd.f32 %v18041_v63, %v15672_v53  ;;  %v4937_v24 = vld [vmem:[#allocation3 + $0x9c] sm:$0xf]  ;;  %v18241_v0 = vld [vmem:[#allocation3 + $0xa0] sm:$0xf] }
 0x18a   : > { %v5258_v26 = vshrl.u32 %v14351_v27, 16  ;;  %v5261_v30 = vshll.u32 %v14351_v27, 16  ;;  %15756 = vmatmul.mubr.msk.bf16.gmra.mxu1 %vm1981_vm3, %v14158_v14  ;;  %v15059_v55 = vpack.c.bf16 %v2446_v32, %v2446_v32  ;;  %2060 = vst.msk [vmem:[#allocation2 + $0x270] sm:$0xff] %vm1981_vm3, %v1931_v38  ;;  %v1929_v21 = vmax.f32 %v1647_v19, 0.0  ;;  %v1649_v13 = vpop.f32.mrf.mxu0  ;;  %v18252_v19 = vld [vmem:[#allocation3 + $0x9c] sm:$0xf] }
 0x18b   : > { %v2445_v45 = vmax.f32 %v2397_v4, %v2399_v37  ;;  %v14222_v54 = vcombine.low %v2656_v59, %v2657_v50  ;;  %v1932_v57 = vmax.f32 %v1658_v23, 0.0  ;;  %v1650_v2 = vadd.f32 %v18041_v63, %v1649_v13  ;;  %v4934_v53 = vld [vmem:[#allocation3 + $0x90] sm:$0xf] }
 0x18c   : > { %v5260_v48 = vrot.slane %v5258_v26, 3  ;;  %v5263_v51 = vrot.slane %v5261_v30, 4  ;;  %2551 = vst.msk [vmem:[#allocation3 + $0x98] sm:$0xf] %vm521_vm1, %v15059_v55  ;;  %v3415_v3 = vrot.slane %v3413_v47, 4  ;;  %v15675_v1 = vpop.f32.mrf.mxu0  ;;  %v18229_v5 = vor.u32 %v5272_v35, %v5269_v33 }
 0x18d   : > { %v15058_v8 = vpack.c.bf16 %v2445_v45, %v2445_v45  ;;  %2058 = vst.msk [vmem:[#allocation2 + $0x260] sm:$0xff] %vm1981_vm3, %v1929_v21  ;;  %v3419_v58 = vshrl.u32 %v14221_v49, 16  ;;  %v3422_v50 = vshll.u32 %v14221_v49, 16  ;;  %2061 = vst.msk [vmem:[#allocation2 + $0x278] sm:$0xff] %vm1981_vm3, %v1932_v57  ;;  %v1930_v12 = vmax.f32 %v1650_v2, 0.0 }
 0x18e   : > { %v5264_v4 = vor.u32 %v5263_v51, %v5260_v48  ;;  %v1671_v59 = vadd.f32 %v18041_v63, %v15675_v1  ;;  %v3416_v52 = vor.u32 %v3415_v3, %v3412_v60  ;;  %v1662_v7 = vpop.f32.mrf.mxu0  ;;  %v2312_v20 = vld [vmem:[#allocation2 + $0x251] ss:$2 sm:$0xff]  ;;  %v3428_v27 = vshrl.u32 %v14222_v54, 16 }
 0x18f   : > { %2550 = vst.msk [vmem:[#allocation3 + $0x94] sm:$0xf] %vm521_vm1, %v15058_v8  ;;  %v3421_v46 = vrot.slane %v3419_v58, 3  ;;  %v3424_v9 = vrot.slane %v3422_v50, 4  ;;  %v1663_v34 = vadd.f32 %v18041_v63, %v1662_v7  ;;  %v3431_v31 = vshll.u32 %v14222_v54, 16 }
 0x190   : > { %v5265_v14 = vsel %vm3274_vm4, %v18170_v22, %v5264_v4  ;;  %v5274_v47 = vsel %vm3274_vm4, %v5264_v4, %v18229_v5  ;;  %2059 = vst.msk [vmem:[#allocation2 + $0x268] sm:$0xff] %vm1981_vm3, %v1930_v12  ;;  %v1935_v43 = vmax.f32 %v1671_v59, 0.0  ;;  %v18245_v60 = vsel %vm3274_vm4, %v18210_v16, %v3416_v52  ;;  %v2184_v22 = vld [vmem:[#allocation2 + $0x250] ss:$2 sm:$0xff]  ;;  %v15676_v25 = vpop.f32.mrf.mxu0  ;;  %v2182_v15 = vld [vmem:[#allocation2 + $0x240] ss:$2 sm:$0xff] }
 0x191   : > { %15946 = vmatmul.mubr.msk.bf16.gmra.mxu0 %vm1981_vm3, %v5265_v14  ;;  %v18248_v49 = vor.u32 %v3424_v9, %v3421_v46  ;;  %v2310_v32 = vld [vmem:[#allocation2 + $0x241] ss:$2 sm:$0xff]  ;;  %v1933_v37 = vmax.f32 %v1663_v34, 0.0  ;;  %v1674_v38 = vadd.f32 %v18041_v63, %v15676_v25  ;;  %v3430_v33 = vrot.slane %v3428_v27, 3 }
 0x192   : > { %15949 = vmatprep.mubr.msk.bf16.mxu0 %vm1981_vm3, %v5274_v47  ;;  %2064 = vst.msk [vmem:[#allocation2 + $0x290] sm:$0xff] %vm1981_vm3, %v1935_v43  ;;  %v1665_v16 = vpop.f32.mrf.mxu0  ;;  %v3433_v23 = vrot.slane %v3431_v31, 4  ;;  %v2402_v13 = vmax.f32 %v2184_v22, %v2312_v20  ;;  %v2401_v48 = vmax.f32 %v2182_v15, %v2310_v32  ;;  %v14160_v2 = vcombine.low %v18252_v19, %v18241_v0 }
 0x193   : > { %v4936_v26 = vld [vmem:[#allocation3 + $0x98] sm:$0xf]  ;;  %v18256_v30 = vsel %vm3274_vm4, %v3416_v52, %v18248_v49  ;;  %2062 = vst.msk [vmem:[#allocation2 + $0x280] sm:$0xff] %vm1981_vm3, %v1933_v37  ;;  %v1936_v35 = vmax.f32 %v1674_v38, 0.0  ;;  %v1666_v55 = vadd.f32 %v18041_v63, %v1665_v16  ;;  %v14467_v38 = vld [vmem:[%s21439_s3 + $0x14] sm:$0xf] }
 0x194   : > { %v2660_v45 = vld [vmem:[#allocation3 + $0x98] sm:$0xf]  ;;  %v14354_v21 = vcombine.low %v4936_v26, %v4937_v24  ;;  %v15679_v8 = vpop.f32.mrf.mxu0  ;;  %16627 = vmatprep.subr.msk.bf16.mxu0 %vm2946_vm2, %v14467_v38 }
 0x195   : > { %v2188_v51 = vld [vmem:[#allocation2 + $0x270] ss:$2 sm:$0xff]  ;;  %v2316_v54 = vld [vmem:[#allocation2 + $0x271] ss:$2 sm:$0xff]  ;;  %2065 = vst.msk [vmem:[#allocation2 + $0x298] sm:$0xff] %vm1981_vm3, %v1936_v35  ;;  %v1934_v1 = vmax.f32 %v1666_v55, 0.0  ;;  %v1687_v4 = vadd.f32 %v18041_v63, %v15679_v8  ;;  %v18277_v35 = vor.u32 %v3433_v23, %v3430_v33 }
 0x196   : > { %v2659_v57 = vld [vmem:[#allocation3 + $0x94] sm:$0xf]  ;;  %v2404_v3 = vmax.f32 %v2188_v51, %v2316_v54  ;;  %v1678_v52 = vpop.f32.mrf.mxu0  ;;  %v5285_v47 = vshrl.u32 %v14354_v21, 16  ;;  %v5288_v46 = vshll.u32 %v14354_v21, 16 }
 0x197   : > { %v14159_v58 = vcombine.low %v2659_v57, %v2660_v45  ;;  %v4935_v50 = vld [vmem:[#allocation3 + $0x94] sm:$0xf]  ;;  %v2186_v12 = vld [vmem:[#allocation2 + $0x260] ss:$2 sm:$0xff]  ;;  %v2314_v59 = vld [vmem:[#allocation2 + $0x261] ss:$2 sm:$0xff]  ;;  %v18265_v7 = vcombine.low %v18190_v41, %v2659_v57  ;;  %v1679_v24 = vadd.f32 %v18041_v63, %v1678_v52  ;;  %v18286_v57 = vcombine.low %v2660_v45, %v18252_v19 }
 0x198   : > { %v14353_v14 = vcombine.low %v4934_v53, %v4935_v50  ;;  %v2448_v9 = vmax.f32 %v2402_v13, %v2404_v3  ;;  %v2403_v43 = vmax.f32 %v2186_v12, %v2314_v59  ;;  %2063 = vst.msk [vmem:[#allocation2 + $0x288] sm:$0xff] %vm1981_vm3, %v1934_v1  ;;  %v1939_v34 = vmax.f32 %v1687_v4, 0.0  ;;  %v15680_v22 = vpop.f32.mrf.mxu0  ;;  %v4941_v4 = vld [vmem:[#allocation3 + $0xac] sm:$0xf]  ;;  %v18304_v12 = vld [vmem:[#allocation3 + $0xb0] sm:$0xf] }
 0x199   : > { %15759 = vmatprep.mubr.msk.bf16.mxu1 %vm1981_vm3, %v14159_v58  ;;  %v5287_v27 = vrot.slane %v5285_v47, 3  ;;  %v5290_v31 = vrot.slane %v5288_v46, 4  ;;  %v1937_v32 = vmax.f32 %v1679_v24, 0.0  ;;  %v1690_v37 = vadd.f32 %v18041_v63, %v15680_v22  ;;  %v2665_v24 = vld [vmem:[#allocation3 + $0xac] sm:$0xf] }
 0x19a   : > { %v5276_v20 = vshrl.u32 %v14353_v14, 16  ;;  %v5279_v25 = vshll.u32 %v14353_v14, 16  ;;  %15760 = vmatmul.mubr.msk.bf16.gmra.mxu1 %vm1981_vm3, %v14160_v2  ;;  %v15061_v41 = vpack.c.bf16 %v2448_v9, %v2448_v9  ;;  %v2447_v15 = vmax.f32 %v2401_v48, %v2403_v43  ;;  %2068 = vst.msk [vmem:[#allocation2 + $0x2b0] sm:$0xff] %vm1981_vm3, %v1939_v34  ;;  %v1681_v16 = vpop.f32.mrf.mxu0 }
 0x19b   : > { %2066 = vst.msk [vmem:[#allocation2 + $0x2a0] sm:$0xff] %vm1981_vm3, %v1937_v32  ;;  %v1940_v21 = vmax.f32 %v1690_v37, 0.0  ;;  %v1682_v13 = vadd.f32 %v18041_v63, %v1681_v16  ;;  %v6953_v48 = vsel %vm2946_vm2, %v14467_v38, 0  ;;  %v18283_v8 = vor.u32 %v5290_v31, %v5287_v27 }
 0x19c   : > { %v5278_v53 = vrot.slane %v5276_v20, 3  ;;  %v5281_v26 = vrot.slane %v5279_v25, 4  ;;  %2561 = vst.msk [vmem:[#allocation3 + $0xa8] sm:$0xf] %vm521_vm1, %v15061_v41  ;;  %v15060_v55 = vpack.c.bf16 %v2447_v15, %v2447_v15  ;;  %v15683_v51 = vpop.f32.mrf.mxu0  ;;  %16052 = vmatpush3.bf16.msra.mxu0 %v6953_v48  ;;  %v18291_v33 = vsel %vm3274_vm4, %v18248_v49, %v18277_v35  ;;  %v2192_v58 = vld [vmem:[#allocation2 + $0x290] ss:$2 sm:$0xff] }
 0x19d   : > { %2069 = vst.msk [vmem:[#allocation2 + $0x2b8] sm:$0xff] %vm1981_vm3, %v1940_v21  ;;  %v1938_v23 = vmax.f32 %v1682_v13, 0.0  ;;  %v1703_v2 = vadd.f32 %v18041_v63, %v15683_v51  ;;  %v3437_v3 = vshrl.u32 %v18265_v7, 16  ;;  %v2320_v59 = vld [vmem:[#allocation2 + $0x291] ss:$2 sm:$0xff]  ;;  %v3446_v47 = vshrl.u32 %v18286_v57, 16 }
 0x19e   : > { %v5282_v54 = vor.u32 %v5281_v26, %v5278_v53  ;;  %2560 = vst.msk [vmem:[#allocation3 + $0xa4] sm:$0xf] %vm521_vm1, %v15060_v55  ;;  %v1694_v1 = vpop.f32.mrf.mxu0  ;;  %v4938_v20 = vld [vmem:[#allocation3 + $0xa0] sm:$0xf]  ;;  %v3449_v31 = vshll.u32 %v18286_v57, 16  ;;  %v2406_v38 = vmax.f32 %v2192_v58, %v2320_v59  ;;  %v14162_v13 = vcombine.low %v2665_v24, %v18304_v12 }
 0x19f   : > { %2067 = vst.msk [vmem:[#allocation2 + $0x2a8] sm:$0xff] %vm1981_vm3, %v1938_v23  ;;  %v1943_v49 = vmax.f32 %v1703_v2, 0.0  ;;  %v1695_v50 = vadd.f32 %v18041_v63, %v1694_v1  ;;  %v3439_v14 = vrot.slane %v3437_v3, 3  ;;  %v2190_v46 = vld [vmem:[#allocation2 + $0x280] ss:$2 sm:$0xff]  ;;  %v3448_v37 = vrot.slane %v3446_v47, 3 }
 0x1a0   : > { %v5283_v19 = vsel %vm3274_vm4, %v18229_v5, %v5282_v54  ;;  %v5292_v45 = vsel %vm3274_vm4, %v5282_v54, %v18283_v8  ;;  %v15684_v52 = vpop.f32.mrf.mxu0  ;;  %v3440_v5 = vshll.u32 %v18265_v7, 16  ;;  %v2318_v9 = vld [vmem:[#allocation2 + $0x281] ss:$2 sm:$0xff] }
 0x1a1   : > { %15950 = vmatmul.mubr.msk.bf16.gmra.mxu0 %vm1981_vm3, %v5283_v19  ;;  %2072 = vst.msk [vmem:[#allocation2 + $0x2d0] sm:$0xff] %vm1981_vm3, %v1943_v49  ;;  %v1941_v43 = vmax.f32 %v1695_v50, 0.0  ;;  %v1706_v34 = vadd.f32 %v18041_v63, %v15684_v52  ;;  %v2405_v16 = vmax.f32 %v2190_v46, %v2318_v9 }
 0x1a2   : > { %15953 = vmatprep.mubr.msk.bf16.mxu0 %vm1981_vm3, %v5292_v45  ;;  %v1697_v22 = vpop.f32.mrf.mxu0  ;;  %v3442_v27 = vrot.slane %v3440_v5, 4 }
 0x1a3   : > { %v4940_v25 = vld [vmem:[#allocation3 + $0xa8] sm:$0xf]  ;;  %2070 = vst.msk [vmem:[#allocation2 + $0x2c0] sm:$0xff] %vm1981_vm3, %v1941_v43  ;;  %v1944_v41 = vmax.f32 %v1706_v34, 0.0  ;;  %v1698_v7 = vadd.f32 %v18041_v63, %v1697_v22  ;;  %v18321_v63 = vld [vmem:[%s21440_s2] ss:$0 sm:$0xff] }
 0x1a4   : > { %v2664_v15 = vld [vmem:[#allocation3 + $0xa8] sm:$0xf]  ;;  %v14356_v32 = vcombine.low %v4940_v25, %v4941_v4  ;;  %v2196_v53 = vld [vmem:[#allocation2 + $0x2b0] ss:$2 sm:$0xff]  ;;  %v2324_v26 = vld [vmem:[#allocation2 + $0x2b1] ss:$2 sm:$0xff]  ;;  %v15687_v55 = vpop.f32.mrf.mxu0  ;;  %v18315_v48 = vor.u32 %v3442_v27, %v3439_v14 }
 0x1a5   : > { %v2663_v21 = vld [vmem:[#allocation3 + $0xa4] sm:$0xf]  ;;  %v2408_v51 = vmax.f32 %v2196_v53, %v2324_v26  ;;  %2073 = vst.msk [vmem:[#allocation2 + $0x2d8] sm:$0xff] %vm1981_vm3, %v1944_v41  ;;  %v1942_v54 = vmax.f32 %v1698_v7, 0.0  ;;  %v1719_v57 = vadd.f32 %v18321_v63, %v15687_v55  ;;  %v14226_v7 = vcombine.low %v2664_v15, %v2665_v24  ;;  %s13893_s2 = scalar_lea.sflag [#allocation11], %s505_s15 }
 0x1a6   : > { %v14161_v23 = vcombine.low %v2663_v21, %v2664_v15  ;;  %v4939_v2 = vld [vmem:[#allocation3 + $0xa4] sm:$0xf]  ;;  %v1710_v19 = vpop.f32.mrf.mxu0  ;;  %v14225_v45 = vcombine.low %v18241_v0, %v2663_v21  ;;  %v5303_v58 = vshrl.u32 %v14356_v32, 16  ;;  %v5306_v49 = vshll.u32 %v14356_v32, 16 }
 0x1a7   : > { %v2194_v3 = vld [vmem:[#allocation2 + $0x2a0] ss:$2 sm:$0xff]  ;;  %v2322_v1 = vld [vmem:[#allocation2 + $0x2a1] ss:$2 sm:$0xff]  ;;  %v14355_v4 = vcombine.low %v4938_v20, %v4939_v2  ;;  %v2450_v50 = vmax.f32 %v2406_v38, %v2408_v51  ;;  %2071 = vst.msk [vmem:[#allocation2 + $0x2c8] sm:$0xff] %vm1981_vm3, %v1942_v54  ;;  %v1947_v52 = vmax.f32 %v1719_v57, 0.0  ;;  %v1711_v14 = vadd.f32 %v18321_v63, %v1710_v19 }
 0x1a8   : > { %v2407_v59 = vmax.f32 %v2194_v3, %v2322_v1  ;;  %15763 = vmatprep.mubr.msk.bf16.mxu1 %vm1981_vm3, %v14161_v23  ;;  %v15688_v5 = vpop.f32.mrf.mxu0  ;;  %v5305_v9 = vrot.slane %v5303_v58, 3  ;;  %v5308_v43 = vrot.slane %v5306_v49, 4  ;;  %v18334_v32 = vsel %vm3274_vm4, %v18277_v35, %v18315_v48  ;;  %v4945_v2 = vld [vmem:[#allocation3 + $0xbc] sm:$0xf]  ;;  %v18351_v58 = vld [vmem:[#allocation3 + $0xc0] sm:$0xf] }
 0x1a9   : > { %v5294_v47 = vshrl.u32 %v14355_v4, 16  ;;  %v5297_v46 = vshll.u32 %v14355_v4, 16  ;;  %15764 = vmatmul.mubr.msk.bf16.gmra.mxu1 %vm1981_vm3, %v14162_v13  ;;  %v15063_v0 = vpack.c.bf16 %v2450_v50, %v2450_v50  ;;  %2076 = vst.msk [vmem:[#allocation2 + $0x2f0] sm:$0xff] %vm1981_vm3, %v1947_v52  ;;  %v1945_v22 = vmax.f32 %v1711_v14, 0.0  ;;  %v2669_v4 = vld [vmem:[#allocation3 + $0xbc] sm:$0xf] }
 0x1aa   : > { %v2449_v34 = vmax.f32 %v2405_v16, %v2407_v59  ;;  %v1722_v20 = vadd.f32 %v18321_v63, %v15688_v5  ;;  %v1713_v25 = vpop.f32.mrf.mxu0  ;;  %v3451_v26 = vrot.slane %v3449_v31, 4  ;;  %v18339_v13 = vor.u32 %v5308_v43, %v5305_v9 }
 0x1ab   : > { %v5296_v27 = vrot.slane %v5294_v47, 3  ;;  %v5299_v41 = vrot.slane %v5297_v46, 4  ;;  %2571 = vst.msk [vmem:[#allocation3 + $0xb8] sm:$0xf] %vm521_vm1, %v15063_v0  ;;  %v1714_v53 = vadd.f32 %v18321_v63, %v1713_v25  ;;  %v3455_v51 = vshrl.u32 %v14225_v45, 16 }
 0x1ac   : > { %v15062_v38 = vpack.c.bf16 %v2449_v34, %v2449_v34  ;;  %2074 = vst.msk [vmem:[#allocation2 + $0x2e0] sm:$0xff] %vm1981_vm3, %v1945_v22  ;;  %v1948_v16 = vmax.f32 %v1722_v20, 0.0  ;;  %v15691_v55 = vpop.f32.mrf.mxu0  ;;  %v3458_v24 = vshll.u32 %v14225_v45, 16  ;;  %v3452_v54 = vor.u32 %v3451_v26, %v3448_v37  ;;  %v2328_v49 = vld [vmem:[#allocation2 + $0x2d1] ss:$2 sm:$0xff] }
 0x1ad   : > { %v5300_v21 = vor.u32 %v5299_v41, %v5296_v27  ;;  %v1946_v35 = vmax.f32 %v1714_v53, 0.0  ;;  %v1735_v15 = vadd.f32 %v18321_v63, %v15691_v55  ;;  %v3457_v3 = vrot.slane %v3455_v51, 3  ;;  %v4942_v41 = vld [vmem:[#allocation3 + $0xb0] sm:$0xf] }
 0x1ae   : > { %2570 = vst.msk [vmem:[#allocation3 + $0xb4] sm:$0xf] %vm521_vm1, %v15062_v38  ;;  %v1726_v57 = vpop.f32.mrf.mxu0  ;;  %v3460_v1 = vrot.slane %v3458_v24, 4  ;;  %v18355_v37 = vsel %vm3274_vm4, %v18315_v48, %v3452_v54  ;;  %v3464_v52 = vshrl.u32 %v14226_v7, 16  ;;  %v3467_v14 = vshll.u32 %v14226_v7, 16 }
 0x1af   : > { %2077 = vst.msk [vmem:[#allocation2 + $0x2f8] sm:$0xff] %vm1981_vm3, %v1948_v16  ;;  %v5301_v23 = vsel %vm3274_vm4, %v18283_v8, %v5300_v21  ;;  %v5310_v31 = vsel %vm3274_vm4, %v5300_v21, %v18339_v13  ;;  %2075 = vst.msk [vmem:[#allocation2 + $0x2e8] sm:$0xff] %vm1981_vm3, %v1946_v35  ;;  %v1951_v19 = vmax.f32 %v1735_v15, 0.0  ;;  %v1727_v45 = vadd.f32 %v18321_v63, %v1726_v57  ;;  %v2200_v8 = vld [vmem:[#allocation2 + $0x2d0] ss:$2 sm:$0xff] }
 0x1b0   : > { %15954 = vmatmul.mubr.msk.bf16.gmra.mxu0 %vm1981_vm3, %v5301_v23  ;;  %v15692_v50 = vpop.f32.mrf.mxu0  ;;  %v3461_v59 = vor.u32 %v3460_v1, %v3457_v3  ;;  %v2198_v5 = vld [vmem:[#allocation2 + $0x2c0] ss:$2 sm:$0xff]  ;;  %v2326_v47 = vld [vmem:[#allocation2 + $0x2c1] ss:$2 sm:$0xff]  ;;  %v3466_v22 = vrot.slane %v3464_v52, 3  ;;  %v3469_v20 = vrot.slane %v3467_v14, 4  ;;  %v14164_v38 = vcombine.low %v2669_v4, %v18351_v58 }
 0x1b1   : > { %15957 = vmatprep.mubr.msk.bf16.mxu0 %vm1981_vm3, %v5310_v31  ;;  %2080 = vst.msk [vmem:[#allocation2 + $0x310] sm:$0xff] %vm1981_vm3, %v1951_v19  ;;  %v1949_v46 = vmax.f32 %v1727_v45, 0.0  ;;  %v1738_v9 = vadd.f32 %v18321_v63, %v15692_v50  ;;  %v2410_v16 = vmax.f32 %v2200_v8, %v2328_v49  ;;  %v2409_v53 = vmax.f32 %v2198_v5, %v2326_v47 }
 0x1b2   : > { %v1729_v43 = vpop.f32.mrf.mxu0  ;;  %v2668_v0 = vld [vmem:[#allocation3 + $0xb8] sm:$0xf]  ;;  %v18361_v48 = vsel %vm3274_vm4, %v3452_v54, %v3461_v59  ;;  %v18368_v35 = vor.u32 %v3469_v20, %v3466_v22 }
 0x1b3   : > { %v4944_v34 = vld [vmem:[#allocation3 + $0xb8] sm:$0xf]  ;;  %2078 = vst.msk [vmem:[#allocation2 + $0x300] sm:$0xff] %vm1981_vm3, %v1949_v46  ;;  %v1952_v25 = vmax.f32 %v1738_v9, 0.0  ;;  %v1730_v27 = vadd.f32 %v18321_v63, %v1729_v43  ;;  %v18366_v24 = vcombine.low %v2668_v0, %v2669_v4 }
 0x1b4   : > { %v14358_v7 = vcombine.low %v4944_v34, %v4945_v2  ;;  %v15695_v21 = vpop.f32.mrf.mxu0 }
 0x1b5   : > { %v2667_v51 = vld [vmem:[#allocation3 + $0xb4] sm:$0xf]  ;;  %2081 = vst.msk [vmem:[#allocation2 + $0x318] sm:$0xff] %vm1981_vm3, %v1952_v25  ;;  %v1950_v54 = vmax.f32 %v1730_v27, 0.0  ;;  %v1751_v57 = vadd.f32 %v18321_v63, %v15695_v21 }
 0x1b6   : > { %v2204_v26 = vld [vmem:[#allocation2 + $0x2f0] ss:$2 sm:$0xff]  ;;  %v2332_v55 = vld [vmem:[#allocation2 + $0x2f1] ss:$2 sm:$0xff]  ;;  %v14163_v23 = vcombine.low %v2667_v51, %v2668_v0  ;;  %v2202_v2 = vld [vmem:[#allocation2 + $0x2e0] ss:$2 sm:$0xff]  ;;  %v1742_v1 = vpop.f32.mrf.mxu0  ;;  %v14227_v19 = vcombine.low %v18304_v12, %v2667_v51 }
 0x1b7   : > { %v2412_v15 = vmax.f32 %v2204_v26, %v2332_v55  ;;  %v4943_v31 = vld [vmem:[#allocation3 + $0xb4] sm:$0xf]  ;;  %v2330_v3 = vld [vmem:[#allocation2 + $0x2e1] ss:$2 sm:$0xff]  ;;  %v5321_v8 = vshrl.u32 %v14358_v7, 16  ;;  %v5324_v49 = vshll.u32 %v14358_v7, 16  ;;  %v1743_v14 = vadd.f32 %v18321_v63, %v1742_v1 }
 0x1b8   : > { %v14357_v45 = vcombine.low %v4942_v41, %v4943_v31  ;;  %v2411_v50 = vmax.f32 %v2202_v2, %v2330_v3  ;;  %2079 = vst.msk [vmem:[#allocation2 + $0x308] sm:$0xff] %vm1981_vm3, %v1950_v54  ;;  %v1955_v52 = vmax.f32 %v1751_v57, 0.0  ;;  %15767 = vmatprep.mubr.msk.bf16.mxu1 %vm1981_vm3, %v14163_v23  ;;  %v15696_v5 = vpop.f32.mrf.mxu0  ;;  %v18381_v41 = vsel %vm3274_vm4, %v3461_v59, %v18368_v35  ;;  %v4949_v3 = vld [vmem:[#allocation3 + $0xcc] sm:$0xf] }
 0x1b9   : > { %v2452_v4 = vmax.f32 %v2410_v16, %v2412_v15  ;;  %v5323_v9 = vrot.slane %v5321_v8, 3  ;;  %v5326_v43 = vrot.slane %v5324_v49, 4  ;;  %15768 = vmatmul.mubr.msk.bf16.gmra.mxu1 %vm1981_vm3, %v14164_v38  ;;  %v1953_v34 = vmax.f32 %v1743_v14, 0.0  ;;  %v2673_v8 = vld [vmem:[#allocation3 + $0xcc] sm:$0xf] }
 0x1ba   : > { %v5312_v47 = vshrl.u32 %v14357_v45, 16  ;;  %v5315_v46 = vshll.u32 %v14357_v45, 16  ;;  %v2451_v0 = vmax.f32 %v2409_v53, %v2411_v50  ;;  %2084 = vst.msk [vmem:[#allocation2 + $0x330] sm:$0xff] %vm1981_vm3, %v1955_v52  ;;  %v1754_v22 = vadd.f32 %v18321_v63, %v15696_v5  ;;  %v1745_v20 = vpop.f32.mrf.mxu0  ;;  %v18399_v49 = vld [vmem:[#allocation3 + $0xd0] sm:$0xf] }
 0x1bb   : > { %v15065_v12 = vpack.c.bf16 %v2452_v4, %v2452_v4  ;;  %2082 = vst.msk [vmem:[#allocation2 + $0x320] sm:$0xff] %vm1981_vm3, %v1953_v34  ;;  %v1746_v16 = vadd.f32 %v18321_v63, %v1745_v20  ;;  %v3473_v53 = vshrl.u32 %v14227_v19, 16  ;;  %v18386_v21 = vor.u32 %v5326_v43, %v5323_v9 }
 0x1bc   : > { %v5314_v25 = vrot.slane %v5312_v47, 3  ;;  %v5317_v27 = vrot.slane %v5315_v46, 4  ;;  %v15064_v7 = vpack.c.bf16 %v2451_v0, %v2451_v0  ;;  %v1956_v38 = vmax.f32 %v1754_v22, 0.0  ;;  %v15699_v26 = vpop.f32.mrf.mxu0  ;;  %v2208_v50 = vld [vmem:[#allocation2 + $0x310] ss:$2 sm:$0xff] }
 0x1bd   : > { %2581 = vst.msk [vmem:[#allocation3 + $0xc8] sm:$0xf] %vm521_vm1, %v15065_v12  ;;  %v3476_v51 = vshll.u32 %v14227_v19, 16  ;;  %v3482_v15 = vshrl.u32 %v18366_v24, 16  ;;  %v1954_v59 = vmax.f32 %v1746_v16, 0.0  ;;  %v1767_v54 = vadd.f32 %v18321_v63, %v15699_v26 }
 0x1be   : > { %v5318_v55 = vor.u32 %v5317_v27, %v5314_v25  ;;  %2580 = vst.msk [vmem:[#allocation3 + $0xc4] sm:$0xf] %vm521_vm1, %v15064_v7  ;;  %v3475_v57 = vrot.slane %v3473_v53, 3  ;;  %v1758_v23 = vpop.f32.mrf.mxu0  ;;  %v3485_v4 = vshll.u32 %v18366_v24, 16  ;;  %v2336_v52 = vld [vmem:[#allocation2 + $0x311] ss:$2 sm:$0xff] }
 0x1bf   : > { %2085 = vst.msk [vmem:[#allocation2 + $0x338] sm:$0xff] %vm1981_vm3, %v1956_v38  ;;  %v3478_v1 = vrot.slane %v3476_v51, 4  ;;  %2083 = vst.msk [vmem:[#allocation2 + $0x328] sm:$0xff] %vm1981_vm3, %v1954_v59  ;;  %v1959_v19 = vmax.f32 %v1767_v54, 0.0  ;;  %v1759_v45 = vadd.f32 %v18321_v63, %v1758_v23  ;;  %v3484_v5 = vrot.slane %v3482_v15, 3 }
 0x1c0   : > { %v5319_v31 = vsel %vm3274_vm4, %v18339_v13, %v5318_v55  ;;  %v5328_v2 = vsel %vm3274_vm4, %v5318_v55, %v18386_v21  ;;  %v15700_v13 = vpop.f32.mrf.mxu0  ;;  %v2206_v47 = vld [vmem:[#allocation2 + $0x300] ss:$2 sm:$0xff]  ;;  %v2334_v46 = vld [vmem:[#allocation2 + $0x301] ss:$2 sm:$0xff]  ;;  %v3487_v12 = vrot.slane %v3485_v4, 4  ;;  %v14166_v38 = vcombine.low %v2673_v8, %v18399_v49 }
 0x1c1   : > { %15958 = vmatmul.mubr.msk.bf16.gmra.mxu0 %vm1981_vm3, %v5319_v31  ;;  %v3479_v14 = vor.u32 %v3478_v1, %v3475_v57  ;;  %2088 = vst.msk [vmem:[#allocation2 + $0x350] sm:$0xff] %vm1981_vm3, %v1959_v19  ;;  %v1957_v9 = vmax.f32 %v1759_v45, 0.0  ;;  %v1770_v43 = vadd.f32 %v18321_v63, %v15700_v13  ;;  %v4946_v27 = vld [vmem:[#allocation3 + $0xc0] sm:$0xf]  ;;  %v2414_v16 = vmax.f32 %v2208_v50, %v2336_v52 }
 0x1c2   : > { %15961 = vmatprep.mubr.msk.bf16.mxu0 %vm1981_vm3, %v5328_v2  ;;  %v1761_v0 = vpop.f32.mrf.mxu0  ;;  %v2413_v53 = vmax.f32 %v2206_v47, %v2334_v46  ;;  %v18414_v54 = vor.u32 %v3487_v12, %v3484_v5 }
 0x1c3   : > { %v18407_v24 = vsel %vm3274_vm4, %v18368_v35, %v3479_v14  ;;  %2086 = vst.msk [vmem:[#allocation2 + $0x340] sm:$0xff] %vm1981_vm3, %v1957_v9  ;;  %v1960_v20 = vmax.f32 %v1770_v43, 0.0  ;;  %v1762_v25 = vadd.f32 %v18321_v63, %v1761_v0 }
 0x1c4   : > { %v2672_v34 = vld [vmem:[#allocation3 + $0xc8] sm:$0xf]  ;;  %v15703_v51 = vpop.f32.mrf.mxu0 }
 0x1c5   : > { %v4948_v22 = vld [vmem:[#allocation3 + $0xc8] sm:$0xf]  ;;  %v2671_v15 = vld [vmem:[#allocation3 + $0xc4] sm:$0xf]  ;;  %v18412_v59 = vcombine.low %v2672_v34, %v2673_v8  ;;  %2089 = vst.msk [vmem:[#allocation2 + $0x358] sm:$0xff] %vm1981_vm3, %v1960_v20  ;;  %v1958_v57 = vmax.f32 %v1762_v25, 0.0  ;;  %v1783_v23 = vadd.f32 %v18321_v63, %v15703_v51 }
 0x1c6   : > { %v14360_v7 = vcombine.low %v4948_v22, %v4949_v3  ;;  %v2212_v26 = vld [vmem:[#allocation2 + $0x330] ss:$2 sm:$0xff]  ;;  %v2340_v55 = vld [vmem:[#allocation2 + $0x331] ss:$2 sm:$0xff]  ;;  %v14165_v31 = vcombine.low %v2671_v15, %v2672_v34  ;;  %v4947_v2 = vld [vmem:[#allocation3 + $0xc4] sm:$0xf]  ;;  %v1774_v19 = vpop.f32.mrf.mxu0  ;;  %v14229_v45 = vcombine.low %v18351_v58, %v2671_v15 }
 0x1c7   : > { %v2416_v35 = vmax.f32 %v2212_v26, %v2340_v55  ;;  %v2210_v3 = vld [vmem:[#allocation2 + $0x320] ss:$2 sm:$0xff]  ;;  %v2338_v1 = vld [vmem:[#allocation2 + $0x321] ss:$2 sm:$0xff]  ;;  %v14359_v4 = vcombine.low %v4946_v27, %v4947_v2  ;;  %2087 = vst.msk [vmem:[#allocation2 + $0x348] sm:$0xff] %vm1981_vm3, %v1958_v57  ;;  %v1963_v5 = vmax.f32 %v1783_v23, 0.0  ;;  %v1775_v47 = vadd.f32 %v18321_v63, %v1774_v19 }
 0x1c8   : > { %v5339_v50 = vshrl.u32 %v14360_v7, 16  ;;  %v5342_v52 = vshll.u32 %v14360_v7, 16  ;;  %v2415_v13 = vmax.f32 %v2210_v3, %v2338_v1  ;;  %15771 = vmatprep.mubr.msk.bf16.mxu1 %vm1981_vm3, %v14165_v31  ;;  %v15704_v46 = vpop.f32.mrf.mxu0  ;;  %v18427_v26 = vsel %vm3274_vm4, %v3479_v14, %v18414_v54 }
 0x1c9   : > { %v2454_v8 = vmax.f32 %v2414_v16, %v2416_v35  ;;  %v5330_v9 = vshrl.u32 %v14359_v4, 16  ;;  %v5333_v43 = vshll.u32 %v14359_v4, 16  ;;  %15772 = vmatmul.mubr.msk.bf16.gmra.mxu1 %vm1981_vm3, %v14166_v38  ;;  %2092 = vst.msk [vmem:[#allocation2 + $0x370] sm:$0xff] %vm1981_vm3, %v1963_v5  ;;  %v1961_v22 = vmax.f32 %v1775_v47, 0.0  ;;  %v15725_v16 = vpop.f32.mrf.mxu1  ;;  %v2677_v5 = vld [vmem:[#allocation3 + $0xdc] sm:$0xf] }
 0x1ca   : > { %v5341_v12 = vrot.slane %v5339_v50, 3  ;;  %v5344_v0 = vrot.slane %v5342_v52, 4  ;;  %v2453_v34 = vmax.f32 %v2413_v53, %v2415_v13  ;;  %v1786_v20 = vadd.f32 %v18321_v63, %v15704_v46  ;;  %v1777_v25 = vpop.f32.mrf.mxu0  ;;  %v4953_v50 = vld [vmem:[#allocation3 + $0xdc] sm:$0xf]  ;;  %v18447_v47 = vld [vmem:[#allocation3 + $0xe0] sm:$0xf] }
 0x1cb   : > { %v15067_v58 = vpack.c.bf16 %v2454_v8, %v2454_v8  ;;  %v5332_v27 = vrot.slane %v5330_v9, 3  ;;  %v5335_v7 = vrot.slane %v5333_v43, 4  ;;  %2090 = vst.msk [vmem:[#allocation2 + $0x360] sm:$0xff] %vm1981_vm3, %v1961_v22  ;;  %v1778_v53 = vadd.f32 %v18321_v63, %v1777_v25  ;;  %v18442_v52 = vpop.f32.mrf.mxu1 }
 0x1cc   : > { %v15066_v55 = vpack.c.bf16 %v2453_v34, %v2453_v34  ;;  %v1964_v38 = vmax.f32 %v1786_v20, 0.0  ;;  %v3491_v51 = vshrl.u32 %v14229_v45, 16  ;;  %v15707_v15 = vpop.f32.mrf.mxu0  ;;  %v18432_v57 = vor.u32 %v5344_v0, %v5341_v12  ;;  %21441 = vst [vmem:[#allocation16_spill] sm:$0xff] %v18442_v52  ;;  %v2344_v9 = vld [vmem:[#allocation2 + $0x351] ss:$2 sm:$0xff] }
 0x1cd   : > { %2591 = vst.msk [vmem:[#allocation3 + $0xd8] sm:$0xf] %vm521_vm1, %v15067_v58  ;;  %v5336_v35 = vor.u32 %v5335_v7, %v5332_v27  ;;  %v3494_v23 = vshll.u32 %v14229_v45, 16  ;;  %v3500_v31 = vshrl.u32 %v18412_v59, 16  ;;  %v1962_v14 = vmax.f32 %v1778_v53, 0.0 }
 0x1ce   : > { %2590 = vst.msk [vmem:[#allocation3 + $0xd4] sm:$0xf] %vm521_vm1, %v15066_v55  ;;  %v1799_v2 = vadd.f32 %v18321_v63, %v15707_v15  ;;  %v3493_v3 = vrot.slane %v3491_v51, 3  ;;  %v1790_v1 = vpop.f32.mrf.mxu0  ;;  %v3503_v46 = vshll.u32 %v18412_v59, 16  ;;  %v2214_v58 = vld [vmem:[#allocation2 + $0x340] ss:$2 sm:$0xff]  ;;  %v15726_v59 = vpop.f32.mrf.mxu1 }
 0x1cf   : > { %2093 = vst.msk [vmem:[#allocation2 + $0x378] sm:$0xff] %vm1981_vm3, %v1964_v38  ;;  %v5337_v19 = vsel %vm3274_vm4, %v18386_v21, %v5336_v35  ;;  %v5346_v4 = vsel %vm3274_vm4, %v5336_v35, %v18432_v57  ;;  %v3496_v45 = vrot.slane %v3494_v23, 4  ;;  %2091 = vst.msk [vmem:[#allocation2 + $0x368] sm:$0xff] %vm1981_vm3, %v1962_v14  ;;  %v1791_v13 = vadd.f32 %v18321_v63, %v1790_v1  ;;  %v2216_v21 = vld [vmem:[#allocation2 + $0x350] ss:$2 sm:$0xff] }
 0x1d0   : > { %v1967_v8 = vmax.f32 %v1799_v2, 0.0  ;;  %15962 = vmatmul.mubr.msk.bf16.gmra.mxu0 %vm1981_vm3, %v5337_v19  ;;  %v15708_v43 = vpop.f32.mrf.mxu0  ;;  %v3502_v0 = vrot.slane %v3500_v31, 3  ;;  %v2342_v34 = vld [vmem:[#allocation2 + $0x341] ss:$2 sm:$0xff]  ;;  %v3505_v25 = vrot.slane %v3503_v46, 4  ;;  %v14168_v35 = vcombine.low %v2677_v5, %v18447_v47 }
 0x1d1   : > { %15965 = vmatprep.mubr.msk.bf16.mxu0 %vm1981_vm3, %v5346_v4  ;;  %v18451_v12 = vor.u32 %v3496_v45, %v3493_v3  ;;  %v1965_v22 = vmax.f32 %v1791_v13, 0.0  ;;  %v1802_v20 = vadd.f32 %v18321_v63, %v15708_v43  ;;  %v4950_v51 = vld [vmem:[#allocation3 + $0xd0] sm:$0xf]  ;;  %v2418_v23 = vmax.f32 %v2216_v21, %v2344_v9  ;;  %v7317_v52 = vld [vmem:[#allocation3 + $0x44] sm:$0xf] }
 0x1d2   : > { %2096 = vst.msk [vmem:[#allocation2 + $0x390] sm:$0xff] %vm1981_vm3, %v1967_v8  ;;  %v1793_v27 = vpop.f32.mrf.mxu0  ;;  %v2417_v31 = vmax.f32 %v2214_v58, %v2342_v34  ;;  %v3506_v4 = vor.u32 %v3505_v25, %v3502_v0 }
 0x1d3   : > { %v18458_v55 = vsel %vm3274_vm4, %v18414_v54, %v18451_v12  ;;  %2094 = vst.msk [vmem:[#allocation2 + $0x380] sm:$0xff] %vm1981_vm3, %v1965_v22  ;;  %v1968_v38 = vmax.f32 %v1802_v20, 0.0  ;;  %v1794_v53 = vadd.f32 %v18321_v63, %v1793_v27  ;;  %v18468_v20 = vpop.f32.mrf.mxu1 }
 0x1d4   : > { %v2676_v7 = vld [vmem:[#allocation3 + $0xd8] sm:$0xf]  ;;  %v15711_v3 = vpop.f32.mrf.mxu0  ;;  %21442 = vst [vmem:[#allocation17_spill] sm:$0xff] %v18468_v20  ;;  %v7316_v20 = vld [vmem:[#allocation3 + $0x40] sm:$0xf] }
 0x1d5   : > { %v4952_v16 = vld [vmem:[#allocation3 + $0xd8] sm:$0xf]  ;;  %v2675_v1 = vld [vmem:[#allocation3 + $0xd4] sm:$0xf]  ;;  %v18463_v19 = vcombine.low %v2676_v7, %v2677_v5  ;;  %2097 = vst.msk [vmem:[#allocation2 + $0x398] sm:$0xff] %vm1981_vm3, %v1968_v38  ;;  %v1966_v45 = vmax.f32 %v1794_v53, 0.0  ;;  %v1815_v8 = vadd.f32 %v18321_v63, %v15711_v3 }
 0x1d6   : > { %v14362_v15 = vcombine.low %v4952_v16, %v4953_v50  ;;  %v2220_v14 = vld [vmem:[#allocation2 + $0x370] ss:$2 sm:$0xff]  ;;  %v2348_v2 = vld [vmem:[#allocation2 + $0x371] ss:$2 sm:$0xff]  ;;  %v14167_v13 = vcombine.low %v2675_v1, %v2676_v7  ;;  %v2218_v50 = vld [vmem:[#allocation2 + $0x360] ss:$2 sm:$0xff]  ;;  %v1806_v22 = vpop.f32.mrf.mxu0  ;;  %v14231_v21 = vcombine.low %v18399_v49, %v2675_v1 }
 0x1d7   : > { %v2420_v54 = vmax.f32 %v2220_v14, %v2348_v2  ;;  %v4951_v46 = vld [vmem:[#allocation3 + $0xd4] sm:$0xf]  ;;  %v2346_v43 = vld [vmem:[#allocation2 + $0x361] ss:$2 sm:$0xff]  ;;  %2095 = vst.msk [vmem:[#allocation2 + $0x388] sm:$0xff] %vm1981_vm3, %v1966_v45  ;;  %v1971_v25 = vmax.f32 %v1815_v8, 0.0  ;;  %v1807_v27 = vadd.f32 %v18321_v63, %v1806_v22  ;;  %v18481_v22 = vsel %vm3274_vm4, %v18451_v12, %v3506_v4 }
 0x1d8   : > { %v14361_v9 = vcombine.low %v4950_v51, %v4951_v46  ;;  %v5357_v58 = vshrl.u32 %v14362_v15, 16  ;;  %v5360_v34 = vshll.u32 %v14362_v15, 16  ;;  %v2419_v0 = vmax.f32 %v2218_v50, %v2346_v43  ;;  %15775 = vmatprep.mubr.msk.bf16.mxu1 %vm1981_vm3, %v14167_v13  ;;  %v15712_v59 = vpop.f32.mrf.mxu0 }
 0x1d9   : > { %v2456_v5 = vmax.f32 %v2418_v23, %v2420_v54  ;;  %v3509_v7 = vshrl.u32 %v14231_v21, 16  ;;  %v3512_v16 = vshll.u32 %v14231_v21, 16  ;;  %15776 = vmatmul.mubr.msk.bf16.gmra.mxu1 %vm1981_vm3, %v14168_v35  ;;  %2100 = vst.msk [vmem:[#allocation2 + $0x3b0] sm:$0xff] %vm1981_vm3, %v1971_v25  ;;  %v1969_v15 = vmax.f32 %v1807_v27, 0.0  ;;  %v15729_v45 = vpop.f32.mrf.mxu1 }
 0x1da   : > { %v5348_v38 = vshrl.u32 %v14361_v9, 16  ;;  %v5351_v53 = vshll.u32 %v14361_v9, 16  ;;  %v2455_v51 = vmax.f32 %v2417_v31, %v2419_v0  ;;  %v1818_v23 = vadd.f32 %v18321_v63, %v15712_v59  ;;  %v1809_v3 = vpop.f32.mrf.mxu0 }
 0x1db   : > { %v15069_v49 = vpack.c.bf16 %v2456_v5, %v2456_v5  ;;  %v3511_v14 = vrot.slane %v3509_v7, 3  ;;  %v3514_v2 = vrot.slane %v3512_v16, 4  ;;  %2098 = vst.msk [vmem:[#allocation2 + $0x3a0] sm:$0xff] %vm1981_vm3, %v1969_v15  ;;  %v1810_v35 = vadd.f32 %v18321_v63, %v1809_v3  ;;  %v18491_v7 = vpop.f32.mrf.mxu1 }
 0x1dc   : > { %v5350_v1 = vrot.slane %v5348_v38, 3  ;;  %v5353_v54 = vrot.slane %v5351_v53, 4  ;;  %v15068_v8 = vpack.c.bf16 %v2455_v51, %v2455_v51  ;;  %v1972_v13 = vmax.f32 %v1818_v23, 0.0  ;;  %v15715_v46 = vpop.f32.mrf.mxu0  ;;  %21443 = vst [vmem:[#allocation18_spill] sm:$0xff] %v18491_v7  ;;  %v2681_v53 = vld [vmem:[#allocation3 + $0xec] sm:$0xf] }
 0x1dd   : > { %2601 = vst.msk [vmem:[#allocation3 + $0xe8] sm:$0xf] %vm521_vm1, %v15069_v49  ;;  %v5359_v31 = vrot.slane %v5357_v58, 3  ;;  %v5362_v43 = vrot.slane %v5360_v34, 4  ;;  %v3515_v21 = vor.u32 %v3514_v2, %v3511_v14  ;;  %v1970_v9 = vmax.f32 %v1810_v35, 0.0 }
 0x1de   : > { %v5354_v50 = vor.u32 %v5353_v54, %v5350_v1  ;;  %2600 = vst.msk [vmem:[#allocation3 + $0xe4] sm:$0xf] %vm521_vm1, %v15068_v8  ;;  %v1831_v5 = vadd.f32 %v18321_v63, %v15715_v46  ;;  %v3518_v0 = vshrl.u32 %v18463_v19, 16  ;;  %v1822_v25 = vpop.f32.mrf.mxu0  ;;  %v4957_v34 = vld [vmem:[#allocation3 + $0xec] sm:$0xf]  ;;  %v3521_v16 = vshll.u32 %v18463_v19, 16 }
 0x1df   : > { %2101 = vst.msk [vmem:[#allocation2 + $0x3b8] sm:$0xff] %vm1981_vm3, %v1972_v13  ;;  %v18489_v27 = vor.u32 %v5362_v43, %v5359_v31  ;;  %v18494_v12 = vsel %vm3274_vm4, %v3506_v4, %v3515_v21  ;;  %2099 = vst.msk [vmem:[#allocation2 + $0x3a8] sm:$0xff] %vm1981_vm3, %v1970_v9  ;;  %v1823_v38 = vadd.f32 %v18321_v63, %v1822_v25  ;;  %v18500_v49 = vld [vmem:[#allocation3 + $0xf0] sm:$0xf]  ;;  %v2222_v2 = vld [vmem:[#allocation2 + $0x380] ss:$2 sm:$0xff]  ;;  %v15730_v31 = vpop.f32.mrf.mxu1 }
 0x1e0   : > { %v5355_v58 = vsel %vm3274_vm4, %v18432_v57, %v5354_v50  ;;  %21444 = vst [vmem:[#allocation19_spill] sm:$0xff] %v18494_v12  ;;  %v1975_v59 = vmax.f32 %v1831_v5, 0.0  ;;  %v18502_v57 = vld [vmem:[#allocation3 + $0x100] sm:$0xf]  ;;  %v3520_v51 = vrot.slane %v3518_v0, 3  ;;  %v15716_v14 = vpop.f32.mrf.mxu0  ;;  %v3523_v19 = vrot.slane %v3521_v16, 4 }
 0x1e1   : > { %15966 = vmatmul.mubr.msk.bf16.gmra.mxu0 %vm1981_vm3, %v5355_v58  ;;  %v2224_v15 = vld [vmem:[#allocation2 + $0x390] ss:$2 sm:$0xff]  ;;  %v2352_v23 = vld [vmem:[#allocation2 + $0x391] ss:$2 sm:$0xff]  ;;  %v5364_v4 = vsel %vm3274_vm4, %v5354_v50, %v18489_v27  ;;  %v2350_v3 = vld [vmem:[#allocation2 + $0x381] ss:$2 sm:$0xff]  ;;  %v1834_v54 = vadd.f32 %v18321_v63, %v15716_v14  ;;  %v14170_v13 = vcombine.low %v2681_v53, %v18500_v49  ;;  %v18516_v0 = vcombine.low %v18502_v57, %v18502_v57  ;;  %v18527_v29 = vpop.f32.mrf.mxu1 }
 0x1e2   : > { %2104 = vst.msk [vmem:[#allocation2 + $0x3d0] sm:$0xff] %vm1981_vm3, %v1975_v59  ;;  %v1973_v1 = vmax.f32 %v1823_v38, 0.0  ;;  %15969 = vmatprep.mubr.msk.bf16.mxu0 %vm1981_vm3, %v5364_v4  ;;  %v1825_v45 = vpop.f32.mrf.mxu0  ;;  %v18510_v46 = vor.u32 %v3523_v19, %v3520_v51  ;;  %v4954_v9 = vld [vmem:[#allocation3 + $0xe0] sm:$0xf]  ;;  %v2422_v25 = vmax.f32 %v2224_v15, %v2352_v23  ;;  %v2421_v58 = vmax.f32 %v2222_v2, %v2350_v3 }
 0x1e3   : > { %v1976_v50 = vmax.f32 %v1834_v54, 0.0  ;;  %v1826_v43 = vadd.f32 %v18321_v63, %v1825_v45  ;;  %21446 = vst [vmem:[#allocation21_spill] sm:$0xff] %v18527_v29  ;;  %v7344_v29 = vld [vmem:[#allocation3 + $0xb0] sm:$0xf] }
 0x1e4   : > { %v2680_v8 = vld [vmem:[#allocation3 + $0xe8] sm:$0xf]  ;;  %2102 = vst.msk [vmem:[#allocation2 + $0x3c0] sm:$0xff] %vm1981_vm3, %v1973_v1  ;;  %v15719_v38 = vpop.f32.mrf.mxu0  ;;  %v18522_v51 = vsel %vm3274_vm4, %v3515_v21, %v18510_v46 }
 0x1e5   : > { %v4956_v35 = vld [vmem:[#allocation3 + $0xe8] sm:$0xf]  ;;  %v2679_v4 = vld [vmem:[#allocation3 + $0xe4] sm:$0xf]  ;;  %v18518_v14 = vcombine.low %v2680_v8, %v2681_v53  ;;  %21445 = vst [vmem:[#allocation20_spill] sm:$0xff] %v18522_v51  ;;  %2105 = vst.msk [vmem:[#allocation2 + $0x3d8] sm:$0xff] %vm1981_vm3, %v1976_v50  ;;  %v1847_v1 = vadd.f32 %v18321_v63, %v15719_v38 }
 0x1e6   : > { %v14364_v5 = vcombine.low %v4956_v35, %v4957_v34  ;;  %v2228_v16 = vld [vmem:[#allocation2 + $0x3b0] ss:$2 sm:$0xff]  ;;  %v2356_v59 = vld [vmem:[#allocation2 + $0x3b1] ss:$2 sm:$0xff]  ;;  %v1974_v34 = vmax.f32 %v1826_v43, 0.0  ;;  %v14169_v54 = vcombine.low %v2679_v4, %v2680_v8  ;;  %v1838_v2 = vpop.f32.mrf.mxu0  ;;  %v14233_v3 = vcombine.low %v18447_v47, %v2679_v4 }
 0x1e7   : > { %v2424_v19 = vmax.f32 %v2228_v16, %v2356_v59  ;;  %v4955_v45 = vld [vmem:[#allocation3 + $0xe4] sm:$0xf]  ;;  %v1979_v50 = vmax.f32 %v1847_v1, 0.0  ;;  %v1839_v43 = vadd.f32 %v18321_v63, %v1838_v2 }
 0x1e8   : > { %v2226_v15 = vld [vmem:[#allocation2 + $0x3a0] ss:$2 sm:$0xff]  ;;  %v2354_v23 = vld [vmem:[#allocation2 + $0x3a1] ss:$2 sm:$0xff]  ;;  %v14363_v35 = vcombine.low %v4954_v9, %v4955_v45  ;;  %v5375_v53 = vshrl.u32 %v14364_v5, 16  ;;  %v5378_v31 = vshll.u32 %v14364_v5, 16  ;;  %15779 = vmatprep.mubr.msk.bf16.mxu1 %vm1981_vm3, %v14169_v54  ;;  %v15720_v59 = vpop.f32.mrf.mxu0 }
 0x1e9   : > { %v2458_v21 = vmax.f32 %v2422_v25, %v2424_v19  ;;  %v2423_v7 = vmax.f32 %v2226_v15, %v2354_v23  ;;  %2103 = vst.msk [vmem:[#allocation2 + $0x3c8] sm:$0xff] %vm1981_vm3, %v1974_v34  ;;  %v3527_v8 = vshrl.u32 %v14233_v3, 16  ;;  %v3530_v16 = vshll.u32 %v14233_v3, 16  ;;  %15780 = vmatmul.mubr.msk.bf16.gmra.mxu1 %vm1981_vm3, %v14170_v13  ;;  %2108 = vst.msk [vmem:[#allocation2 + $0x3f0] sm:$0xff] %vm1981_vm3, %v1979_v50  ;;  %v15733_v54 = vpop.f32.mrf.mxu1 }
 0x1ea   : > { %v5366_v47 = vshrl.u32 %v14363_v35, 16  ;;  %v5369_v9 = vshll.u32 %v14363_v35, 16  ;;  %v1977_v25 = vmax.f32 %v1839_v43, 0.0  ;;  %v1850_v4 = vadd.f32 %v18321_v63, %v15720_v59  ;;  %v1841_v1 = vpop.f32.mrf.mxu0  ;;  %v2685_v59 = vld [vmem:[#allocation3 + $0xfc] sm:$0xf] }
 0x1eb   : > { %v15071_v38 = vpack.c.bf16 %v2458_v21, %v2458_v21  ;;  %v2457_v5 = vmax.f32 %v2421_v58, %v2423_v7  ;;  %v3529_v19 = vrot.slane %v3527_v8, 3  ;;  %v3532_v34 = vrot.slane %v3530_v16, 4 }
 0x1ec   : > { %v5368_v45 = vrot.slane %v5366_v47, 3  ;;  %v5371_v15 = vrot.slane %v5369_v9, 4  ;;  %2106 = vst.msk [vmem:[#allocation2 + $0x3e0] sm:$0xff] %vm1981_vm3, %v1977_v25  ;;  %v1980_v13 = vmax.f32 %v1850_v4, 0.0  ;;  %v1842_v2 = vadd.f32 %v18321_v63, %v1841_v1  ;;  %v4961_v25 = vld [vmem:[#allocation3 + $0xfc] sm:$0xf] }
 0x1ed   : > { %2611 = vst.msk [vmem:[#allocation3 + $0xf8] sm:$0xf] %vm521_vm1, %v15071_v38  ;;  %v15070_v23 = vpack.c.bf16 %v2457_v5, %v2457_v5  ;;  %v5377_v7 = vrot.slane %v5375_v53, 3  ;;  %v5380_v3 = vrot.slane %v5378_v31, 4  ;;  %v3533_v35 = vor.u32 %v3532_v34, %v3529_v19  ;;  %v18548_v31 = vpop.f32.mrf.mxu1  ;;  %v2360_v38 = vld [vmem:[#allocation2 + $0x3d1] ss:$2 sm:$0xff] }
 0x1ee   : > { %v5372_v58 = vor.u32 %v5371_v15, %v5368_v45  ;;  %2109 = vst.msk [vmem:[#allocation2 + $0x3f8] sm:$0xff] %vm1981_vm3, %v1980_v13  ;;  %v1978_v21 = vmax.f32 %v1842_v2, 0.0  ;;  %v3536_v50 = vshrl.u32 %v18518_v14, 16  ;;  %v3539_v43 = vshll.u32 %v18518_v14, 16  ;;  %21447 = vst [vmem:[#allocation22_spill] sm:$0xff] %v18548_v31 }
 0x1ef   : > { %2610 = vst.msk [vmem:[#allocation3 + $0xf4] sm:$0xf] %vm521_vm1, %v15070_v23  ;;  %v18544_v16 = vor.u32 %v5380_v3, %v5377_v7  ;;  %v3563_v63 = vshrl.u32 %v18516_v0, 16  ;;  %v3566_v53 = vshll.u32 %v18516_v0, 16  ;;  %v18554_v47 = vsel %vm3274_vm4, %v18510_v46, %v3533_v35  ;;  %v15734_v15 = vpop.f32.mrf.mxu1  ;;  %v4958_v13 = vld [vmem:[#allocation3 + $0xf0] sm:$0xf] }
 0x1f0   : > { %v5373_v8 = vsel %vm3274_vm4, %v18489_v27, %v5372_v58  ;;  %2107 = vst.msk [vmem:[#allocation2 + $0x3e8] sm:$0xff] %vm1981_vm3, %v1978_v21  ;;  %21448 = vst [vmem:[#allocation23_spill] sm:$0xff] %v18554_v47  ;;  %v3538_v14 = vrot.slane %v3536_v50, 3  ;;  %v3541_v9 = vrot.slane %v3539_v43, 4  ;;  %v2232_v27 = vld [vmem:[#allocation2 + $0x3d0] ss:$2 sm:$0xff]  ;;  %v14172_v43 = vcombine.low %v2685_v59, %v18502_v57 }
 0x1f1   : > { %15970 = vmatmul.mubr.msk.bf16.gmra.mxu0 %vm1981_vm3, %v5373_v8  ;;  %v5382_v5 = vsel %vm3274_vm4, %v5372_v58, %v18544_v16  ;;  %v2230_v0 = vld [vmem:[#allocation2 + $0x3c0] ss:$2 sm:$0xff]  ;;  %v2358_v4 = vld [vmem:[#allocation2 + $0x3c1] ss:$2 sm:$0xff]  ;;  %v18559_v1 = vrot.slane %v3563_v63, 3  ;;  %v18561_v45 = vrot.slane %v3566_v53, 4  ;;  %v2426_v54 = vmax.f32 %v2232_v27, %v2360_v38 }
 0x1f2   : > { %15973 = vmatprep.mubr.msk.bf16.mxu0 %vm1981_vm3, %v5382_v5  ;;  %v3542_v19 = vor.u32 %v3541_v9, %v3538_v14  ;;  %v2425_v58 = vmax.f32 %v2230_v0, %v2358_v4  ;;  %v14538_v47 = vcombine.low %v7316_v20, %v7317_v52  ;;  %v7322_v52 = vld [vmem:[#allocation3 + $0x58] sm:$0xf]  ;;  %v7323_v20 = vld [vmem:[#allocation3 + $0x5c] sm:$0xf] }
 0x1f4   : > { %v2684_v34 = vld [vmem:[#allocation3 + $0xf8] sm:$0xf]  ;;  %v18564_v7 = vsel %vm3274_vm4, %v3533_v35, %v3542_v19 }
 0x1f5   : > { %v4960_v46 = vld [vmem:[#allocation3 + $0xf8] sm:$0xf]  ;;  %v14236_v23 = vcombine.low %v2684_v34, %v2685_v59  ;;  %21449 = vst [vmem:[#allocation24_spill] sm:$0xff] %v18564_v7  ;;  %v7351_v7 = vld [vmem:[#allocation3 + $0xcc] sm:$0xf] }
 0x1f6   : > { %v14366_v2 = vcombine.low %v4960_v46, %v4961_v25  ;;  %v2236_v3 = vld [vmem:[#allocation2 + $0x3f0] ss:$2 sm:$0xff]  ;;  %v2364_v21 = vld [vmem:[#allocation2 + $0x3f1] ss:$2 sm:$0xff]  ;;  %v18568_v25 = vpop.f32.mrf.mxu1 }
 0x1f7   : > { %v2683_v50 = vld [vmem:[#allocation3 + $0xf4] sm:$0xf]  ;;  %v2428_v8 = vmax.f32 %v2236_v3, %v2364_v21  ;;  %v2234_v5 = vld [vmem:[#allocation2 + $0x3e0] ss:$2 sm:$0xff]  ;;  %v2362_v27 = vld [vmem:[#allocation2 + $0x3e1] ss:$2 sm:$0xff] }
 0x1f8   : > { %v14171_v63 = vcombine.low %v2683_v50, %v2684_v34  ;;  %v14235_v53 = vcombine.low %v18500_v49, %v2683_v50  ;;  %v4959_v14 = vld [vmem:[#allocation3 + $0xf4] sm:$0xf]  ;;  %v5393_v9 = vshrl.u32 %v14366_v2, 16  ;;  %v5396_v15 = vshll.u32 %v14366_v2, 16  ;;  %21450 = vst [vmem:[#allocation25_spill] sm:$0xff] %v18568_v25 }
 0x1f9   : > { %v14365_v38 = vcombine.low %v4958_v13, %v4959_v14  ;;  %v3554_v35 = vshrl.u32 %v14236_v23, 16  ;;  %v2460_v46 = vmax.f32 %v2426_v54, %v2428_v8  ;;  %v2427_v0 = vmax.f32 %v2234_v5, %v2362_v27  ;;  %v7312_v25 = vld [vmem:[#allocation3 + $0x30] sm:$0xf] }
 0x1fa   : > { %15783 = vmatprep.mubr.msk.bf16.mxu1 %vm1981_vm3, %v14171_v63  ;;  %v3545_v4 = vshrl.u32 %v14235_v53, 16  ;;  %v3548_v31 = vshll.u32 %v14235_v53, 16  ;;  %v5395_v49 = vrot.slane %v5393_v9, 3  ;;  %v5398_v34 = vrot.slane %v5396_v15, 4  ;;  %v15737_v8 = vpop.f32.mrf.mxu1 }
 0x1fb   : > { %15784 = vmatmul.mubr.msk.bf16.gmra.mxu1 %vm1981_vm3, %v14172_v43  ;;  %v5384_v57 = vshrl.u32 %v14365_v38, 16  ;;  %v5387_v59 = vshll.u32 %v14365_v38, 16  ;;  %v15073_v3 = vpack.c.bf16 %v2460_v46, %v2460_v46  ;;  %v2459_v21 = vmax.f32 %v2425_v58, %v2427_v0 }
 0x1fc   : > { %v3547_v50 = vrot.slane %v3545_v4, 3  ;;  %v3550_v13 = vrot.slane %v3548_v31, 4  ;;  %15789 = vmatprep.mubr.msk.bf16.mxu1 %vm1981_vm3, %v18204_v11  ;;  %v3556_v14 = vrot.slane %v3554_v35, 3  ;;  %v3557_v43 = vshll.u32 %v14236_v23, 16  ;;  %v17151_v23 = vld [vmem:[%s21439_s3 + $0x8] sm:$0xf]  ;;  %v18588_v35 = vpop.f32.mrf.mxu1 }
 0x1fd   : > { %v5386_v2 = vrot.slane %v5384_v57, 3  ;;  %v5389_v54 = vrot.slane %v5387_v59, 4  ;;  %2621 = vst.msk [vmem:[#allocation3 + $0x108] sm:$0xf] %vm521_vm1, %v15073_v3  ;;  %v15072_v63 = vpack.c.bf16 %v2459_v21, %v2459_v21  ;;  %v5399_v27 = vor.u32 %v5398_v34, %v5395_v49  ;;  %21452 = vst [vmem:[#allocation27_spill] sm:$0xff] %v18588_v35 }
 0x1fe   : > { %v3551_v53 = vor.u32 %v3550_v13, %v3547_v50  ;;  %v3559_v31 = vrot.slane %v3557_v43, 4  ;;  %v3569_v11 = vor.u32 %v18561_v45, %v18559_v1  ;;  %v4547_v15 = vsel %vm2946_vm2, %v17151_v23, 0  ;;  %v14402_v1 = vld [vmem:[%s21439_s3 + $0x10] sm:$0xf]  ;;  %v4962_v4 = vld [vmem:[#allocation3 + $0x100] sm:$0xf]  ;;  %v15738_v49 = vpop.f32.mrf.mxu1 }
 0x1ff   : > { %v5390_v5 = vor.u32 %v5389_v54, %v5386_v2  ;;  %2620 = vst.msk [vmem:[#allocation3 + $0x104] sm:$0xf] %vm521_vm1, %v15072_v63  ;;  %v16838_v13 = vld [vmem:[#allocation3 + $0x14] sm:$0xff]   ;;  %v7311_v35 = vld [vmem:[#allocation3 + $0x2c] sm:$0xf] }
 0x200   : > { %v18577_v58 = vsel %vm3274_vm4, %v3542_v19, %v3551_v53  ;;  %v4966_v19 = vld [vmem:[#allocation3 + $0x110] sm:$0xf]  ;;  %v3560_v46 = vor.u32 %v3559_v31, %v3556_v14  ;;  %v18606_v54 = vpop.f32.mrf.mxu1 }
 0x201   : > { %21451 = vst [vmem:[#allocation26_spill] sm:$0xff] %v18577_v58  ;;  %v5391_v9 = vsel %vm3274_vm4, %v18544_v16, %v5390_v5  ;;  %v5400_v38 = vsel %vm3274_vm4, %v5390_v5, %v5399_v27  ;;  %v4965_v16 = vld [vmem:[#allocation3 + $0x10c] sm:$0xf]  ;;  %v14369_v59 = vcombine.low %v4966_v19, %v4966_v19  ;;  %21455 = vst [vmem:[#allocation30_spill] sm:$0xff] %v18606_v54  ;;  %v7310_v54 = vld [vmem:[#allocation3 + $0x28] sm:$0xf] }
 0x202   : > { %15974 = vmatmul.mubr.msk.bf16.gmra.mxu0 %vm1981_vm3, %v5391_v9  ;;  %v18600_v45 = vsel %vm3274_vm4, %v3551_v53, %v3560_v46  ;;  %v18603_v0 = vsel %vm3274_vm4, %v3560_v46, %v3569_v11  ;;  %v15923_v11 = vpop.f32.mrf.mxu0  ;;  %v16839_v9 = vld [vmem:[#allocation3 + $0x1c] sm:$0xff]  }
 0x203   : > { %15977 = vmatprep.mubr.msk.bf16.mxu0 %vm1981_vm3, %v5400_v38  ;;  %15790 = vmatmul.mubr.msk.bf16.vlgmr.msra.gmra.mxu1 %vm1981_vm3, %v17876_v36  ;;  %21453 = vst [vmem:[#allocation28_spill] sm:$0xff] %v18600_v45  ;;  %21454 = vst [vmem:[#allocation29_spill] sm:$0xff] %v18603_v0  ;;  %v5420_v2 = vshrl.u32 %v14369_v59, 16  ;;  %v6599_v38 = vshll.u32 %v16838_v13, 16  ;;  %v18636_v11 = vld [vmem:[#allocation3 + $0x3c] sm:$0xff]  }
 0x204   : > { %15854 = vmatpush3.bf16.msra.mxu1 %v4547_v15  ;;  %15793 = vmatprep.mubr.msk.bf16.mxu1 %vm1981_vm3, %v17903_v10  ;;  %v4964_v57 = vld [vmem:[#allocation3 + $0x108] sm:$0xf]  ;;  %v5423_v10 = vshll.u32 %v14369_v59, 16 }
 0x205   : > { %16626 = vmatprep.subr.msk.bf16.mxu1 %vm2946_vm2, %v14402_v1  ;;  %v14368_v34 = vcombine.low %v4964_v57, %v4965_v16  ;;  %v5422_v19 = vrot.slane %v5420_v2, 3  ;;  %v16840_v57 = vld [vmem:[#allocation3 + $0x24] sm:$0xff]  }
 0x206   : > { %v4963_v3 = vld [vmem:[#allocation3 + $0x104] sm:$0xf]  ;;  %v5425_v46 = vrot.slane %v5423_v10, 4  ;;  %v7350_v0 = vld [vmem:[#allocation3 + $0xc8] sm:$0xf] }
 0x207   : > { %v14367_v36 = vcombine.low %v4962_v4, %v4963_v3  ;;  %v5411_v21 = vshrl.u32 %v14368_v34, 16  ;;  %v5414_v50 = vshll.u32 %v14368_v34, 16  ;;  %v18614_v4 = vpop.f32.mrf.mxu0  ;;  %v6597_v34 = vshrl.u32 %v16838_v13, 16 }
 0x208   : > { %21456 = vst [vmem:[#allocation31_spill] sm:$0xff] %v18614_v4  ;;  %v5426_v49 = vor.u32 %v5425_v46, %v5422_v19  ;;  %v18642_v46 = vld [vmem:[#allocation3 + $0x4c] sm:$0xff]  }
 0x209   : > { %v5402_v8 = vshrl.u32 %v14367_v36, 16  ;;  %v5405_v63 = vshll.u32 %v14367_v36, 16  ;;  %v5413_v53 = vrot.slane %v5411_v21, 3  ;;  %v5416_v14 = vrot.slane %v5414_v50, 4  ;;  %v15741_v23 = vpop.f32.mrf.mxu1  ;;  %v16841_v50 = vld [vmem:[#allocation3 + $0x2c] sm:$0xff]  }
 0x20a   : > { %v6612_v21 = vshll.u32 %v16840_v57, 16 }
 0x20b   : > { %15794 = vmatmul.mubr.msk.bf16.gmra.mxu1 %vm1981_vm3, %v17942_v18  ;;  %v5404_v43 = vrot.slane %v5402_v8, 3  ;;  %v5407_v5 = vrot.slane %v5405_v63, 4  ;;  %v5417_v31 = vor.u32 %v5416_v14, %v5413_v53  ;;  %v6601_v18 = vrot.slane %v6599_v38, 1  ;;  %v18617_v59 = vpop.f32.mrf.mxu1  ;;  %v16842_v14 = vld [vmem:[#allocation3 + $0x34] sm:$0xff]  }
 0x20c   : > { %15797 = vmatprep.mubr.msk.bf16.mxu1 %vm1981_vm3, %v17966_v6  ;;  %v6604_v6 = vshll.u32 %v16839_v9, 16  ;;  %21457 = vst [vmem:[#allocation32_spill] sm:$0xff] %v18617_v59  ;;  %v6608_v8 = vshrl.u32 %v16839_v9, 16  ;;  %v6614_v13 = vrot.slane %v6612_v21, 1  ;;  %v6620_v53 = vshll.u32 %v16841_v50, 16 }
 0x20d   : > { %v5408_v15 = vor.u32 %v5407_v5, %v5404_v43  ;;  %v6602_v3 = vor.u32 %v6601_v18, %v6597_v34  ;;  %v15742_v2 = vpop.f32.mrf.mxu1  ;;  %v5427_v10 = vsel %vm3274_vm4, %v5417_v31, %v5426_v49  ;;  %v6616_v5 = vshrl.u32 %v16840_v57, 16  ;;  %v14599_v9 = vld [vmem:[%s21439_s3 + $0x1c] sm:$0xf]  ;;  %v16844_v57 = vld [vmem:[#allocation3 + $0x44] sm:$0xff]  }
 0x20e   : > { %v6606_v36 = vrot.slane %v6604_v6, 1  ;;  %v6622_v23 = vrot.slane %v6620_v53, 1  ;;  %16629 = vmatprep.subr.msk.bf16.mxu0 %vm2946_vm2, %v14599_v9  ;;  %v6636_v6 = vshll.u32 %v18636_v11, 16  ;;  %v6632_v2 = vshrl.u32 %v16842_v14, 16  ;;  %v7342_v59 = vld [vmem:[#allocation3 + $0xa8] sm:$0xf] }
 0x20f   : > { %v5409_v1 = vsel %vm3274_vm4, %v5399_v27, %v5408_v15  ;;  %v5418_v16 = vsel %vm3274_vm4, %v5408_v15, %v5417_v31  ;;  %v15924_v27 = vpop.f32.mrf.mxu0  ;;  %v6618_v38 = vor.u32 %v6616_v5, %v6614_v13  ;;  %v6628_v15 = vshll.u32 %v16842_v14, 16  ;;  %v18670_v5 = vld [vmem:[#allocation3 + $0x64] sm:$0xff]  }
 0x210   : > { %15978 = vmatmul.mubr.msk.bf16.gmra.mxu0 %vm1981_vm3, %v5409_v1  ;;  %v6610_v31 = vor.u32 %v6608_v8, %v6606_v36  ;;  %v18662_v8 = vld [vmem:[#allocation3 + $0x7c] sm:$0xff]   ;;  %v6644_v53 = vshll.u32 %v16844_v57, 16  ;;  %v7333_v14 = vld [vmem:[#allocation3 + $0x84] sm:$0xf] }
 0x211   : > { %15981 = vmatprep.mubr.msk.bf16.mxu0 %vm1981_vm3, %v5418_v16  ;;  %v18625_v63 = vpop.f32.mrf.mxu0  ;;  %v6624_v16 = vshrl.u32 %v16841_v50, 16  ;;  %v6623_v49 = vsel %vm4189_vm5, %v6618_v38, %v6622_v23  ;;  %v6630_v34 = vrot.slane %v6628_v15, 1  ;;  %v6640_v15 = vshrl.u32 %v18636_v11, 16 }
 0x212   : > { %21458 = vst [vmem:[#allocation33_spill] sm:$0xff] %v18625_v63  ;;  %v6615_v18 = vsel %vm4189_vm5, %v6610_v31, %v6614_v13  ;;  %v6638_v13 = vrot.slane %v6636_v6, 1  ;;  %v7334_v31 = vld [vmem:[#allocation3 + $0x88] sm:$0xf]  ;;  %v7337_v63 = vld [vmem:[#allocation3 + $0x94] sm:$0xf] }
 0x213   : > { %15798 = vmatmul.mubr.msk.bf16.gmra.mxu1 %vm1981_vm3, %v17992_v42  ;;  %v6607_v42 = vsel %vm4189_vm5, %v6602_v3, %v6606_v36  ;;  %v15927_v43 = vpop.f32.mrf.mxu0  ;;  %v6652_v3 = vshll.u32 %v18642_v46, 16  ;;  %v6626_v50 = vor.u32 %v6624_v16, %v6622_v23  ;;  %v7335_v23 = vld [vmem:[#allocation3 + $0x8c] sm:$0xf]  ;;  %v6656_v16 = vshrl.u32 %v18642_v46, 16 }
 0x214   : > { %15801 = vmatprep.mubr.msk.bf16.mxu1 %vm1981_vm3, %v18016_v62  ;;  %v18629_v62 = vpop.f32.mrf.mxu1  ;;  %v18668_v43 = vld [vmem:[#allocation3 + $0x54] sm:$0xff]   ;;  %v18685_v11 = vcombine.low %v7334_v31, %v7335_v23  ;;  %v7339_v23 = vld [vmem:[#allocation3 + $0x9c] sm:$0xf]  ;;  %v6704_v4 = vshrl.u32 %v18662_v8, 16 }
 0x215   : > { %21459 = vst [vmem:[#allocation34_spill] sm:$0xff] %v18629_v62  ;;  %v18646_v1 = vpop.f32.mrf.mxu0 }
 0x216   : > { %21460 = vst [vmem:[#allocation35_spill] sm:$0xff] %v18646_v1 }
 0x217   : > { %v15928_v21 = vpop.f32.mrf.mxu0 }
 0x218   : > { %15982 = vmatmul.mubr.msk.bf16.gmra.mxu0 %vm1981_vm3, %v5427_v10  ;;  %v18660_v10 = vld [vmem:[#allocation3 + $0x6c] sm:$0xff]  }
 0x219   : > { %16053 = vmatprep.mubr.msk.bf16.mxu0 %vm1981_vm3, %v6607_v42  ;;  %v15745_v19 = vpop.f32.mrf.mxu1  ;;  %v18664_v42 = vld [vmem:[#allocation3 + $0x8c] sm:$0xff]   ;;  %v6684_v6 = vshll.u32 %v18660_v10, 16 }
 0x21a   : > { %v6654_v19 = vrot.slane %v6652_v3, 1  ;;  %v6716_v21 = vshll.u32 %v18664_v42, 16 }
 0x21b   : > { %15802 = vmatmul.mubr.msk.bf16.gmra.mxu1 %vm1981_vm3, %v18047_v56  ;;  %v18644_v56 = vld [vmem:[#allocation3 + $0x5c] sm:$0xff]   ;;  %v18653_v27 = vpop.f32.mrf.mxu1 }
 0x21c   : > { %15805 = vmatprep.mubr.msk.bf16.mxu1 %vm1981_vm3, %v18071_v61  ;;  %v8417_v61 = vsel %vm2946_vm2, %v14599_v9, 0  ;;  %21461 = vst [vmem:[#allocation36_spill] sm:$0xff] %v18653_v27  ;;  %v6668_v36 = vshll.u32 %v18644_v56, 16  ;;  %v6634_v9 = vor.u32 %v6632_v2, %v6630_v34  ;;  %v6646_v2 = vrot.slane %v6644_v53, 1 }
 0x21d   : > { %v15746_v38 = vpop.f32.mrf.mxu1  ;;  %v6642_v53 = vor.u32 %v6640_v15, %v6638_v13  ;;  %v6672_v31 = vshrl.u32 %v18644_v56, 16  ;;  %v18710_v15 = vld [vmem:[#allocation3 + $0x9c] sm:$0xff]  }
 0x21e   : > { %v6660_v38 = vshll.u32 %v18668_v43, 16  ;;  %v6639_v3 = vsel %vm4189_vm5, %v6634_v9, %v6638_v13  ;;  %v18698_v9 = vrot.slane %v6684_v6, 1  ;;  %v18708_v13 = vrot.slane %v6716_v21, 1  ;;  %v7340_v21 = vld [vmem:[#allocation3 + $0xa0] sm:$0xf] }
 0x21f   : > { %v6647_v62 = vsel %vm4189_vm5, %v6642_v53, %v6646_v2 }
 0x220   : > { %16054 = vmatmul.mubr.msk.bf16.vlgmr.msra.gmra.mxu0 %vm1981_vm3, %v6615_v18  ;;  %v6631_v18 = vsel %vm4189_vm5, %v6626_v50, %v6630_v34  ;;  %v6676_v34 = vshll.u32 %v18670_v5, 16  ;;  %v18692_v50 = vpop.f32.mrf.mxu1  ;;  %v6662_v56 = vrot.slane %v6660_v38, 1  ;;  %v6680_v38 = vshrl.u32 %v18670_v5, 16  ;;  %v7347_v5 = vld [vmem:[#allocation3 + $0xbc] sm:$0xf] }
 0x221   : > { %16057 = vmatprep.mubr.msk.bf16.mxu0 %vm1981_vm3, %v6623_v49  ;;  %16184 = vmatpush3.bf16.msra.mxu0 %v8417_v61  ;;  %v18674_v61 = vrot.slane %v6668_v36, 1  ;;  %v6700_v49 = vshll.u32 %v18662_v8, 16  ;;  %v18690_v36 = vld [vmem:[#allocation3 + $0x74] sm:$0xff]   ;;  %21463 = vst [vmem:[#allocation38_spill] sm:$0xff] %v18692_v50  ;;  %v18704_v50 = vld [vmem:[#allocation3 + $0x84] sm:$0xff]   ;;  %v6720_v8 = vshrl.u32 %v18664_v42, 16 }
 0x222   : > { %v7343_v42 = vld [vmem:[#allocation3 + $0xac] sm:$0xf]  ;;  %v6696_v53 = vshrl.u32 %v18690_v36, 16 }
 0x223   : > { %15806 = vmatmul.mubr.msk.bf16.gmra.mxu1 %vm1981_vm3, %v18097_v39  ;;  %v7332_v39 = vld [vmem:[#allocation3 + $0x80] sm:$0xf] }
 0x224   : > { %15809 = vmatprep.mubr.msk.bf16.mxu1 %vm1981_vm3, %v18121_v44  ;;  %v18676_v44 = vpop.f32.mrf.mxu0  ;;  %v18683_v1 = vcombine.low %v7332_v39, %v7333_v14  ;;  %v6648_v39 = vshrl.u32 %v16844_v57, 16  ;;  %v7338_v14 = vld [vmem:[#allocation3 + $0x98] sm:$0xf] }
 0x225   : > { %21462 = vst [vmem:[#allocation37_spill] sm:$0xff] %v18676_v44  ;;  %v7336_v44 = vld [vmem:[#allocation3 + $0x90] sm:$0xf]  ;;  %v18718_v27 = vcombine.low %v7338_v14, %v7339_v23 }
 0x226   : > { %v15931_v46 = vpop.f32.mrf.mxu0  ;;  %v6650_v57 = vor.u32 %v6648_v39, %v6646_v2  ;;  %v7341_v39 = vld [vmem:[#allocation3 + $0xa4] sm:$0xf] }
 0x227   : > { %v18701_v46 = vrot.slane %v6700_v49, 1  ;;  %v6692_v49 = vshll.u32 %v18690_v36, 16 }
 0x228   : > { %16058 = vmatmul.mubr.msk.bf16.gmra.mxu0 %vm1981_vm3, %v6631_v18  ;;  %v6688_v18 = vshrl.u32 %v18660_v10, 16  ;;  %v18714_v6 = vpop.f32.mrf.mxu0  ;;  %v6678_v10 = vrot.slane %v6676_v34, 1  ;;  %v6708_v34 = vshll.u32 %v18704_v50, 16  ;;  %v6655_v14 = vsel %vm4189_vm5, %v6650_v57, %v6654_v19  ;;  %v7345_v57 = vld [vmem:[#allocation3 + $0xb4] sm:$0xf] }
 0x229   : > { %16061 = vmatprep.mubr.msk.bf16.mxu0 %vm1981_vm3, %v6639_v3  ;;  %21464 = vst [vmem:[#allocation39_spill] sm:$0xff] %v18714_v6  ;;  %v15749_v3 = vpop.f32.mrf.mxu1  ;;  %v18725_v6 = vld [vmem:[#allocation3 + $0x94] sm:$0xff]  }
 0x22a   : > { %v15932_v3 = vpop.f32.mrf.mxu0  ;;  %v6682_v2 = vor.u32 %v6680_v38, %v6678_v10  ;;  %v18741_v38 = vcombine.low %v7342_v59, %v7343_v42  ;;  %v6690_v36 = vor.u32 %v6688_v18, %v18698_v9  ;;  %v7320_v18 = vld [vmem:[#allocation3 + $0x50] sm:$0xf] }
 0x22b   : > { %15810 = vmatmul.mubr.msk.bf16.gmra.mxu1 %vm1981_vm3, %v18152_v28  ;;  %v18712_v28 = vcombine.low %v7336_v44, %v7337_v63  ;;  %v6658_v63 = vor.u32 %v6656_v16, %v6654_v19  ;;  %v6674_v44 = vor.u32 %v6672_v31, %v18674_v61  ;;  %v18731_v16 = vrot.slane %v6692_v49, 1  ;;  %v18734_v31 = vpop.f32.mrf.mxu1  ;;  %v18739_v3 = vld [vmem:[#allocation3 + $0x24] sm:$0xf]  ;;  %v7346_v49 = vld [vmem:[#allocation3 + $0xb8] sm:$0xf] }
 0x22c   : > { %15813 = vmatprep.mubr.msk.bf16.mxu1 %vm1981_vm3, %v18177_v17  ;;  %v6664_v17 = vshrl.u32 %v18668_v43, 16  ;;  %21465 = vst [vmem:[#allocation40_spill] sm:$0xff] %v18734_v31  ;;  %v18736_v19 = vcombine.low %v7340_v21, %v7341_v39  ;;  %21466 = vst [vmem:[#allocation41_spill] sm:$0xff] %v18739_v3  ;;  %v6706_v43 = vor.u32 %v6704_v4, %v18701_v46  ;;  %v6710_v21 = vrot.slane %v6708_v34, 1  ;;  %v7314_v31 = vld [vmem:[#allocation3 + $0x38] sm:$0xf]  ;;  %v18758_v45 = vpop.f32.mrf.mxu0 }
 0x22d   : > { %v6724_v39 = vshll.u32 %v18725_v6, 16  ;;  %v6663_v59 = vsel %vm4189_vm5, %v6658_v63, %v6662_v56  ;;  %v7321_v4 = vld [vmem:[#allocation3 + $0x54] sm:$0xf]  ;;  %v18756_v34 = vcombine.low %v7344_v29, %v7345_v57  ;;  %21467 = vst [vmem:[#allocation42_spill] sm:$0xff] %v18758_v45  ;;  %v18761_v58 = vsel %vm4189_vm5, %v6674_v44, %v6678_v10  ;;  %v7348_v63 = vld [vmem:[#allocation3 + $0xc0] sm:$0xf] }
 0x22e   : > { %v6666_v23 = vor.u32 %v6664_v17, %v6662_v56  ;;  %v7308_v17 = vld [vmem:[#allocation3 + $0x20] sm:$0x8]  ;;  %v6698_v56 = vor.u32 %v6696_v53, %v18731_v16  ;;  %v6712_v29 = vshrl.u32 %v18704_v50, 16  ;;  %v18771_v57 = vcombine.low %v7310_v54, %v7311_v35  ;;  %v7325_v44 = vld [vmem:[#allocation3 + $0x64] sm:$0xf]  ;;  %v15935_v51 = vpop.f32.mrf.mxu0 }
 0x22f   : > { %v7324_v10 = vld [vmem:[#allocation3 + $0x60] sm:$0xf]  ;;  %v18773_v12 = vrot.slane %v6724_v39, 1  ;;  %v7318_v53 = vld [vmem:[#allocation3 + $0x48] sm:$0xf] }
 0x230   : > { %16062 = vmatmul.mubr.msk.bf16.gmra.mxu0 %vm1981_vm3, %v6647_v62  ;;  %v7313_v62 = vld [vmem:[#allocation3 + $0x34] sm:$0xf]  ;;  %v6671_v42 = vsel %vm4189_vm5, %v6666_v23, %v18674_v61  ;;  %v15750_v61 = vpop.f32.mrf.mxu1  ;;  %v7349_v23 = vld [vmem:[#allocation3 + $0xc4] sm:$0xf]  ;;  %v7354_v50 = vld [vmem:[#allocation3 + $0xd8] sm:$0xf]  ;;  %v6714_v35 = vor.u32 %v6712_v29, %v6710_v21 }
 0x231   : > { %16065 = vmatprep.mubr.msk.bf16.mxu0 %vm1981_vm3, %v6655_v14  ;;  %v7315_v14 = vld [vmem:[#allocation3 + $0x3c] sm:$0xf]  ;;  %v14536_v45 = vcombine.low %v7312_v25, %v7313_v62  ;;  %v14540_v61 = vcombine.low %v7320_v18, %v7321_v4  ;;  %v7352_v25 = vld [vmem:[#allocation3 + $0xd0] sm:$0xf]  ;;  %v18783_v51 = vcombine.low %v7348_v63, %v7349_v23  ;;  %v18785_v62 = vcombine.low %v7350_v0, %v7351_v7  ;;  %v7326_v4 = vld [vmem:[#allocation3 + $0x68] sm:$0xf] }
 0x232   : > { %v18781_v54 = vcombine.low %v7314_v31, %v7315_v14  ;;  %v7355_v39 = vld [vmem:[#allocation3 + $0xdc] sm:$0xf]  ;;  %v18794_v18 = vsel %vm4189_vm5, %v6698_v56, %v18701_v46  ;;  %v18797_v31 = vsel %vm4189_vm5, %v6706_v43, %v6710_v21  ;;  %v18799_v14 = vpop.f32.mrf.mxu1  ;;  %v7328_v7 = vld [vmem:[#allocation3 + $0x70] sm:$0xf]  ;;  %v18801_v0 = vcombine.low %v7324_v10, %v7325_v44  ;;  %v7329_v63 = vld [vmem:[#allocation3 + $0x74] sm:$0xf] }
 0x233   : > { %15814 = vmatmul.mubr.msk.bf16.gmra.mxu1 %vm1981_vm3, %v18224_v40  ;;  %v18754_v40 = vor.u32 %v6720_v8, %v18708_v13  ;;  %v18768_v8 = vcombine.low %v7346_v49, %v7347_v5  ;;  %v18779_v5 = vcombine.low %v7308_v17, %v18739_v3  ;;  %v7319_v49 = vld [vmem:[#allocation3 + $0x4c] sm:$0xf]  ;;  %v18790_v17 = vsel %vm4189_vm5, %v6690_v36, %v18731_v16  ;;  %v18804_v3 = vpop.f32.mrf.mxu0 }
 0x234   : > { %15817 = vmatprep.mubr.msk.bf16.mxu1 %vm1981_vm3, %v18245_v60  ;;  %v18765_v60 = vsel %vm4189_vm5, %v6682_v2, %v18698_v9  ;;  %v6728_v9 = vshrl.u32 %v18725_v6, 16  ;;  %v18776_v2 = vld [vmem:[#allocation3 + $0xa4] sm:$0xff]   ;;  %v7353_v6 = vld [vmem:[#allocation3 + $0xd4] sm:$0xf]  ;;  %21468 = vst [vmem:[#allocation43_spill] sm:$0xff] %v18799_v14  ;;  %v7559_v23 = vshll.u32 %v14536_v45, 16  ;;  %v18810_v56 = vcombine.low %v7354_v50, %v7355_v39 }
 0x235   : > { %v7574_v16 = vshrl.u32 %v14538_v47, 16  ;;  %v7577_v36 = vshll.u32 %v14538_v47, 16  ;;  %v7327_v29 = vld [vmem:[#allocation3 + $0x6c] sm:$0xf]  ;;  %21469 = vst [vmem:[#allocation44_spill] sm:$0xff] %v18804_v3  ;;  %v7592_v46 = vshrl.u32 %v14540_v61, 16  ;;  %v18808_v21 = vcombine.low %v7352_v25, %v7353_v6 }
 0x236   : > { %v7595_v43 = vshll.u32 %v14540_v61, 16  ;;  %21470 = vst [vmem:[#allocation45_spill] sm:$0xff] %v18810_v56  ;;  %v21471_v47 = vshll.u32 %v18710_v15, 16  ;;  %v18822_v10 = vcombine.low %v7318_v53, %v7319_v49  ;;  %v18827_v44 = vor.u32 %v6728_v9, %v18773_v12  ;;  %v7359_v61 = vld [vmem:[#allocation3 + $0xec] sm:$0xf] }
 0x237   : > { %v18830_v25 = vcombine.low %v7322_v52, %v7323_v20  ;;  %v7576_v6 = vrot.slane %v7574_v16, 3  ;;  %v7579_v39 = vrot.slane %v7577_v36, 4  ;;  %v18834_v3 = vrot.slane %v7592_v46, 3 }
 0x238   : > { %16066 = vmatmul.mubr.msk.bf16.gmra.mxu0 %vm1981_vm3, %v6663_v59  ;;  %v7556_v59 = vshrl.u32 %v14536_v45, 16  ;;  %v18816_v45 = vsel %vm4189_vm5, %v6714_v35, %v18708_v13  ;;  %v7561_v35 = vrot.slane %v7559_v23, 4  ;;  %v18836_v53 = vrot.slane %v7595_v43, 4 }
 0x239   : > { %16069 = vmatprep.mubr.msk.bf16.mxu0 %vm1981_vm3, %v6671_v42  ;;  %v18820_v42 = vrot.slane %v21471_v47, 1  ;;  %v15753_v50 = vpop.f32.mrf.mxu1  ;;  %v15936_v47 = vpop.f32.mrf.mxu0  ;;  %v7610_v49 = vshrl.u32 %v18801_v0, 16  ;;  %v7613_v9 = vshll.u32 %v18801_v0, 16  ;;  %v7547_v16 = vshrl.u32 %v18771_v57, 16 }
 0x23a   : > { %v7558_v13 = vrot.slane %v7556_v59, 3  ;;  %v7542_v59 = vshll.u32 %v18779_v5, 16  ;;  %v7550_v36 = vshll.u32 %v18771_v57, 16  ;;  %v7565_v0 = vshrl.u32 %v18781_v54, 16  ;;  %v7358_v47 = vld [vmem:[#allocation3 + $0xe8] sm:$0xf] }
 0x23b   : > { %15818 = vmatmul.mubr.msk.bf16.gmra.mxu1 %vm1981_vm3, %v18256_v30  ;;  %v18824_v30 = vcombine.low %v7328_v7, %v7329_v63  ;;  %v7330_v7 = vld [vmem:[#allocation3 + $0x78] sm:$0xf]  ;;  %v7331_v63 = vld [vmem:[#allocation3 + $0x7c] sm:$0xf]  ;;  %v18846_v23 = vpop.f32.mrf.mxu1  ;;  %v7646_v46 = vshrl.u32 %v18683_v1, 16  ;;  %v7664_v56 = vshrl.u32 %v18712_v28, 16 }
 0x23c   : > { %15821 = vmatprep.mubr.msk.bf16.mxu1 %vm1981_vm3, %v18291_v33  ;;  %v18832_v33 = vcombine.low %v7326_v4, %v7327_v29  ;;  %v7539_v4 = vshrl.u32 %v18779_v5, 16  ;;  %21472 = vst [vmem:[#allocation46_spill] sm:$0xff] %v18846_v23  ;;  %v7568_v29 = vshll.u32 %v18781_v54, 16  ;;  %v7649_v5 = vshll.u32 %v18683_v1, 16 }
 0x23d   : > { %v7628_v52 = vshrl.u32 %v18824_v30, 16  ;;  %v7631_v20 = vshll.u32 %v18824_v30, 16  ;;  %v7544_v30 = vrot.slane %v7542_v59, 4  ;;  %v7562_v50 = vor.u32 %v7561_v35, %v7558_v13  ;;  %v7356_v13 = vld [vmem:[#allocation3 + $0xe0] sm:$0xf] }
 0x23e   : > { %v7541_v43 = vrot.slane %v7539_v4, 3  ;;  %v18860_v57 = vcombine.low %v7330_v7, %v7331_v63  ;;  %v7549_v54 = vrot.slane %v7547_v16, 3  ;;  %v7552_v23 = vrot.slane %v7550_v36, 4  ;;  %v7357_v35 = vld [vmem:[#allocation3 + $0xe4] sm:$0xf] }
 0x23f   : > { %v7567_v4 = vrot.slane %v7565_v0, 3  ;;  %v7570_v59 = vrot.slane %v7568_v29, 4  ;;  %v7580_v63 = vor.u32 %v7579_v39, %v7576_v6  ;;  %v7682_v16 = vshrl.u32 %v18736_v19, 16 }
 0x240   : > { %16070 = vmatmul.mubr.msk.bf16.gmra.mxu0 %vm1981_vm3, %v18761_v58  ;;  %v18856_v58 = vpop.f32.mrf.mxu0  ;;  %v7545_v1 = vor.u32 %v7544_v30, %v7541_v43  ;;  %v7553_v7 = vor.u32 %v7552_v23, %v7549_v54  ;;  %v18869_v36 = vcombine.low %v7356_v13, %v7357_v35  ;;  %v7612_v43 = vrot.slane %v7610_v49, 3 }
 0x241   : > { %16073 = vmatprep.mubr.msk.bf16.mxu0 %vm1981_vm3, %v18765_v60  ;;  %21473 = vst [vmem:[#allocation47_spill] sm:$0xff] %v18856_v58  ;;  %v18864_v60 = vcombine.low %v7358_v47, %v7359_v61  ;;  %v15754_v58 = vpop.f32.mrf.mxu1  ;;  %v7583_v61 = vshrl.u32 %v18822_v10, 16  ;;  %v7685_v0 = vshll.u32 %v18736_v19, 16  ;;  %v7586_v29 = vshll.u32 %v18822_v10, 16 }
 0x242   : > { %v15939_v14 = vpop.f32.mrf.mxu0  ;;  %v7630_v30 = vrot.slane %v7628_v52, 3  ;;  %v18878_v23 = vsel %vm3274_vm4, %v7553_v7, %v7562_v50  ;;  %v7633_v19 = vrot.slane %v7631_v20, 4  ;;  %v7648_v58 = vrot.slane %v7646_v46, 3 }
 0x243   : > { %15822 = vmatmul.mubr.msk.bf16.gmra.mxu1 %vm1981_vm3, %v18334_v32  ;;  %v7667_v32 = vshll.u32 %v18712_v28, 16  ;;  %v18874_v14 = vsel %vm3274_vm4, %v7545_v1, %v7553_v7  ;;  %v7615_v28 = vrot.slane %v7613_v9, 4  ;;  %v18887_v49 = vpop.f32.mrf.mxu1  ;;  %v7651_v47 = vrot.slane %v7649_v5, 4 }
 0x244   : > { %15825 = vmatprep.mubr.msk.bf16.mxu1 %vm1981_vm3, %v18355_v37  ;;  %v7571_v37 = vor.u32 %v7570_v59, %v7567_v4  ;;  %v18883_v39 = vpop.f32.mrf.mxu0  ;;  %v7666_v9 = vrot.slane %v7664_v56, 3  ;;  %v7585_v54 = vrot.slane %v7583_v61, 3  ;;  %v7687_v1 = vrot.slane %v7685_v0, 4 }
 0x245   : > { %21474 = vst [vmem:[#allocation48_spill] sm:$0xff] %v18883_v39  ;;  %v7669_v52 = vrot.slane %v7667_v32, 4  ;;  %v7588_v4 = vrot.slane %v7586_v29, 4  ;;  %v7598_v20 = vor.u32 %v18836_v53, %v18834_v3  ;;  %v7601_v46 = vshrl.u32 %v18830_v25, 16 }
 0x246   : > { %v18881_v6 = vsel %vm3274_vm4, %v7562_v50, %v7571_v37  ;;  %v18890_v10 = vsel %vm3274_vm4, %v7571_v37, %v7580_v63  ;;  %v7684_v50 = vrot.slane %v7682_v16, 3  ;;  %v7619_v56 = vshrl.u32 %v18832_v33, 16  ;;  %v15940_v59 = vpop.f32.mrf.mxu0 }
 0x247   : > { %v7622_v5 = vshll.u32 %v18832_v33, 16  ;;  %v7589_v32 = vor.u32 %v7588_v4, %v7585_v54  ;;  %v7616_v13 = vor.u32 %v7615_v28, %v7612_v43  ;;  %v7634_v35 = vor.u32 %v7633_v19, %v7630_v30 }
 0x248   : > { %16074 = vmatmul.mubr.msk.bf16.gmra.mxu0 %vm1981_vm3, %v18790_v17  ;;  %v7700_v17 = vshrl.u32 %v18756_v34, 16  ;;  %v7637_v7 = vshrl.u32 %v18860_v57, 16  ;;  %v7603_v16 = vrot.slane %v7601_v46, 3  ;;  %v7621_v53 = vrot.slane %v7619_v56, 3  ;;  %v18915_v30 = vpop.f32.mrf.mxu0 }
 0x249   : > { %16077 = vmatprep.mubr.msk.bf16.mxu0 %vm1981_vm3, %v18794_v18  ;;  %v7604_v18 = vshll.u32 %v18830_v25, 16  ;;  %v7624_v37 = vrot.slane %v7622_v5, 4  ;;  %v18910_v25 = vsel %vm3274_vm4, %v7589_v32, %v7598_v20  ;;  %v7640_v33 = vshll.u32 %v18860_v57, 16  ;;  %21475 = vst [vmem:[#allocation49_spill] sm:$0xff] %v18915_v30  ;;  %v18925_v57 = vld [vmem:[#allocation3 + $0xac] sm:$0xff]  }
 0x24a   : > { %v7639_v61 = vrot.slane %v7637_v7, 3  ;;  %v7655_v43 = vshrl.u32 %v18685_v11, 16  ;;  %v7658_v28 = vshll.u32 %v18685_v11, 16  ;;  %v7652_v54 = vor.u32 %v7651_v47, %v7648_v58  ;;  %v15943_v58 = vpop.f32.mrf.mxu0  ;;  %v7363_v47 = vld [vmem:[#allocation3 + $0xfc] sm:$0xf] }
 0x24b   : > { %15826 = vmatmul.mubr.msk.bf16.gmra.mxu1 %vm1981_vm3, %v18361_v48  ;;  %v15757_v48 = vpop.f32.mrf.mxu1  ;;  %v7606_v3 = vrot.slane %v7604_v18, 4  ;;  %v7625_v29 = vor.u32 %v7624_v37, %v7621_v53  ;;  %v7673_v4 = vshrl.u32 %v18718_v27, 16  ;;  %v7676_v46 = vshll.u32 %v18718_v27, 16  ;;  %v7362_v27 = vld [vmem:[#allocation3 + $0xf8] sm:$0xf] }
 0x24c   : > { %15829 = vmatprep.mubr.msk.bf16.mxu1 %vm1981_vm3, %v18381_v41  ;;  %v18907_v41 = vsel %vm3274_vm4, %v7580_v63, %v7589_v32  ;;  %v7642_v63 = vrot.slane %v7640_v33, 4  ;;  %v7703_v11 = vshll.u32 %v18756_v34, 16  ;;  %v7657_v59 = vrot.slane %v7655_v43, 3  ;;  %v7361_v53 = vld [vmem:[#allocation3 + $0xf4] sm:$0xf] }
 0x24d   : > { %v7607_v0 = vor.u32 %v7606_v3, %v7603_v16  ;;  %v18919_v19 = vpop.f32.mrf.mxu1  ;;  %v18935_v56 = vsel %vm3274_vm4, %v7616_v13, %v7625_v29  ;;  %v7660_v48 = vrot.slane %v7658_v28, 4  ;;  %v7670_v32 = vor.u32 %v7669_v52, %v7666_v9  ;;  %v7360_v3 = vld [vmem:[#allocation3 + $0xf0] sm:$0xf]  ;;  %v16858_v58 = vld [vmem:[#allocation3 + $0xb4] sm:$0xff]  }
 0x24e   : > { %v7643_v5 = vor.u32 %v7642_v63, %v7639_v61  ;;  %v7678_v7 = vrot.slane %v7676_v46, 4  ;;  %v7688_v33 = vor.u32 %v7687_v1, %v7684_v50  ;;  %v7691_v52 = vshrl.u32 %v18741_v38, 16 }
 0x24f   : > { %v18929_v18 = vsel %vm3274_vm4, %v7598_v20, %v7607_v0  ;;  %v18944_v20 = vcombine.low %v7362_v27, %v7363_v47  ;;  %v15758_v16 = vpop.f32.mrf.mxu1  ;;  %v7661_v61 = vor.u32 %v7660_v48, %v7657_v59  ;;  %v21479_v43 = vshll.u32 %v18776_v2, 16 }
 0x250   : > { %16078 = vmatmul.mubr.msk.bf16.gmra.mxu0 %vm1981_vm3, %v18797_v31  ;;  %v18932_v31 = vsel %vm3274_vm4, %v7607_v0, %v7616_v13  ;;  %v7675_v13 = vrot.slane %v7673_v4, 3  ;;  %v18950_v37 = vsel %vm3274_vm4, %v7643_v5, %v7652_v54  ;;  %v18955_v0 = vcombine.low %v7360_v3, %v7361_v53 }
 0x251   : > { %16081 = vmatprep.mubr.msk.bf16.mxu0 %vm1981_vm3, %v18816_v45  ;;  %v18940_v45 = vsel %vm3274_vm4, %v7625_v29, %v7634_v35  ;;  %21477 = vst [vmem:[#allocation51_spill] sm:$0xff] %v18950_v37  ;;  %v18958_v29 = vpop.f32.mrf.mxu0  ;;  %v6748_v28 = vshll.u32 %v18925_v57, 16  ;;  %v18964_v63 = vsel %vm3274_vm4, %v7652_v54, %v7661_v61  ;;  %v7694_v50 = vshll.u32 %v18741_v38, 16  ;;  %v18980_v38 = vpop.f32.mrf.mxu1  ;;  %v17233_v37 = vld [vmem:[#allocation3 + $0x78] sm:$0xf] }
 0x252   : > { %v7679_v9 = vor.u32 %v7678_v7, %v7675_v13  ;;  %21478 = vst [vmem:[#allocation52_spill] sm:$0xff] %v18958_v29  ;;  %21480 = vst [vmem:[#allocation53_spill] sm:$0xff] %v18964_v63  ;;  %v18970_v1 = vsel %vm3274_vm4, %v7661_v61, %v7670_v32  ;;  %v6735_v46 = vsel %vm4189_vm5, %v18827_v44, %v18820_v42  ;;  %v6744_v54 = vshrl.u32 %v18776_v2, 16  ;;  %v16859_v7 = vld [vmem:[#allocation3 + $0xbc] sm:$0xff]   ;;  %v19065_v29 = vld [vmem:[#allocation3 + $0xec] sm:$0xff]  }
 0x253   : > { %15830 = vmatmul.mubr.msk.bf16.gmra.mxu1 %vm1981_vm3, %v18407_v24  ;;  %v18947_v24 = vsel %vm3274_vm4, %v7634_v35, %v7643_v5  ;;  %v6742_v35 = vrot.slane %v21479_v43, 1  ;;  %21481 = vst [vmem:[#allocation54_spill] sm:$0xff] %v18970_v1  ;;  %v21484_v27 = vshrl.u32 %v18710_v15, 16  ;;  %v7696_v5 = vrot.slane %v7694_v50, 4  ;;  %v16860_v43 = vld [vmem:[#allocation3 + $0xc4] sm:$0xff]  }
 0x254   : > { %15833 = vmatprep.mubr.msk.bf16.mxu1 %vm1981_vm3, %v18427_v26  ;;  %21476 = vst [vmem:[#allocation50_spill] sm:$0xff] %v18947_v24  ;;  %v6727_v26 = vsel %vm4189_vm5, %v18754_v40, %v18773_v12  ;;  %v7702_v12 = vrot.slane %v7700_v17, 3  ;;  %v7705_v40 = vrot.slane %v7703_v11, 4  ;;  %v18973_v4 = vsel %vm3274_vm4, %v7670_v32, %v7679_v9  ;;  %v15944_v11 = vpop.f32.mrf.mxu0  ;;  %v17229_v63 = vld [vmem:[#allocation3 + $0x68] sm:$0xf] }
 0x255   : > { %21482 = vst [vmem:[#allocation55_spill] sm:$0xff] %v18973_v4  ;;  %v18983_v34 = vsel %vm3274_vm4, %v7679_v9, %v7688_v33  ;;  %v7693_v17 = vrot.slane %v7691_v52, 3  ;;  %v6738_v47 = vor.u32 %v21484_v27, %v18820_v42  ;;  %v6746_v44 = vor.u32 %v6744_v54, %v6742_v35  ;;  %v17237_v24 = vld [vmem:[#allocation3 + $0x88] sm:$0xf] }
 0x256   : > { %21483 = vst [vmem:[#allocation56_spill] sm:$0xff] %v18983_v34  ;;  %v6750_v2 = vrot.slane %v6748_v28, 1  ;;  %v7706_v59 = vor.u32 %v7705_v40, %v7702_v12  ;;  %v7709_v48 = vshrl.u32 %v18768_v8, 16  ;;  %v7712_v32 = vshll.u32 %v18768_v8, 16  ;;  %v18995_v53 = vpop.f32.mrf.mxu0 }
 0x257   : > { %v6756_v13 = vshll.u32 %v16858_v58, 16  ;;  %v7697_v3 = vor.u32 %v7696_v5, %v7693_v17  ;;  %21485 = vst [vmem:[#allocation57_spill] sm:$0xff] %v18995_v53  ;;  %v7721_v61 = vshll.u32 %v18783_v51, 16  ;;  %v6743_v8 = vsel %vm4189_vm5, %v6738_v47, %v6742_v35  ;;  %v21490_v5 = vld [vmem:[#allocation20_spill] sm:$0xff] }
 0x258   : > { %16082 = vmatmul.mubr.msk.bf16.gmra.mxu0 %vm1981_vm3, %v6727_v26  ;;  %v7711_v15 = vrot.slane %v7709_v48, 3  ;;  %v7714_v42 = vrot.slane %v7712_v32, 4  ;;  %v6751_v9 = vsel %vm4189_vm5, %v6746_v44, %v6750_v2  ;;  %v6752_v52 = vshrl.u32 %v18925_v57, 16  ;;  %v15947_v50 = vpop.f32.mrf.mxu0  ;;  %v21489_v57 = vld [vmem:[#allocation19_spill] sm:$0xff]  ;;  %v16861_v32 = vld [vmem:[#allocation3 + $0xcc] sm:$0xff]  }
 0x259   : > { %16085 = vmatprep.mubr.msk.bf16.mxu0 %vm1981_vm3, %v6735_v46  ;;  %v19003_v26 = vsel %vm3274_vm4, %v7697_v3, %v7706_v59  ;;  %v6758_v12 = vrot.slane %v6756_v13, 1  ;;  %v6764_v40 = vshll.u32 %v16859_v7, 16  ;;  %v7730_v46 = vshll.u32 %v18785_v62, 16 }
 0x25a   : > { %v15761_v16 = vpop.f32.mrf.mxu1  ;;  %21487 = vst [vmem:[#allocation59_spill] sm:$0xff] %v19003_v26  ;;  %v7715_v28 = vor.u32 %v7714_v42, %v7711_v15  ;;  %v6760_v35 = vshrl.u32 %v16858_v58, 16  ;;  %v7723_v11 = vrot.slane %v7721_v61, 4  ;;  %v6754_v44 = vor.u32 %v6752_v52, %v6750_v2  ;;  %v16862_v52 = vld [vmem:[#allocation3 + $0xd4] sm:$0xff]   ;;  %v19129_v26 = vld [vmem:[#allocation3 + $0x3c] sm:$0xff]  }
 0x25b   : > { %15834 = vmatmul.mubr.msk.bf16.gmra.mxu1 %vm1981_vm3, %v18458_v55  ;;  %v7718_v55 = vshrl.u32 %v18783_v51, 16  ;;  %v7732_v47 = vrot.slane %v7730_v46, 4  ;;  %v6772_v48 = vshll.u32 %v16860_v43, 16  ;;  %v6766_v58 = vrot.slane %v6764_v40, 1  ;;  %v16865_v40 = vld [vmem:[#allocation3 + $0x4] sm:$0xff]  }
 0x25c   : > { %15837 = vmatprep.mubr.msk.bf16.mxu1 %vm1981_vm3, %v18481_v22  ;;  %v19000_v22 = vsel %vm3274_vm4, %v7688_v33, %v7697_v3  ;;  %v19009_v51 = vpop.f32.mrf.mxu1  ;;  %v7727_v33 = vshrl.u32 %v18785_v62, 16  ;;  %v19015_v54 = vsel %vm3274_vm4, %v7706_v59, %v7715_v28  ;;  %v19021_v62 = vpop.f32.mrf.mxu0  ;;  %v6762_v13 = vor.u32 %v6760_v35, %v6758_v12  ;;  %v7364_v59 = vld [vmem:[#allocation3 + $0x100] sm:$0xf]  ;;  %v7365_v3 = vld [vmem:[#allocation3 + $0x104] sm:$0xf] }
 0x25d   : > { %21486 = vst [vmem:[#allocation58_spill] sm:$0xff] %v19000_v22  ;;  %21488 = vst [vmem:[#allocation60_spill] sm:$0xff] %v19015_v54  ;;  %v7720_v17 = vrot.slane %v7718_v55, 3  ;;  %v19023_v15 = vcombine.low %v7364_v59, %v7365_v3  ;;  %v6759_v61 = vsel %vm4189_vm5, %v6754_v44, %v6758_v12  ;;  %v6768_v2 = vshrl.u32 %v16859_v7, 16  ;;  %v21494_v12 = vld [vmem:[#allocation23_spill] sm:$0xff] }
 0x25e   : > { %v7729_v27 = vrot.slane %v7727_v33, 3  ;;  %21491 = vst [vmem:[#allocation19_spill] sm:$0xff] %v19021_v62  ;;  %v15762_v16 = vpop.f32.mrf.mxu1  ;;  %v15948_v50 = vpop.f32.mrf.mxu0  ;;  %v6767_v33 = vsel %vm4189_vm5, %v6762_v13, %v6766_v58  ;;  %v6776_v7 = vshrl.u32 %v16860_v43, 16  ;;  %v6788_v44 = vshll.u32 %v16862_v52, 16  ;;  %v21500_v62 = vld [vmem:[#allocation28_spill] sm:$0xff] }
 0x25f   : > { %v7724_v42 = vor.u32 %v7723_v11, %v7720_v17  ;;  %v6770_v17 = vor.u32 %v6768_v2, %v6766_v58  ;;  %v21495_v11 = vld [vmem:[#allocation24_spill] sm:$0xff]  ;;  %v16866_v16 = vld [vmem:[#allocation3 + $0xc] sm:$0xff]   ;;  %v6784_v3 = vshrl.u32 %v16861_v32, 16  ;;  %v7736_v43 = vshrl.u32 %v18808_v21, 16 }
 0x260   : > { %16086 = vmatmul.mubr.msk.bf16.gmra.mxu0 %vm1981_vm3, %v6743_v8  ;;  %v19025_v55 = vor.u32 %v7732_v47, %v7729_v27  ;;  %v6774_v8 = vrot.slane %v6772_v48, 1  ;;  %v19030_v46 = vpop.f32.mrf.mxu1  ;;  %v4193_v48 = vshll.u32 %v16865_v40, 16  ;;  %v6790_v2 = vrot.slane %v6788_v44, 1  ;;  %v16864_v50 = vld [vmem:[#allocation3 + $0xe4] sm:$0xff]   ;;  %v21499_v44 = vld [vmem:[#allocation26_spill] sm:$0xff] }
 0x261   : > { %16089 = vmatprep.mubr.msk.bf16.mxu0 %vm1981_vm3, %v6751_v9  ;;  %v6780_v9 = vshll.u32 %v16861_v32, 16  ;;  %v19033_v35 = vsel %vm3274_vm4, %v7715_v28, %v7724_v42  ;;  %v19046_v28 = vpop.f32.mrf.mxu0 }
 0x262   : > { %21492 = vst [vmem:[#allocation20_spill] sm:$0xff] %v19033_v35  ;;  %v6778_v27 = vor.u32 %v6776_v7, %v6774_v8  ;;  %21496 = vst [vmem:[#allocation23_spill] sm:$0xff] %v19046_v28  ;;  %v6775_v58 = vsel %vm4189_vm5, %v6770_v17, %v6774_v8  ;;  %v4195_v7 = vrot.slane %v4193_v48, 1  ;;  %v4198_v8 = vshll.u32 %v16866_v16, 16  ;;  %v16868_v17 = vld [vmem:[#allocation3 + $0x14] sm:$0xff]  }
 0x263   : > { %15838 = vmatmul.mubr.msk.bf16.gmra.mxu1 %vm1981_vm3, %v21489_v57  ;;  %v19037_v57 = vsel %vm3274_vm4, %v7724_v42, %v19025_v55  ;;  %v6782_v47 = vrot.slane %v6780_v9, 1  ;;  %v15951_v59 = vpop.f32.mrf.mxu0  ;;  %v7739_v42 = vshll.u32 %v18808_v21, 16  ;;  %v6792_v21 = vshrl.u32 %v16862_v52, 16 }
 0x264   : > { %15841 = vmatprep.mubr.msk.bf16.mxu1 %vm1981_vm3, %v21490_v5  ;;  %21493 = vst [vmem:[#allocation61_spill] sm:$0xff] %v19037_v57  ;;  %v19044_v5 = vld [vmem:[#allocation3 + $0xdc] sm:$0xff]   ;;  %v7738_v59 = vrot.slane %v7736_v43, 3  ;;  %v6804_v52 = vshll.u32 %v16864_v50, 16  ;;  %v4206_v39 = vshll.u32 %v16868_v17, 16  ;;  %v4202_v43 = vshrl.u32 %v16866_v16, 16 }
 0x265   : > { %v6796_v9 = vshll.u32 %v19044_v5, 16  ;;  %v6786_v28 = vor.u32 %v6784_v3, %v6782_v47  ;;  %v6794_v53 = vor.u32 %v6792_v21, %v6790_v2  ;;  %v6800_v3 = vshrl.u32 %v19044_v5, 16  ;;  %v21504_v21 = vld [vmem:[#allocation29_spill] sm:$0xff] }
 0x268   : > { %16090 = vmatmul.mubr.msk.bf16.gmra.mxu0 %vm1981_vm3, %v6759_v61  ;;  %v6783_v61 = vsel %vm4189_vm5, %v6778_v27, %v6782_v47  ;;  %v19059_v27 = vpop.f32.mrf.mxu0  ;;  %v6791_v47 = vsel %vm4189_vm5, %v6786_v28, %v6790_v2  ;;  %v16872_v2 = vld [vmem:[#allocation3 + $0x24] sm:$0xff]  }
 0x269   : > { %16093 = vmatprep.mubr.msk.bf16.mxu0 %vm1981_vm3, %v6767_v33  ;;  %v15765_v13 = vpop.f32.mrf.mxu1  ;;  %v4191_v33 = vshrl.u32 %v16865_v40, 16  ;;  %21498 = vst [vmem:[#allocation24_spill] sm:$0xff] %v19059_v27  ;;  %v19067_v27 = vld [vmem:[#allocation3 + $0x1c] sm:$0xff]  }
 0x26a   : > { %v15952_v57 = vpop.f32.mrf.mxu0  ;;  %v4214_v5 = vshll.u32 %v19067_v27, 16 }
 0x26b   : > { %15842 = vmatmul.mubr.msk.bf16.gmra.mxu1 %vm1981_vm3, %v21494_v12  ;;  %v19054_v12 = vpop.f32.mrf.mxu1 }
 0x26c   : > { %15845 = vmatprep.mubr.msk.bf16.mxu1 %vm1981_vm3, %v21495_v11  ;;  %v21497_v11 = vld [vmem:[#allocation45_spill] sm:$0xff] }
 0x26d   : > { %v7745_v32 = vshrl.u32 %v21497_v11, 16  ;;  %v7748_v13 = vshll.u32 %v21497_v11, 16  ;;  %v6798_v11 = vrot.slane %v6796_v9, 1  ;;  %v15766_v30 = vpop.f32.mrf.mxu1  ;;  %v6812_v9 = vshll.u32 %v19065_v29, 16 }
 0x26e   : > { %v6806_v30 = vrot.slane %v6804_v52, 1 }
 0x26f   : > { %v7747_v40 = vrot.slane %v7745_v32, 3  ;;  %v7750_v48 = vrot.slane %v7748_v13, 4  ;;  %v16870_v13 = vld [vmem:[#allocation3 + $0xf4] sm:$0xff]   ;;  %v19077_v57 = vpop.f32.mrf.mxu1 }
 0x270   : > { %16094 = vmatmul.mubr.msk.bf16.gmra.mxu0 %vm1981_vm3, %v6775_v58  ;;  %v7741_v58 = vrot.slane %v7739_v42, 4 }
 0x271   : > { %16097 = vmatprep.mubr.msk.bf16.mxu0 %vm1981_vm3, %v6783_v61  ;;  %v4196_v61 = vor.u32 %v4195_v7, %v4191_v33  ;;  %v19069_v32 = vor.u32 %v7750_v48, %v7747_v40  ;;  %v19089_v7 = vpop.f32.mrf.mxu0  ;;  %v6820_v40 = vshll.u32 %v16870_v13, 16  ;;  %v19094_v48 = vld [vmem:[#allocation3 + $0xfc] sm:$0xff]  }
 0x272   : > { %v7742_v42 = vor.u32 %v7741_v58, %v7738_v59  ;;  %21503 = vst [vmem:[#allocation28_spill] sm:$0xff] %v19089_v7  ;;  %v6808_v59 = vshrl.u32 %v16864_v50, 16  ;;  %v6802_v58 = vor.u32 %v6800_v3, %v6798_v11  ;;  %v19096_v7 = vld [vmem:[#allocation3 + $0x2c] sm:$0xff]   ;;  %v4218_v50 = vshrl.u32 %v19067_v27, 16 }
 0x273   : > { %15846 = vmatmul.mubr.msk.bf16.gmra.mxu1 %vm1981_vm3, %v21499_v44  ;;  %v4200_v44 = vrot.slane %v4198_v8, 1  ;;  %v15955_v52 = vpop.f32.mrf.mxu0  ;;  %v6822_v3 = vrot.slane %v6820_v40, 1  ;;  %v17152_v27 = vld [vmem:[%s21439_s3 + $0x10] sm:$0xf]  ;;  %v4230_v40 = vshll.u32 %v19096_v7, 16 }
 0x274   : > { %15849 = vmatprep.mubr.msk.bf16.mxu1 %vm1981_vm3, %v21500_v62  ;;  %v6799_v62 = vsel %vm4189_vm5, %v6794_v53, %v6798_v11  ;;  %v19081_v16 = vsel %vm3274_vm4, %v19025_v55, %v7742_v42  ;;  %v19085_v28 = vsel %vm3274_vm4, %v7742_v42, %v19069_v32  ;;  %v4208_v53 = vrot.slane %v4206_v39, 1  ;;  %v16875_v52 = vld [vmem:[#allocation3 + $0x34] sm:$0xff]  }
 0x275   : > { %v4201_v33 = vsel %vm4189_vm5, %v4196_v61, %v4200_v44  ;;  %21501 = vst [vmem:[#allocation45_spill] sm:$0xff] %v19081_v16  ;;  %21502 = vst [vmem:[#allocation26_spill] sm:$0xff] %v19085_v28  ;;  %v4204_v8 = vor.u32 %v4202_v43, %v4200_v44  ;;  %v4210_v55 = vshrl.u32 %v16868_v17, 16  ;;  %v6810_v61 = vor.u32 %v6808_v59, %v6806_v30 }
 0x276   : > { %v6814_v39 = vrot.slane %v6812_v9, 1  ;;  %v4222_v28 = vshll.u32 %v16872_v2, 16  ;;  %v7754_v11 = vshrl.u32 %v18869_v36, 16  ;;  %v7757_v17 = vshll.u32 %v18869_v36, 16  ;;  %v16874_v36 = vld [vmem:[#allocation3 + $0x104] sm:$0xff]  }
 0x277   : > { %v6807_v44 = vsel %vm4189_vm5, %v6802_v58, %v6806_v30  ;;  %v6816_v43 = vshrl.u32 %v19065_v29, 16  ;;  %v6828_v9 = vshll.u32 %v19094_v48, 16  ;;  %v7763_v29 = vshrl.u32 %v18864_v60, 16 }
 0x278   : > { %16098 = vmatmul.mubr.msk.bf16.gmra.mxu0 %vm1981_vm3, %v6791_v47  ;;  %v4212_v47 = vor.u32 %v4210_v55, %v4208_v53  ;;  %v7766_v30 = vshll.u32 %v18864_v60, 16  ;;  %v6824_v58 = vshrl.u32 %v16870_v13, 16  ;;  %v4224_v55 = vrot.slane %v4222_v28, 1 }
 0x279   : > { %16101 = vmatprep.mubr.msk.bf16.mxu0 %vm1981_vm3, %v6799_v62  ;;  %v15769_v42 = vpop.f32.mrf.mxu1  ;;  %v4216_v62 = vrot.slane %v4214_v5, 1  ;;  %v6815_v5 = vsel %vm4189_vm5, %v6810_v61, %v6814_v39  ;;  %v19123_v61 = vld [vmem:[%s21439_s3 + $0x18] sm:$0xf]  ;;  %v7759_v60 = vrot.slane %v7757_v17, 4  ;;  %v6830_v28 = vrot.slane %v6828_v9, 1 }
 0x27a   : > { %v19126_v42 = vld [vmem:[#allocation3 + $0x10c] sm:$0xff]   ;;  %v6826_v13 = vor.u32 %v6824_v58, %v6822_v3  ;;  %v6836_v54 = vshll.u32 %v16874_v36, 16  ;;  %v4232_v17 = vrot.slane %v4230_v40, 1  ;;  %v19156_v40 = vld [vmem:[#allocation3 + $0x108] sm:$0xf] }
 0x27b   : > { %15850 = vmatmul.mubr.msk.bf16.gmra.mxu1 %vm1981_vm3, %v21504_v21  ;;  %v4209_v21 = vsel %vm4189_vm5, %v4204_v8, %v4208_v53  ;;  %v6011_v53 = vsel %vm2946_vm2, %v17152_v27, 0  ;;  %v19113_v8 = vpop.f32.mrf.mxu1  ;;  %v4217_v59 = vsel %vm4189_vm5, %v4212_v47, %v4216_v62  ;;  %v7765_v27 = vrot.slane %v7763_v29, 3 }
 0x27c   : > { %15855 = vmatprep.mubr.msk.bf16.mxu1 %vm1981_vm3, %v4201_v33  ;;  %v19105_v33 = vpop.f32.mrf.mxu0  ;;  %v4226_v47 = vshrl.u32 %v16872_v2, 16  ;;  %v4220_v35 = vor.u32 %v4218_v50, %v4216_v62  ;;  %v6831_v2 = vsel %vm4189_vm5, %v6826_v13, %v6830_v28  ;;  %v4246_v50 = vshll.u32 %v19129_v26, 16 }
 0x27d   : > { %21505 = vst [vmem:[#allocation29_spill] sm:$0xff] %v19105_v33  ;;  %v6818_v33 = vor.u32 %v6816_v43, %v6814_v39  ;;  %v15770_v22 = vpop.f32.mrf.mxu1  ;;  %v4238_v39 = vshll.u32 %v16875_v52, 16  ;;  %v6840_v43 = vshrl.u32 %v16874_v36, 16 }
 0x27e   : > { %v15956_v16 = vpop.f32.mrf.mxu0  ;;  %v4234_v22 = vshrl.u32 %v19096_v7, 16 }
 0x27f   : > { %v6823_v16 = vsel %vm4189_vm5, %v6818_v33, %v6822_v3  ;;  %v19144_v36 = vpop.f32.mrf.mxu1  ;;  %v4225_v33 = vsel %vm4189_vm5, %v4220_v35, %v4224_v55 }
 0x280   : > { %16102 = vmatmul.mubr.msk.bf16.gmra.mxu0 %vm1981_vm3, %v6807_v44  ;;  %v7756_v44 = vrot.slane %v7754_v11, 3  ;;  %v4228_v11 = vor.u32 %v4226_v47, %v4224_v55  ;;  %v19140_v62 = vpop.f32.mrf.mxu0  ;;  %v4236_v35 = vor.u32 %v4234_v22, %v4232_v17  ;;  %v4248_v55 = vrot.slane %v4246_v50, 1 }
 0x281   : > { %16105 = vmatprep.mubr.msk.bf16.mxu0 %vm1981_vm3, %v6815_v5  ;;  %v7768_v5 = vrot.slane %v7766_v30, 4  ;;  %21506 = vst [vmem:[#allocation62_spill] sm:$0xff] %v19140_v62  ;;  %v16878_v30 = vld [vmem:[#allocation3 + $0x114] ss:$0 sps:$4 sm:$0x11]  }
 0x282   : > { %v7760_v29 = vor.u32 %v7759_v60, %v7756_v44  ;;  %v19158_v44 = vld [vmem:[#allocation3 + $0x10c] sm:$0xf]  ;;  %v15959_v60 = vpop.f32.mrf.mxu0 }
 0x283   : > { %15856 = vmatmul.mubr.msk.bf16.vlgmr.msra.gmra.mxu1 %vm1981_vm3, %v4209_v21  ;;  %v6832_v21 = vshrl.u32 %v19094_v48, 16  ;;  %v19135_v9 = vor.u32 %v7768_v5, %v7765_v27  ;;  %v6838_v48 = vrot.slane %v6836_v54, 1  ;;  %v4240_v54 = vrot.slane %v4238_v39, 1 }
 0x284   : > { %15986 = vmatpush3.bf16.msra.mxu1 %v6011_v53  ;;  %15859 = vmatprep.mubr.msk.bf16.mxu1 %vm1981_vm3, %v4217_v59  ;;  %v6844_v53 = vshll.u32 %v19126_v42, 16  ;;  %v16883_v59 = vld [vmem:[#allocation3 + $0x44] sm:$0xff]   ;;  %v19148_v58 = vsel %vm3274_vm4, %v19069_v32, %v7760_v29  ;;  %v4233_v32 = vsel %vm4189_vm5, %v4228_v11, %v4232_v17  ;;  %v19164_v13 = vcombine.low %v19156_v40, %v19158_v44 }
 0x285   : > { %16628 = vmatprep.subr.msk.bf16.mxu1 %vm2946_vm2, %v19123_v61  ;;  %21507 = vst [vmem:[#allocation63_spill] sm:$0xff] %v19148_v58  ;;  %v19152_v3 = vsel %vm3274_vm4, %v7760_v29, %v19135_v9  ;;  %v6834_v7 = vor.u32 %v6832_v21, %v6830_v28  ;;  %v6842_v27 = vor.u32 %v6840_v43, %v6838_v48  ;;  %v4242_v28 = vshrl.u32 %v16875_v52, 16  ;;  %v19167_v21 = vld [vmem:[#allocation3 + $0x4c] sm:$0xff]  }
 0x286   : > { %21508 = vst [vmem:[#allocation64_spill] sm:$0xff] %v19152_v3  ;;  %v6846_v5 = vrot.slane %v6844_v53, 1  ;;  %v4254_v47 = vshll.u32 %v16883_v59, 16  ;;  %v6848_v11 = vshrl.u32 %v19126_v42, 16  ;;  %v6852_v43 = vshll.u32 %v16878_v30, 16  ;;  %v19171_v53 = vpop.f32.mrf.mxu0 }
 0x287   : > { %v6839_v29 = vsel %vm4189_vm5, %v6834_v7, %v6838_v48  ;;  %21509 = vst [vmem:[#allocation65_spill] sm:$0xff] %v19171_v53  ;;  %v7775_v52 = vshll.u32 %v18955_v0, 16  ;;  %v4250_v17 = vshrl.u32 %v19129_v26, 16  ;;  %v4241_v22 = vsel %vm4189_vm5, %v4236_v35, %v4240_v54  ;;  %v16889_v26 = vld [vmem:[#allocation3 + $0x54] sm:$0xff]  }
 0x288   : > { %16106 = vmatmul.mubr.msk.bf16.gmra.mxu0 %vm1981_vm3, %v6823_v16  ;;  %v4244_v16 = vor.u32 %v4242_v28, %v4240_v54  ;;  %v4262_v48 = vshll.u32 %v19167_v21, 16  ;;  %v7781_v42 = vshrl.u32 %v18944_v20, 16  ;;  %v7784_v30 = vshll.u32 %v18944_v20, 16 }
 0x289   : > { %16109 = vmatprep.mubr.msk.bf16.mxu0 %vm1981_vm3, %v6831_v2  ;;  %v15773_v39 = vpop.f32.mrf.mxu1  ;;  %v6847_v2 = vsel %vm4189_vm5, %v6842_v27, %v6846_v5  ;;  %v6850_v60 = vor.u32 %v6848_v11, %v6846_v5  ;;  %v15960_v27 = vpop.f32.mrf.mxu0  ;;  %v7777_v28 = vrot.slane %v7775_v52, 4  ;;  %v4252_v20 = vor.u32 %v4250_v17, %v4248_v55  ;;  %v16890_v11 = vld [vmem:[#allocation3 + $0x5c] sm:$0xff]   ;;  %v21512_v52 = vld [vmem:[#allocation41_spill] sm:$0xff] }
 0x28a   : > { %v4249_v7 = vsel %vm4189_vm5, %v4244_v16, %v4248_v55  ;;  %v7783_v35 = vrot.slane %v7781_v42, 3  ;;  %v7786_v39 = vrot.slane %v7784_v30, 4  ;;  %v4270_v5 = vshll.u32 %v16889_v26, 16 }
 0x28b   : > { %15860 = vmatmul.mubr.msk.bf16.gmra.mxu1 %vm1981_vm3, %v4225_v33  ;;  %v7772_v33 = vshrl.u32 %v18955_v0, 16  ;;  %v19180_v50 = vpop.f32.mrf.mxu1  ;;  %v6854_v0 = vrot.slane %v6852_v43, 1  ;;  %v4264_v43 = vrot.slane %v4262_v48, 1  ;;  %v4266_v48 = vshrl.u32 %v19167_v21, 16 }
 0x28c   : > { %15863 = vmatprep.mubr.msk.bf16.mxu1 %vm1981_vm3, %v4233_v32  ;;  %21510 = vst [vmem:[#allocation66_spill] sm:$0xff] %v19180_v50  ;;  %v4256_v32 = vrot.slane %v4254_v47, 1  ;;  %v19191_v62 = vor.u32 %v7786_v39, %v7783_v35  ;;  %v4272_v30 = vrot.slane %v4270_v5, 1  ;;  %v17155_v35 = vld [vmem:[#allocation3 + $0x30] sm:$0xf] }
 0x28d   : > { %v7774_v54 = vrot.slane %v7772_v33, 3  ;;  %v15774_v53 = vpop.f32.mrf.mxu1  ;;  %v6855_v16 = vsel %vm4189_vm5, %v6850_v60, %v6854_v0  ;;  %v17153_v33 = vld [vmem:[#allocation3 + $0x28] sm:$0xf]  ;;  %v16896_v5 = vld [vmem:[#allocation3 + $0x6c] sm:$0xff]  }
 0x28e   : > { %v4257_v17 = vsel %vm4189_vm5, %v4252_v20, %v4256_v32  ;;  %v16895_v0 = vld [vmem:[#allocation3 + $0x64] sm:$0xff]  }
 0x28f   : > { %v7778_v27 = vor.u32 %v7777_v28, %v7774_v54  ;;  %v17154_v28 = vld [vmem:[#allocation3 + $0x2c] sm:$0xf]  ;;  %v4286_v21 = vshll.u32 %v16895_v0, 16 }
 0x290   : > { %16110 = vmatmul.mubr.msk.bf16.gmra.mxu0 %vm1981_vm3, %v6839_v29  ;;  %v4258_v29 = vshrl.u32 %v16883_v59, 16  ;;  %v19195_v59 = vpop.f32.mrf.mxu1  ;;  %v14601_v39 = vcombine.low %v17154_v28, %v17155_v35 }
 0x291   : > { %16113 = vmatprep.mubr.msk.bf16.mxu0 %vm1981_vm3, %v6847_v2  ;;  %v19189_v2 = vpop.f32.mrf.mxu0  ;;  %21513 = vst [vmem:[#allocation41_spill] sm:$0xff] %v19195_v59  ;;  %v19199_v55 = vsel %vm3274_vm4, %v19135_v9, %v7778_v27  ;;  %v19203_v53 = vsel %vm3274_vm4, %v7778_v27, %v19191_v62  ;;  %v4274_v9 = vshrl.u32 %v16889_v26, 16  ;;  %v7790_v27 = vshrl.u32 %v19023_v15, 16 }
 0x292   : > { %21511 = vst [vmem:[#allocation67_spill] sm:$0xff] %v19189_v2  ;;  %v4260_v47 = vor.u32 %v4258_v29, %v4256_v32  ;;  %21514 = vst [vmem:[#allocation68_spill] sm:$0xff] %v19199_v55 }
 0x293   : > { %15864 = vmatmul.mubr.msk.bf16.gmra.mxu1 %vm1981_vm3, %v4241_v22  ;;  %v14600_v22 = vcombine.low %v21512_v52, %v17153_v33  ;;  %v15963_v42 = vpop.f32.mrf.mxu0  ;;  %21515 = vst [vmem:[#allocation69_spill] sm:$0xff] %v19203_v53  ;;  %v4276_v32 = vor.u32 %v4274_v9, %v4272_v30  ;;  %v7793_v33 = vshll.u32 %v19023_v15, 16  ;;  %v17157_v52 = vld [vmem:[#allocation3 + $0x38] sm:$0xf]  ;;  %v7792_v9 = vrot.slane %v7790_v27, 3 }
 0x294   : > { %15867 = vmatprep.mubr.msk.bf16.mxu1 %vm1981_vm3, %v4249_v7  ;;  %v4278_v7 = vshll.u32 %v16890_v11, 16  ;;  %v4265_v60 = vsel %vm4189_vm5, %v4260_v47, %v4264_v43  ;;  %v17156_v47 = vld [vmem:[#allocation3 + $0x34] sm:$0xf]  ;;  %v17161_v27 = vld [vmem:[#allocation3 + $0x48] sm:$0xf] }
 0x295   : > { %v19211_v54 = vpop.f32.mrf.mxu0  ;;  %v16901_v15 = vld [vmem:[#allocation3 + $0x74] sm:$0xff]   ;;  %v7795_v28 = vrot.slane %v7793_v33, 4 }
 0x296   : > { %21516 = vst [vmem:[#allocation70_spill] sm:$0xff] %v19211_v54  ;;  %v4280_v20 = vrot.slane %v4278_v7, 1  ;;  %v4288_v7 = vrot.slane %v4286_v21, 1  ;;  %v17160_v54 = vld [vmem:[#allocation3 + $0x44] sm:$0xf] }
 0x297   : > { %v15964_v42 = vpop.f32.mrf.mxu0  ;;  %v19225_v21 = vor.u32 %v7795_v28, %v7792_v9  ;;  %v14604_v33 = vcombine.low %v17160_v54, %v17161_v27  ;;  %v16907_v28 = vld [vmem:[#allocation3 + $0x84] sm:$0xff]  }
 0x298   : > { %16114 = vmatmul.mubr.msk.bf16.gmra.mxu0 %vm1981_vm3, %v6855_v16  ;;  %v4268_v16 = vor.u32 %v4266_v48, %v4264_v43  ;;  %v4282_v48 = vshrl.u32 %v16890_v11, 16  ;;  %v4302_v42 = vshll.u32 %v16901_v15, 16 }
 0x299   : > { %16185 = vmatprep.mubr.msk.bf16.mxu0 %vm1981_vm3, %v14600_v22  ;;  %v15777_v29 = vpop.f32.mrf.mxu1  ;;  %v14602_v22 = vcombine.low %v17156_v47, %v17157_v52  ;;  %v19223_v35 = vpop.f32.mrf.mxu0 }
 0x29a   : > { %v4273_v43 = vsel %vm4189_vm5, %v4268_v16, %v4272_v30  ;;  %21518 = vst [vmem:[#allocation72_spill] sm:$0xff] %v19223_v35  ;;  %v17159_v29 = vld [vmem:[#allocation3 + $0x40] sm:$0xf]  ;;  %v4284_v30 = vor.u32 %v4282_v48, %v4280_v20 }
 0x29b   : > { %15868 = vmatmul.mubr.msk.bf16.gmra.mxu1 %vm1981_vm3, %v4257_v17  ;;  %v19216_v26 = vpop.f32.mrf.mxu1  ;;  %v4281_v17 = vsel %vm4189_vm5, %v4276_v32, %v4280_v20  ;;  %v4298_v20 = vshrl.u32 %v16896_v5, 16 }
 0x29c   : > { %15871 = vmatprep.mubr.msk.bf16.mxu1 %vm1981_vm3, %v4265_v60  ;;  %21517 = vst [vmem:[#allocation71_spill] sm:$0xff] %v19216_v26  ;;  %v4294_v60 = vshll.u32 %v16896_v5, 16 }
 0x29d   : > { %v15778_v52 = vpop.f32.mrf.mxu1 }
 0x29e   : > { %v4296_v11 = vrot.slane %v4294_v60, 1  ;;  %v4304_v60 = vrot.slane %v4302_v42, 1 }
 0x2a0   : > { %16186 = vmatmul.mubr.msk.bf16.vlgmr.msra.gmra.mxu0 %vm1981_vm3, %v14601_v39  ;;  %v17158_v39 = vld [vmem:[#allocation3 + $0x3c] sm:$0xf] }
 0x2a1   : > { %16189 = vmatprep.mubr.msk.bf16.mxu0 %vm1981_vm3, %v14602_v22  ;;  %v14603_v47 = vcombine.low %v17158_v39, %v17159_v29  ;;  %v4290_v22 = vshrl.u32 %v16895_v0, 16  ;;  %v15967_v16 = vpop.f32.mrf.mxu0  ;;  %v19233_v39 = vsel %vm3274_vm4, %v19191_v62, %v19225_v21  ;;  %v4289_v0 = vsel %vm4189_vm5, %v4284_v30, %v4288_v7  ;;  %v17162_v29 = vld [vmem:[#allocation3 + $0x50] sm:$0xf] }
 0x2a2   : > { %21520 = vst [vmem:[#allocation74_spill] sm:$0xff] %v19233_v39  ;;  %v4300_v16 = vor.u32 %v4298_v20, %v4296_v11  ;;  %v4318_v30 = vshll.u32 %v16907_v28, 16 }
 0x2a3   : > { %15872 = vmatmul.mubr.msk.bf16.gmra.mxu1 %vm1981_vm3, %v4273_v43  ;;  %v4292_v32 = vor.u32 %v4290_v22, %v4288_v7  ;;  %v16902_v43 = vld [vmem:[#allocation3 + $0x7c] sm:$0xff]   ;;  %v19237_v48 = vpop.f32.mrf.mxu0  ;;  %v4306_v22 = vshrl.u32 %v16901_v15, 16 }
 0x2a4   : > { %15875 = vmatprep.mubr.msk.bf16.mxu1 %vm1981_vm3, %v4281_v17  ;;  %v19228_v17 = vpop.f32.mrf.mxu1  ;;  %21521 = vst [vmem:[#allocation75_spill] sm:$0xff] %v19237_v48  ;;  %v4310_v9 = vshll.u32 %v16902_v43, 16  ;;  %v17164_v48 = vld [vmem:[#allocation3 + $0x54] sm:$0xf]  ;;  %v4305_v42 = vsel %vm4189_vm5, %v4300_v16, %v4304_v60 }
 0x2a5   : > { %21519 = vst [vmem:[#allocation73_spill] sm:$0xff] %v19228_v17  ;;  %v4297_v54 = vsel %vm4189_vm5, %v4292_v32, %v4296_v11  ;;  %v15968_v27 = vpop.f32.mrf.mxu0  ;;  %v4308_v7 = vor.u32 %v4306_v22, %v4304_v60  ;;  %v4320_v11 = vrot.slane %v4318_v30, 1 }
 0x2a6   : > { %v4312_v5 = vrot.slane %v4310_v9, 1  ;;  %v16913_v9 = vld [vmem:[#allocation3 + $0x94] sm:$0xff]  }
 0x2a7   : > { %v4334_v16 = vshll.u32 %v16913_v9, 16 }
 0x2a8   : > { %16190 = vmatmul.mubr.msk.bf16.gmra.mxu0 %vm1981_vm3, %v14603_v47  ;;  %v17163_v47 = vld [vmem:[#allocation3 + $0x4c] sm:$0xf]  ;;  %v4313_v15 = vsel %vm4189_vm5, %v4308_v7, %v4312_v5 }
 0x2a9   : > { %16193 = vmatprep.mubr.msk.bf16.mxu0 %vm1981_vm3, %v14604_v33  ;;  %v14605_v62 = vcombine.low %v17163_v47, %v17162_v29  ;;  %v15781_v52 = vpop.f32.mrf.mxu1  ;;  %v16908_v33 = vld [vmem:[#allocation3 + $0x8c] sm:$0xff]   ;;  %v19247_v29 = vpop.f32.mrf.mxu0 }
 0x2aa   : > { %21523 = vst [vmem:[#allocation77_spill] sm:$0xff] %v19247_v29  ;;  %v4326_v20 = vshll.u32 %v16908_v33, 16  ;;  %v17166_v52 = vld [vmem:[#allocation3 + $0x60] sm:$0xf]  ;;  %v17168_v29 = vld [vmem:[#allocation3 + $0x64] sm:$0xf] }
 0x2ab   : > { %15876 = vmatmul.mubr.msk.bf16.gmra.mxu1 %vm1981_vm3, %v4289_v0  ;;  %v17165_v0 = vld [vmem:[#allocation3 + $0x58] sm:$0xf]  ;;  %v19242_v32 = vpop.f32.mrf.mxu1 }
 0x2ac   : > { %15879 = vmatprep.mubr.msk.bf16.mxu1 %vm1981_vm3, %v4297_v54  ;;  %v14606_v35 = vcombine.low %v17164_v48, %v17165_v0  ;;  %21522 = vst [vmem:[#allocation76_spill] sm:$0xff] %v19242_v32  ;;  %v4314_v54 = vshrl.u32 %v16902_v43, 16  ;;  %v4328_v43 = vrot.slane %v4326_v20, 1  ;;  %v16914_v0 = vld [vmem:[#allocation3 + $0x9c] sm:$0xff]  }
 0x2ad   : > { %v15782_v48 = vpop.f32.mrf.mxu1  ;;  %v4342_v20 = vshll.u32 %v16914_v0, 16 }
 0x2ae   : > { %v4316_v27 = vor.u32 %v4314_v54, %v4312_v5  ;;  %v4330_v48 = vshrl.u32 %v16908_v33, 16  ;;  %v4336_v54 = vrot.slane %v4334_v16, 1 }
 0x2af   : > { %v19252_v7 = vpop.f32.mrf.mxu1 }
 0x2b0   : > { %16194 = vmatmul.mubr.msk.bf16.gmra.mxu0 %vm1981_vm3, %v14605_v62  ;;  %v17167_v62 = vld [vmem:[#allocation3 + $0x5c] sm:$0xf]  ;;  %21524 = vst [vmem:[#allocation78_spill] sm:$0xff] %v19252_v7 }
 0x2b1   : > { %16197 = vmatprep.mubr.msk.bf16.mxu0 %vm1981_vm3, %v14606_v35  ;;  %v15971_v47 = vpop.f32.mrf.mxu0  ;;  %v14607_v22 = vcombine.low %v17167_v62, %v17166_v52  ;;  %v4322_v35 = vshrl.u32 %v16907_v28, 16  ;;  %v17170_v52 = vld [vmem:[#allocation3 + $0x70] sm:$0xf]  ;;  %v17171_v62 = vld [vmem:[#allocation3 + $0x6c] sm:$0xf] }
 0x2b2   : > { %v16919_v47 = vld [vmem:[#allocation3 + $0xa4] sm:$0xff]  }
 0x2b3   : > { %15880 = vmatmul.mubr.msk.bf16.gmra.mxu1 %vm1981_vm3, %v4305_v42  ;;  %v4324_v60 = vor.u32 %v4322_v35, %v4320_v11  ;;  %v17169_v42 = vld [vmem:[#allocation3 + $0x68] sm:$0xf]  ;;  %v19254_v30 = vpop.f32.mrf.mxu0  ;;  %v14609_v35 = vcombine.low %v17171_v62, %v17170_v52  ;;  %v17174_v62 = vld [vmem:[#allocation3 + $0x80] sm:$0xf] }
 0x2b4   : > { %15883 = vmatprep.mubr.msk.bf16.mxu1 %vm1981_vm3, %v4313_v15  ;;  %v14608_v2 = vcombine.low %v17168_v29, %v17169_v42  ;;  %21525 = vst [vmem:[#allocation79_spill] sm:$0xff] %v19254_v30  ;;  %v4321_v15 = vsel %vm4189_vm5, %v4316_v27, %v4320_v11  ;;  %v4332_v42 = vor.u32 %v4330_v48, %v4328_v43  ;;  %v4344_v27 = vrot.slane %v4342_v20, 1  ;;  %v17172_v30 = vld [vmem:[#allocation3 + $0x74] sm:$0xf] }
 0x2b5   : > { %v4329_v5 = vsel %vm4189_vm5, %v4324_v60, %v4328_v43  ;;  %v15972_v29 = vpop.f32.mrf.mxu0  ;;  %v17173_v60 = vld [vmem:[#allocation3 + $0x78] sm:$0xf] }
 0x2b6   : > { %v14610_v16 = vcombine.low %v17172_v30, %v17173_v60  ;;  %v16925_v30 = vld [vmem:[#allocation3 + $0xb4] sm:$0xff]   ;;  %v4354_v60 = vshrl.u32 %v16919_v47, 16 }
 0x2b7   : > { %v19264_v39 = vpop.f32.mrf.mxu0 }
 0x2b8   : > { %16198 = vmatmul.mubr.msk.bf16.gmra.mxu0 %vm1981_vm3, %v14607_v22  ;;  %21527 = vst [vmem:[#allocation81_spill] sm:$0xff] %v19264_v39 }
 0x2b9   : > { %16201 = vmatprep.mubr.msk.bf16.mxu0 %vm1981_vm3, %v14608_v2  ;;  %v4338_v2 = vshrl.u32 %v16913_v9, 16  ;;  %v4346_v9 = vshrl.u32 %v16914_v0, 16 }
 0x2bb   : > { %v15785_v28 = vpop.f32.mrf.mxu1  ;;  %15884 = vmatmul.mubr.msk.bf16.gmra.mxu1 %vm1981_vm3, %v4321_v15  ;;  %v4340_v33 = vor.u32 %v4338_v2, %v4336_v54  ;;  %v16920_v15 = vld [vmem:[#allocation3 + $0xac] sm:$0xff]   ;;  %v17175_v2 = vld [vmem:[#allocation3 + $0x7c] sm:$0xf] }
 0x2bc   : > { %15887 = vmatprep.mubr.msk.bf16.mxu1 %vm1981_vm3, %v4329_v5  ;;  %v4350_v28 = vshll.u32 %v16919_v47, 16  ;;  %v4337_v5 = vsel %vm4189_vm5, %v4332_v42, %v4336_v54  ;;  %v4358_v52 = vshll.u32 %v16920_v15, 16  ;;  %v4362_v47 = vshrl.u32 %v16920_v15, 16 }
 0x2bd   : > { %v19262_v22 = vpop.f32.mrf.mxu1  ;;  %v4345_v20 = vsel %vm4189_vm5, %v4340_v33, %v4344_v27  ;;  %v17176_v33 = vld [vmem:[#allocation3 + $0x88] sm:$0xf] }
 0x2be   : > { %21526 = vst [vmem:[#allocation80_spill] sm:$0xff] %v19262_v22  ;;  %v4352_v29 = vrot.slane %v4350_v28, 1  ;;  %v17177_v28 = vld [vmem:[#allocation3 + $0x84] sm:$0xf] }
 0x2bf   : > { %v15786_v11 = vpop.f32.mrf.mxu1  ;;  %v14612_v39 = vcombine.low %v17177_v28, %v17176_v33  ;;  %v17179_v33 = vld [vmem:[#allocation3 + $0x90] sm:$0xf] }
 0x2c0   : > { %16202 = vmatmul.mubr.msk.bf16.gmra.mxu0 %vm1981_vm3, %v14609_v35  ;;  %v14611_v11 = vcombine.low %v17175_v2, %v17174_v62  ;;  %v4356_v42 = vor.u32 %v4354_v60, %v4352_v29  ;;  %v16931_v60 = vld [vmem:[#allocation3 + $0xc4] sm:$0xff]  }
 0x2c1   : > { %v19266_v53 = vpop.f32.mrf.mxu1  ;;  %16205 = vmatprep.mubr.msk.bf16.mxu0 %vm1981_vm3, %v14610_v16  ;;  %v4348_v16 = vor.u32 %v4346_v9, %v4344_v27 }
 0x2c2   : > { %21528 = vst [vmem:[#allocation82_spill] sm:$0xff] %v19266_v53  ;;  %v15975_v43 = vpop.f32.mrf.mxu0  ;;  %v17185_v53 = vld [vmem:[#allocation3 + $0xa8] sm:$0xf] }
 0x2c3   : > { %v15791_v48 = vpop.f32.mrf.mxu1  ;;  %15888 = vmatmul.mubr.msk.bf16.gmra.mxu1 %vm1981_vm3, %v4337_v5  ;;  %v4360_v43 = vrot.slane %v4358_v52, 1  ;;  %v4366_v5 = vshll.u32 %v16925_v30, 16 }
 0x2c4   : > { %15891 = vmatprep.mubr.msk.bf16.mxu1 %vm1981_vm3, %v4345_v20  ;;  %v19276_v54 = vpop.f32.mrf.mxu0  ;;  %v16926_v48 = vld [vmem:[#allocation3 + $0xbc] sm:$0xff]   ;;  %v4353_v20 = vsel %vm4189_vm5, %v4348_v16, %v4352_v29 }
 0x2c5   : > { %v19274_v35 = vpop.f32.mrf.mxu1  ;;  %21529 = vst [vmem:[#allocation83_spill] sm:$0xff] %v19276_v54  ;;  %v4361_v52 = vsel %vm4189_vm5, %v4356_v42, %v4360_v43  ;;  %v4368_v62 = vrot.slane %v4366_v5, 1  ;;  %v4374_v2 = vshll.u32 %v16926_v48, 16  ;;  %v4364_v54 = vor.u32 %v4362_v47, %v4360_v43  ;;  %v17180_v42 = vld [vmem:[#allocation3 + $0x94] sm:$0xf] }
 0x2c6   : > { %v15976_v27 = vpop.f32.mrf.mxu0  ;;  %v17181_v5 = vld [vmem:[#allocation3 + $0x98] sm:$0xf]  ;;  %v4378_v43 = vshrl.u32 %v16926_v48, 16 }
 0x2c7   : > { %v15792_v0 = vpop.f32.mrf.mxu1  ;;  %v4376_v27 = vrot.slane %v4374_v2, 1  ;;  %v14614_v3 = vcombine.low %v17180_v42, %v17181_v5  ;;  %v17182_v42 = vld [vmem:[#allocation3 + $0x9c] sm:$0xf]  ;;  %v17183_v5 = vld [vmem:[#allocation3 + $0xa0] sm:$0xf] }
 0x2c8   : > { %16206 = vmatmul.mubr.msk.bf16.gmra.mxu0 %vm1981_vm3, %v14611_v11  ;;  %v17178_v0 = vld [vmem:[#allocation3 + $0x8c] sm:$0xf]  ;;  %v19288_v29 = vpop.f32.mrf.mxu0 }
 0x2c9   : > { %v19278_v55 = vpop.f32.mrf.mxu1  ;;  %16209 = vmatprep.mubr.msk.bf16.mxu0 %vm1981_vm3, %v14612_v39  ;;  %v14613_v28 = vcombine.low %v17178_v0, %v17179_v33  ;;  %v4370_v39 = vshrl.u32 %v16925_v30, 16  ;;  %21530 = vst [vmem:[#allocation84_spill] sm:$0xff] %v19288_v29  ;;  %v4369_v30 = vsel %vm4189_vm5, %v4364_v54, %v4368_v62  ;;  %v4386_v54 = vshrl.u32 %v16931_v60, 16 }
 0x2ca   : > { %v4380_v48 = vor.u32 %v4378_v43, %v4376_v27 }
 0x2cb   : > { %v15795_v9 = vpop.f32.mrf.mxu1  ;;  %15892 = vmatmul.mubr.msk.bf16.gmra.mxu1 %vm1981_vm3, %v4353_v20  ;;  %v4372_v16 = vor.u32 %v4370_v39, %v4368_v62  ;;  %v4382_v20 = vshll.u32 %v16931_v60, 16 }
 0x2cc   : > { %15895 = vmatprep.mubr.msk.bf16.mxu1 %vm1981_vm3, %v4361_v52  ;;  %v16932_v9 = vld [vmem:[#allocation3 + $0xcc] sm:$0xff]  }
 0x2cd   : > { %v19286_v11 = vpop.f32.mrf.mxu1  ;;  %v4377_v2 = vsel %vm4189_vm5, %v4372_v16, %v4376_v27  ;;  %v4384_v33 = vrot.slane %v4382_v20, 1  ;;  %v4390_v39 = vshll.u32 %v16932_v9, 16  ;;  %v16938_v16 = vld [vmem:[#allocation3 + $0xdc] sm:$0xff]   ;;  %v17184_v20 = vld [vmem:[#allocation3 + $0xa4] sm:$0xf]  ;;  %v4394_v27 = vshrl.u32 %v16932_v9, 16 }
 0x2ce   : > { %v14616_v22 = vcombine.low %v17184_v20, %v17185_v53  ;;  %v16943_v53 = vld [vmem:[#allocation3 + $0xe4] sm:$0xff]  }
 0x2cf   : > { %v15796_v15 = vpop.f32.mrf.mxu1  ;;  %v4385_v60 = vsel %vm4189_vm5, %v4380_v48, %v4384_v33 }
 0x2d0   : > { %v15979_v52 = vpop.f32.mrf.mxu0  ;;  %16210 = vmatmul.mubr.msk.bf16.gmra.mxu0 %vm1981_vm3, %v14613_v28  ;;  %v16937_v15 = vld [vmem:[#allocation3 + $0xd4] sm:$0xff]   ;;  %v14615_v28 = vcombine.low %v17182_v42, %v17183_v5 }
 0x2d1   : > { %v19290_v58 = vpop.f32.mrf.mxu1  ;;  %16213 = vmatprep.mubr.msk.bf16.mxu0 %vm1981_vm3, %v14614_v3  ;;  %v4398_v29 = vshll.u32 %v16937_v15, 16 }
 0x2d2   : > { %v19296_v0 = vpop.f32.mrf.mxu0 }
 0x2d3   : > { %v15799_v47 = vpop.f32.mrf.mxu1  ;;  %15896 = vmatmul.mubr.msk.bf16.gmra.mxu1 %vm1981_vm3, %v4369_v30  ;;  %21531 = vst [vmem:[#allocation85_spill] sm:$0xff] %v19296_v0  ;;  %v4388_v30 = vor.u32 %v4386_v54, %v4384_v33  ;;  %v4392_v0 = vrot.slane %v4390_v39, 1  ;;  %v4400_v5 = vrot.slane %v4398_v29, 1  ;;  %v17186_v54 = vld [vmem:[#allocation3 + $0xac] sm:$0xf]  ;;  %v4402_v33 = vshrl.u32 %v16937_v15, 16 }
 0x2d4   : > { %15899 = vmatprep.mubr.msk.bf16.mxu1 %vm1981_vm3, %v4377_v2  ;;  %v15980_v3 = vpop.f32.mrf.mxu0  ;;  %v4410_v15 = vshrl.u32 %v16938_v16, 16 }
 0x2d5   : > { %v19300_v52 = vpop.f32.mrf.mxu1  ;;  %v4393_v39 = vsel %vm4189_vm5, %v4388_v30, %v4392_v0  ;;  %v4406_v3 = vshll.u32 %v16938_v16, 16  ;;  %v4396_v9 = vor.u32 %v4394_v27, %v4392_v0  ;;  %v17189_v30 = vld [vmem:[#allocation3 + $0xb8] sm:$0xf] }
 0x2d6   : > { %v19302_v47 = vpop.f32.mrf.mxu0 }
 0x2d7   : > { %v15800_v62 = vpop.f32.mrf.mxu1  ;;  %21532 = vst [vmem:[#allocation86_spill] sm:$0xff] %v19302_v47  ;;  %v17188_v47 = vld [vmem:[#allocation3 + $0xb4] sm:$0xf] }
 0x2d8   : > { %v15983_v2 = vpop.f32.mrf.mxu0  ;;  %16214 = vmatmul.mubr.msk.bf16.gmra.mxu0 %vm1981_vm3, %v14615_v28  ;;  %v17187_v62 = vld [vmem:[#allocation3 + $0xb0] sm:$0xf]  ;;  %v14618_v29 = vcombine.low %v17188_v47, %v17189_v30  ;;  %v4418_v30 = vshrl.u32 %v16943_v53, 16 }
 0x2d9   : > { %v19304_v34 = vpop.f32.mrf.mxu1  ;;  %16217 = vmatprep.mubr.msk.bf16.mxu0 %vm1981_vm3, %v14616_v22  ;;  %v14617_v28 = vcombine.low %v17186_v54, %v17187_v62  ;;  %v4404_v2 = vor.u32 %v4402_v33, %v4400_v5  ;;  %v16949_v62 = vld [vmem:[#allocation3 + $0xf4] sm:$0xff]   ;;  %v17191_v33 = vld [vmem:[#allocation3 + $0xc0] sm:$0xf] }
 0x2da   : > { %v19310_v42 = vpop.f32.mrf.mxu0 }
 0x2db   : > { %v15803_v43 = vpop.f32.mrf.mxu1  ;;  %15900 = vmatmul.mubr.msk.bf16.gmra.mxu1 %vm1981_vm3, %v4385_v60  ;;  %21533 = vst [vmem:[#allocation87_spill] sm:$0xff] %v19310_v42  ;;  %v4408_v60 = vrot.slane %v4406_v3, 1  ;;  %v16944_v42 = vld [vmem:[#allocation3 + $0xec] sm:$0xff]  }
 0x2dc   : > { %15903 = vmatprep.mubr.msk.bf16.mxu1 %vm1981_vm3, %v4393_v39  ;;  %v15984_v22 = vpop.f32.mrf.mxu0  ;;  %v4414_v43 = vshll.u32 %v16943_v53, 16  ;;  %v4401_v39 = vsel %vm4189_vm5, %v4396_v9, %v4400_v5  ;;  %v4422_v54 = vshll.u32 %v16944_v42, 16  ;;  %v4426_v53 = vshrl.u32 %v16944_v42, 16 }
 0x2dd   : > { %v19314_v20 = vpop.f32.mrf.mxu1  ;;  %v4409_v27 = vsel %vm4189_vm5, %v4404_v2, %v4408_v60  ;;  %v17190_v22 = vld [vmem:[#allocation3 + $0xbc] sm:$0xf]  ;;  %v17193_v2 = vld [vmem:[#allocation3 + $0xc4] sm:$0xf] }
 0x2de   : > { %v19316_v7 = vpop.f32.mrf.mxu0  ;;  %v4416_v3 = vrot.slane %v4414_v43, 1  ;;  %v4424_v9 = vrot.slane %v4422_v54, 1 }
 0x2df   : > { %v15804_v48 = vpop.f32.mrf.mxu1  ;;  %21534 = vst [vmem:[#allocation88_spill] sm:$0xff] %v19316_v7  ;;  %v17192_v7 = vld [vmem:[#allocation3 + $0xc8] sm:$0xf] }
 0x2e0   : > { %16218 = vmatmul.mubr.msk.bf16.gmra.mxu0 %vm1981_vm3, %v14617_v28  ;;  %v16055_v47 = vpop.f32.mrf.mxu0  ;;  %v14619_v48 = vcombine.low %v17190_v22, %v17191_v33  ;;  %v4420_v16 = vor.u32 %v4418_v30, %v4416_v3  ;;  %v14620_v43 = vcombine.low %v17193_v2, %v17192_v7  ;;  %v17194_v22 = vld [vmem:[#allocation3 + $0xcc] sm:$0xf]  ;;  %v17195_v33 = vld [vmem:[#allocation3 + $0xd0] sm:$0xf]  ;;  %v4428_v2 = vor.u32 %v4426_v53, %v4424_v9 }
 0x2e1   : > { %v19318_v4 = vpop.f32.mrf.mxu1  ;;  %16221 = vmatprep.mubr.msk.bf16.mxu0 %vm1981_vm3, %v14618_v29  ;;  %v4412_v29 = vor.u32 %v4410_v15, %v4408_v60  ;;  %v14621_v30 = vcombine.low %v17194_v22, %v17195_v33  ;;  %v17198_v22 = vld [vmem:[#allocation3 + $0xdc] sm:$0xf]  ;;  %v17199_v33 = vld [vmem:[#allocation3 + $0xe0] sm:$0xf] }
 0x2e2   : > { %v19328_v32 = vpop.f32.mrf.mxu0  ;;  %v4425_v15 = vsel %vm4189_vm5, %v4420_v16, %v4424_v9 }
 0x2e3   : > { %v15807_v0 = vpop.f32.mrf.mxu1  ;;  %15904 = vmatmul.mubr.msk.bf16.gmra.mxu1 %vm1981_vm3, %v4401_v39  ;;  %v16950_v39 = vld [vmem:[#allocation3 + $0xfc] sm:$0xff]   ;;  %21535 = vst [vmem:[#allocation89_spill] sm:$0xff] %v19328_v32 }
 0x2e4   : > { %15907 = vmatprep.mubr.msk.bf16.mxu1 %vm1981_vm3, %v4409_v27  ;;  %v4430_v0 = vshll.u32 %v16949_v62, 16  ;;  %v4417_v27 = vsel %vm4189_vm5, %v4412_v29, %v4416_v3  ;;  %v4438_v47 = vshll.u32 %v16950_v39, 16  ;;  %v16056_v7 = vpop.f32.mrf.mxu0 }
 0x2e5   : > { %v19326_v28 = vpop.f32.mrf.mxu1  ;;  %v4442_v7 = vshrl.u32 %v16950_v39, 16 }
 0x2e6   : > { %v4432_v54 = vrot.slane %v4430_v0, 1  ;;  %v4440_v29 = vrot.slane %v4438_v47, 1  ;;  %v19340_v16 = vpop.f32.mrf.mxu0 }
 0x2e7   : > { %v15808_v5 = vpop.f32.mrf.mxu1  ;;  %21536 = vst [vmem:[#allocation90_spill] sm:$0xff] %v19340_v16  ;;  %v17226_v16 = vld [vmem:[#allocation3 + $0x54] sm:$0xf] }
 0x2e8   : > { %16222 = vmatmul.mubr.msk.bf16.gmra.mxu0 %vm1981_vm3, %v14619_v48  ;;  %v4434_v48 = vshrl.u32 %v16949_v62, 16  ;;  %v16059_v47 = vpop.f32.mrf.mxu0 }
 0x2e9   : > { %v19330_v1 = vpop.f32.mrf.mxu1  ;;  %16225 = vmatprep.mubr.msk.bf16.mxu0 %vm1981_vm3, %v14620_v43  ;;  %v16955_v43 = vld [vmem:[#allocation3 + $0x104] ss:$0 sps:$4 sm:$0x11]  }
 0x2ea   : > { %v4436_v42 = vor.u32 %v4434_v48, %v4432_v54  ;;  %v4446_v62 = vshll.u32 %v16955_v43, 16  ;;  %v14623_v48 = vcombine.low %v17198_v22, %v17199_v33 }
 0x2eb   : > { %v15811_v60 = vpop.f32.mrf.mxu1  ;;  %15908 = vmatmul.mubr.msk.bf16.gmra.mxu1 %vm1981_vm3, %v4417_v27  ;;  %v17197_v27 = vld [vmem:[#allocation3 + $0xd4] sm:$0xf] }
 0x2ec   : > { %15911 = vmatprep.mubr.msk.bf16.mxu1 %vm1981_vm3, %v4425_v15  ;;  %v17196_v60 = vld [vmem:[#allocation3 + $0xd8] sm:$0xf]  ;;  %v4433_v15 = vsel %vm4189_vm5, %v4428_v2, %v4432_v54  ;;  %v4441_v53 = vsel %vm4189_vm5, %v4436_v42, %v4440_v29  ;;  %v17201_v54 = vld [vmem:[#allocation3 + $0xe4] sm:$0xf]  ;;  %v19352_v2 = vpop.f32.mrf.mxu0 }
 0x2ed   : > { %v19338_v5 = vpop.f32.mrf.mxu1  ;;  %v14622_v32 = vcombine.low %v17197_v27, %v17196_v60  ;;  %v4448_v60 = vrot.slane %v4446_v62, 1  ;;  %v17200_v27 = vld [vmem:[#allocation3 + $0xe8] sm:$0xf]  ;;  %21537 = vst [vmem:[#allocation91_spill] sm:$0xff] %v19352_v2  ;;  %v17205_v62 = vld [vmem:[#allocation3 + $0xf0] sm:$0xf] }
 0x2ee   : > { %v14624_v39 = vcombine.low %v17201_v54, %v17200_v27 }
 0x2ef   : > { %v15812_v3 = vpop.f32.mrf.mxu1 }
 0x2f0   : > { %16226 = vmatmul.mubr.msk.bf16.gmra.mxu0 %vm1981_vm3, %v14621_v30  ;;  %v4444_v30 = vor.u32 %v4442_v7, %v4440_v29  ;;  %v16060_v29 = vpop.f32.mrf.mxu0  ;;  %v17204_v7 = vld [vmem:[#allocation3 + $0xec] sm:$0xf] }
 0x2f1   : > { %v19342_v0 = vpop.f32.mrf.mxu1  ;;  %16229 = vmatprep.mubr.msk.bf16.mxu0 %vm1981_vm3, %v14622_v32  ;;  %v14625_v22 = vcombine.low %v17204_v7, %v17205_v62  ;;  %v19374_v29 = vld [vmem:[%s21439_s3 + $0x20] sm:$0xf]  ;;  %s17276_s3 = scalar_lea.vmem %s13907_s25, 16 }
 0x2f2   : > { %v4449_v42 = vsel %vm4189_vm5, %v4444_v30, %v4448_v60  ;;  %v17209_v30 = vld [vmem:[#allocation3 + $0xf4] sm:$0xf]  ;;  %v19363_v2 = vpop.f32.mrf.mxu0  ;;  %p17277_p12 = scmp.ne.s32.totalorder %s13907_s25, %s17276_s3  ;;  %p17284_p2 = scmp.lt.s32.totalorder %s17282_s26, %s17276_s3 }
 0x2f3   : > { %v15815_v9 = vpop.f32.mrf.mxu1  ;;  %15912 = vmatmul.mubr.msk.bf16.gmra.mxu1 %vm1981_vm3, %v4433_v15  ;;  %v17202_v15 = vld [vmem:[#allocation3 + $0x18] sm:$0xf]  ;;  %21538 = vst [vmem:[#allocation92_spill] sm:$0xff] %v19363_v2  ;;  %v17224_v2 = vld [vmem:[#allocation3 + $0x50] sm:$0xf] }
 0x2f4   : > { %15915 = vmatprep.mubr.msk.bf16.mxu1 %vm1981_vm3, %v4441_v53  ;;  %v17203_v9 = vld [vmem:[#allocation3 + $0x14] sm:$0xf]  ;;  %v16063_v62 = vpop.f32.mrf.mxu0  ;;  %p17278_p13 = pnand %p17277_p12, %p17478_p4  ;;  %p17285_p3 = por %p17284_p2, %p17283_p1 }
 0x2f5   : > { %v19350_v3 = vpop.f32.mrf.mxu1  ;;  %v14403_v53 = vcombine.low %v17203_v9, %v17202_v15  ;;  %v17210_v9 = vld [vmem:[#allocation3 + $0x28] sm:$0xf] }
 0x2f6   : > { %p17279_p0 = pneg %p17278_p13 }
 0x2f7   : > { %v15816_v32 = vpop.f32.mrf.mxu1 }
 0x2f8   : > { %16230 = vmatmul.mubr.msk.bf16.gmra.mxu0 %vm1981_vm3, %v14623_v48  ;;  %v17206_v32 = vld [vmem:[#allocation3 + $0x1c] sm:$0xf]  ;;  %v17207_v48 = vld [vmem:[#allocation3 + $0x20] sm:$0xf]  ;;  %p17286_p5 = pnand %p17285_p3, %p17279_p0 }
 0x2f9   : > { %v19354_v43 = vpop.f32.mrf.mxu1  ;;  %16233 = vmatprep.mubr.msk.bf16.mxu0 %vm1981_vm3, %v14624_v39  ;;  %v14404_v27 = vcombine.low %v17206_v32, %v17207_v48  ;;  %v17208_v39 = vld [vmem:[#allocation3 + $0xf8] sm:$0xf]  ;;  %v17213_v32 = vld [vmem:[#allocation3 + $0x100] sm:$0xf] }
 0x2fa   : > { %v14626_v60 = vcombine.low %v17209_v30, %v17208_v39  ;;  %v17214_v39 = vld [vmem:[#allocation3 + $0x2c] sm:$0xf]  ;;  %v17215_v30 = vld [vmem:[#allocation3 + $0x30] sm:$0xf] }
 0x2fb   : > { %v15819_v47 = vpop.f32.mrf.mxu1  ;;  %15916 = vmatmul.mubr.msk.bf16.gmra.mxu1 %vm1981_vm3, %v4449_v42  ;;  %v7931_v42 = vsel %vm2946_vm2, %v19123_v61, 0 }
 0x2fc   : > { %15987 = vmatprep.mubr.msk.bf16.mxu1 %vm1981_vm3, %v14403_v53  ;;  %v17211_v53 = vld [vmem:[#allocation3 + $0x24] sm:$0xf] }
 0x2fd   : > { %v19361_v33 = vpop.f32.mrf.mxu1  ;;  %v14405_v47 = vcombine.low %v17211_v53, %v17210_v9  ;;  %v17216_v9 = vld [vmem:[#allocation3 + $0x104] sm:$0xf] }
 0x2fe   : > { %v14628_v53 = vcombine.low %v17216_v9, %v19156_v40  ;;  %v17220_v9 = vld [vmem:[#allocation3 + $0x40] sm:$0xf] }
 0x2ff   : > { %v15820_v54 = vpop.f32.mrf.mxu1 }
 0x300   : > { %16234 = vmatmul.mubr.msk.bf16.gmra.mxu0 %vm1981_vm3, %v14625_v22  ;;  %v17212_v22 = vld [vmem:[#allocation3 + $0xfc] sm:$0xf] }
 0x301   : > { %v19365_v15 = vpop.f32.mrf.mxu1  ;;  %16237 = vmatprep.mubr.msk.bf16.mxu0 %vm1981_vm3, %v14626_v60  ;;  %v14627_v61 = vcombine.low %v17212_v22, %v17213_v32  ;;  %v14406_v60 = vcombine.low %v17214_v39, %v17215_v30  ;;  %v19390_v32 = vld [vmem:[#allocation3 + $0x110] sm:$0xf] }
 0x302   : > { %v14629_v40 = vcombine.low %v19158_v44, %v19390_v32 }
 0x303   : > { %v15823_v7 = vpop.f32.mrf.mxu1  ;;  %15988 = vmatmul.mubr.msk.bf16.vlgmr.msra.gmra.mxu1 %vm1981_vm3, %v14404_v27  ;;  %v19383_v27 = vpop.f32.mrf.mxu0 }
 0x304   : > { %16118 = vmatpush3.bf16.msra.mxu1 %v7931_v42  ;;  %15991 = vmatprep.mubr.msk.bf16.mxu1 %vm1981_vm3, %v14405_v47  ;;  %21539 = vst [vmem:[#allocation93_spill] sm:$0xff] %v19383_v27  ;;  %v17217_v47 = vld [vmem:[#allocation3 + $0x38] sm:$0xf]  ;;  %v17218_v7 = vld [vmem:[#allocation3 + $0x34] sm:$0xf] }
 0x305   : > { %v19378_v48 = vpop.f32.mrf.mxu1  ;;  %16630 = vmatprep.subr.msk.bf16.mxu1 %vm2946_vm2, %v19374_v29  ;;  %v14407_v62 = vcombine.low %v17218_v7, %v17217_v47  ;;  %v17222_v7 = vld [vmem:[#allocation3 + $0x44] sm:$0xf] }
 0x307   : > { %v15824_v54 = vpop.f32.mrf.mxu1 }
 0x308   : > { %16238 = vmatmul.mubr.msk.bf16.gmra.mxu0 %vm1981_vm3, %v14627_v61  ;;  %v16064_v54 = vpop.f32.mrf.mxu0  ;;  %v17219_v61 = vld [vmem:[#allocation3 + $0x3c] sm:$0xf] }
 0x309   : > { %v19385_v42 = vpop.f32.mrf.mxu1  ;;  %16241 = vmatprep.mubr.msk.bf16.mxu0 %vm1981_vm3, %v14628_v53  ;;  %v14408_v53 = vcombine.low %v17219_v61, %v17220_v9 }
 0x30a   : > { %v19397_v27 = vpop.f32.mrf.mxu0 }
 0x30b   : > { %v15827_v22 = vpop.f32.mrf.mxu1  ;;  %15992 = vmatmul.mubr.msk.bf16.gmra.mxu1 %vm1981_vm3, %v14406_v60  ;;  %21540 = vst [vmem:[#allocation94_spill] sm:$0xff] %v19397_v27  ;;  %v17221_v60 = vld [vmem:[#allocation3 + $0x48] sm:$0xf]  ;;  %v17225_v27 = vld [vmem:[#allocation3 + $0x58] sm:$0xf] }
 0x30c   : > { %15995 = vmatprep.mubr.msk.bf16.mxu1 %vm1981_vm3, %v14407_v62  ;;  %v14409_v22 = vcombine.low %v17222_v7, %v17221_v60  ;;  %v14411_v17 = vcombine.low %v17226_v16, %v17225_v27  ;;  %v17227_v7 = vld [vmem:[#allocation3 + $0x5c] sm:$0xf] }
 0x30d   : > { %v19395_v39 = vpop.f32.mrf.mxu1 }
 0x30f   : > { %v15828_v30 = vpop.f32.mrf.mxu1 }
 0x310   : > { %16242 = vmatmul.mubr.msk.bf16.gmra.mxu0 %vm1981_vm3, %v14629_v40  ;;  %v17223_v30 = vld [vmem:[#allocation3 + $0x4c] sm:$0xf] }
 0x311   : > { %v19399_v47 = vpop.f32.mrf.mxu1  ;;  %v14410_v61 = vcombine.low %v17223_v30, %v17224_v2  ;;  %v17230_v2 = vld [vmem:[#allocation3 + $0x64] sm:$0xf] }
 0x312   : > { %v14413_v30 = vcombine.low %v17230_v2, %v17229_v63  ;;  %v17236_v2 = vld [vmem:[#allocation3 + $0x80] sm:$0xf] }
 0x313   : > { %v15831_v62 = vpop.f32.mrf.mxu1  ;;  %15996 = vmatmul.mubr.msk.bf16.gmra.mxu1 %vm1981_vm3, %v14408_v53 }
 0x314   : > { %15999 = vmatprep.mubr.msk.bf16.mxu1 %vm1981_vm3, %v14409_v22  ;;  %v17228_v22 = vld [vmem:[#allocation3 + $0x60] sm:$0xf] }
 0x315   : > { %v19404_v44 = vpop.f32.mrf.mxu1  ;;  %v14412_v62 = vcombine.low %v17227_v7, %v17228_v22  ;;  %v17234_v7 = vld [vmem:[#allocation3 + $0x74] sm:$0xf] }
 0x316   : > { %v14415_v22 = vcombine.low %v17234_v7, %v17233_v37  ;;  %v17240_v7 = vld [vmem:[#allocation3 + $0x90] sm:$0xf] }
 0x317   : > { %v15832_v54 = vpop.f32.mrf.mxu1 }
 0x319   : > { %v19406_v9 = vpop.f32.mrf.mxu1 }
 0x31b   : > { %v15835_v40 = vpop.f32.mrf.mxu1  ;;  %16000 = vmatmul.mubr.msk.bf16.gmra.mxu1 %vm1981_vm3, %v14410_v61  ;;  %v17232_v61 = vld [vmem:[#allocation3 + $0x70] sm:$0xf] }
 0x31c   : > { %16003 = vmatprep.mubr.msk.bf16.mxu1 %vm1981_vm3, %v14411_v17  ;;  %v17231_v17 = vld [vmem:[#allocation3 + $0x6c] sm:$0xf] }
 0x31d   : > { %v19410_v60 = vpop.f32.mrf.mxu1  ;;  %v14414_v40 = vcombine.low %v17231_v17, %v17232_v61  ;;  %v17238_v17 = vld [vmem:[#allocation3 + $0x84] sm:$0xf] }
 0x31e   : > { %v14417_v61 = vcombine.low %v17238_v17, %v17237_v24  ;;  %v17244_v17 = vld [vmem:[#allocation3 + $0xa0] sm:$0xf] }
 0x31f   : > { %v15836_v53 = vpop.f32.mrf.mxu1 }
 0x321   : > { %v19412_v54 = vpop.f32.mrf.mxu1 }
 0x323   : > { %v15839_v26 = vpop.f32.mrf.mxu1  ;;  %16004 = vmatmul.mubr.msk.bf16.gmra.mxu1 %vm1981_vm3, %v14412_v62  ;;  %v17235_v62 = vld [vmem:[#allocation3 + $0x7c] sm:$0xf] }
 0x324   : > { %16007 = vmatprep.mubr.msk.bf16.mxu1 %vm1981_vm3, %v14413_v30  ;;  %v14416_v30 = vcombine.low %v17235_v62, %v17236_v2  ;;  %v17242_v62 = vld [vmem:[#allocation3 + $0x94] sm:$0xf] }
 0x325   : > { %v19416_v16 = vpop.f32.mrf.mxu1 }
 0x326   : > { %21541 = vst [vmem:[#allocation95_spill] sm:$0xff] %v19416_v16 }
 0x327   : > { %v15840_v27 = vpop.f32.mrf.mxu1 }
 0x329   : > { %v19418_v53 = vpop.f32.mrf.mxu1 }
 0x32a   : > { %21542 = vst [vmem:[#allocation96_spill] sm:$0xff] %v19418_v53 }
 0x32b   : > { %v15843_v59 = vpop.f32.mrf.mxu1  ;;  %16008 = vmatmul.mubr.msk.bf16.gmra.mxu1 %vm1981_vm3, %v14414_v40  ;;  %v17239_v40 = vld [vmem:[#allocation3 + $0x8c] sm:$0xf] }
 0x32c   : > { %16011 = vmatprep.mubr.msk.bf16.mxu1 %vm1981_vm3, %v14415_v22  ;;  %v14418_v22 = vcombine.low %v17239_v40, %v17240_v7  ;;  %v17246_v40 = vld [vmem:[#allocation3 + $0xa4] sm:$0xf] }
 0x32d   : > { %v19422_v63 = vpop.f32.mrf.mxu1 }
 0x32e   : > { %21543 = vst [vmem:[#allocation97_spill] sm:$0xff] %v19422_v63  ;;  %v17241_v63 = vld [vmem:[#allocation3 + $0x98] sm:$0xf] }
 0x32f   : > { %v15844_v26 = vpop.f32.mrf.mxu1  ;;  %v14419_v2 = vcombine.low %v17242_v62, %v17241_v63  ;;  %v21549_v63 = vld [vmem:[#allocation16_spill] sm:$0xff] }
 0x331   : > { %v19424_v27 = vpop.f32.mrf.mxu1 }
 0x332   : > { %21544 = vst [vmem:[#allocation98_spill] sm:$0xff] %v19424_v27 }
 0x333   : > { %v15847_v53 = vpop.f32.mrf.mxu1  ;;  %16012 = vmatmul.mubr.msk.bf16.gmra.mxu1 %vm1981_vm3, %v14416_v30  ;;  %v17243_v30 = vld [vmem:[#allocation3 + $0x9c] sm:$0xf] }
 0x334   : > { %16015 = vmatprep.mubr.msk.bf16.mxu1 %vm1981_vm3, %v14417_v61  ;;  %v14420_v61 = vcombine.low %v17243_v30, %v17244_v17  ;;  %v21550_v17 = vld [vmem:[#allocation17_spill] sm:$0xff] }
 0x335   : > { %v19428_v37 = vpop.f32.mrf.mxu1 }
 0x336   : > { %21545 = vst [vmem:[#allocation99_spill] sm:$0xff] %v19428_v37  ;;  %v17245_v37 = vld [vmem:[#allocation3 + $0xa8] sm:$0xf] }
 0x337   : > { %v15848_v59 = vpop.f32.mrf.mxu1  ;;  %v14421_v7 = vcombine.low %v17246_v40, %v17245_v37 }
 0x339   : > { %v19430_v26 = vpop.f32.mrf.mxu1 }
 0x33a   : > { %21546 = vst [vmem:[#allocation100_spill] sm:$0xff] %v19430_v26 }
 0x33b   : > { %v15851_v27 = vpop.f32.mrf.mxu1  ;;  %16016 = vmatmul.mubr.msk.bf16.gmra.mxu1 %vm1981_vm3, %v14418_v22 }
 0x33c   : > { %16019 = vmatprep.mubr.msk.bf16.mxu1 %vm1981_vm3, %v14419_v2  ;;  %v3705_v27 = vadd.f32 %v19274_v35, %v21549_v63  ;;  %v21551_v35 = vld [vmem:[#allocation18_spill] sm:$0xff] }
 0x33d   : > { %v19434_v24 = vpop.f32.mrf.mxu1 }
 0x33e   : > { %21547 = vst [vmem:[#allocation101_spill] sm:$0xff] %v19434_v24  ;;  %v17248_v24 = vld [vmem:[#allocation3 + $0xb0] sm:$0xf] }
 0x33f   : > { %v15852_v53 = vpop.f32.mrf.mxu1 }
 0x340   : > { %v17247_v53 = vld [vmem:[#allocation3 + $0xac] sm:$0xf] }
 0x341   : > { %v19436_v59 = vpop.f32.mrf.mxu1  ;;  %v14422_v30 = vcombine.low %v17247_v53, %v17248_v24 }
 0x342   : > { %21548 = vst [vmem:[#allocation102_spill] sm:$0xff] %v19436_v59  ;;  %v3708_v59 = vadd.f32 %v19278_v55, %v21550_v17  ;;  %v17252_v55 = vld [vmem:[#allocation3 + $0xc0] sm:$0xf] }
 0x343   : > { %v15857_v26 = vpop.f32.mrf.mxu1  ;;  %16020 = vmatmul.mubr.msk.bf16.gmra.mxu1 %vm1981_vm3, %v14420_v61  ;;  %v17250_v61 = vld [vmem:[#allocation3 + $0xb4] sm:$0xf] }
 0x344   : > { %16023 = vmatprep.mubr.msk.bf16.mxu1 %vm1981_vm3, %v14421_v7  ;;  %v17249_v26 = vld [vmem:[#allocation3 + $0xb8] sm:$0xf]  ;;  %v3721_v7 = vadd.f32 %v19286_v11, %v21551_v35 }
 0x345   : > { %v4583_v22 = vpop.f32.mrf.mxu1  ;;  %v14423_v40 = vcombine.low %v17250_v61, %v17249_v26  ;;  %v21553_v11 = vld [vmem:[#allocation22_spill] sm:$0xff] }
 0x346   : > { %v19442_v62 = vadd.f32 %v4583_v22, %v3705_v27  ;;  %v17251_v22 = vld [vmem:[#allocation3 + $0xbc] sm:$0xf] }
 0x347   : > { %v15858_v2 = vpop.f32.mrf.mxu1 }
 0x348   : > { %v14424_v2 = vcombine.low %v17251_v22, %v17252_v55  ;;  %v21554_v55 = vld [vmem:[#allocation25_spill] sm:$0xff] }
 0x349   : > { %v4586_v16 = vpop.f32.mrf.mxu1 }
 0x34a   : > { %v19446_v37 = vadd.f32 %v4586_v16, %v3708_v59  ;;  %v21552_v16 = vld [vmem:[#allocation21_spill] sm:$0xff] }
 0x34b   : > { %v15861_v50 = vpop.f32.mrf.mxu1  ;;  %16024 = vmatmul.mubr.msk.bf16.gmra.mxu1 %vm1981_vm3, %v14422_v30  ;;  %v3724_v59 = vadd.f32 %v19290_v58, %v21552_v16  ;;  %v17254_v30 = vld [vmem:[#allocation3 + $0xc4] sm:$0xf]  ;;  %v17256_v58 = vld [vmem:[#allocation3 + $0xd0] sm:$0xf]  ;;  %v3740_v16 = vadd.f32 %v19304_v34, %v21554_v55  ;;  %v17260_v34 = vld [vmem:[#allocation3 + $0xe0] sm:$0xf] }
 0x34c   : > { %16027 = vmatprep.mubr.msk.bf16.mxu1 %vm1981_vm3, %v14423_v40  ;;  %v17253_v50 = vld [vmem:[#allocation3 + $0xc8] sm:$0xf]  ;;  %v3737_v40 = vadd.f32 %v19300_v52, %v21553_v11  ;;  %v21555_v52 = vld [vmem:[#allocation27_spill] sm:$0xff] }
 0x34d   : > { %v4599_v63 = vpop.f32.mrf.mxu1  ;;  %v14425_v26 = vcombine.low %v17254_v30, %v17253_v50  ;;  %v17257_v50 = vld [vmem:[#allocation3 + $0xd8] sm:$0xf] }
 0x34e   : > { %v19452_v27 = vadd.f32 %v4599_v63, %v3721_v7 }
 0x34f   : > { %v15862_v24 = vpop.f32.mrf.mxu1 }
 0x350   : > { %v17255_v24 = vld [vmem:[#allocation3 + $0xcc] sm:$0xf] }
 0x351   : > { %v4602_v53 = vpop.f32.mrf.mxu1  ;;  %v14426_v22 = vcombine.low %v17255_v24, %v17256_v58  ;;  %v21556_v58 = vld [vmem:[#allocation30_spill] sm:$0xff] }
 0x352   : > { %v19456_v17 = vadd.f32 %v4602_v53, %v3724_v59  ;;  %v3756_v55 = vadd.f32 %v19318_v4, %v21556_v58  ;;  %v17264_v4 = vld [vmem:[#allocation3 + $0xf0] sm:$0xf] }
 0x353   : > { %v15865_v61 = vpop.f32.mrf.mxu1  ;;  %16028 = vmatmul.mubr.msk.bf16.gmra.mxu1 %vm1981_vm3, %v14424_v2  ;;  %v17258_v2 = vld [vmem:[#allocation3 + $0xd4] sm:$0xf] }
 0x354   : > { %16031 = vmatprep.mubr.msk.bf16.mxu1 %vm1981_vm3, %v14425_v26  ;;  %v14427_v30 = vcombine.low %v17258_v2, %v17257_v50  ;;  %v3753_v26 = vadd.f32 %v19314_v20, %v21555_v52  ;;  %v17261_v50 = vld [vmem:[#allocation3 + $0xe8] sm:$0xf] }
 0x355   : > { %v4615_v35 = vpop.f32.mrf.mxu1  ;;  %v21557_v20 = vld [vmem:[#allocation32_spill] sm:$0xff] }
 0x356   : > { %v19462_v7 = vadd.f32 %v4615_v35, %v3737_v40 }
 0x357   : > { %v15866_v63 = vpop.f32.mrf.mxu1 }
 0x358   : > { %v17259_v63 = vld [vmem:[#allocation3 + $0xdc] sm:$0xf] }
 0x359   : > { %v4618_v59 = vpop.f32.mrf.mxu1  ;;  %v14428_v24 = vcombine.low %v17259_v63, %v17260_v34  ;;  %v21559_v34 = vld [vmem:[#allocation34_spill] sm:$0xff] }
 0x35a   : > { %v19466_v53 = vadd.f32 %v4618_v59, %v3740_v16  ;;  %v3772_v58 = vadd.f32 %v19330_v1, %v21559_v34 }
 0x35b   : > { %v15869_v61 = vpop.f32.mrf.mxu1  ;;  %16032 = vmatmul.mubr.msk.bf16.gmra.mxu1 %vm1981_vm3, %v14426_v22  ;;  %v17262_v22 = vld [vmem:[#allocation3 + $0xe4] sm:$0xf] }
 0x35c   : > { %16035 = vmatprep.mubr.msk.bf16.mxu1 %vm1981_vm3, %v14427_v30  ;;  %v14429_v2 = vcombine.low %v17262_v22, %v17261_v50  ;;  %v3769_v30 = vadd.f32 %v19326_v28, %v21557_v20  ;;  %v17265_v50 = vld [vmem:[#allocation3 + $0xf8] sm:$0xf]  ;;  %v21561_v28 = vld [vmem:[#allocation36_spill] sm:$0xff]  ;;  %v7799_v20 = vshrl.u32 %v19164_v13, 16 }
 0x35d   : > { %v4631_v11 = vpop.f32.mrf.mxu1 }
 0x35e   : > { %v19472_v40 = vadd.f32 %v4631_v11, %v3753_v26 }
 0x35f   : > { %v15870_v35 = vpop.f32.mrf.mxu1 }
 0x360   : > { %v17263_v35 = vld [vmem:[#allocation3 + $0xec] sm:$0xf] }
 0x361   : > { %v4634_v16 = vpop.f32.mrf.mxu1  ;;  %v14430_v63 = vcombine.low %v17263_v35, %v17264_v4  ;;  %v7801_v35 = vrot.slane %v7799_v20, 3 }
 0x362   : > { %v19476_v59 = vadd.f32 %v4634_v16, %v3756_v55 }
 0x363   : > { %v15873_v61 = vpop.f32.mrf.mxu1  ;;  %16036 = vmatmul.mubr.msk.bf16.gmra.mxu1 %vm1981_vm3, %v14428_v24  ;;  %v17266_v24 = vld [vmem:[#allocation3 + $0xf4] sm:$0xf] }
 0x364   : > { %16039 = vmatprep.mubr.msk.bf16.mxu1 %vm1981_vm3, %v14429_v2  ;;  %v14431_v22 = vcombine.low %v17266_v24, %v17265_v50  ;;  %v3785_v2 = vadd.f32 %v19338_v5, %v21561_v28 }
 0x365   : > { %v4647_v52 = vpop.f32.mrf.mxu1 }
 0x366   : > { %v19482_v26 = vadd.f32 %v4647_v52, %v3769_v30  ;;  %v7802_v30 = vshll.u32 %v19164_v13, 16  ;;  %v7369_v52 = vld [vmem:[#allocation3 + $0x114] sm:$0xf]  ;;  %v17269_v13 = vld [vmem:[#allocation3 + $0x108] sm:$0xf] }
 0x367   : > { %v15874_v11 = vpop.f32.mrf.mxu1  ;;  %v14564_v5 = vcombine.low %v19390_v32, %v7369_v52 }
 0x368   : > { %21558 = vst [vmem:[#allocation16_spill] sm:$0xff] %v19482_v26  ;;  %v7804_v4 = vrot.slane %v7802_v30, 4  ;;  %v21563_v30 = vld [vmem:[#allocation40_spill] sm:$0xff] }
 0x369   : > { %v4650_v55 = vpop.f32.mrf.mxu1  ;;  %v7808_v32 = vshrl.u32 %v14564_v5, 16 }
 0x36a   : > { %v19486_v16 = vadd.f32 %v4650_v55, %v3772_v58  ;;  %v17267_v58 = vld [vmem:[#allocation3 + $0xfc] sm:$0xf]  ;;  %v17268_v55 = vld [vmem:[#allocation3 + $0x100] sm:$0xf] }
 0x36b   : > { %v15877_v61 = vpop.f32.mrf.mxu1  ;;  %16040 = vmatmul.mubr.msk.bf16.gmra.mxu1 %vm1981_vm3, %v14430_v63  ;;  %v14432_v50 = vcombine.low %v17267_v58, %v17268_v55  ;;  %v21562_v63 = vld [vmem:[#allocation38_spill] sm:$0xff]  ;;  %v7810_v58 = vrot.slane %v7808_v32, 3 }
 0x36c   : > { %21560 = vst [vmem:[#allocation17_spill] sm:$0xff] %v19486_v16  ;;  %16043 = vmatprep.mubr.msk.bf16.mxu1 %vm1981_vm3, %v14431_v22  ;;  %v3788_v24 = vadd.f32 %v19342_v0, %v21562_v63  ;;  %v7805_v22 = vor.u32 %v7804_v4, %v7801_v35  ;;  %v17270_v16 = vld [vmem:[#allocation3 + $0x104] sm:$0xf]  ;;  %v16067_v0 = vpop.f32.mrf.mxu0  ;;  %v7811_v35 = vshll.u32 %v14564_v5, 16  ;;  %v17271_v63 = vld [vmem:[#allocation3 + $0x110] sm:$0xf] }
 0x36d   : > { %v4663_v1 = vpop.f32.mrf.mxu1  ;;  %v14433_v26 = vcombine.low %v17270_v16, %v17269_v13  ;;  %v7370_v5 = vld [vmem:[#allocation3 + $0x118] sm:$0xf] }
 0x36e   : > { %v19494_v11 = vadd.f32 %v4663_v1, %v3785_v2  ;;  %v19503_v2 = vsel %vm3274_vm4, %v19225_v21, %v7805_v22  ;;  %v3801_v1 = vadd.f32 %v19350_v3, %v21563_v30  ;;  %v7813_v16 = vrot.slane %v7811_v35, 4  ;;  %v17272_v21 = vld [vmem:[#allocation3 + $0x10c] sm:$0xf]  ;;  %v19513_v13 = vpop.f32.mrf.mxu0  ;;  %v21566_v35 = vld [vmem:[#allocation46_spill] sm:$0xff] }
 0x36f   : > { %v15878_v34 = vpop.f32.mrf.mxu1  ;;  %21565 = vst [vmem:[#allocation18_spill] sm:$0xff] %v19513_v13 }
 0x370   : > { %v7814_v3 = vor.u32 %v7813_v16, %v7810_v58  ;;  %v14630_v58 = vcombine.low %v7369_v52, %v7370_v5 }
 0x371   : > { %v4666_v61 = vpop.f32.mrf.mxu1 }
 0x372   : > { %v19499_v28 = vadd.f32 %v4666_v61, %v3788_v24  ;;  %v14434_v24 = vcombine.low %v17272_v21, %v17271_v63  ;;  %v21564_v61 = vld [vmem:[#allocation43_spill] sm:$0xff]  ;;  %16245 = vmatprep.mubr.msk.bf16.mxu0 %vm1981_vm3, %v14630_v58 }
 0x373   : > { %v15881_v20 = vpop.f32.mrf.mxu1  ;;  %16044 = vmatmul.mubr.msk.bf16.gmra.mxu1 %vm1981_vm3, %v14432_v50  ;;  %v3804_v50 = vadd.f32 %v19354_v43, %v21564_v61  ;;  %v7372_v43 = vld [vmem:[#allocation3 + $0x120] sm:$0xf] }
 0x374   : > { %16047 = vmatprep.mubr.msk.bf16.mxu1 %vm1981_vm3, %v14433_v26  ;;  %v19518_v26 = vsel %vm3274_vm4, %v7805_v22, %v7814_v3  ;;  %v14566_v22 = vcombine.low %v7372_v43, %v7372_v43 }
 0x375   : > { %v4679_v4 = vpop.f32.mrf.mxu1 }
 0x376   : > { %v19509_v34 = vadd.f32 %v4679_v4, %v3801_v1  ;;  %v7371_v1 = vld [vmem:[#allocation3 + $0x11c] sm:$0xf]  ;;  %v3817_v4 = vadd.f32 %v19361_v33, %v21566_v35  ;;  %v7826_v13 = vshrl.u32 %v14566_v22, 16  ;;  %v7829_v33 = vshll.u32 %v14566_v22, 16 }
 0x377   : > { %v15882_v55 = vpop.f32.mrf.mxu1  ;;  %v14565_v32 = vcombine.low %v7370_v5, %v7371_v1  ;;  %v9359_v5 = vsel %vm2946_vm2, %v19374_v29, 0 }
 0x378   : > { %v16068_v55 = vpop.f32.mrf.mxu0 }
 0x379   : > { %v4682_v20 = vpop.f32.mrf.mxu1  ;;  %v7817_v63 = vshrl.u32 %v14565_v32, 16  ;;  %v7820_v21 = vshll.u32 %v14565_v32, 16  ;;  %v7831_v55 = vrot.slane %v7829_v33, 4 }
 0x37a   : > { %v19515_v30 = vadd.f32 %v4682_v20, %v3804_v50  ;;  %v14631_v50 = vcombine.low %v7371_v1, %v7372_v43  ;;  %v19528_v35 = vpop.f32.mrf.mxu0 }
 0x37b   : > { %v15885_v0 = vpop.f32.mrf.mxu1  ;;  %16048 = vmatmul.mubr.msk.bf16.gmra.mxu1 %vm1981_vm3, %v14434_v24  ;;  %v7819_v20 = vrot.slane %v7817_v63, 3 }
 0x37c   : > { %16119 = vmatprep.mubr.msk.bf16.mxu1 %vm1981_vm3, %v18874_v14  ;;  %v7822_v0 = vrot.slane %v7820_v21, 4  ;;  %v3820_v14 = vadd.f32 %v19365_v15, %v18887_v49  ;;  %16246 = vmatmul.mubr.msk.bf16.gmra.mxu0 %vm1981_vm3, %v14631_v50  ;;  %v16071_v49 = vpop.f32.mrf.mxu0  ;;  %v3833_v15 = vadd.f32 %v19378_v48, %v18919_v19  ;;  %v3849_v48 = vadd.f32 %v19395_v39, %v19009_v51 }
 0x37d   : > { %v4695_v16 = vpop.f32.mrf.mxu1 }
 0x37e   : > { %v19525_v61 = vadd.f32 %v4695_v16, %v3817_v4  ;;  %v7823_v32 = vor.u32 %v7822_v0, %v7819_v20  ;;  %v7828_v4 = vrot.slane %v7826_v13, 3 }
 0x37f   : > { %v15886_v24 = vpop.f32.mrf.mxu1 }
 0x380   : > { %v19540_v58 = vsel %vm3274_vm4, %v7814_v3, %v7823_v32  ;;  %v7832_v16 = vor.u32 %v7831_v55, %v7828_v4  ;;  %v3836_v3 = vadd.f32 %v19385_v42, %v18980_v38  ;;  %v3852_v38 = vadd.f32 %v19399_v47, %v19030_v46 }
 0x381   : > { %v4698_v52 = vpop.f32.mrf.mxu1  ;;  %v3868_v46 = vadd.f32 %v19406_v9, %v19077_v57  ;;  %v3884_v57 = vadd.f32 %v19412_v54, %v19144_v36  ;;  %v21571_v36 = vld [vmem:[#allocation41_spill] sm:$0xff]  ;;  %v21572_v54 = vld [vmem:[#allocation96_spill] sm:$0xff] }
 0x382   : > { %v19535_v1 = vadd.f32 %v4698_v52, %v3820_v14  ;;  %v19547_v13 = vsel %vm3274_vm4, %v7823_v32, %v7832_v16 }
 0x383   : > { %v15889_v43 = vpop.f32.mrf.mxu1  ;;  %16120 = vmatmul.mubr.msk.bf16.vlgmr.msra.gmra.mxu1 %vm1981_vm3, %v18878_v23  ;;  %v19551_v23 = vpop.f32.mrf.mxu0 }
 0x384   : > { %16250 = vmatpush3.bf16.msra.mxu1 %v9359_v5  ;;  %16123 = vmatprep.mubr.msk.bf16.mxu1 %vm1981_vm3, %v18881_v6 }
 0x385   : > { %v4711_v29 = vpop.f32.mrf.mxu1  ;;  %v16072_v6 = vpop.f32.mrf.mxu0 }
 0x386   : > { %v19549_v63 = vadd.f32 %v4711_v29, %v3833_v15  ;;  %v21569_v15 = vld [vmem:[#allocation95_spill] sm:$0xff]  ;;  %v21570_v29 = vld [vmem:[#allocation50_spill] sm:$0xff]  ;;  %v3900_v6 = vadd.f32 %v21572_v54, %v21571_v36 }
 0x387   : > { %v15890_v21 = vpop.f32.mrf.mxu1  ;;  %v19565_v33 = vpop.f32.mrf.mxu0  ;;  %v21584_v54 = vld [vmem:[#allocation78_spill] sm:$0xff] }
 0x389   : > { %v4714_v22 = vpop.f32.mrf.mxu1  ;;  %v16075_v51 = vpop.f32.mrf.mxu0 }
 0x38a   : > { %v19555_v50 = vadd.f32 %v4714_v22, %v3836_v3 }
 0x38b   : > { %v15893_v19 = vpop.f32.mrf.mxu1  ;;  %16124 = vmatmul.mubr.msk.bf16.gmra.mxu1 %vm1981_vm3, %v18890_v10  ;;  %v19579_v32 = vpop.f32.mrf.mxu0 }
 0x38c   : > { %16127 = vmatprep.mubr.msk.bf16.mxu1 %vm1981_vm3, %v18907_v41  ;;  %v3865_v41 = vadd.f32 %v19404_v44, %v19054_v12 }
 0x38d   : > { %v4727_v24 = vpop.f32.mrf.mxu1  ;;  %v16076_v12 = vpop.f32.mrf.mxu0 }
 0x38e   : > { %v19563_v20 = vadd.f32 %v4727_v24, %v3849_v48  ;;  %v21579_v12 = vld [vmem:[#allocation98_spill] sm:$0xff] }
 0x38f   : > { %v15894_v0 = vpop.f32.mrf.mxu1  ;;  %v19593_v16 = vpop.f32.mrf.mxu0 }
 0x390   : > { %21567 = vst [vmem:[#allocation21_spill] sm:$0xff] %v19593_v16  ;;  %v21573_v0 = vld [vmem:[#allocation51_spill] sm:$0xff] }
 0x391   : > { %v4730_v42 = vpop.f32.mrf.mxu1 }
 0x392   : > { %v19569_v14 = vadd.f32 %v4730_v42, %v3852_v38  ;;  %v21574_v42 = vld [vmem:[#allocation71_spill] sm:$0xff] }
 0x393   : > { %v15897_v10 = vpop.f32.mrf.mxu1  ;;  %16128 = vmatmul.mubr.msk.bf16.gmra.mxu1 %vm1981_vm3, %v18910_v25 }
 0x394   : > { %16131 = vmatprep.mubr.msk.bf16.mxu1 %vm1981_vm3, %v18929_v18  ;;  %v3881_v18 = vadd.f32 %v19410_v60, %v19113_v8  ;;  %v16079_v8 = vpop.f32.mrf.mxu0  ;;  %v21568_v60 = vld [vmem:[#allocation66_spill] sm:$0xff]  ;;  %v21575_v10 = vld [vmem:[#allocation97_spill] sm:$0xff] }
 0x395   : > { %v4743_v39 = vpop.f32.mrf.mxu1  ;;  %v3913_v51 = vadd.f32 %v21575_v10, %v21574_v42  ;;  %v21581_v8 = vld [vmem:[#allocation76_spill] sm:$0xff] }
 0x396   : > { %v19577_v52 = vadd.f32 %v4743_v39, %v3865_v41  ;;  %v19607_v19 = vpop.f32.mrf.mxu0  ;;  %v21576_v41 = vld [vmem:[#allocation53_spill] sm:$0xff]  ;;  %v21586_v42 = vld [vmem:[#allocation56_spill] sm:$0xff] }
 0x397   : > { %v15898_v5 = vpop.f32.mrf.mxu1 }
 0x398   : > { %v16080_v38 = vpop.f32.mrf.mxu0 }
 0x399   : > { %v4746_v47 = vpop.f32.mrf.mxu1 }
 0x39a   : > { %v19583_v4 = vadd.f32 %v4746_v47, %v3868_v46  ;;  %v19621_v47 = vpop.f32.mrf.mxu0 }
 0x39b   : > { %v15901_v25 = vpop.f32.mrf.mxu1  ;;  %16132 = vmatmul.mubr.msk.bf16.gmra.mxu1 %vm1981_vm3, %v18932_v31  ;;  %21577 = vst [vmem:[#allocation22_spill] sm:$0xff] %v19621_v47 }
 0x39c   : > { %16135 = vmatprep.mubr.msk.bf16.mxu1 %vm1981_vm3, %v18935_v56  ;;  %v3897_v56 = vadd.f32 %v21569_v15, %v21568_v60  ;;  %v21578_v25 = vld [vmem:[#allocation73_spill] sm:$0xff]  ;;  %v21582_v60 = vld [vmem:[#allocation99_spill] sm:$0xff] }
 0x39d   : > { %v4759_v44 = vpop.f32.mrf.mxu1  ;;  %v3929_v15 = vadd.f32 %v21582_v60, %v21581_v8 }
 0x39e   : > { %v19591_v55 = vadd.f32 %v4759_v44, %v3881_v18  ;;  %v3916_v18 = vadd.f32 %v21579_v12, %v21578_v25 }
 0x39f   : > { %v15902_v43 = vpop.f32.mrf.mxu1 }
 0x3a1   : > { %v4762_v9 = vpop.f32.mrf.mxu1 }
 0x3a2   : > { %v19597_v49 = vadd.f32 %v4762_v9, %v3884_v57  ;;  %v21580_v9 = vld [vmem:[#allocation54_spill] sm:$0xff] }
 0x3a3   : > { %v15905_v31 = vpop.f32.mrf.mxu1  ;;  %16136 = vmatmul.mubr.msk.bf16.gmra.mxu1 %vm1981_vm3, %v18940_v45 }
 0x3a4   : > { %16139 = vmatprep.mubr.msk.bf16.mxu1 %vm1981_vm3, %v21570_v29  ;;  %v16083_v31 = vpop.f32.mrf.mxu0 }
 0x3a5   : > { %v4775_v21 = vpop.f32.mrf.mxu1 }
 0x3a6   : > { %v19605_v3 = vadd.f32 %v4775_v21, %v3897_v56  ;;  %v21583_v56 = vld [vmem:[#allocation55_spill] sm:$0xff]  ;;  %v19635_v36 = vpop.f32.mrf.mxu0 }
 0x3a7   : > { %v15906_v22 = vpop.f32.mrf.mxu1 }
 0x3a8   : > { %v16084_v10 = vpop.f32.mrf.mxu0 }
 0x3a9   : > { %v4778_v48 = vpop.f32.mrf.mxu1  ;;  %v21596_v10 = vld [vmem:[#allocation33_spill] sm:$0xff] }
 0x3aa   : > { %v19611_v24 = vadd.f32 %v4778_v48, %v3900_v6  ;;  %v21585_v6 = vld [vmem:[#allocation100_spill] sm:$0xff] }
 0x3ab   : > { %v15909_v45 = vpop.f32.mrf.mxu1  ;;  %16140 = vmatmul.mubr.msk.bf16.gmra.mxu1 %vm1981_vm3, %v21573_v0  ;;  %v3932_v48 = vadd.f32 %v21585_v6, %v21584_v54  ;;  %v21595_v54 = vld [vmem:[#allocation31_spill] sm:$0xff] }
 0x3ac   : > { %16143 = vmatprep.mubr.msk.bf16.mxu1 %vm1981_vm3, %v21576_v41  ;;  %v21588_v41 = vld [vmem:[#allocation101_spill] sm:$0xff]  ;;  %v5816_v6 = vadd.f32 %v21595_v54, %v19442_v62  ;;  %v21599_v62 = vld [vmem:[#allocation35_spill] sm:$0xff] }
 0x3ad   : > { %v4791_v39 = vpop.f32.mrf.mxu1 }
 0x3ae   : > { %v19619_v5 = vadd.f32 %v4791_v39, %v3913_v51  ;;  %v21587_v51 = vld [vmem:[#allocation80_spill] sm:$0xff] }
 0x3af   : > { %v15910_v46 = vpop.f32.mrf.mxu1  ;;  %v3945_v39 = vadd.f32 %v21588_v41, %v21587_v51  ;;  %v5817_v51 = vadd.f32 %v21596_v10, %v19446_v37  ;;  %v21601_v37 = vld [vmem:[#allocation37_spill] sm:$0xff]  ;;  %v21603_v10 = vld [vmem:[#allocation26_spill] sm:$0xff] }
 0x3b0   : > { %v21589_v46 = vld [vmem:[#allocation58_spill] sm:$0xff] }
 0x3b1   : > { %v4794_v44 = vpop.f32.mrf.mxu1 }
 0x3b2   : > { %v19625_v43 = vadd.f32 %v4794_v44, %v3916_v18  ;;  %v19649_v44 = vpop.f32.mrf.mxu0 }
 0x3b3   : > { %v15913_v57 = vpop.f32.mrf.mxu1  ;;  %16144 = vmatmul.mubr.msk.bf16.gmra.mxu1 %vm1981_vm3, %v21580_v9  ;;  %21590 = vst [vmem:[#allocation25_spill] sm:$0xff] %v19649_v44  ;;  %v21592_v9 = vld [vmem:[#allocation102_spill] sm:$0xff] }
 0x3b4   : > { %16147 = vmatprep.mubr.msk.bf16.mxu1 %vm1981_vm3, %v21583_v56  ;;  %v21591_v57 = vld [vmem:[#allocation82_spill] sm:$0xff]  ;;  %v21593_v56 = vld [vmem:[#allocation59_spill] sm:$0xff] }
 0x3b5   : > { %v4807_v29 = vpop.f32.mrf.mxu1  ;;  %v3948_v31 = vadd.f32 %v21592_v9, %v21591_v57  ;;  %v21598_v57 = vld [vmem:[#allocation61_spill] sm:$0xff]  ;;  %v5820_v9 = vadd.f32 %v21599_v62, %v19452_v27  ;;  %v21604_v27 = vld [vmem:[#allocation39_spill] sm:$0xff] }
 0x3b6   : > { %v19633_v21 = vadd.f32 %v4807_v29, %v3929_v15  ;;  %v16087_v29 = vpop.f32.mrf.mxu0 }
 0x3b7   : > { %v15914_v22 = vpop.f32.mrf.mxu1  ;;  %v5821_v29 = vadd.f32 %v21601_v37, %v19456_v17  ;;  %v21605_v17 = vld [vmem:[#allocation42_spill] sm:$0xff] }
 0x3b8   : > { %v21594_v22 = vld [vmem:[#allocation60_spill] sm:$0xff] }
 0x3b9   : > { %v4810_v45 = vpop.f32.mrf.mxu1 }
 0x3ba   : > { %v19639_v0 = vadd.f32 %v4810_v45, %v3932_v48 }
 0x3bb   : > { %v15917_v38 = vpop.f32.mrf.mxu1  ;;  %16148 = vmatmul.mubr.msk.bf16.gmra.mxu1 %vm1981_vm3, %v21586_v42  ;;  %v19663_v42 = vpop.f32.mrf.mxu0 }
 0x3bc   : > { %16151 = vmatprep.mubr.msk.bf16.mxu1 %vm1981_vm3, %v21589_v46 }
 0x3bd   : > { %v4823_v25 = vpop.f32.mrf.mxu1 }
 0x3be   : > { %v19647_v12 = vadd.f32 %v4823_v25, %v3945_v39  ;;  %v21597_v25 = vld [vmem:[#allocation20_spill] sm:$0xff] }
 0x3bf   : > { %v15918_v18 = vpop.f32.mrf.mxu1 }
 0x3c0   : > { %v16088_v18 = vpop.f32.mrf.mxu0 }
 0x3c1   : > { %v4826_v8 = vpop.f32.mrf.mxu1 }
 0x3c2   : > { %v19653_v60 = vadd.f32 %v4826_v8, %v3948_v31 }
 0x3c3   : > { %v15989_v15 = vpop.f32.mrf.mxu1  ;;  %16152 = vmatmul.mubr.msk.bf16.gmra.mxu1 %vm1981_vm3, %v21593_v56  ;;  %v19677_v56 = vpop.f32.mrf.mxu0 }
 0x3c4   : > { %16155 = vmatprep.mubr.msk.bf16.mxu1 %vm1981_vm3, %v21594_v22  ;;  %21600 = vst [vmem:[#allocation27_spill] sm:$0xff] %v19677_v56  ;;  %v16978_v56 = vld [vmem:[#allocation3 + $0x3c] sm:$0xff]  }
 0x3c5   : > { %v6047_v48 = vpop.f32.mrf.mxu1 }
 0x3c6   : > { %v19661_v45 = vadd.f32 %v6047_v48, %v5816_v6  ;;  %v21602_v48 = vld [vmem:[#allocation45_spill] sm:$0xff] }
 0x3c7   : > { %v15990_v38 = vpop.f32.mrf.mxu1 }
 0x3c8   : > { %v16091_v38 = vpop.f32.mrf.mxu0 }
 0x3c9   : > { %v6050_v41 = vpop.f32.mrf.mxu1 }
 0x3ca   : > { %v19667_v39 = vadd.f32 %v6050_v41, %v5817_v51  ;;  %v5824_v51 = vadd.f32 %v21604_v27, %v19462_v7  ;;  %v19691_v18 = vpop.f32.mrf.mxu0  ;;  %v21608_v7 = vld [vmem:[#allocation44_spill] sm:$0xff] }
 0x3cb   : > { %v15993_v46 = vpop.f32.mrf.mxu1  ;;  %16156 = vmatmul.mubr.msk.bf16.gmra.mxu1 %vm1981_vm3, %v21597_v25 }
 0x3cc   : > { %16159 = vmatprep.mubr.msk.bf16.mxu1 %vm1981_vm3, %v21598_v57  ;;  %v5825_v57 = vadd.f32 %v21605_v17, %v19466_v53  ;;  %v16092_v37 = vpop.f32.mrf.mxu0  ;;  %v21610_v53 = vld [vmem:[#allocation47_spill] sm:$0xff]  ;;  %v21611_v17 = vld [vmem:[#allocation68_spill] sm:$0xff] }
 0x3cd   : > { %v6063_v31 = vpop.f32.mrf.mxu1  ;;  %v5829_v27 = vadd.f32 %v21610_v53, %v19476_v59  ;;  %v21615_v59 = vld [vmem:[#allocation17_spill] sm:$0xff] }
 0x3ce   : > { %v19675_v8 = vadd.f32 %v6063_v31, %v5820_v9 }
 0x3cf   : > { %v15994_v15 = vpop.f32.mrf.mxu1 }
 0x3d0   : > { %v21606_v15 = vld [vmem:[#allocation63_spill] sm:$0xff] }
 0x3d1   : > { %v6066_v22 = vpop.f32.mrf.mxu1 }
 0x3d2   : > { %v19681_v54 = vadd.f32 %v6066_v22, %v5821_v29  ;;  %v21607_v29 = vld [vmem:[#allocation64_spill] sm:$0xff]  ;;  %v5828_v22 = vadd.f32 %v21608_v7, %v19472_v40 }
 0x3d3   : > { %v15997_v6 = vpop.f32.mrf.mxu1  ;;  %16160 = vmatmul.mubr.msk.bf16.gmra.mxu1 %vm1981_vm3, %v21602_v48  ;;  %v21613_v40 = vld [vmem:[#allocation16_spill] sm:$0xff] }
 0x3d4   : > { %16163 = vmatprep.mubr.msk.bf16.mxu1 %vm1981_vm3, %v21603_v10  ;;  %v19705_v10 = vpop.f32.mrf.mxu0 }
 0x3d5   : > { %v6079_v41 = vpop.f32.mrf.mxu1  ;;  %21609 = vst [vmem:[#allocation30_spill] sm:$0xff] %v19705_v10 }
 0x3d6   : > { %v19689_v46 = vadd.f32 %v6079_v41, %v5824_v51 }
 0x3d7   : > { %v15998_v25 = vpop.f32.mrf.mxu1 }
 0x3d9   : > { %v6082_v62 = vpop.f32.mrf.mxu1 }
 0x3da   : > { %v19695_v9 = vadd.f32 %v6082_v62, %v5825_v57  ;;  %v16095_v57 = vpop.f32.mrf.mxu0  ;;  %v21612_v62 = vld [vmem:[#allocation69_spill] sm:$0xff] }
 0x3db   : > { %v16001_v31 = vpop.f32.mrf.mxu1  ;;  %16164 = vmatmul.mubr.msk.bf16.gmra.mxu1 %vm1981_vm3, %v21606_v15 }
 0x3dc   : > { %16167 = vmatprep.mubr.msk.bf16.mxu1 %vm1981_vm3, %v21607_v29  ;;  %v21614_v31 = vld [vmem:[#allocation48_spill] sm:$0xff] }
 0x3dd   : > { %v6095_v6 = vpop.f32.mrf.mxu1  ;;  %v5832_v15 = vadd.f32 %v21614_v31, %v21613_v40 }
 0x3de   : > { %v19703_v48 = vadd.f32 %v6095_v6, %v5828_v22  ;;  %v19719_v22 = vpop.f32.mrf.mxu0  ;;  %v21616_v6 = vld [vmem:[#allocation49_spill] sm:$0xff] }
 0x3df   : > { %v16002_v38 = vpop.f32.mrf.mxu1 }
 0x3e0   : > { %v5833_v38 = vadd.f32 %v21616_v6, %v21615_v59  ;;  %v16096_v57 = vpop.f32.mrf.mxu0 }
 0x3e1   : > { %v6098_v51 = vpop.f32.mrf.mxu1 }
 0x3e2   : > { %v19709_v41 = vadd.f32 %v6098_v51, %v5829_v27  ;;  %v19733_v6 = vpop.f32.mrf.mxu0 }
 0x3e3   : > { %v16005_v25 = vpop.f32.mrf.mxu1  ;;  %16168 = vmatmul.mubr.msk.bf16.gmra.mxu1 %vm1981_vm3, %v21611_v17  ;;  %v16974_v17 = vld [vmem:[#allocation3 + $0x24] sm:$0xff]   ;;  %21619 = vst [vmem:[#allocation32_spill] sm:$0xff] %v19733_v6 }
 0x3e4   : > { %16171 = vmatprep.mubr.msk.bf16.mxu1 %vm1981_vm3, %v21612_v62  ;;  %v21617_v25 = vld [vmem:[#allocation74_spill] sm:$0xff]  ;;  %v21618_v62 = vld [vmem:[#allocation52_spill] sm:$0xff]  ;;  %v9005_v59 = vshll.u32 %v16974_v17, 16  ;;  %v9003_v10 = vshrl.u32 %v16974_v17, 16 }
 0x3e5   : > { %v6111_v37 = vpop.f32.mrf.mxu1  ;;  %v5836_v40 = vadd.f32 %v21618_v62, %v19494_v11  ;;  %v16977_v62 = vld [vmem:[#allocation3 + $0x34] sm:$0xff]  }
 0x3e6   : > { %v19717_v29 = vadd.f32 %v6111_v37, %v5832_v15 }
 0x3e7   : > { %v16006_v7 = vpop.f32.mrf.mxu1 }
 0x3e8   : > { %v16975_v7 = vld [vmem:[#allocation3 + $0x2c] sm:$0xff]  }
 0x3e9   : > { %v6114_v53 = vpop.f32.mrf.mxu1  ;;  %v9010_v11 = vshll.u32 %v16975_v7, 16 }
 0x3ea   : > { %v19723_v27 = vadd.f32 %v6114_v53, %v5833_v38  ;;  %v21620_v38 = vld [vmem:[#allocation57_spill] sm:$0xff] }
 0x3eb   : > { %v16009_v51 = vpop.f32.mrf.mxu1  ;;  %16172 = vmatmul.mubr.msk.bf16.gmra.mxu1 %vm1981_vm3, %v21617_v25  ;;  %v5837_v53 = vadd.f32 %v21620_v38, %v19499_v28 }
 0x3ec   : > { %16175 = vmatprep.mubr.msk.bf16.mxu1 %vm1981_vm3, %v19503_v2  ;;  %v9007_v2 = vrot.slane %v9005_v59, 1  ;;  %v21622_v59 = vld [vmem:[#allocation23_spill] sm:$0xff] }
 0x3ed   : > { %v6127_v31 = vpop.f32.mrf.mxu1 }
 0x3ee   : > { %v19731_v15 = vadd.f32 %v6127_v31, %v5836_v40  ;;  %v16099_v40 = vpop.f32.mrf.mxu0  ;;  %v21621_v31 = vld [vmem:[#allocation19_spill] sm:$0xff] }
 0x3ef   : > { %v16010_v37 = vpop.f32.mrf.mxu1  ;;  %v5841_v40 = vadd.f32 %v21622_v59, %v19515_v30 }
 0x3f0   : > { %v5840_v37 = vadd.f32 %v21621_v31, %v19509_v34  ;;  %v9014_v34 = vshrl.u32 %v16975_v7, 16 }
 0x3f1   : > { %v6130_v51 = vpop.f32.mrf.mxu1 }
 0x3f2   : > { %v19737_v25 = vadd.f32 %v6130_v51, %v5837_v53  ;;  %v9008_v53 = vor.u32 %v9007_v2, %v9003_v10  ;;  %v9012_v51 = vrot.slane %v9010_v11, 1  ;;  %v9026_v10 = vshll.u32 %v16978_v56, 16  ;;  %v21624_v11 = vld [vmem:[#allocation24_spill] sm:$0xff] }
 0x3f3   : > { %v16013_v57 = vpop.f32.mrf.mxu1  ;;  %16176 = vmatmul.mubr.msk.bf16.gmra.mxu1 %vm1981_vm3, %v19518_v26  ;;  %v19747_v26 = vpop.f32.mrf.mxu0 }
 0x3f4   : > { %16179 = vmatprep.mubr.msk.bf16.mxu1 %vm1981_vm3, %v19540_v58  ;;  %v9018_v57 = vshll.u32 %v16977_v62, 16  ;;  %v9013_v58 = vsel %vm4189_vm5, %v9008_v53, %v9012_v51 }
 0x3f5   : > { %v6143_v6 = vpop.f32.mrf.mxu1  ;;  %v16100_v2 = vpop.f32.mrf.mxu0 }
 0x3f6   : > { %v19745_v28 = vadd.f32 %v6143_v6, %v5840_v37  ;;  %v9020_v17 = vrot.slane %v9018_v57, 1  ;;  %v16979_v6 = vld [vmem:[#allocation3 + $0x44] sm:$0xff]   ;;  %v5844_v37 = vadd.f32 %v21624_v11, %v19525_v61  ;;  %v9030_v11 = vshrl.u32 %v16978_v56, 16 }
 0x3f7   : > { %v16014_v38 = vpop.f32.mrf.mxu1  ;;  %v19761_v53 = vpop.f32.mrf.mxu0  ;;  %v21626_v57 = vld [vmem:[#allocation28_spill] sm:$0xff] }
 0x3f8   : > { %v9022_v38 = vshrl.u32 %v16977_v62, 16  ;;  %21625 = vst [vmem:[#allocation36_spill] sm:$0xff] %v19761_v53  ;;  %v5845_v2 = vadd.f32 %v21626_v57, %v19535_v1 }
 0x3f9   : > { %v6146_v44 = vpop.f32.mrf.mxu1 }
 0x3fa   : > { %v19751_v47 = vadd.f32 %v6146_v44, %v5841_v40  ;;  %v9016_v44 = vor.u32 %v9014_v34, %v9012_v51  ;;  %v9024_v40 = vor.u32 %v9022_v38, %v9020_v17  ;;  %v21627_v38 = vld [vmem:[#allocation29_spill] sm:$0xff] }
 0x3fb   : > { %v16017_v31 = vpop.f32.mrf.mxu1  ;;  %16180 = vmatmul.mubr.msk.bf16.gmra.mxu1 %vm1981_vm3, %v19547_v13  ;;  %v9034_v13 = vshll.u32 %v16979_v6, 16  ;;  %v5848_v1 = vadd.f32 %v21627_v38, %v19549_v63 }
 0x3fc   : > { %21623 = vst [vmem:[#allocation34_spill] sm:$0xff] %v19751_v47  ;;  %16251 = vmatprep.mubr.msk.bf16.mxu1 %vm1981_vm3, %v9013_v58  ;;  %v9028_v31 = vrot.slane %v9026_v10, 1  ;;  %v16980_v47 = vld [vmem:[#allocation3 + $0x4c] sm:$0xff]   ;;  %v9021_v61 = vsel %vm4189_vm5, %v9016_v44, %v9020_v17 }
 0x3fd   : > { %v6159_v30 = vpop.f32.mrf.mxu1  ;;  %v9036_v34 = vrot.slane %v9034_v13, 1  ;;  %v9042_v10 = vshll.u32 %v16980_v47, 16  ;;  %v21628_v13 = vld [vmem:[#allocation62_spill] sm:$0xff]  ;;  %v9046_v38 = vshrl.u32 %v16980_v47, 16 }
 0x3fe   : > { %v19759_v59 = vadd.f32 %v6159_v30, %v5844_v37  ;;  %v9029_v51 = vsel %vm4189_vm5, %v9024_v40, %v9028_v31  ;;  %v16981_v37 = vld [vmem:[#allocation3 + $0x54] sm:$0xff]   ;;  %v16103_v30 = vpop.f32.mrf.mxu0  ;;  %v9032_v57 = vor.u32 %v9030_v11, %v9028_v31 }
 0x3ff   : > { %v16018_v7 = vpop.f32.mrf.mxu1  ;;  %v9044_v44 = vrot.slane %v9042_v10, 1  ;;  %v5849_v30 = vadd.f32 %v21628_v13, %v19555_v50 }
 0x400   : > { %v19775_v40 = vpop.f32.mrf.mxu0  ;;  %v9037_v63 = vsel %vm4189_vm5, %v9032_v57, %v9036_v34 }
 0x401   : > { %v6162_v16 = vpop.f32.mrf.mxu1  ;;  %v9048_v13 = vor.u32 %v9046_v38, %v9044_v44 }
 0x402   : > { %v19765_v58 = vadd.f32 %v6162_v16, %v5845_v2  ;;  %v9038_v16 = vshrl.u32 %v16979_v6, 16 }
 0x403   : > { %v16021_v62 = vpop.f32.mrf.mxu1  ;;  %16252 = vmatmul.mubr.msk.bf16.vlgmr.msra.gmra.mxu1 %vm1981_vm3, %v9021_v61  ;;  %v9050_v61 = vshll.u32 %v16981_v37, 16 }
 0x404   : > { %16255 = vmatprep.mubr.msk.bf16.mxu1 %vm1981_vm3, %v9029_v51  ;;  %v9040_v17 = vor.u32 %v9038_v16, %v9036_v34  ;;  %v16982_v62 = vld [vmem:[#allocation3 + $0x5c] sm:$0xff]   ;;  %v21630_v16 = vld [vmem:[#allocation65_spill] sm:$0xff] }
 0x405   : > { %v6175_v7 = vpop.f32.mrf.mxu1  ;;  %v9052_v11 = vrot.slane %v9050_v61, 1  ;;  %v9058_v10 = vshll.u32 %v16982_v62, 16  ;;  %v5852_v50 = vadd.f32 %v21630_v16, %v19563_v20  ;;  %v21632_v61 = vld [vmem:[#allocation67_spill] sm:$0xff]  ;;  %v9062_v16 = vshrl.u32 %v16982_v62, 16 }
 0x406   : > { %v19773_v2 = vadd.f32 %v6175_v7, %v5848_v1  ;;  %v9045_v31 = vsel %vm4189_vm5, %v9040_v17, %v9044_v44  ;;  %v16983_v1 = vld [vmem:[#allocation3 + $0x64] sm:$0xff]   ;;  %v16104_v7 = vpop.f32.mrf.mxu0 }
 0x407   : > { %v16022_v56 = vpop.f32.mrf.mxu1  ;;  %v9060_v57 = vrot.slane %v9058_v10, 1  ;;  %v5853_v7 = vadd.f32 %v21632_v61, %v19569_v14  ;;  %v9053_v20 = vsel %vm4189_vm5, %v9048_v13, %v9052_v11 }
 0x408   : > { %v19789_v17 = vpop.f32.mrf.mxu0 }
 0x409   : > { %v6178_v53 = vpop.f32.mrf.mxu1  ;;  %21631 = vst [vmem:[#allocation40_spill] sm:$0xff] %v19789_v17  ;;  %v9064_v61 = vor.u32 %v9062_v16, %v9060_v57 }
 0x40a   : > { %v19779_v51 = vadd.f32 %v6178_v53, %v5849_v30  ;;  %v9054_v53 = vshrl.u32 %v16981_v37, 16 }
 0x40b   : > { %v16025_v6 = vpop.f32.mrf.mxu1  ;;  %16256 = vmatmul.mubr.msk.bf16.gmra.mxu1 %vm1981_vm3, %v9037_v63  ;;  %v9066_v63 = vshll.u32 %v16983_v1, 16 }
 0x40c   : > { %21629 = vst [vmem:[#allocation38_spill] sm:$0xff] %v19779_v51  ;;  %16259 = vmatprep.mubr.msk.bf16.mxu1 %vm1981_vm3, %v9045_v31  ;;  %v9056_v34 = vor.u32 %v9054_v53, %v9052_v11  ;;  %v16984_v6 = vld [vmem:[#allocation3 + $0x6c] sm:$0xff]  }
 0x40d   : > { %v6191_v56 = vpop.f32.mrf.mxu1  ;;  %v9068_v38 = vrot.slane %v9066_v63, 1  ;;  %v9074_v10 = vshll.u32 %v16984_v6, 16  ;;  %v21634_v53 = vld [vmem:[#allocation70_spill] sm:$0xff]  ;;  %v21635_v63 = vld [vmem:[#allocation72_spill] sm:$0xff] }
 0x40e   : > { %v19787_v30 = vadd.f32 %v6191_v56, %v5852_v50  ;;  %v9061_v44 = vsel %vm4189_vm5, %v9056_v34, %v9060_v57  ;;  %v16985_v50 = vld [vmem:[#allocation3 + $0x74] sm:$0xff]   ;;  %v16107_v56 = vpop.f32.mrf.mxu0  ;;  %v5856_v14 = vadd.f32 %v21634_v53, %v19577_v52  ;;  %v9078_v53 = vshrl.u32 %v16984_v6, 16 }
 0x40f   : > { %v16026_v47 = vpop.f32.mrf.mxu1  ;;  %v9076_v13 = vrot.slane %v9074_v10, 1  ;;  %v5857_v56 = vadd.f32 %v21635_v63, %v19583_v4  ;;  %v9069_v52 = vsel %vm4189_vm5, %v9064_v61, %v9068_v38 }
 0x410   : > { %v19803_v34 = vpop.f32.mrf.mxu0 }
 0x411   : > { %v6194_v51 = vpop.f32.mrf.mxu1  ;;  %v9080_v63 = vor.u32 %v9078_v53, %v9076_v13 }
 0x412   : > { %v19793_v31 = vadd.f32 %v6194_v51, %v5853_v7  ;;  %v9070_v51 = vshrl.u32 %v16983_v1, 16 }
 0x413   : > { %v16029_v37 = vpop.f32.mrf.mxu1  ;;  %16260 = vmatmul.mubr.msk.bf16.gmra.mxu1 %vm1981_vm3, %v9053_v20  ;;  %v9082_v20 = vshll.u32 %v16985_v50, 16 }
 0x414   : > { %21633 = vst [vmem:[#allocation43_spill] sm:$0xff] %v19793_v31  ;;  %16263 = vmatprep.mubr.msk.bf16.mxu1 %vm1981_vm3, %v9061_v44  ;;  %v9072_v11 = vor.u32 %v9070_v51, %v9068_v38  ;;  %v16986_v37 = vld [vmem:[#allocation3 + $0x7c] sm:$0xff]  }
 0x415   : > { %v6207_v47 = vpop.f32.mrf.mxu1  ;;  %v9084_v16 = vrot.slane %v9082_v20, 1  ;;  %v9090_v10 = vshll.u32 %v16986_v37, 16  ;;  %v21637_v51 = vld [vmem:[#allocation75_spill] sm:$0xff]  ;;  %v21639_v20 = vld [vmem:[#allocation77_spill] sm:$0xff] }
 0x416   : > { %v19801_v7 = vadd.f32 %v6207_v47, %v5856_v14  ;;  %v9077_v57 = vsel %vm4189_vm5, %v9072_v11, %v9076_v13  ;;  %v16987_v14 = vld [vmem:[#allocation3 + $0x84] sm:$0xff]   ;;  %v16108_v47 = vpop.f32.mrf.mxu0  ;;  %v5860_v4 = vadd.f32 %v21637_v51, %v19591_v55 }
 0x417   : > { %v16030_v62 = vpop.f32.mrf.mxu1  ;;  %v9092_v61 = vrot.slane %v9090_v10, 1  ;;  %v5861_v47 = vadd.f32 %v21639_v20, %v19597_v49  ;;  %v9085_v55 = vsel %vm4189_vm5, %v9080_v63, %v9084_v16 }
 0x418   : > { %v19817_v11 = vpop.f32.mrf.mxu0 }
 0x419   : > { %v6210_v17 = vpop.f32.mrf.mxu1  ;;  %21638 = vst [vmem:[#allocation66_spill] sm:$0xff] %v19817_v11 }
 0x41a   : > { %v19807_v44 = vadd.f32 %v6210_v17, %v5857_v56  ;;  %v9086_v17 = vshrl.u32 %v16985_v50, 16  ;;  %v9094_v50 = vshrl.u32 %v16986_v37, 16 }
 0x41b   : > { %v16033_v1 = vpop.f32.mrf.mxu1  ;;  %16264 = vmatmul.mubr.msk.bf16.gmra.mxu1 %vm1981_vm3, %v9069_v52  ;;  %v9098_v52 = vshll.u32 %v16987_v14, 16 }
 0x41c   : > { %21636 = vst [vmem:[#allocation46_spill] sm:$0xff] %v19807_v44  ;;  %16267 = vmatprep.mubr.msk.bf16.mxu1 %vm1981_vm3, %v9077_v57  ;;  %v9088_v38 = vor.u32 %v9086_v17, %v9084_v16  ;;  %v16988_v1 = vld [vmem:[#allocation3 + $0x8c] sm:$0xff]   ;;  %v16111_v57 = vpop.f32.mrf.mxu0  ;;  %v9096_v20 = vor.u32 %v9094_v50, %v9092_v61 }
 0x41d   : > { %v6223_v62 = vpop.f32.mrf.mxu1  ;;  %v9100_v10 = vrot.slane %v9098_v52, 1  ;;  %v9106_v51 = vshll.u32 %v16988_v1, 16  ;;  %v21642_v52 = vld [vmem:[#allocation81_spill] sm:$0xff] }
 0x41e   : > { %v19815_v56 = vadd.f32 %v6223_v62, %v5860_v4  ;;  %v9093_v53 = vsel %vm4189_vm5, %v9088_v38, %v9092_v61  ;;  %v16989_v4 = vld [vmem:[#allocation3 + $0x94] sm:$0xff]   ;;  %v16990_v38 = vld [vmem:[#allocation3 + $0x9c] sm:$0xff]  }
 0x41f   : > { %v16034_v6 = vpop.f32.mrf.mxu1  ;;  %v21641_v62 = vld [vmem:[#allocation79_spill] sm:$0xff]  ;;  %v9114_v57 = vshll.u32 %v16989_v4, 16 }
 0x420   : > { %v5864_v49 = vadd.f32 %v21641_v62, %v19605_v3  ;;  %v9102_v6 = vshrl.u32 %v16987_v14, 16  ;;  %v9101_v3 = vsel %vm4189_vm5, %v9096_v20, %v9100_v10  ;;  %v9110_v14 = vshrl.u32 %v16988_v1, 16 }
 0x421   : > { %v6226_v44 = vpop.f32.mrf.mxu1  ;;  %v9116_v50 = vrot.slane %v9114_v57, 1  ;;  %v21646_v57 = vld [vmem:[#allocation84_spill] sm:$0xff] }
 0x422   : > { %v19821_v31 = vadd.f32 %v6226_v44, %v5861_v47  ;;  %v19829_v44 = vpop.f32.mrf.mxu0  ;;  %v9104_v63 = vor.u32 %v9102_v6, %v9100_v10  ;;  %v9108_v47 = vrot.slane %v9106_v51, 1  ;;  %v16991_v51 = vld [vmem:[#allocation3 + $0xa4] sm:$0xff]  }
 0x423   : > { %v16037_v13 = vpop.f32.mrf.mxu1  ;;  %16268 = vmatmul.mubr.msk.bf16.gmra.mxu1 %vm1981_vm3, %v9085_v55  ;;  %v5865_v55 = vadd.f32 %v21642_v52, %v19611_v24 }
 0x424   : > { %21640 = vst [vmem:[#allocation95_spill] sm:$0xff] %v19821_v31  ;;  %16271 = vmatprep.mubr.msk.bf16.mxu1 %vm1981_vm3, %v9093_v53  ;;  %v16112_v53 = vpop.f32.mrf.mxu0  ;;  %v9109_v61 = vsel %vm4189_vm5, %v9104_v63, %v9108_v47  ;;  %v16992_v63 = vld [vmem:[#allocation3 + $0xac] sm:$0xff]  }
 0x425   : > { %v6239_v17 = vpop.f32.mrf.mxu1  ;;  %v9130_v53 = vshll.u32 %v16991_v51, 16 }
 0x426   : > { %v19831_v16 = vadd.f32 %v6239_v17, %v5864_v49  ;;  %v9122_v49 = vshll.u32 %v16990_v38, 16  ;;  %v21644_v17 = vld [vmem:[#allocation83_spill] sm:$0xff]  ;;  %v19843_v52 = vpop.f32.mrf.mxu0 }
 0x427   : > { %v16038_v37 = vpop.f32.mrf.mxu1  ;;  %v5868_v24 = vadd.f32 %v21644_v17, %v19619_v5  ;;  %21645 = vst [vmem:[#allocation41_spill] sm:$0xff] %v19843_v52 }
 0x428   : > { %v9118_v37 = vshrl.u32 %v16989_v4, 16  ;;  %v9126_v4 = vshrl.u32 %v16990_v38, 16 }
 0x429   : > { %v6242_v13 = vpop.f32.mrf.mxu1 }
 0x42a   : > { %v19835_v11 = vadd.f32 %v6242_v13, %v5865_v55  ;;  %v9112_v55 = vor.u32 %v9110_v14, %v9108_v47  ;;  %v9120_v20 = vor.u32 %v9118_v37, %v9116_v50  ;;  %v9124_v13 = vrot.slane %v9122_v49, 1  ;;  %v16993_v49 = vld [vmem:[#allocation3 + $0xb4] sm:$0xff]  }
 0x42b   : > { %v16041_v62 = vpop.f32.mrf.mxu1  ;;  %16272 = vmatmul.mubr.msk.bf16.gmra.mxu1 %vm1981_vm3, %v9101_v3  ;;  %v5869_v3 = vadd.f32 %v21646_v57, %v19625_v43  ;;  %v9132_v14 = vrot.slane %v9130_v53, 1  ;;  %v9134_v57 = vshrl.u32 %v16991_v51, 16  ;;  %v21649_v53 = vld [vmem:[#allocation86_spill] sm:$0xff] }
 0x42c   : > { %21643 = vst [vmem:[#allocation50_spill] sm:$0xff] %v19835_v11  ;;  %16275 = vmatprep.mubr.msk.bf16.mxu1 %vm1981_vm3, %v9109_v61  ;;  %v16115_v62 = vpop.f32.mrf.mxu0  ;;  %v9117_v5 = vsel %vm4189_vm5, %v9112_v55, %v9116_v50  ;;  %v9125_v47 = vsel %vm4189_vm5, %v9120_v20, %v9124_v13  ;;  %v16994_v20 = vld [vmem:[#allocation3 + $0xbc] sm:$0xff]  }
 0x42d   : > { %v6255_v6 = vpop.f32.mrf.mxu1  ;;  %v9136_v55 = vor.u32 %v9134_v57, %v9132_v14  ;;  %v21651_v57 = vld [vmem:[#allocation87_spill] sm:$0xff] }
 0x42e   : > { %v19845_v10 = vadd.f32 %v6255_v6, %v5868_v24  ;;  %v9138_v24 = vshll.u32 %v16992_v63, 16  ;;  %v21648_v6 = vld [vmem:[#allocation85_spill] sm:$0xff]  ;;  %v19857_v37 = vpop.f32.mrf.mxu0 }
 0x42f   : > { %v16042_v1 = vpop.f32.mrf.mxu1  ;;  %v5872_v43 = vadd.f32 %v21648_v6, %v19633_v21  ;;  %v17008_v21 = vld [vmem:[%s21403_s5 + $0x8] sm:$0xff]  }
 0x430   : > { %v9140_v62 = vrot.slane %v9138_v24, 1  ;;  %16315 = vmatprep.subr.bf16.mxu0 %v17008_v21 }
 0x431   : > { %v6258_v61 = vpop.f32.mrf.mxu1  ;;  %16316 = vmatpush3.bf16.msra.mxu0 %v17008_v21 }
 0x432   : > { %v19849_v11 = vadd.f32 %v6258_v61, %v5869_v3  ;;  %v9128_v3 = vor.u32 %v9126_v4, %v9124_v13  ;;  %v9146_v61 = vshll.u32 %v16993_v49, 16  ;;  %v9142_v13 = vshrl.u32 %v16992_v63, 16 }
 0x433   : > { %v16045_v17 = vpop.f32.mrf.mxu1  ;;  %16276 = vmatmul.mubr.msk.bf16.gmra.mxu1 %vm1981_vm3, %v9117_v5  ;;  %v5873_v5 = vadd.f32 %v21649_v53, %v19639_v0  ;;  %v9141_v24 = vsel %vm4189_vm5, %v9136_v55, %v9140_v62  ;;  %v16995_v0 = vld [vmem:[#allocation3 + $0xc4] sm:$0xff]  }
 0x434   : > { %21647 = vst [vmem:[#allocation96_spill] sm:$0xff] %v19849_v11  ;;  %16279 = vmatprep.mubr.msk.bf16.mxu1 %vm1981_vm3, %v9125_v47  ;;  %v16116_v17 = vpop.f32.mrf.mxu0  ;;  %v9133_v51 = vsel %vm4189_vm5, %v9128_v3, %v9132_v14  ;;  %v9150_v14 = vshrl.u32 %v16993_v49, 16  ;;  %v9144_v63 = vor.u32 %v9142_v13, %v9140_v62  ;;  %v9162_v55 = vshll.u32 %v16995_v0, 16 }
 0x435   : > { %v6271_v1 = vpop.f32.mrf.mxu1 }
 0x436   : > { %v19859_v50 = vadd.f32 %v6271_v1, %v5872_v43  ;;  %v9148_v43 = vrot.slane %v9146_v61, 1  ;;  %v9154_v1 = vshll.u32 %v16994_v20, 16  ;;  %v19874_v53 = vpop.f32.mrf.mxu0  ;;  %v16996_v61 = vld [vmem:[#allocation3 + $0xcc] sm:$0xff]   ;;  %v9164_v62 = vrot.slane %v9162_v55, 1 }
 0x437   : > { %v16046_v38 = vpop.f32.mrf.mxu1  ;;  %21652 = vst [vmem:[#allocation71_spill] sm:$0xff] %v19874_v53  ;;  %v9170_v13 = vshll.u32 %v16996_v61, 16  ;;  %v21656_v55 = vld [vmem:[#allocation90_spill] sm:$0xff] }
 0x438   : > { %v5876_v38 = vadd.f32 %v21651_v57, %v19647_v12  ;;  %v16187_v52 = vpop.f32.mrf.mxu0  ;;  %v9149_v12 = vsel %vm4189_vm5, %v9144_v63, %v9148_v43  ;;  %v9158_v57 = vshrl.u32 %v16994_v20, 16 }
 0x439   : > { %v6274_v47 = vpop.f32.mrf.mxu1  ;;  %v9172_v63 = vrot.slane %v9170_v13, 1  ;;  %v16999_v13 = vld [vmem:[#allocation3 + $0xe4] sm:$0xff]  }
 0x43a   : > { %v19866_v6 = vadd.f32 %v6274_v47, %v5873_v5  ;;  %v9152_v47 = vor.u32 %v9150_v14, %v9148_v43  ;;  %v19888_v52 = vpop.f32.mrf.mxu0  ;;  %v9166_v14 = vshrl.u32 %v16995_v0, 16 }
 0x43b   : > { %v16049_v4 = vpop.f32.mrf.mxu1  ;;  %16280 = vmatmul.mubr.msk.bf16.gmra.mxu1 %vm1981_vm3, %v9133_v51  ;;  %v9156_v51 = vrot.slane %v9154_v1, 1  ;;  %v16997_v1 = vld [vmem:[#allocation3 + $0xd4] sm:$0xff]  }
 0x43c   : > { %21650 = vst [vmem:[#allocation51_spill] sm:$0xff] %v19866_v6  ;;  %16283 = vmatprep.mubr.msk.bf16.mxu1 %vm1981_vm3, %v9141_v24  ;;  %v21653_v4 = vld [vmem:[#allocation88_spill] sm:$0xff] }
 0x43d   : > { %v6287_v5 = vpop.f32.mrf.mxu1  ;;  %v5877_v21 = vadd.f32 %v21653_v4, %v19653_v60  ;;  %v9157_v49 = vsel %vm4189_vm5, %v9152_v47, %v9156_v51  ;;  %v9178_v4 = vshll.u32 %v16997_v1, 16  ;;  %v16998_v47 = vld [vmem:[#allocation3 + $0xdc] sm:$0xff]  }
 0x43e   : > { %v19876_v3 = vadd.f32 %v6287_v5, %v5876_v38  ;;  %v21655_v38 = vld [vmem:[#allocation89_spill] sm:$0xff] }
 0x43f   : > { %v16050_v17 = vpop.f32.mrf.mxu1  ;;  %v7244_v60 = vadd.f32 %v21655_v38, %v19661_v45  ;;  %v9174_v38 = vshrl.u32 %v16996_v61, 16 }
 0x440   : > { %v9160_v17 = vor.u32 %v9158_v57, %v9156_v51  ;;  %v9180_v51 = vrot.slane %v9178_v4, 1  ;;  %v9186_v57 = vshll.u32 %v16998_v47, 16 }
 0x441   : > { %v6290_v24 = vpop.f32.mrf.mxu1 }
 0x442   : > { %v19880_v6 = vadd.f32 %v6290_v24, %v5877_v21  ;;  %v7245_v21 = vadd.f32 %v21656_v55, %v19667_v39  ;;  %v16188_v24 = vpop.f32.mrf.mxu0  ;;  %v9165_v45 = vsel %vm4189_vm5, %v9160_v17, %v9164_v62  ;;  %v21657_v39 = vld [vmem:[#allocation91_spill] sm:$0xff]  ;;  %v9176_v55 = vor.u32 %v9174_v38, %v9172_v63 }
 0x443   : > { %v16121_v53 = vpop.f32.mrf.mxu1  ;;  %16284 = vmatmul.mubr.msk.bf16.gmra.mxu1 %vm1981_vm3, %v9149_v12  ;;  %v9188_v17 = vrot.slane %v9186_v57, 1  ;;  %v21658_v24 = vld [vmem:[#allocation92_spill] sm:$0xff]  ;;  %v17001_v57 = vld [vmem:[#allocation3 + $0xf4] sm:$0xff]  }
 0x444   : > { %21654 = vst [vmem:[#allocation97_spill] sm:$0xff] %v19880_v6  ;;  %16287 = vmatprep.mubr.msk.bf16.mxu1 %vm1981_vm3, %v9157_v49  ;;  %v9168_v53 = vor.u32 %v9166_v14, %v9164_v62 }
 0x445   : > { %v7967_v5 = vpop.f32.mrf.mxu1 }
 0x446   : > { %v19890_v43 = vadd.f32 %v7967_v5, %v7244_v60  ;;  %v9173_v0 = vsel %vm4189_vm5, %v9168_v53, %v9172_v63  ;;  %v19899_v60 = vpop.f32.mrf.mxu0  ;;  %v7248_v5 = vadd.f32 %v21657_v39, %v19675_v8  ;;  %v17000_v53 = vld [vmem:[#allocation3 + $0xec] sm:$0xff]   ;;  %v9190_v8 = vshrl.u32 %v16998_v47, 16 }
 0x447   : > { %v16122_v20 = vpop.f32.mrf.mxu1  ;;  %v9202_v38 = vshll.u32 %v17000_v53, 16 }
 0x448   : > { %v9182_v20 = vshrl.u32 %v16997_v1, 16  ;;  %v16191_v4 = vpop.f32.mrf.mxu0 }
 0x449   : > { %v7970_v12 = vpop.f32.mrf.mxu1  ;;  %v9192_v4 = vor.u32 %v9190_v8, %v9188_v17 }
 0x44a   : > { %v19894_v49 = vadd.f32 %v7970_v12, %v7245_v21  ;;  %v9184_v61 = vor.u32 %v9182_v20, %v9180_v51  ;;  %v9194_v21 = vshll.u32 %v16999_v13, 16  ;;  %v7249_v12 = vadd.f32 %v21658_v24, %v19681_v54  ;;  %v21659_v54 = vld [vmem:[#allocation93_spill] sm:$0xff] }
 0x44b   : > { %v16125_v6 = vpop.f32.mrf.mxu1  ;;  %16288 = vmatmul.mubr.msk.bf16.gmra.mxu1 %vm1981_vm3, %v9165_v45  ;;  %v9204_v24 = vrot.slane %v9202_v38, 1  ;;  %v17003_v38 = vld [vmem:[#allocation3 + $0x104] sm:$0xff]  }
 0x44c   : > { %16291 = vmatprep.mubr.msk.bf16.mxu1 %vm1981_vm3, %v9173_v0  ;;  %v9181_v0 = vsel %vm4189_vm5, %v9176_v55, %v9180_v51  ;;  %v9189_v1 = vsel %vm4189_vm5, %v9184_v61, %v9188_v17  ;;  %v9196_v63 = vrot.slane %v9194_v21, 1  ;;  %v17002_v61 = vld [vmem:[#allocation3 + $0xfc] sm:$0xff]  }
 0x44d   : > { %v7983_v14 = vpop.f32.mrf.mxu1  ;;  %v9218_v8 = vshll.u32 %v17002_v61, 16 }
 0x44e   : > { %v19904_v62 = vadd.f32 %v7983_v14, %v7248_v5  ;;  %v19913_v5 = vpop.f32.mrf.mxu0  ;;  %v7252_v14 = vadd.f32 %v21659_v54, %v19689_v46  ;;  %v9206_v46 = vshrl.u32 %v17000_v53, 16 }
 0x44f   : > { %v16126_v6 = vpop.f32.mrf.mxu1 }
 0x450   : > { %v9198_v6 = vshrl.u32 %v16999_v13, 16  ;;  %v16192_v21 = vpop.f32.mrf.mxu0 }
 0x451   : > { %v7986_v45 = vpop.f32.mrf.mxu1  ;;  %v9208_v21 = vor.u32 %v9206_v46, %v9204_v24  ;;  %v9230_v46 = vshrl.u32 %v17003_v38, 16 }
 0x452   : > { %v19908_v11 = vadd.f32 %v7986_v45, %v7249_v12  ;;  %v9200_v55 = vor.u32 %v9198_v6, %v9196_v63  ;;  %v9210_v12 = vshll.u32 %v17001_v57, 16  ;;  %v21660_v45 = vld [vmem:[#allocation94_spill] sm:$0xff] }
 0x453   : > { %v16129_v39 = vpop.f32.mrf.mxu1  ;;  %16292 = vmatmul.mubr.msk.bf16.gmra.mxu1 %vm1981_vm3, %v9181_v0  ;;  %v7253_v0 = vadd.f32 %v21660_v45, %v19695_v9  ;;  %v21661_v9 = vld [vmem:[#allocation18_spill] sm:$0xff]  ;;  %v9220_v45 = vrot.slane %v9218_v8, 1 }
 0x454   : > { %16295 = vmatprep.mubr.msk.bf16.mxu1 %vm1981_vm3, %v9189_v1  ;;  %v9197_v1 = vsel %vm4189_vm5, %v9192_v4, %v9196_v63  ;;  %v9205_v13 = vsel %vm4189_vm5, %v9200_v55, %v9204_v24  ;;  %v9212_v17 = vrot.slane %v9210_v12, 1  ;;  %v17004_v55 = vld [vmem:[#allocation3 + $0x10c] sm:$0xff]  }
 0x455   : > { %v7999_v20 = vpop.f32.mrf.mxu1  ;;  %v9234_v8 = vshll.u32 %v17004_v55, 16 }
 0x456   : > { %v19918_v51 = vadd.f32 %v7999_v20, %v7252_v14  ;;  %v19927_v14 = vpop.f32.mrf.mxu0  ;;  %v7256_v20 = vadd.f32 %v21661_v9, %v19703_v48  ;;  %v9222_v48 = vshrl.u32 %v17002_v61, 16 }
 0x457   : > { %v16130_v47 = vpop.f32.mrf.mxu1 }
 0x458   : > { %v9214_v47 = vshrl.u32 %v17001_v57, 16  ;;  %v16195_v12 = vpop.f32.mrf.mxu0 }
 0x459   : > { %v8002_v39 = vpop.f32.mrf.mxu1  ;;  %v9236_v12 = vrot.slane %v9234_v8, 1 }
 0x45a   : > { %v19922_v31 = vadd.f32 %v8002_v39, %v7253_v0  ;;  %v9216_v4 = vor.u32 %v9214_v47, %v9212_v17  ;;  %v9226_v0 = vshll.u32 %v17003_v38, 16  ;;  %v7257_v39 = vadd.f32 %v19528_v35, %v19709_v41  ;;  %v17006_v47 = vld [vmem:[#allocation3 + $0x11c] sm:$0xff]  }
 0x45b   : > { %v16133_v54 = vpop.f32.mrf.mxu1  ;;  %16296 = vmatmul.mubr.msk.bf16.gmra.mxu1 %vm1981_vm3, %v9197_v1  ;;  %v7260_v35 = vadd.f32 %v19551_v23, %v19717_v29  ;;  %v9238_v38 = vshrl.u32 %v17004_v55, 16  ;;  %v7264_v55 = vadd.f32 %v19579_v32, %v19731_v15  ;;  %v7268_v15 = vadd.f32 %v19607_v19, %v19745_v28 }
 0x45c   : > { %16299 = vmatprep.mubr.msk.bf16.mxu1 %vm1981_vm3, %v9205_v13  ;;  %v9213_v13 = vsel %vm4189_vm5, %v9208_v21, %v9212_v17  ;;  %v9221_v57 = vsel %vm4189_vm5, %v9216_v4, %v9220_v45  ;;  %v9228_v24 = vrot.slane %v9226_v0, 1  ;;  %v9224_v17 = vor.u32 %v9222_v48, %v9220_v45 }
 0x45d   : > { %v8015_v6 = vpop.f32.mrf.mxu1  ;;  %v9240_v48 = vor.u32 %v9238_v38, %v9236_v12 }
 0x45e   : > { %v19932_v63 = vadd.f32 %v8015_v6, %v7256_v20  ;;  %v17005_v20 = vld [vmem:[#allocation3 + $0x114] sm:$0xff]   ;;  %v19941_v6 = vpop.f32.mrf.mxu0 }
 0x45f   : > { %v16134_v53 = vpop.f32.mrf.mxu1  ;;  %v9242_v4 = vshll.u32 %v17005_v20, 16 }
 0x460   : > { %v9232_v53 = vor.u32 %v9230_v46, %v9228_v24  ;;  %v16196_v0 = vpop.f32.mrf.mxu0  ;;  %v17007_v46 = vld [vmem:[#allocation3 + $0x124] ss:$0 sps:$4 sm:$0x11]  }
 0x461   : > { %v8018_v1 = vpop.f32.mrf.mxu1  ;;  %v9244_v29 = vrot.slane %v9242_v4, 1  ;;  %v9258_v4 = vshll.u32 %v17007_v46, 16  ;;  %v7272_v46 = vadd.f32 %v19635_v36, %v19759_v59  ;;  %v7276_v36 = vadd.f32 %v19663_v42, %v19773_v2 }
 0x462   : > { %v19936_v54 = vadd.f32 %v8018_v1, %v7257_v39  ;;  %v9246_v1 = vshrl.u32 %v17005_v20, 16  ;;  %v9237_v23 = vsel %vm4189_vm5, %v9232_v53, %v9236_v12  ;;  %v19953_v45 = vpop.f32.mrf.mxu0  ;;  %v9254_v53 = vshrl.u32 %v17006_v47, 16 }
 0x463   : > { %v16137_v9 = vpop.f32.mrf.mxu1  ;;  %16300 = vmatmul.mubr.msk.bf16.gmra.mxu1 %vm1981_vm3, %v9213_v13  ;;  %v9250_v13 = vshll.u32 %v17006_v47, 16 }
 0x464   : > { %16303 = vmatprep.mubr.msk.bf16.mxu1 %vm1981_vm3, %v9221_v57  ;;  %v9229_v9 = vsel %vm4189_vm5, %v9224_v17, %v9228_v24  ;;  %v9248_v20 = vor.u32 %v9246_v1, %v9244_v29  ;;  %v16199_v17 = vpop.f32.mrf.mxu0 }
 0x465   : > { %v8031_v41 = vpop.f32.mrf.mxu1 }
 0x466   : > { %v19946_v61 = vadd.f32 %v8031_v41, %v7260_v35  ;;  %v9252_v35 = vrot.slane %v9250_v13, 1  ;;  %v19965_v32 = vpop.f32.mrf.mxu0  ;;  %v9260_v13 = vrot.slane %v9258_v4, 1 }
 0x467   : > { %v16138_v21 = vpop.f32.mrf.mxu1 }
 0x468   : > { %v9245_v21 = vsel %vm4189_vm5, %v9240_v48, %v9244_v29  ;;  %v9253_v12 = vsel %vm4189_vm5, %v9248_v20, %v9252_v35  ;;  %v9256_v1 = vor.u32 %v9254_v53, %v9252_v35 }
 0x469   : > { %v19948_v39 = vpop.f32.mrf.mxu1 }
 0x46a   : > { %v9261_v29 = vsel %vm4189_vm5, %v9256_v1, %v9260_v13 }
 0x46b   : > { %v16141_v57 = vpop.f32.mrf.mxu1  ;;  %16304 = vmatmul.mubr.msk.bf16.gmra.mxu1 %vm1981_vm3, %v9229_v9 }
 0x46c   : > { %16307 = vmatprep.mubr.msk.bf16.mxu1 %vm1981_vm3, %v9237_v23  ;;  %v16200_v23 = vpop.f32.mrf.mxu0 }
 0x46d   : > { %v8047_v8 = vpop.f32.mrf.mxu1 }
 0x46e   : > { %v19958_v41 = vadd.f32 %v8047_v8, %v7264_v55  ;;  %v21662_v55 = vmov 0   ;;  %v20020_v28 = vpop.f32.mrf.mxu0 }
 0x46f   : > { %v16142_v24 = vpop.f32.mrf.mxu1  ;;  %603 = vst.msk [vmem:[#allocation5] sm:$0xf] %vm602_vm6, %v21662_v55  ;;  %604 = vst.msk [vmem:[#allocation5 + $0x4] sm:$0xf] %vm602_vm6, %v21662_v55 }
 0x470   : > { %605 = vst.msk [vmem:[#allocation5 + $0x8] sm:$0xf] %vm602_vm6, %v21662_v55  ;;  %606 = vst.msk [vmem:[#allocation5 + $0xc] sm:$0xf] %vm602_vm6, %v21662_v55  ;;  %v16203_v24 = vpop.f32.mrf.mxu0 }
 0x471   : > { %v19961_v0 = vpop.f32.mrf.mxu1  ;;  %607 = vst.msk [vmem:[#allocation5 + $0x10] sm:$0xf] %vm602_vm6, %v21662_v55  ;;  %608 = vst.msk [vmem:[#allocation5 + $0x14] sm:$0xf] %vm602_vm6, %v21662_v55 }
 0x472   : > { %609 = vst.msk [vmem:[#allocation5 + $0x18] sm:$0xf] %vm602_vm6, %v21662_v55  ;;  %610 = vst.msk [vmem:[#allocation5 + $0x1c] sm:$0xf] %vm602_vm6, %v21662_v55 }
 0x473   : > { %v16145_v38 = vpop.f32.mrf.mxu1  ;;  %16308 = vmatmul.mubr.msk.bf16.gmra.mxu1 %vm1981_vm3, %v9245_v21  ;;  %611 = vst.msk [vmem:[#allocation5 + $0x20] sm:$0xf] %vm602_vm6, %v21662_v55  ;;  %612 = vst.msk [vmem:[#allocation5 + $0x24] sm:$0xf] %vm602_vm6, %v21662_v55 }
 0x474   : > { %16311 = vmatprep.mubr.msk.bf16.mxu1 %vm1981_vm3, %v9253_v12  ;;  %613 = vst.msk [vmem:[#allocation5 + $0x28] sm:$0xf] %vm602_vm6, %v21662_v55  ;;  %614 = vst.msk [vmem:[#allocation5 + $0x2c] sm:$0xf] %vm602_vm6, %v21662_v55  ;;  %v20035_v38 = vpop.f32.mrf.mxu0 }
 0x475   : > { %v8063_v9 = vpop.f32.mrf.mxu1  ;;  %615 = vst.msk [vmem:[#allocation5 + $0x30] sm:$0xf] %vm602_vm6, %v21662_v55  ;;  %616 = vst.msk [vmem:[#allocation5 + $0x34] sm:$0xf] %vm602_vm6, %v21662_v55 }
 0x476   : > { %v19970_v57 = vadd.f32 %v8063_v9, %v7268_v15  ;;  %617 = vst.msk [vmem:[#allocation5 + $0x38] sm:$0xf] %vm602_vm6, %v21662_v55  ;;  %618 = vst.msk [vmem:[#allocation5 + $0x3c] sm:$0xf] %vm602_vm6, %v21662_v55  ;;  %v20026_v17 = vld [vmem:[#allocation5 + $0x4] sm:$0xf]  ;;  %v16204_v13 = vpop.f32.mrf.mxu0 }
 0x477   : > { %v16146_v47 = vpop.f32.mrf.mxu1  ;;  %619 = vst.msk [vmem:[#allocation5 + $0x40] sm:$0xf] %vm602_vm6, %v21662_v55  ;;  %620 = vst.msk [vmem:[#allocation5 + $0x44] sm:$0xf] %vm602_vm6, %v21662_v55  ;;  %v20028_v21 = vld [vmem:[#allocation5 + $0x8] sm:$0xf] }
 0x478   : > { %621 = vst.msk [vmem:[#allocation5 + $0x48] sm:$0xf] %vm602_vm6, %v21662_v55  ;;  %622 = vst.msk [vmem:[#allocation5 + $0x4c] sm:$0xf] %vm602_vm6, %v21662_v55  ;;  %v14733_v4 = vcombine.low %v20026_v17, %v20028_v21  ;;  %v17017_v9 = vld [vmem:[%s21403_s5 + $0x20] sm:$0xff]  }
 0x479   : > { %v19973_v48 = vpop.f32.mrf.mxu1  ;;  %623 = vst.msk [vmem:[#allocation5 + $0x50] sm:$0xf] %vm602_vm6, %v21662_v55  ;;  %624 = vst.msk [vmem:[#allocation5 + $0x54] sm:$0xf] %vm602_vm6, %v21662_v55  ;;  %16387 = vmatprep.subr.bf16.mxu1 %v17017_v9 }
 0x47a   : > { %16317 = vmatprep.mubr.msk.bf16.mxu0 %vm9849_vm7, %v14733_v4  ;;  %16388 = vmatpush3.bf16.msra.mxu1 %v17017_v9 }
 0x47b   : > { %v16149_v19 = vpop.f32.mrf.mxu1  ;;  %16312 = vmatmul.mubr.msk.bf16.gmra.mxu1 %vm1981_vm3, %v9261_v29  ;;  %v20046_v29 = vpop.f32.mrf.mxu0 }
 0x47c   : > { %v7280_v19 = vadd.f32 %v19691_v18, %v19787_v30 }
 0x47d   : > { %v8079_v8 = vpop.f32.mrf.mxu1 }
 0x47e   : > { %v20024_v20 = vadd.f32 %v8079_v8, %v7272_v46  ;;  %v16207_v8 = vpop.f32.mrf.mxu0 }
 0x47f   : > { %v16150_v35 = vpop.f32.mrf.mxu1 }
 0x480   : > { %v20054_v4 = vpop.f32.mrf.mxu0 }
 0x481   : > { %v20030_v53 = vpop.f32.mrf.mxu1 }
 0x482   : > { %v16208_v13 = vpop.f32.mrf.mxu0 }
 0x483   : > { %v16153_v12 = vpop.f32.mrf.mxu1 }
 0x484   : > { %v7284_v12 = vadd.f32 %v19719_v22, %v19801_v7  ;;  %v20062_v30 = vpop.f32.mrf.mxu0 }
 0x485   : > { %v8095_v59 = vpop.f32.mrf.mxu1 }
 0x486   : > { %v20039_v15 = vadd.f32 %v8095_v59, %v7276_v36  ;;  %v16211_v8 = vpop.f32.mrf.mxu0 }
 0x487   : > { %v16154_v1 = vpop.f32.mrf.mxu1 }
 0x488   : > { %v20070_v7 = vpop.f32.mrf.mxu0 }
 0x489   : > { %v20044_v47 = vpop.f32.mrf.mxu1 }
 0x48b   : > { %v16157_v23 = vpop.f32.mrf.mxu1 }
 0x48c   : > { %v7288_v23 = vadd.f32 %v19747_v26, %v19815_v56 }
 0x48d   : > { %v8111_v42 = vpop.f32.mrf.mxu1 }
 0x48e   : > { %v20050_v2 = vadd.f32 %v8111_v42, %v7280_v19 }
 0x48f   : > { %v16158_v46 = vpop.f32.mrf.mxu1 }
 0x491   : > { %v20052_v35 = vpop.f32.mrf.mxu1 }
 0x493   : > { %v16161_v24 = vpop.f32.mrf.mxu1 }
 0x495   : > { %v8127_v36 = vpop.f32.mrf.mxu1 }
 0x496   : > { %v20058_v59 = vadd.f32 %v8127_v36, %v7284_v12  ;;  %v7292_v12 = vadd.f32 %v19775_v40, %v19831_v16 }
 0x497   : > { %v16162_v1 = vpop.f32.mrf.mxu1 }
 0x499   : > { %v20060_v9 = vpop.f32.mrf.mxu1 }
 0x49b   : > { %v16165_v18 = vpop.f32.mrf.mxu1 }
 0x49c   : > { %v16212_v18 = vpop.f32.mrf.mxu0 }
 0x49d   : > { %v8143_v19 = vpop.f32.mrf.mxu1 }
 0x49e   : > { %v20066_v42 = vadd.f32 %v8143_v19, %v7288_v23  ;;  %v20078_v56 = vpop.f32.mrf.mxu0  ;;  %v7296_v23 = vadd.f32 %v19803_v34, %v19845_v10  ;;  %v7304_v10 = vadd.f32 %v19857_v37, %v19876_v3 }
 0x49f   : > { %v16166_v46 = vpop.f32.mrf.mxu1 }
 0x4a0   : > { %21663 = vst [vmem:[#allocation53_spill] sm:$0xff] %v20066_v42 }
 0x4a1   : > { %v20068_v24 = vpop.f32.mrf.mxu1 }
 0x4a3   : > { %v16169_v22 = vpop.f32.mrf.mxu1 }
 0x4a4   : > { %v16215_v22 = vpop.f32.mrf.mxu0 }
 0x4a5   : > { %v8159_v36 = vpop.f32.mrf.mxu1 }
 0x4a6   : > { %v20074_v1 = vadd.f32 %v8159_v36, %v7292_v12  ;;  %v20086_v16 = vpop.f32.mrf.mxu0  ;;  %v7300_v12 = vadd.f32 %v19829_v44, %v19859_v50  ;;  %v20105_v50 = vld [vmem:[%s21402_s4] ss:$0 sm:$0xff] }
 0x4a7   : > { %v16170_v13 = vpop.f32.mrf.mxu1 }
 0x4a9   : > { %v20076_v55 = vpop.f32.mrf.mxu1 }
 0x4aa   : > { %21664 = vst [vmem:[#allocation73_spill] sm:$0xff] %v20076_v55 }
 0x4ab   : > { %v16173_v26 = vpop.f32.mrf.mxu1 }
 0x4ac   : > { %v16216_v26 = vpop.f32.mrf.mxu0 }
 0x4ad   : > { %v8175_v19 = vpop.f32.mrf.mxu1 }
 0x4ae   : > { %v20082_v46 = vadd.f32 %v8175_v19, %v7296_v23  ;;  %v20096_v23 = vpop.f32.mrf.mxu0 }
 0x4af   : > { %v16174_v8 = vpop.f32.mrf.mxu1 }
 0x4b0   : > { %21665 = vst [vmem:[#allocation98_spill] sm:$0xff] %v20082_v46 }
 0x4b1   : > { %v20084_v42 = vpop.f32.mrf.mxu1 }
 0x4b3   : > { %v16177_v40 = vpop.f32.mrf.mxu1 }
 0x4b4   : > { %v16219_v40 = vpop.f32.mrf.mxu0 }
 0x4b5   : > { %v8191_v36 = vpop.f32.mrf.mxu1 }
 0x4b6   : > { %v20090_v13 = vadd.f32 %v8191_v36, %v7300_v12  ;;  %v8708_v12 = vadd.f32 %v19888_v52, %v19890_v43  ;;  %v20109_v36 = vpop.f32.mrf.mxu0 }
 0x4b7   : > { %v16178_v18 = vpop.f32.mrf.mxu1 }
 0x4b8   : > { %v20114_v18 = vld [vmem:[%s21403_s5] sm:$0xff]  }
 0x4b9   : > { %v20092_v55 = vpop.f32.mrf.mxu1  ;;  %16333 = vmatprep.subr.bf16.mxu0 %v20114_v18 }
 0x4bb   : > { %v16181_v34 = vpop.f32.mrf.mxu1 }
 0x4bc   : > { %v8709_v34 = vadd.f32 %v19899_v60, %v19894_v49 }
 0x4bd   : > { %v8207_v19 = vpop.f32.mrf.mxu1 }
 0x4be   : > { %v20098_v8 = vadd.f32 %v8207_v19, %v7304_v10  ;;  %v16220_v10 = vpop.f32.mrf.mxu0 }
 0x4bf   : > { %v16182_v22 = vpop.f32.mrf.mxu1 }
 0x4c0   : > { %21666 = vst [vmem:[#allocation54_spill] sm:$0xff] %v20098_v8 }
 0x4c1   : > { %v20100_v46 = vpop.f32.mrf.mxu1 }
 0x4c3   : > { %v16253_v44 = vpop.f32.mrf.mxu1 }
 0x4c4   : > { %v8712_v44 = vadd.f32 %v19913_v5, %v19904_v62 }
 0x4c5   : > { %v9395_v37 = vpop.f32.mrf.mxu1 }
 0x4c6   : > { %v9650_v3 = vadd.f32 %v9395_v37, %v8708_v12  ;;  %v20122_v12 = vpop.f32.mrf.mxu0 }
 0x4c7   : > { %v16254_v26 = vpop.f32.mrf.mxu1 }
 0x4c8   : > { %v9721_v19 = vadd.f32 %v20105_v50, %v9650_v3  ;;  %v8713_v3 = vadd.f32 %v19927_v14, %v19908_v11  ;;  %v16223_v8 = vpop.f32.mrf.mxu0 }
 0x4c9   : > { %v9398_v22 = vpop.f32.mrf.mxu1 }
 0x4ca   : > { %v9785_v52 = vmax.f32 %v9721_v19, 0.0  ;;  %v9651_v43 = vadd.f32 %v9398_v22, %v8709_v34 }
 0x4cb   : > { %v16257_v40 = vpop.f32.mrf.mxu1 }
 0x4cc   : > { %9850 = vst.msk [vmem:[#allocation4] sm:$0xff] %vm9849_vm7, %v9785_v52  ;;  %v9722_v37 = vadd.f32 %v20105_v50, %v9651_v43  ;;  %v8716_v52 = vadd.f32 %v19941_v6, %v19918_v51  ;;  %v20132_v43 = vpop.f32.mrf.mxu0 }
 0x4cd   : > { %v9411_v26 = vpop.f32.mrf.mxu1 }
 0x4ce   : > { %v9786_v49 = vmax.f32 %v9722_v37, 0.0  ;;  %v9654_v60 = vadd.f32 %v9411_v26, %v8712_v44  ;;  %v8717_v37 = vadd.f32 %v19953_v45, %v19922_v31  ;;  %v16224_v26 = vpop.f32.mrf.mxu0 }
 0x4cf   : > { %v16258_v10 = vpop.f32.mrf.mxu1  ;;  %v7261_v26 = vadd.f32 %v19565_v33, %v19723_v27 }
 0x4d0   : > { %9851 = vst.msk [vmem:[#allocation4 + $0x8] sm:$0xff] %vm9849_vm7, %v9786_v49  ;;  %v9725_v34 = vadd.f32 %v20105_v50, %v9654_v60 }
 0x4d1   : > { %v9414_v19 = vpop.f32.mrf.mxu1 }
 0x4d2   : > { %v9789_v62 = vmax.f32 %v9725_v34, 0.0  ;;  %v9655_v5 = vadd.f32 %v9414_v19, %v8713_v3  ;;  %v8720_v3 = vadd.f32 %v19965_v32, %v19932_v63  ;;  %v20142_v34 = vpop.f32.mrf.mxu0 }
 0x4d3   : > { %v16261_v22 = vpop.f32.mrf.mxu1 }
 0x4d4   : > { %9854 = vst.msk [vmem:[#allocation4 + $0x20] sm:$0xff] %vm9849_vm7, %v9789_v62  ;;  %v9726_v40 = vadd.f32 %v20105_v50, %v9655_v5 }
 0x4d5   : > { %v9427_v44 = vpop.f32.mrf.mxu1 }
 0x4d6   : > { %v9790_v11 = vmax.f32 %v9726_v40, 0.0  ;;  %v9658_v14 = vadd.f32 %v9427_v44, %v8716_v52  ;;  %v8721_v52 = vadd.f32 %v20020_v28, %v19936_v54  ;;  %v20155_v54 = vld [vmem:[%s21403_s5 + $0x30] sm:$0xff]   ;;  %v8724_v28 = vadd.f32 %v20035_v38, %v19946_v61 }
 0x4d7   : > { %v16262_v8 = vpop.f32.mrf.mxu1  ;;  %v9914_v19 = vld [vmem:[#allocation4] ss:$2 sm:$0xff]  ;;  %v9946_v62 = vld [vmem:[#allocation4 + $0x1] ss:$2 sm:$0xff]  ;;  %16423 = vmatprep.subr.bf16.mxu1 %v20155_v54 }
 0x4d8   : > { %9855 = vst.msk [vmem:[#allocation4 + $0x28] sm:$0xff] %vm9849_vm7, %v9790_v11  ;;  %v9729_v49 = vadd.f32 %v20105_v50, %v9658_v14  ;;  %v9977_v40 = vmax.f32 %v9914_v19, %v9946_v62  ;;  %v16227_v8 = vpop.f32.mrf.mxu0 }
 0x4d9   : > { %v9430_v60 = vpop.f32.mrf.mxu1 }
 0x4da   : > { %v9793_v51 = vmax.f32 %v9729_v49, 0.0  ;;  %v9659_v6 = vadd.f32 %v9430_v60, %v8717_v37  ;;  %v10018_v37 = vld [vmem:[#allocation5] sm:$0x8]  ;;  %v20161_v62 = vpop.f32.mrf.mxu0 }
 0x4db   : > { %v16265_v10 = vpop.f32.mrf.mxu1  ;;  %v14750_v19 = vcombine.low %v10018_v37, %v20026_v17  ;;  %v20177_v37 = vld [vmem:[#allocation5 + $0x10] sm:$0xf] }
 0x4dc   : > { %9858 = vst.msk [vmem:[#allocation4 + $0x40] sm:$0xff] %vm9849_vm7, %v9793_v51  ;;  %v9730_v31 = vadd.f32 %v20105_v50, %v9659_v6  ;;  %v8239_v10 = vadd.f32 %v19948_v39, %v7261_v26  ;;  %v21667_v39 = vld [vmem:[#allocation21_spill] sm:$0xff] }
 0x4dd   : > { %v9443_v45 = vpop.f32.mrf.mxu1  ;;  %v7265_v38 = vadd.f32 %v21667_v39, %v19737_v25  ;;  %v10222_v25 = vshll.u32 %v14750_v19, 16 }
 0x4de   : > { %v9794_v5 = vmax.f32 %v9730_v31, 0.0  ;;  %v9662_v22 = vadd.f32 %v9443_v45, %v8720_v3  ;;  %v8725_v61 = vadd.f32 %v20046_v29, %v8239_v10  ;;  %v20175_v29 = vld [vmem:[#allocation5 + $0x10] sm:$0xf] }
 0x4df   : > { %v9916_v44 = vld [vmem:[#allocation4 + $0x20] ss:$2 sm:$0xff]  ;;  %v9948_v11 = vld [vmem:[#allocation4 + $0x21] ss:$2 sm:$0xff]  ;;  %v16266_v14 = vpop.f32.mrf.mxu1  ;;  %v21669_v10 = vld [vmem:[#allocation22_spill] sm:$0xff] }
 0x4e0   : > { %v9978_v63 = vmax.f32 %v9916_v44, %v9948_v11  ;;  %9859 = vst.msk [vmem:[#allocation4 + $0x48] sm:$0xff] %vm9849_vm7, %v9794_v5  ;;  %v9733_v32 = vadd.f32 %v20105_v50, %v9662_v22  ;;  %v16228_v22 = vpop.f32.mrf.mxu0  ;;  %v8243_v44 = vadd.f32 %v19961_v0, %v7265_v38 }
 0x4e1   : > { %v9446_v49 = vpop.f32.mrf.mxu1  ;;  %v10224_v22 = vrot.slane %v10222_v25, 4 }
 0x4e2   : > { %v9993_v60 = vmax.f32 %v9977_v40, %v9978_v63  ;;  %v9797_v51 = vmax.f32 %v9733_v32, 0.0  ;;  %v9663_v6 = vadd.f32 %v9446_v49, %v8721_v52  ;;  %v10219_v40 = vshrl.u32 %v14750_v19, 16  ;;  %v20179_v26 = vpop.f32.mrf.mxu0 }
 0x4e3   : > { %v16269_v3 = vpop.f32.mrf.mxu1  ;;  %v8728_v63 = vadd.f32 %v20054_v4, %v19958_v41 }
 0x4e4   : > { %v10001_v33 = vpack.c.bf16 %v9993_v60, %v9993_v60  ;;  %9862 = vst.msk [vmem:[#allocation4 + $0x60] sm:$0xff] %vm9849_vm7, %v9797_v51  ;;  %v9734_v27 = vadd.f32 %v20105_v50, %v9663_v6  ;;  %v10221_v51 = vrot.slane %v10219_v40, 3  ;;  %v8729_v6 = vadd.f32 %v20062_v30, %v8243_v44 }
 0x4e5   : > { %v9459_v31 = vpop.f32.mrf.mxu1 }
 0x4e6   : > { %v9798_v45 = vmax.f32 %v9734_v27, 0.0  ;;  %v9666_v5 = vadd.f32 %v9459_v31, %v8724_v28  ;;  %10003 = vst.msk [vmem:[#allocation5 + $0xc] sm:$0xf] %vm602_vm6, %v10001_v33  ;;  %v21668_v28 = vld [vmem:[#allocation34_spill] sm:$0xff] }
 0x4e7   : > { %v16270_v17 = vpop.f32.mrf.mxu1  ;;  %v9918_v49 = vld [vmem:[#allocation4 + $0x40] ss:$2 sm:$0xff]  ;;  %v9950_v60 = vld [vmem:[#allocation4 + $0x41] ss:$2 sm:$0xff]  ;;  %v7269_v41 = vadd.f32 %v21669_v10, %v21668_v28 }
 0x4e8   : > { %9863 = vst.msk [vmem:[#allocation4 + $0x68] sm:$0xff] %vm9849_vm7, %v9798_v45  ;;  %v9737_v52 = vadd.f32 %v20105_v50, %v9666_v5  ;;  %v17039_v45 = vld [vmem:[%s21403_s5 + $0x10] sm:$0xff]   ;;  %v9979_v5 = vmax.f32 %v9918_v49, %v9950_v60 }
 0x4e9   : > { %v9462_v11 = vpop.f32.mrf.mxu1  ;;  %v8247_v49 = vadd.f32 %v19973_v48, %v7269_v41 }
 0x4ea   : > { %v9801_v14 = vmax.f32 %v9737_v52, 0.0  ;;  %v9667_v8 = vadd.f32 %v9462_v11, %v8725_v61  ;;  %v16231_v52 = vpop.f32.mrf.mxu0  ;;  %v8732_v11 = vadd.f32 %v20070_v7, %v19970_v57 }
 0x4eb   : > { %v16273_v32 = vpop.f32.mrf.mxu1 }
 0x4ec   : > { %9866 = vst.msk [vmem:[#allocation4 + $0x80] sm:$0xff] %vm9849_vm7, %v9801_v14  ;;  %v9738_v0 = vadd.f32 %v20105_v50, %v9667_v8 }
 0x4ed   : > { %v9475_v4 = vpop.f32.mrf.mxu1  ;;  %v10021_v3 = vld [vmem:[#allocation5 + $0xc] sm:$0xf] }
 0x4ee   : > { %v20186_v33 = vld [vmem:[#allocation5 + $0xc] sm:$0xf]  ;;  %v9802_v27 = vmax.f32 %v9738_v0, 0.0  ;;  %v9670_v19 = vadd.f32 %v9475_v4, %v8728_v63  ;;  %v14734_v31 = vcombine.low %v10021_v3, %v20175_v29  ;;  %v14751_v30 = vcombine.low %v20028_v21, %v10021_v3  ;;  %v20203_v4 = vpop.f32.mrf.mxu0 }
 0x4ef   : > { %v9920_v61 = vld [vmem:[#allocation4 + $0x60] ss:$2 sm:$0xff]  ;;  %v9952_v39 = vld [vmem:[#allocation4 + $0x61] ss:$2 sm:$0xff]  ;;  %v16274_v38 = vpop.f32.mrf.mxu1  ;;  %v14810_v17 = vcombine.low %v20186_v33, %v20177_v37  ;;  %v10225_v0 = vor.u32 %v10224_v22, %v10221_v51  ;;  %v8733_v51 = vadd.f32 %v20078_v56, %v8247_v49 }
 0x4f0   : > { %v9980_v40 = vmax.f32 %v9920_v61, %v9952_v39  ;;  %9867 = vst.msk [vmem:[#allocation4 + $0x88] sm:$0xff] %vm9849_vm7, %v9802_v27  ;;  %v9741_v44 = vadd.f32 %v20105_v50, %v9670_v19  ;;  %16318 = vmatmul.mubr.msk.bf16.vlgmr.msra.gmra.mxu0 %vm9849_vm7, %v14734_v31  ;;  %v10227_v21 = vshrl.u32 %v14751_v30, 16  ;;  %v10230_v8 = vshll.u32 %v14751_v30, 16  ;;  %v16232_v41 = vpop.f32.mrf.mxu0 }
 0x4f1   : > { %16389 = vmatprep.mubr.msk.bf16.mxu1 %vm9849_vm7, %v14810_v17  ;;  %v9478_v14 = vpop.f32.mrf.mxu1  ;;  %16334 = vmatpush3.bf16.msra.mxu0 %v20114_v18  ;;  %v20220_v17 = vld [vmem:[#allocation5 + $0x18] sm:$0xf]  ;;  %v8740_v41 = vadd.f32 %v20109_v36, %v20039_v15 }
 0x4f2   : > { %v9994_v63 = vmax.f32 %v9979_v5, %v9980_v40  ;;  %v9805_v32 = vmax.f32 %v9741_v44, 0.0  ;;  %v9671_v25 = vadd.f32 %v9478_v14, %v8729_v6  ;;  %16351 = vmatprep.subr.bf16.mxu0 %v17039_v45  ;;  %v10229_v28 = vrot.slane %v10227_v21, 3  ;;  %v21670_v45 = vld [vmem:[#allocation25_spill] sm:$0xff]  ;;  %v20222_v52 = vpop.f32.mrf.mxu0  ;;  %v20226_v44 = vld [vmem:[#allocation5 + $0x18] sm:$0xf] }
 0x4f3   : > { %v16277_v60 = vpop.f32.mrf.mxu1  ;;  %v10232_v10 = vrot.slane %v10230_v8, 4  ;;  %v7273_v5 = vadd.f32 %v21670_v45, %v19765_v58  ;;  %v8736_v58 = vadd.f32 %v20086_v16, %v20024_v20  ;;  %v21672_v14 = vld [vmem:[#allocation27_spill] sm:$0xff] }
 0x4f4   : > { %v10004_v57 = vpack.c.bf16 %v9994_v63, %v9994_v63  ;;  %9870 = vst.msk [vmem:[#allocation4 + $0xa0] sm:$0xff] %vm9849_vm7, %v9805_v32  ;;  %v9742_v7 = vadd.f32 %v20105_v50, %v9671_v25 }
 0x4f5   : > { %v9491_v18 = vpop.f32.mrf.mxu1  ;;  %v20207_v3 = vor.u32 %v10232_v10, %v10229_v28  ;;  %v8251_v30 = vadd.f32 %v20030_v53, %v7273_v5 }
 0x4f6   : > { %10005 = vst.msk [vmem:[#allocation5 + $0x14] sm:$0xf] %vm602_vm6, %v10004_v57  ;;  %v9806_v6 = vmax.f32 %v9742_v7, 0.0  ;;  %v9674_v27 = vadd.f32 %v9491_v18, %v8732_v11  ;;  %v21671_v11 = vld [vmem:[#allocation38_spill] sm:$0xff]  ;;  %v16235_v18 = vpop.f32.mrf.mxu0 }
 0x4f7   : > { %v16278_v19 = vpop.f32.mrf.mxu1  ;;  %v20212_v48 = vsel %vm3274_vm4, %v10225_v0, %v20207_v3  ;;  %v9922_v40 = vld [vmem:[#allocation4 + $0x80] ss:$2 sm:$0xff]  ;;  %v7277_v21 = vadd.f32 %v21672_v14, %v21671_v11  ;;  %v9954_v8 = vld [vmem:[#allocation4 + $0x81] ss:$2 sm:$0xff]  ;;  %v8737_v0 = vadd.f32 %v20096_v23, %v8251_v30  ;;  %v21674_v11 = vld [vmem:[#allocation30_spill] sm:$0xff]  ;;  %v8744_v18 = vadd.f32 %v20132_v43, %v20050_v2 }
 0x4f8   : > { %9871 = vst.msk [vmem:[#allocation4 + $0xa8] sm:$0xff] %vm9849_vm7, %v9806_v6  ;;  %v9745_v31 = vadd.f32 %v20105_v50, %v9674_v27  ;;  %v9981_v6 = vmax.f32 %v9922_v40, %v9954_v8 }
 0x4f9   : > { %v9494_v61 = vpop.f32.mrf.mxu1  ;;  %v8255_v5 = vadd.f32 %v20044_v47, %v7277_v21  ;;  %v21673_v47 = vld [vmem:[#allocation43_spill] sm:$0xff] }
 0x4fa   : > { %v9809_v39 = vmax.f32 %v9745_v31, 0.0  ;;  %v9675_v38 = vadd.f32 %v9494_v61, %v8733_v51  ;;  %v7281_v14 = vadd.f32 %v21674_v11, %v21673_v47  ;;  %v8748_v47 = vadd.f32 %v20161_v62, %v20058_v59 }
 0x4fb   : > { %v16281_v22 = vpop.f32.mrf.mxu1 }
 0x4fc   : > { %9874 = vst.msk [vmem:[#allocation4 + $0xc0] sm:$0xff] %vm9849_vm7, %v9809_v39  ;;  %v9746_v56 = vadd.f32 %v20105_v50, %v9675_v38  ;;  %v20250_v22 = vpop.f32.mrf.mxu0 }
 0x4fd   : > { %v10702_v53 = vld [vmem:[#allocation5 + $0x14] sm:$0xf]  ;;  %v9507_v63 = vpop.f32.mrf.mxu1 }
 0x4fe   : > { %v10023_v32 = vld [vmem:[#allocation5 + $0x14] sm:$0xf]  ;;  %v20233_v25 = vcombine.low %v20177_v37, %v10702_v53  ;;  %v14811_v49 = vcombine.low %v10702_v53, %v20220_v17  ;;  %v9810_v60 = vmax.f32 %v9746_v56, 0.0  ;;  %v9678_v57 = vadd.f32 %v9507_v63, %v8736_v58  ;;  %v16236_v63 = vpop.f32.mrf.mxu0 }
 0x4ff   : > { %v9924_v28 = vld [vmem:[#allocation4 + $0xa0] ss:$2 sm:$0xff]  ;;  %v9956_v10 = vld [vmem:[#allocation4 + $0xa1] ss:$2 sm:$0xff]  ;;  %v16282_v7 = vpop.f32.mrf.mxu1  ;;  %v14735_v20 = vcombine.low %v10023_v32, %v20226_v44  ;;  %v14752_v16 = vcombine.low %v20175_v29, %v10023_v32  ;;  %v8741_v53 = vadd.f32 %v20122_v12, %v8255_v5 }
 0x500   : > { %v9982_v27 = vmax.f32 %v9924_v28, %v9956_v10  ;;  %9875 = vst.msk [vmem:[#allocation4 + $0xc8] sm:$0xff] %vm9849_vm7, %v9810_v60  ;;  %16390 = vmatmul.mubr.msk.bf16.vlgmr.msra.gmra.mxu1 %vm9849_vm7, %v14811_v49  ;;  %v9749_v37 = vadd.f32 %v20105_v50, %v9678_v57  ;;  %v17060_v29 = vld [vmem:[%s21403_s5 + $0x40] sm:$0xff]   ;;  %v8259_v49 = vadd.f32 %v20052_v35, %v7281_v14 }
 0x501   : > { %16321 = vmatprep.mubr.msk.bf16.mxu0 %vm9849_vm7, %v14735_v20  ;;  %v10236_v23 = vshrl.u32 %v14752_v16, 16  ;;  %v10239_v19 = vshll.u32 %v14752_v16, 16  ;;  %v9510_v51 = vpop.f32.mrf.mxu1  ;;  %16424 = vmatpush3.bf16.msra.mxu1 %v20155_v54  ;;  %v20268_v10 = vld [vmem:[#allocation5 + $0x20] sm:$0xf]  ;;  %v20272_v20 = vpop.f32.mrf.mxu0 }
 0x502   : > { %v9995_v31 = vmax.f32 %v9981_v6, %v9982_v27  ;;  %v9679_v45 = vadd.f32 %v9510_v51, %v8737_v0  ;;  %v9813_v61 = vmax.f32 %v9749_v37, 0.0  ;;  %16459 = vmatprep.subr.bf16.mxu1 %v17060_v29  ;;  %v20270_v7 = vld [vmem:[#allocation5 + $0x20] sm:$0xf]  ;;  %v8745_v35 = vadd.f32 %v20142_v34, %v8259_v49 }
 0x503   : > { %v10238_v39 = vrot.slane %v10236_v23, 3  ;;  %v10241_v38 = vrot.slane %v10239_v19, 4  ;;  %v16285_v30 = vpop.f32.mrf.mxu1  ;;  %v16239_v43 = vpop.f32.mrf.mxu0 }
 0x504   : > { %v10006_v40 = vpack.c.bf16 %v9995_v31, %v9995_v31  ;;  %v9750_v54 = vadd.f32 %v20105_v50, %v9679_v45  ;;  %9878 = vst.msk [vmem:[#allocation4 + $0xe0] sm:$0xff] %vm9849_vm7, %v9813_v61 }
 0x505   : > { %v20254_v56 = vor.u32 %v10241_v38, %v10238_v39  ;;  %v9523_v58 = vpop.f32.mrf.mxu1  ;;  %v21675_v38 = vld [vmem:[#allocation46_spill] sm:$0xff]  ;;  %v20298_v49 = vpop.f32.mrf.mxu0 }
 0x506   : > { %10007 = vst.msk [vmem:[#allocation5 + $0x1c] sm:$0xf] %vm602_vm6, %v10006_v40  ;;  %v9814_v15 = vmax.f32 %v9750_v54, 0.0  ;;  %v9682_v36 = vadd.f32 %v9523_v58, %v8740_v41 }
 0x507   : > { %v16286_v21 = vpop.f32.mrf.mxu1  ;;  %v20262_v8 = vsel %vm3274_vm4, %v20207_v3, %v20254_v56  ;;  %v9926_v3 = vld [vmem:[#allocation4 + $0xc0] ss:$2 sm:$0xff]  ;;  %v9958_v16 = vld [vmem:[#allocation4 + $0xc1] ss:$2 sm:$0xff] }
 0x508   : > { %9879 = vst.msk [vmem:[#allocation4 + $0xe8] sm:$0xff] %vm9849_vm7, %v9814_v15  ;;  %v9753_v32 = vadd.f32 %v20105_v50, %v9682_v36  ;;  %v9983_v29 = vmax.f32 %v9926_v3, %v9958_v16 }
 0x509   : > { %v9526_v60 = vpop.f32.mrf.mxu1 }
 0x50a   : > { %v9817_v0 = vmax.f32 %v9753_v32, 0.0  ;;  %v9683_v28 = vadd.f32 %v9526_v60, %v8741_v53  ;;  %v20296_v32 = vld [vmem:[#allocation5 + $0x20] sm:$0xf] }
 0x50b   : > { %v16289_v57 = vpop.f32.mrf.mxu1 }
 0x50c   : > { %9882 = vst.msk [vmem:[#allocation4 + $0x100] sm:$0xff] %vm9849_vm7, %v9817_v0  ;;  %v9754_v12 = vadd.f32 %v20105_v50, %v9683_v28 }
 0x50d   : > { %v10025_v6 = vld [vmem:[#allocation5 + $0x1c] sm:$0xf]  ;;  %v9539_v27 = vpop.f32.mrf.mxu1 }
 0x50e   : > { %v10704_v37 = vld [vmem:[#allocation5 + $0x1c] sm:$0xf]  ;;  %v14736_v23 = vcombine.low %v10025_v6, %v20268_v10  ;;  %v14753_v19 = vcombine.low %v20226_v44, %v10025_v6  ;;  %v9818_v51 = vmax.f32 %v9754_v12, 0.0  ;;  %v9686_v45 = vadd.f32 %v9539_v27, %v8744_v18  ;;  %v21676_v44 = vld [vmem:[#allocation32_spill] sm:$0xff]  ;;  %v16240_v18 = vpop.f32.mrf.mxu0 }
 0x50f   : > { %v9928_v41 = vld [vmem:[#allocation4 + $0xe0] ss:$2 sm:$0xff]  ;;  %v9960_v31 = vld [vmem:[#allocation4 + $0xe1] ss:$2 sm:$0xff]  ;;  %v16290_v5 = vpop.f32.mrf.mxu1  ;;  %v20282_v61 = vcombine.low %v20220_v17, %v10704_v37  ;;  %v14812_v2 = vcombine.low %v10704_v37, %v20270_v7  ;;  %v7285_v30 = vadd.f32 %v21676_v44, %v21675_v38  ;;  %v20294_v63 = vld [vmem:[#allocation5 + $0x1c] sm:$0xf] }
 0x510   : > { %v9984_v34 = vmax.f32 %v9928_v41, %v9960_v31  ;;  %9883 = vst.msk [vmem:[#allocation4 + $0x108] sm:$0xff] %vm9849_vm7, %v9818_v51  ;;  %16322 = vmatmul.mubr.msk.bf16.gmra.mxu0 %vm9849_vm7, %v14736_v23  ;;  %v10245_v39 = vshrl.u32 %v14753_v19, 16  ;;  %v9757_v40 = vadd.f32 %v20105_v50, %v9686_v45  ;;  %v10248_v58 = vshll.u32 %v14753_v19, 16  ;;  %v21677_v6 = vld [vmem:[#allocation95_spill] sm:$0xff]  ;;  %v21678_v27 = vld [vmem:[#allocation36_spill] sm:$0xff] }
 0x511   : > { %16393 = vmatprep.mubr.msk.bf16.mxu1 %vm9849_vm7, %v14812_v2  ;;  %v9542_v54 = vpop.f32.mrf.mxu1  ;;  %v8263_v11 = vadd.f32 %v20060_v9, %v7285_v30  ;;  %v14870_v62 = vcombine.low %v20294_v63, %v20296_v32  ;;  %v7289_v37 = vadd.f32 %v21678_v27, %v21677_v6  ;;  %v20318_v41 = vld [vmem:[#allocation5 + $0x28] sm:$0xf] }
 0x512   : > { %v9996_v17 = vmax.f32 %v9983_v29, %v9984_v34  ;;  %v9687_v15 = vadd.f32 %v9542_v54, %v8745_v35  ;;  %v10247_v36 = vrot.slane %v10245_v39, 3  ;;  %v9821_v14 = vmax.f32 %v9757_v40, 0.0  ;;  %v20324_v5 = vld [vmem:[#allocation5 + $0x28] sm:$0xf]  ;;  %v21680_v34 = vld [vmem:[#allocation50_spill] sm:$0xff] }
 0x513   : > { %v16293_v21 = vpop.f32.mrf.mxu1  ;;  %v10250_v53 = vrot.slane %v10248_v58, 4  ;;  %v8749_v12 = vadd.f32 %v20179_v26, %v8263_v11  ;;  %v8267_v29 = vadd.f32 %v20068_v24, %v7289_v37  ;;  %v21679_v2 = vld [vmem:[#allocation53_spill] sm:$0xff]  ;;  %v21681_v39 = vld [vmem:[#allocation40_spill] sm:$0xff] }
 0x514   : > { %v10008_v60 = vpack.c.bf16 %v9996_v17, %v9996_v17  ;;  %v9758_v0 = vadd.f32 %v20105_v50, %v9687_v15  ;;  %9886 = vst.msk [vmem:[#allocation4 + $0x120] sm:$0xff] %vm9849_vm7, %v9821_v14  ;;  %v8752_v43 = vadd.f32 %v20203_v4, %v21679_v2  ;;  %v7293_v38 = vadd.f32 %v21681_v39, %v21680_v34  ;;  %v21683_v39 = vld [vmem:[#allocation96_spill] sm:$0xff] }
 0x515   : > { %v9555_v28 = vpop.f32.mrf.mxu1  ;;  %v20302_v57 = vor.u32 %v10250_v53, %v10247_v36  ;;  %v8753_v15 = vadd.f32 %v20222_v52, %v8267_v29 }
 0x516   : > { %10009 = vst.msk [vmem:[#allocation5 + $0x24] sm:$0xf] %vm602_vm6, %v10008_v60  ;;  %v9822_v59 = vmax.f32 %v9758_v0, 0.0  ;;  %v9690_v9 = vadd.f32 %v9555_v28, %v8748_v47 }
 0x517   : > { %v16294_v3 = vpop.f32.mrf.mxu1  ;;  %v20310_v16 = vsel %vm3274_vm4, %v20254_v56, %v20302_v57  ;;  %v20320_v56 = vpop.f32.mrf.mxu0  ;;  %v9930_v45 = vld [vmem:[#allocation4 + $0x100] ss:$2 sm:$0xff]  ;;  %v9962_v44 = vld [vmem:[#allocation4 + $0x101] ss:$2 sm:$0xff] }
 0x518   : > { %9887 = vst.msk [vmem:[#allocation4 + $0x128] sm:$0xff] %vm9849_vm7, %v9822_v59  ;;  %v9761_v35 = vadd.f32 %v20105_v50, %v9690_v9  ;;  %v9985_v60 = vmax.f32 %v9930_v45, %v9962_v44  ;;  %v8756_v9 = vadd.f32 %v20250_v22, %v20074_v1 }
 0x519   : > { %v9558_v23 = vpop.f32.mrf.mxu1  ;;  %v16243_v53 = vpop.f32.mrf.mxu0 }
 0x51a   : > { %v9825_v19 = vmax.f32 %v9761_v35, 0.0  ;;  %v9691_v51 = vadd.f32 %v9558_v23, %v8749_v12 }
 0x51b   : > { %v16297_v31 = vpop.f32.mrf.mxu1  ;;  %v8677_v23 = vpop.f32.mrf.mxu0 }
 0x51c   : > { %9890 = vst.msk [vmem:[#allocation4 + $0x140] sm:$0xff] %vm9849_vm7, %v9825_v19  ;;  %v9762_v26 = vadd.f32 %v20105_v50, %v9691_v51 }
 0x51d   : > { %v10706_v24 = vld [vmem:[#allocation5 + $0x24] sm:$0xf]  ;;  %v9571_v30 = vpop.f32.mrf.mxu1 }
 0x51e   : > { %v10027_v40 = vld [vmem:[#allocation5 + $0x24] sm:$0xf]  ;;  %v20331_v54 = vcombine.low %v20270_v7, %v10706_v24  ;;  %v14813_v58 = vcombine.low %v10706_v24, %v20318_v41  ;;  %v9826_v17 = vmax.f32 %v9762_v26, 0.0  ;;  %v9694_v11 = vadd.f32 %v9571_v30, %v8752_v43  ;;  %v16244_v43 = vpop.f32.mrf.mxu0 }
 0x51f   : > { %v9932_v36 = vld [vmem:[#allocation4 + $0x120] ss:$2 sm:$0xff]  ;;  %v9964_v47 = vld [vmem:[#allocation4 + $0x121] ss:$2 sm:$0xff]  ;;  %v16298_v14 = vpop.f32.mrf.mxu1  ;;  %v14737_v4 = vcombine.low %v10027_v40, %v20324_v5  ;;  %v14754_v21 = vcombine.low %v20268_v10, %v10027_v40 }
 0x520   : > { %v9986_v0 = vmax.f32 %v9932_v36, %v9964_v47  ;;  %9891 = vst.msk [vmem:[#allocation4 + $0x148] sm:$0xff] %vm9849_vm7, %v9826_v17  ;;  %16394 = vmatmul.mubr.msk.bf16.gmra.mxu1 %vm9849_vm7, %v14813_v58  ;;  %v9765_v7 = vadd.f32 %v20105_v50, %v9694_v11  ;;  %v21682_v10 = vld [vmem:[#allocation73_spill] sm:$0xff]  ;;  %v21685_v11 = vld [vmem:[#allocation98_spill] sm:$0xff] }
 0x521   : > { %16325 = vmatprep.mubr.msk.bf16.mxu0 %vm9849_vm7, %v14737_v4  ;;  %v10254_v52 = vshrl.u32 %v14754_v21, 16  ;;  %v10257_v28 = vshll.u32 %v14754_v21, 16  ;;  %v9574_v59 = vpop.f32.mrf.mxu1  ;;  %v8271_v18 = vadd.f32 %v21682_v10, %v7293_v38  ;;  %v21684_v38 = vld [vmem:[#allocation66_spill] sm:$0xff]  ;;  %v8760_v14 = vadd.f32 %v20298_v49, %v21685_v11 }
 0x522   : > { %v9997_v3 = vmax.f32 %v9985_v60, %v9986_v0  ;;  %v9695_v12 = vadd.f32 %v9574_v59, %v8753_v15  ;;  %v9829_v35 = vmax.f32 %v9765_v7, 0.0  ;;  %v7297_v44 = vadd.f32 %v21684_v38, %v21683_v39  ;;  %v20360_v17 = vld [vmem:[#allocation5 + $0x30] sm:$0xf]  ;;  %v20395_v11 = vld [vmem:[#allocation5 + $0x38] sm:$0xf] }
 0x523   : > { %v10256_v6 = vrot.slane %v10254_v52, 3  ;;  %v10259_v27 = vrot.slane %v10257_v28, 4  ;;  %v16301_v37 = vpop.f32.mrf.mxu1  ;;  %v8757_v2 = vadd.f32 %v20272_v20, %v8271_v18  ;;  %v10709_v47 = vld [vmem:[#allocation5 + $0x30] sm:$0xf]  ;;  %v21686_v18 = vld [vmem:[#allocation51_spill] sm:$0xff] }
 0x524   : > { %v10010_v19 = vpack.c.bf16 %v9997_v3, %v9997_v3  ;;  %v9766_v51 = vadd.f32 %v20105_v50, %v9695_v12  ;;  %9894 = vst.msk [vmem:[#allocation4 + $0x160] sm:$0xff] %vm9849_vm7, %v9829_v35  ;;  %v8275_v58 = vadd.f32 %v20084_v42, %v7297_v44  ;;  %v21687_v35 = vld [vmem:[#allocation41_spill] sm:$0xff] }
 0x525   : > { %v9587_v29 = vpop.f32.mrf.mxu1  ;;  %v20346_v31 = vor.u32 %v10259_v27, %v10256_v6  ;;  %v7301_v6 = vadd.f32 %v21687_v35, %v21686_v18 }
 0x526   : > { %10011 = vst.msk [vmem:[#allocation5 + $0x2c] sm:$0xf] %vm602_vm6, %v10010_v19  ;;  %v9830_v1 = vmax.f32 %v9766_v51, 0.0  ;;  %v9698_v22 = vadd.f32 %v9587_v29, %v8756_v9  ;;  %v8761_v7 = vadd.f32 %v20320_v56, %v8275_v58  ;;  %v20381_v56 = vld [vmem:[%s21402_s4] ss:$0 sm:$0xff]  ;;  %v8764_v51 = vadd.f32 %v8677_v23, %v20090_v13  ;;  %v21688_v13 = vld [vmem:[#allocation97_spill] sm:$0xff] }
 0x527   : > { %v16302_v45 = vpop.f32.mrf.mxu1  ;;  %v20352_v26 = vsel %vm3274_vm4, %v20302_v57, %v20346_v31  ;;  %v8680_v57 = vpop.f32.mrf.mxu0  ;;  %v9934_v36 = vld [vmem:[#allocation4 + $0x140] ss:$2 sm:$0xff]  ;;  %v9966_v4 = vld [vmem:[#allocation4 + $0x141] ss:$2 sm:$0xff]  ;;  %v8279_v29 = vadd.f32 %v20092_v55, %v7301_v6 }
 0x528   : > { %9895 = vst.msk [vmem:[#allocation4 + $0x168] sm:$0xff] %vm9849_vm7, %v9830_v1  ;;  %v9769_v34 = vadd.f32 %v20105_v50, %v9698_v22  ;;  %v9987_v12 = vmax.f32 %v9934_v36, %v9966_v4  ;;  %v21689_v23 = vld [vmem:[#allocation71_spill] sm:$0xff] }
 0x529   : > { %v9590_v24 = vpop.f32.mrf.mxu1  ;;  %v16247_v49 = vpop.f32.mrf.mxu0 }
 0x52a   : > { %v9833_v30 = vmax.f32 %v9769_v34, 0.0  ;;  %v9699_v40 = vadd.f32 %v9590_v24, %v8757_v2  ;;  %v8765_v24 = vadd.f32 %v8680_v57, %v8279_v29 }
 0x52b   : > { %v16305_v15 = vpop.f32.mrf.mxu1  ;;  %v8693_v45 = vpop.f32.mrf.mxu0 }
 0x52c   : > { %9898 = vst.msk [vmem:[#allocation4 + $0x180] sm:$0xff] %vm9849_vm7, %v9833_v30  ;;  %v9770_v20 = vadd.f32 %v20105_v50, %v9699_v40  ;;  %v7305_v40 = vadd.f32 %v21689_v23, %v21688_v13  ;;  %v10774_v23 = vshll.u32 %v20233_v25, 16 }
 0x52d   : > { %v20366_v21 = vld [vmem:[#allocation5 + $0x2c] sm:$0xf]  ;;  %v9603_v53 = vpop.f32.mrf.mxu1  ;;  %v16248_v30 = vpop.f32.mrf.mxu0 }
 0x52e   : > { %v10708_v60 = vld [vmem:[#allocation5 + $0x2c] sm:$0xf]  ;;  %v14738_v42 = vcombine.low %v20366_v21, %v20360_v17  ;;  %v9834_v0 = vmax.f32 %v9770_v20, 0.0  ;;  %v9702_v59 = vadd.f32 %v9603_v53, %v8760_v14  ;;  %v8283_v20 = vadd.f32 %v20100_v46, %v7305_v40  ;;  %v10699_v53 = vld [vmem:[#allocation5 + $0x8] sm:$0x8] }
 0x52f   : > { %v9936_v52 = vld [vmem:[#allocation4 + $0x160] ss:$2 sm:$0xff]  ;;  %v9968_v28 = vld [vmem:[#allocation4 + $0x161] ss:$2 sm:$0xff]  ;;  %v16306_v9 = vpop.f32.mrf.mxu1  ;;  %v20372_v50 = vcombine.low %v20318_v41, %v10708_v60  ;;  %v14814_v3 = vcombine.low %v10708_v60, %v10709_v47  ;;  %v8696_v4 = vpop.f32.mrf.mxu0 }
 0x530   : > { %v9988_v10 = vmax.f32 %v9936_v52, %v9968_v28  ;;  %9899 = vst.msk [vmem:[#allocation4 + $0x188] sm:$0xff] %vm9849_vm7, %v9834_v0  ;;  %16326 = vmatmul.mubr.msk.bf16.gmra.mxu0 %vm9849_vm7, %v14738_v42  ;;  %v9773_v27 = vadd.f32 %v20381_v56, %v9702_v59  ;;  %v20399_v42 = vld [vmem:[#allocation5 + $0x38] sm:$0xf] }
 0x531   : > { %16397 = vmatprep.mubr.msk.bf16.mxu1 %vm9849_vm7, %v14814_v3  ;;  %v9606_v41 = vpop.f32.mrf.mxu1  ;;  %v21690_v0 = vld [vmem:[#allocation54_spill] sm:$0xff] }
 0x532   : > { %v9998_v37 = vmax.f32 %v9987_v12, %v9988_v10  ;;  %v9703_v19 = vadd.f32 %v9606_v41, %v8761_v7  ;;  %v9837_v1 = vmax.f32 %v9773_v27, 0.0  ;;  %v8768_v7 = vadd.f32 %v8693_v45, %v21690_v0 }
 0x533   : > { %v16309_v22 = vpop.f32.mrf.mxu1  ;;  %v8769_v12 = vadd.f32 %v8696_v4, %v8283_v20  ;;  %v10783_v45 = vshll.u32 %v20282_v61, 16  ;;  %v10801_v20 = vshll.u32 %v20372_v50, 16  ;;  %v10776_v4 = vrot.slane %v10774_v23, 4 }
 0x534   : > { %v10012_v2 = vpack.c.bf16 %v9998_v37, %v9998_v37  ;;  %v9774_v43 = vadd.f32 %v20381_v56, %v9703_v19  ;;  %9902 = vst.msk [vmem:[#allocation4 + $0x1a0] sm:$0xff] %vm9849_vm7, %v9837_v1  ;;  %v10780_v22 = vshrl.u32 %v20282_v61, 16  ;;  %v11413_v61 = vld [vmem:[#allocation5 + $0x10] sm:$0x8] }
 0x535   : > { %v9619_v34 = vpop.f32.mrf.mxu1  ;;  %v10785_v30 = vrot.slane %v10783_v45, 4  ;;  %v20453_v45 = vld [vmem:[#allocation5 + $0x24] sm:$0xf] }
 0x536   : > { %10013 = vst.msk [vmem:[#allocation5 + $0x34] sm:$0xf] %vm602_vm6, %v10012_v2  ;;  %v9838_v39 = vmax.f32 %v9774_v43, 0.0  ;;  %v9706_v38 = vadd.f32 %v9619_v34, %v8764_v51 }
 0x537   : > { %v16310_v44 = vpop.f32.mrf.mxu1  ;;  %v9938_v60 = vld [vmem:[#allocation4 + $0x180] ss:$2 sm:$0xff]  ;;  %v9970_v52 = vld [vmem:[#allocation4 + $0x181] ss:$2 sm:$0xff] }
 0x538   : > { %9903 = vst.msk [vmem:[#allocation4 + $0x1a8] sm:$0xff] %vm9849_vm7, %v9838_v39  ;;  %v9777_v55 = vadd.f32 %v20381_v56, %v9706_v38  ;;  %v9989_v41 = vmax.f32 %v9938_v60, %v9970_v52  ;;  %v10771_v39 = vshrl.u32 %v20233_v25, 16  ;;  %v20428_v60 = vld [vmem:[#allocation5 + $0x40] sm:$0xf] }
 0x539   : > { %v9622_v58 = vpop.f32.mrf.mxu1 }
 0x53a   : > { %v9841_v15 = vmax.f32 %v9777_v55, 0.0  ;;  %v9707_v36 = vadd.f32 %v9622_v58, %v8765_v24  ;;  %v10782_v24 = vrot.slane %v10780_v22, 3  ;;  %v10798_v55 = vshrl.u32 %v20372_v50, 16 }
 0x53b   : > { %v16313_v14 = vpop.f32.mrf.mxu1  ;;  %v10773_v13 = vrot.slane %v10771_v39, 3 }
 0x53c   : > { %9906 = vst.msk [vmem:[#allocation4 + $0x1c0] sm:$0xff] %vm9849_vm7, %v9841_v15  ;;  %v9778_v57 = vadd.f32 %v20381_v56, %v9707_v36  ;;  %v10789_v15 = vshrl.u32 %v20331_v54, 16  ;;  %v10792_v36 = vshll.u32 %v20331_v54, 16  ;;  %v10034_v14 = vld [vmem:[#allocation5 + $0x40] sm:$0xf]  ;;  %v14755_v54 = vcombine.low %v20324_v5, %v20366_v21 }
 0x53d   : > { %v10710_v28 = vld [vmem:[#allocation5 + $0x34] sm:$0xf]  ;;  %v9635_v59 = vpop.f32.mrf.mxu1  ;;  %v10800_v50 = vrot.slane %v10798_v55, 3 }
 0x53e   : > { %v20402_v9 = vld [vmem:[#allocation5 + $0x34] sm:$0xf]  ;;  %v20404_v46 = vcombine.low %v10709_v47, %v10710_v28  ;;  %v14815_v3 = vcombine.low %v10710_v28, %v20395_v11  ;;  %v9842_v49 = vmax.f32 %v9778_v57, 0.0  ;;  %v9710_v35 = vadd.f32 %v9635_v59, %v8768_v7  ;;  %v20430_v57 = vld [vmem:[#allocation5 + $0x18] sm:$0xf] }
 0x53f   : > { %v9940_v10 = vld [vmem:[#allocation4 + $0x1a0] ss:$2 sm:$0xff]  ;;  %v9972_v18 = vld [vmem:[#allocation4 + $0x1a1] ss:$2 sm:$0xff]  ;;  %v16314_v6 = vpop.f32.mrf.mxu1  ;;  %v14739_v27 = vcombine.low %v20402_v9, %v20399_v42  ;;  %v14790_v47 = vcombine.low %v10699_v53, %v20186_v33  ;;  %v10786_v53 = vor.u32 %v10785_v30, %v10782_v24  ;;  %v10791_v0 = vrot.slane %v10789_v15, 3 }
 0x540   : > { %v9990_v37 = vmax.f32 %v9940_v10, %v9972_v18  ;;  %9907 = vst.msk [vmem:[#allocation4 + $0x1c8] sm:$0xff] %vm9849_vm7, %v9842_v49  ;;  %16398 = vmatmul.mubr.msk.bf16.gmra.mxu1 %vm9849_vm7, %v14815_v3  ;;  %v9781_v19 = vadd.f32 %v20381_v56, %v9710_v35  ;;  %v10794_v7 = vrot.slane %v10792_v36, 4  ;;  %v14850_v59 = vcombine.low %v20430_v57, %v20294_v63 }
 0x541   : > { %16329 = vmatprep.mubr.msk.bf16.mxu0 %vm9849_vm7, %v14739_v27  ;;  %v9638_v51 = vpop.f32.mrf.mxu1  ;;  %v10763_v33 = vshrl.u32 %v14790_v47, 16  ;;  %v10766_v38 = vshll.u32 %v14790_v47, 16  ;;  %v10777_v3 = vor.u32 %v10776_v4, %v10773_v13  ;;  %v10803_v35 = vrot.slane %v10801_v20, 4  ;;  %v20456_v13 = vld [vmem:[#allocation5 + $0x2c] sm:$0xf] }
 0x542   : > { %v9999_v29 = vmax.f32 %v9989_v41, %v9990_v37  ;;  %v9711_v1 = vadd.f32 %v9638_v51, %v8769_v12  ;;  %v9845_v2 = vmax.f32 %v9781_v19, 0.0  ;;  %v10795_v18 = vor.u32 %v10794_v7, %v10791_v0  ;;  %v20462_v4 = vld [vmem:[#allocation5 + $0x28] sm:$0xf]  ;;  %v20470_v0 = vld [vmem:[%s21403_s5 + $0x18] sm:$0xff]  }
 0x543   : > { %v10765_v40 = vrot.slane %v10763_v33, 3  ;;  %v10768_v58 = vrot.slane %v10766_v38, 4  ;;  %v10804_v38 = vor.u32 %v10803_v35, %v10800_v50  ;;  %v10263_v55 = vshrl.u32 %v14755_v54, 16 }
 0x544   : > { %v10014_v43 = vpack.c.bf16 %v9999_v29, %v9999_v29  ;;  %v9782_v34 = vadd.f32 %v20381_v56, %v9711_v1  ;;  %9910 = vst.msk [vmem:[#allocation4 + $0x1e0] sm:$0xff] %vm9849_vm7, %v9845_v2  ;;  %v20423_v56 = vld [vmem:[#allocation5 + $0x14] sm:$0xf]  ;;  %v20443_v29 = vsel %vm3274_vm4, %v10777_v3, %v10786_v53  ;;  %v20446_v5 = vsel %vm3274_vm4, %v10786_v53, %v10795_v18 }
 0x545   : > { %v14849_v28 = vcombine.low %v11413_v61, %v20423_v56  ;;  %v10769_v10 = vor.u32 %v10768_v58, %v10765_v40  ;;  %v10266_v61 = vshll.u32 %v14755_v54, 16  ;;  %v20460_v58 = vcombine.low %v10034_v14, %v10034_v14 }
 0x546   : > { %10015 = vst.msk [vmem:[#allocation5 + $0x3c] sm:$0xf] %vm602_vm6, %v10014_v43  ;;  %v9846_v44 = vmax.f32 %v9782_v34, 0.0  ;;  %v11485_v43 = vshrl.u32 %v14850_v59, 16  ;;  %v11488_v34 = vshll.u32 %v14850_v59, 16  ;;  %v14852_v53 = vcombine.low %v20462_v4, %v20456_v13 }
 0x547   : > { %v9942_v25 = vld [vmem:[#allocation4 + $0x1c0] ss:$2 sm:$0xff]  ;;  %v9974_v52 = vld [vmem:[#allocation4 + $0x1c1] ss:$2 sm:$0xff]  ;;  %v20440_v51 = vsel %vm3274_vm4, %v10769_v10, %v10777_v3  ;;  %v11477_v2 = vshrl.u32 %v14849_v28, 16  ;;  %v11480_v33 = vshll.u32 %v14849_v28, 16  ;;  %v20473_v7 = vsel %vm3274_vm4, %v10795_v18, %v10804_v38 }
 0x548   : > { %9911 = vst.msk [vmem:[#allocation4 + $0x1e8] sm:$0xff] %vm9849_vm7, %v9846_v44  ;;  %v9991_v37 = vmax.f32 %v9942_v25, %v9974_v52  ;;  %v10810_v44 = vshll.u32 %v20404_v46, 16  ;;  %v11487_v36 = vrot.slane %v11485_v43, 3  ;;  %v11490_v20 = vrot.slane %v11488_v34, 4  ;;  %v20488_v10 = vld [vmem:[#allocation5 + $0x48] sm:$0xf] }
 0x549   : > { %v11479_v15 = vrot.slane %v11477_v2, 3  ;;  %v14756_v25 = vcombine.low %v20360_v17, %v20402_v9  ;;  %v10265_v52 = vrot.slane %v10263_v55, 3  ;;  %v10268_v28 = vrot.slane %v10266_v61, 4 }
 0x54a   : > { %v11491_v17 = vor.u32 %v11490_v20, %v11487_v36  ;;  %v10290_v9 = vshrl.u32 %v20460_v58, 16 }
 0x54b   : > { %v10272_v35 = vshrl.u32 %v14756_v25, 16 }
 0x54d   : > { %v10033_v49 = vld [vmem:[#allocation5 + $0x3c] sm:$0xf] }
 0x54e   : > { %v10712_v12 = vld [vmem:[#allocation5 + $0x3c] sm:$0xf]  ;;  %v14740_v6 = vcombine.low %v10033_v49, %v10034_v14  ;;  %v10812_v14 = vrot.slane %v10810_v44, 4  ;;  %v14757_v3 = vcombine.low %v20399_v42, %v10033_v49  ;;  %v20511_v44 = vld [vmem:[#allocation5 + $0x38] sm:$0xf] }
 0x54f   : > { %v14796_v27 = vcombine.low %v20395_v11, %v10712_v12  ;;  %v14816_v41 = vcombine.low %v10712_v12, %v20428_v60  ;;  %v9944_v47 = vld [vmem:[#allocation4 + $0x1e0] ss:$2 sm:$0xff]  ;;  %v9976_v19 = vld [vmem:[#allocation4 + $0x1e1] ss:$2 sm:$0xff]  ;;  %v10807_v11 = vshrl.u32 %v20404_v46, 16  ;;  %v11482_v46 = vrot.slane %v11480_v33, 4 }
 0x550   : > { %v9992_v21 = vmax.f32 %v9944_v47, %v9976_v19  ;;  %16330 = vmatmul.mubr.msk.bf16.gmra.mxu0 %vm9849_vm7, %v14740_v6  ;;  %v17274_v12 = vld [vmem:[%s21403_s5 + $0x10] sm:$0xff]   ;;  %v10275_v6 = vshll.u32 %v14756_v25, 16  ;;  %v10281_v19 = vshrl.u32 %v14757_v3, 16  ;;  %v20505_v43 = vld [vmem:[#allocation5 + $0x3c] sm:$0xf] }
 0x551   : > { %v10816_v1 = vshrl.u32 %v14796_v27, 16  ;;  %v10819_v22 = vshll.u32 %v14796_v27, 16  ;;  %16401 = vmatprep.mubr.msk.bf16.mxu1 %vm9849_vm7, %v14816_v41  ;;  %16335 = vmatprep.mubr.msk.bf16.mxu0 %vm9849_vm7, %v20212_v48  ;;  %v14851_v48 = vcombine.low %v20296_v32, %v20453_v45  ;;  %v10809_v40 = vrot.slane %v10807_v11, 3  ;;  %v20498_v41 = vld [vmem:[#allocation5 + $0x30] sm:$0xf] }
 0x552   : > { %v10000_v39 = vmax.f32 %v9991_v37, %v9992_v21  ;;  %v11483_v18 = vor.u32 %v11482_v46, %v11479_v15  ;;  %v10269_v27 = vor.u32 %v10268_v28, %v10265_v52  ;;  %v20500_v37 = vld [vmem:[#allocation5 + $0x34] sm:$0xf]  ;;  %v10284_v21 = vshll.u32 %v14757_v3, 16 }
 0x553   : > { %v10818_v24 = vrot.slane %v10816_v1, 3  ;;  %v10821_v30 = vrot.slane %v10819_v22, 4  ;;  %v11494_v54 = vshrl.u32 %v14851_v48, 16  ;;  %v10813_v50 = vor.u32 %v10812_v14, %v10809_v40  ;;  %v20502_v22 = vld [vmem:[#allocation5 + $0x4] sm:$0xff]   ;;  %v20524_v14 = vld [vmem:[#allocation5 + $0xc] sm:$0xff]  }
 0x554   : > { %v10016_v23 = vpack.c.bf16 %v10000_v39, %v10000_v39  ;;  %v11497_v42 = vshll.u32 %v14851_v48, 16  ;;  %v11506_v1 = vshll.u32 %v14852_v53, 16  ;;  %v11492_v2 = vsel %vm3274_vm4, %v11483_v18, %v11491_v17 }
 0x555   : > { %v20477_v59 = vor.u32 %v10821_v30, %v10818_v24  ;;  %v11496_v47 = vrot.slane %v11494_v54, 3  ;;  %v10274_v24 = vrot.slane %v10272_v35, 3  ;;  %v10277_v30 = vrot.slane %v10275_v6, 4 }
 0x556   : > { %10017 = vst.msk [vmem:[#allocation5 + $0x44] sm:$0xf] %vm602_vm6, %v10016_v23  ;;  %v11499_v33 = vrot.slane %v11497_v42, 4  ;;  %v10270_v55 = vsel %vm3274_vm4, %v20346_v31, %v10269_v27  ;;  %v10286_v23 = vrot.slane %v10284_v21, 4  ;;  %v11508_v48 = vrot.slane %v11506_v1, 4 }
 0x557   : > { %v20496_v49 = vsel %vm3274_vm4, %v10813_v50, %v20477_v59  ;;  %v14854_v40 = vcombine.low %v20511_v44, %v20505_v43  ;;  %v10293_v15 = vshll.u32 %v20460_v58, 16  ;;  %v10491_v31 = vshll.u32 %v20502_v22, 16  ;;  %v20535_v1 = vld [vmem:[#allocation5 + $0x48] sm:$0xf] }
 0x558   : > { %16336 = vmatmul.mubr.msk.bf16.vlgmr.msra.gmra.mxu0 %vm9849_vm7, %v20262_v8  ;;  %v20492_v8 = vsel %vm3274_vm4, %v10804_v38, %v10813_v50  ;;  %v14853_v38 = vcombine.low %v20498_v41, %v20500_v37  ;;  %v11500_v46 = vor.u32 %v11499_v33, %v11496_v47  ;;  %v10278_v25 = vor.u32 %v10277_v30, %v10274_v24 }
 0x559   : > { %16352 = vmatpush3.bf16.msra.mxu0 %v17274_v12  ;;  %16339 = vmatprep.mubr.msk.bf16.mxu0 %vm9849_vm7, %v20310_v16  ;;  %v11503_v16 = vshrl.u32 %v14852_v53, 16  ;;  %v11521_v12 = vshrl.u32 %v14854_v40, 16  ;;  %v11524_v18 = vshll.u32 %v14854_v40, 16  ;;  %v10295_v58 = vrot.slane %v10293_v15, 4 }
 0x55a   : > { %16369 = vmatprep.subr.bf16.mxu0 %v20470_v0  ;;  %v11512_v53 = vshrl.u32 %v14853_v38, 16  ;;  %v11515_v52 = vshll.u32 %v14853_v38, 16  ;;  %v10489_v35 = vshrl.u32 %v20502_v22, 16  ;;  %v10493_v6 = vrot.slane %v10491_v31, 1 }
 0x55b   : > { %v11505_v61 = vrot.slane %v11503_v16, 3  ;;  %v20529_v16 = vld [vmem:[#allocation5 + $0x40] sm:$0xf]  ;;  %v11501_v47 = vsel %vm3274_vm4, %v11491_v17, %v11500_v46  ;;  %v10496_v21 = vshll.u32 %v20524_v14, 16  ;;  %v11523_v38 = vrot.slane %v11521_v12, 3 }
 0x55c   : > { %v11526_v24 = vrot.slane %v11524_v18, 4  ;;  %v14874_v31 = vcombine.low %v20505_v43, %v20529_v16 }
 0x55d   : > { %v10714_v11 = vld [vmem:[#allocation5 + $0x44] sm:$0xf]  ;;  %v11509_v50 = vor.u32 %v11508_v48, %v11505_v61 }
 0x55e   : > { %v14797_v34 = vcombine.low %v20428_v60, %v10714_v11  ;;  %v14817_v39 = vcombine.low %v10714_v11, %v20488_v10  ;;  %v10283_v60 = vrot.slane %v10281_v19, 3  ;;  %v20526_v42 = vld [vmem:[#allocation5 + $0x44] sm:$0xf]  ;;  %v11514_v19 = vrot.slane %v11512_v53, 3  ;;  %v20537_v11 = vld [vmem:[#allocation5 + $0x4c] sm:$0xf] }
 0x55f   : > { %v14855_v22 = vcombine.low %v20529_v16, %v20526_v42  ;;  %v11510_v33 = vsel %vm3274_vm4, %v11500_v46, %v11509_v50  ;;  %v17275_v61 = vld [vmem:[%s21403_s5 + $0x40] sm:$0xff]   ;;  %v11527_v46 = vor.u32 %v11526_v24, %v11523_v38 }
 0x560   : > { %16340 = vmatmul.mubr.msk.bf16.gmra.mxu0 %vm9849_vm7, %v20352_v26  ;;  %16402 = vmatmul.mubr.msk.bf16.gmra.mxu1 %vm9849_vm7, %v14817_v39  ;;  %v10825_v36 = vshrl.u32 %v14797_v34, 16  ;;  %v10828_v20 = vshll.u32 %v14797_v34, 16  ;;  %v10292_v26 = vrot.slane %v10290_v9, 3  ;;  %v10287_v54 = vor.u32 %v10286_v23, %v10283_v60 }
 0x561   : > { %16343 = vmatprep.mubr.msk.bf16.mxu0 %vm9849_vm7, %v10270_v55  ;;  %16425 = vmatprep.mubr.msk.bf16.mxu1 %vm9849_vm7, %v11492_v2  ;;  %v10279_v2 = vsel %vm3274_vm4, %v10269_v27, %v10278_v25  ;;  %v11517_v34 = vrot.slane %v11515_v52, 4  ;;  %v14856_v27 = vcombine.low %v20535_v1, %v20537_v11  ;;  %v20555_v55 = vld [vmem:[#allocation5 + $0x50] sm:$0xf]  ;;  %v14872_v60 = vcombine.low %v20456_v13, %v20498_v41 }
 0x562   : > { %v10827_v28 = vrot.slane %v10825_v36, 3  ;;  %v10830_v3 = vrot.slane %v10828_v20, 4  ;;  %v10288_v17 = vsel %vm3274_vm4, %v10278_v25, %v10287_v54  ;;  %v10296_v30 = vor.u32 %v10295_v58, %v10292_v26  ;;  %v17053_v26 = vld [vmem:[#allocation5 + $0x1c] sm:$0xff]  }
 0x563   : > { %v14873_v23 = vcombine.low %v20500_v37, %v20511_v44  ;;  %v11518_v48 = vor.u32 %v11517_v34, %v11514_v19  ;;  %v11530_v40 = vshrl.u32 %v14855_v22, 16  ;;  %v11533_v15 = vshll.u32 %v14855_v22, 16  ;;  %v17055_v34 = vld [vmem:[#allocation5 + $0x24] sm:$0xff]   ;;  %v17058_v22 = vld [vmem:[#allocation5 + $0x14] sm:$0xff]  }
 0x564   : > { %v20531_v9 = vor.u32 %v10830_v3, %v10827_v28  ;;  %v10494_v36 = vor.u32 %v10493_v6, %v10489_v35  ;;  %v10498_v20 = vrot.slane %v10496_v21, 1  ;;  %v11539_v53 = vshrl.u32 %v14856_v27, 16 }
 0x565   : > { %v11542_v25 = vshll.u32 %v14856_v27, 16  ;;  %v14857_v52 = vcombine.low %v20555_v55, %v20555_v55  ;;  %v10297_v3 = vsel %vm3274_vm4, %v10287_v54, %v10296_v30  ;;  %v11519_v12 = vsel %vm3274_vm4, %v11509_v50, %v11518_v48  ;;  %v17057_v27 = vld [vmem:[#allocation5 + $0x2c] sm:$0xff]   ;;  %v17059_v30 = vld [vmem:[#allocation5 + $0x1c] sm:$0xff]  }
 0x566   : > { %v20545_v39 = vsel %vm3274_vm4, %v20477_v59, %v20531_v9  ;;  %v17051_v59 = vld [vmem:[#allocation5 + $0x14] sm:$0xff]   ;;  %v11532_v18 = vrot.slane %v11530_v40, 3  ;;  %v11535_v58 = vrot.slane %v11533_v15, 4  ;;  %v10499_v35 = vsel %vm4189_vm5, %v10494_v36, %v10498_v20 }
 0x567   : > { %v10504_v28 = vshll.u32 %v17051_v59, 16  ;;  %v11528_v6 = vsel %vm3274_vm4, %v11518_v48, %v11527_v46  ;;  %v11541_v19 = vrot.slane %v11539_v53, 3  ;;  %v11544_v21 = vrot.slane %v11542_v25, 4  ;;  %v20580_v25 = vld [vmem:[%s21403_s5 + $0x28] sm:$0xff]  }
 0x568   : > { %16344 = vmatmul.mubr.msk.bf16.gmra.mxu0 %vm9849_vm7, %v10279_v2  ;;  %16426 = vmatmul.mubr.msk.bf16.vlgmr.msra.gmra.mxu1 %vm9849_vm7, %v11501_v47  ;;  %v10512_v47 = vshll.u32 %v17053_v26, 16  ;;  %v11548_v54 = vshrl.u32 %v14857_v52, 16  ;;  %v11551_v2 = vshll.u32 %v14857_v52, 16  ;;  %v10508_v38 = vshrl.u32 %v17051_v59, 16 }
 0x569   : > { %16347 = vmatprep.mubr.msk.bf16.mxu0 %vm9849_vm7, %v10288_v17  ;;  %16429 = vmatprep.mubr.msk.bf16.mxu1 %vm9849_vm7, %v11510_v33  ;;  %v10506_v50 = vrot.slane %v10504_v28, 1  ;;  %v10500_v17 = vshrl.u32 %v20524_v14, 16  ;;  %v11536_v33 = vor.u32 %v11535_v58, %v11532_v18  ;;  %v11545_v48 = vor.u32 %v11544_v21, %v11541_v19 }
 0x56a   : > { %16460 = vmatpush3.bf16.msra.mxu1 %v17275_v61  ;;  %v10514_v24 = vrot.slane %v10512_v47, 1  ;;  %v11550_v40 = vrot.slane %v11548_v54, 3  ;;  %v11553_v15 = vrot.slane %v11551_v2, 4  ;;  %v11919_v53 = vshll.u32 %v17058_v22, 16 }
 0x56b   : > { %v10502_v61 = vor.u32 %v10500_v17, %v10498_v20  ;;  %v10510_v36 = vor.u32 %v10508_v38, %v10506_v50  ;;  %v11537_v14 = vsel %vm3274_vm4, %v11527_v46, %v11536_v33  ;;  %v10528_v20 = vshll.u32 %v17057_v27, 16  ;;  %v17061_v46 = vld [vmem:[#allocation5 + $0x34] sm:$0xff]  }
 0x56c   : > { %v11924_v28 = vshll.u32 %v17059_v30, 16  ;;  %v11554_v18 = vor.u32 %v11553_v15, %v11550_v40  ;;  %v10516_v47 = vshrl.u32 %v17053_v26, 16  ;;  %v10524_v19 = vshrl.u32 %v17055_v34, 16 }
 0x56d   : > { %v10507_v52 = vsel %vm4189_vm5, %v10502_v61, %v10506_v50  ;;  %v10515_v59 = vsel %vm4189_vm5, %v10510_v36, %v10514_v24  ;;  %v10530_v21 = vrot.slane %v10528_v20, 1  ;;  %v11917_v54 = vshrl.u32 %v17058_v22, 16  ;;  %v17063_v50 = vld [vmem:[#allocation5 + $0x3c] sm:$0xff]  }
 0x56e   : > { %v11926_v2 = vrot.slane %v11924_v28, 1  ;;  %v10518_v17 = vor.u32 %v10516_v47, %v10514_v24  ;;  %v11555_v38 = vsel %vm3274_vm4, %v11545_v48, %v11554_v18  ;;  %v10536_v40 = vshll.u32 %v17061_v46, 16 }
 0x56f   : > { %v10544_v22 = vshll.u32 %v17063_v50, 16  ;;  %v10540_v20 = vshrl.u32 %v17061_v46, 16  ;;  %v14876_v32 = vcombine.low %v20537_v11, %v20555_v55 }
 0x570   : > { %16348 = vmatmul.mubr.msk.bf16.gmra.mxu0 %vm9849_vm7, %v10297_v3  ;;  %16430 = vmatmul.mubr.msk.bf16.gmra.mxu1 %vm9849_vm7, %v11519_v12  ;;  %v10520_v3 = vshll.u32 %v17055_v34, 16  ;;  %v11546_v12 = vsel %vm3274_vm4, %v11536_v33, %v11545_v48  ;;  %v10538_v24 = vrot.slane %v10536_v40, 1 }
 0x571   : > { %16353 = vmatprep.mubr.msk.bf16.mxu0 %vm9849_vm7, %v10499_v35  ;;  %16433 = vmatprep.mubr.msk.bf16.mxu1 %vm9849_vm7, %v11528_v6  ;;  %v11921_v35 = vrot.slane %v11919_v53, 1  ;;  %v17062_v6 = vld [vmem:[#allocation5 + $0x24] sm:$0xff]   ;;  %v17066_v53 = vld [vmem:[#allocation5 + $0x34] sm:$0xff]   ;;  %v10546_v28 = vrot.slane %v10544_v22, 1 }
 0x572   : > { %v10522_v58 = vrot.slane %v10520_v3, 1  ;;  %v11932_v15 = vshll.u32 %v17062_v6, 16 }
 0x573   : > { %v11922_v61 = vor.u32 %v11921_v35, %v11917_v54 }
 0x574   : > { %v10526_v33 = vor.u32 %v10524_v19, %v10522_v58  ;;  %v10523_v36 = vsel %vm4189_vm5, %v10518_v17, %v10522_v58  ;;  %v11934_v48 = vrot.slane %v11932_v15, 1  ;;  %v17067_v58 = vld [vmem:[#allocation5 + $0x3c] sm:$0xff]   ;;  %v10542_v19 = vor.u32 %v10540_v20, %v10538_v24 }
 0x575   : > { %v11927_v34 = vsel %vm4189_vm5, %v11922_v61, %v11926_v2  ;;  %v11948_v17 = vshll.u32 %v17066_v53, 16  ;;  %v11956_v46 = vshll.u32 %v17067_v58, 16  ;;  %v11960_v20 = vshrl.u32 %v17067_v58, 16 }
 0x576   : > { %v10531_v26 = vsel %vm4189_vm5, %v10526_v33, %v10530_v21 }
 0x578   : > { %16354 = vmatmul.mubr.msk.bf16.vlgmr.msra.gmra.mxu0 %vm9849_vm7, %v10507_v52  ;;  %16434 = vmatmul.mubr.msk.bf16.gmra.mxu1 %vm9849_vm7, %v11537_v14  ;;  %v10532_v52 = vshrl.u32 %v17057_v27, 16  ;;  %v11928_v14 = vshrl.u32 %v17059_v30, 16  ;;  %v10547_v27 = vsel %vm4189_vm5, %v10542_v19, %v10546_v28 }
 0x579   : > { %16370 = vmatpush3.bf16.msra.mxu0 %v20470_v0  ;;  %16357 = vmatprep.mubr.msk.bf16.mxu0 %vm9849_vm7, %v10515_v59  ;;  %v17064_v0 = vld [vmem:[#allocation5 + $0x2c] sm:$0xff]   ;;  %v17065_v59 = vld [vmem:[#allocation5 + $0x44] ss:$0 sps:$4 sm:$0x11]  }
 0x57a   : > { %16437 = vmatprep.mubr.msk.bf16.mxu1 %vm9849_vm7, %v11546_v12  ;;  %16405 = vmatprep.subr.bf16.mxu0 %v20580_v25  ;;  %v11940_v3 = vshll.u32 %v17064_v0, 16  ;;  %v11936_v12 = vshrl.u32 %v17062_v6, 16  ;;  %v10534_v35 = vor.u32 %v10532_v52, %v10530_v21  ;;  %v11930_v47 = vor.u32 %v11928_v14, %v11926_v2  ;;  %v17069_v6 = vld [vmem:[#allocation5 + $0x44] sm:$0xff]  }
 0x57b   : > { %v10552_v61 = vshll.u32 %v17065_v59, 16  ;;  %v11950_v21 = vrot.slane %v11948_v17, 1  ;;  %v10548_v2 = vshrl.u32 %v17063_v50, 16  ;;  %v11944_v40 = vshrl.u32 %v17064_v0, 16 }
 0x57c   : > { %v11942_v18 = vrot.slane %v11940_v3, 1  ;;  %v11938_v54 = vor.u32 %v11936_v12, %v11934_v48  ;;  %v11935_v33 = vsel %vm4189_vm5, %v11930_v47, %v11934_v48  ;;  %v11964_v3 = vshll.u32 %v17069_v6, 16 }
 0x57d   : > { %v10554_v15 = vrot.slane %v10552_v61, 1  ;;  %v14798_v61 = vcombine.low %v20488_v10, %v20488_v10  ;;  %v17074_v10 = vld [vmem:[#allocation5 + $0x1c] sm:$0xff]  }
 0x57e   : > { %v11943_v30 = vsel %vm4189_vm5, %v11938_v54, %v11942_v18  ;;  %v11946_v22 = vor.u32 %v11944_v40, %v11942_v18  ;;  %v11966_v50 = vrot.slane %v11964_v3, 1  ;;  %v17073_v54 = vld [vmem:[%s21403_s5 + $0x38] sm:$0xff]  }
 0x580   : > { %16358 = vmatmul.mubr.msk.bf16.gmra.mxu0 %vm9849_vm7, %v10523_v36  ;;  %16438 = vmatmul.mubr.msk.bf16.gmra.mxu1 %vm9849_vm7, %v11555_v38  ;;  %v10539_v38 = vsel %vm4189_vm5, %v10534_v35, %v10538_v24  ;;  %v11952_v36 = vshrl.u32 %v17066_v53, 16  ;;  %v17070_v24 = vld [vmem:[#allocation5 + $0x4c] sm:$0xff]   ;;  %v11951_v14 = vsel %vm4189_vm5, %v11946_v22, %v11950_v21  ;;  %v17088_v53 = vld [vmem:[#allocation5 + $0x54] ss:$0 sps:$4 sm:$0x11]  }
 0x581   : > { %16361 = vmatprep.mubr.msk.bf16.mxu0 %vm9849_vm7, %v10531_v26  ;;  %16461 = vmatprep.mubr.msk.bf16.mxu1 %vm9849_vm7, %v11927_v34  ;;  %v11958_v26 = vrot.slane %v11956_v46, 1  ;;  %v10550_v34 = vor.u32 %v10548_v2, %v10546_v28  ;;  %v11972_v0 = vshll.u32 %v17070_v24, 16  ;;  %v11968_v28 = vshrl.u32 %v17069_v6, 16 }
 0x582   : > { %v11954_v48 = vor.u32 %v11952_v36, %v11950_v21  ;;  %v11976_v12 = vshrl.u32 %v17070_v24, 16  ;;  %v11980_v19 = vshll.u32 %v17088_v53, 16 }
 0x583   : > { %v10555_v52 = vsel %vm4189_vm5, %v10550_v34, %v10554_v15  ;;  %v11962_v18 = vor.u32 %v11960_v20, %v11958_v26  ;;  %v11970_v35 = vor.u32 %v11968_v28, %v11966_v50  ;;  %v11974_v47 = vrot.slane %v11972_v0, 1 }
 0x584   : > { %v11959_v59 = vsel %vm4189_vm5, %v11954_v48, %v11958_v26  ;;  %v11218_v26 = vshll.u32 %v17074_v10, 16  ;;  %v11222_v48 = vshrl.u32 %v17074_v10, 16 }
 0x585   : > { %v11967_v17 = vsel %vm4189_vm5, %v11962_v18, %v11966_v50  ;;  %v11978_v58 = vor.u32 %v11976_v12, %v11974_v47  ;;  %v17078_v12 = vld [vmem:[#allocation5 + $0x3c] sm:$0xff]  }
 0x586   : > { %v11220_v3 = vrot.slane %v11218_v26, 1 }
 0x588   : > { %16362 = vmatmul.mubr.msk.bf16.gmra.mxu0 %vm9849_vm7, %v10539_v38  ;;  %16462 = vmatmul.mubr.msk.bf16.vlgmr.msra.gmra.mxu1 %vm9849_vm7, %v11935_v33  ;;  %v11982_v38 = vrot.slane %v11980_v19, 1  ;;  %v11224_v50 = vor.u32 %v11222_v48, %v11220_v3  ;;  %v17079_v19 = vld [vmem:[#allocation5 + $0x44] sm:$0xff]  }
 0x589   : > { %16365 = vmatprep.mubr.msk.bf16.mxu0 %vm9849_vm7, %v10547_v27  ;;  %16465 = vmatprep.mubr.msk.bf16.mxu1 %vm9849_vm7, %v11943_v30  ;;  %v17072_v27 = vld [vmem:[#allocation5 + $0x14] sm:$0xff]   ;;  %v11262_v10 = vshrl.u32 %v17079_v19, 16 }
 0x58a   : > { %v11983_v33 = vsel %vm4189_vm5, %v11978_v58, %v11982_v38  ;;  %v11210_v21 = vshll.u32 %v17072_v27, 16  ;;  %v11214_v24 = vshrl.u32 %v17072_v27, 16  ;;  %v11250_v58 = vshll.u32 %v17078_v12, 16 }
 0x58c   : > { %v11212_v15 = vrot.slane %v11210_v21, 1 }
 0x590   : > { %16366 = vmatmul.mubr.msk.bf16.gmra.mxu0 %vm9849_vm7, %v10555_v52  ;;  %16466 = vmatmul.mubr.msk.bf16.gmra.mxu1 %vm9849_vm7, %v11951_v14  ;;  %v17077_v14 = vld [vmem:[#allocation5 + $0x34] sm:$0xff]  }
 0x591   : > { %16371 = vmatprep.mubr.msk.bf16.mxu0 %vm9849_vm7, %v20440_v51  ;;  %16469 = vmatprep.mubr.msk.bf16.mxu1 %vm9849_vm7, %v11959_v59  ;;  %v11975_v51 = vsel %vm4189_vm5, %v11970_v35, %v11974_v47  ;;  %v11216_v59 = vor.u32 %v11214_v24, %v11212_v15  ;;  %v11242_v20 = vshll.u32 %v17077_v14, 16 }
 0x593   : > { %v11221_v53 = vsel %vm4189_vm5, %v11216_v59, %v11220_v3  ;;  %v11244_v47 = vrot.slane %v11242_v20, 1 }
 0x598   : > { %16372 = vmatmul.mubr.msk.bf16.vlgmr.msra.gmra.mxu0 %vm9849_vm7, %v20443_v29  ;;  %16470 = vmatmul.mubr.msk.bf16.gmra.mxu1 %vm9849_vm7, %v11967_v17  ;;  %v17071_v29 = vld [vmem:[#allocation5 + $0xc] sm:$0xff]  }
 0x599   : > { %16406 = vmatpush3.bf16.msra.mxu0 %v20580_v25  ;;  %16375 = vmatprep.mubr.msk.bf16.mxu0 %vm9849_vm7, %v20446_v5  ;;  %v10834_v5 = vshrl.u32 %v14798_v61, 16  ;;  %v10837_v25 = vshll.u32 %v14798_v61, 16  ;;  %v11205_v30 = vshll.u32 %v17071_v29, 16  ;;  %v11203_v40 = vshrl.u32 %v17071_v29, 16 }
 0x59a   : > { %16473 = vmatprep.mubr.msk.bf16.mxu1 %vm9849_vm7, %v11975_v51  ;;  %16441 = vmatprep.subr.bf16.mxu0 %v17073_v54  ;;  %v11258_v61 = vshll.u32 %v17079_v19, 16  ;;  %v11246_v29 = vshrl.u32 %v17077_v14, 16 }
 0x59b   : > { %v10836_v46 = vrot.slane %v10834_v5, 3  ;;  %v10839_v6 = vrot.slane %v10837_v25, 4  ;;  %v17080_v5 = vld [vmem:[#allocation5 + $0x4c] ss:$0 sps:$4 sm:$0x11]   ;;  %v11254_v25 = vshrl.u32 %v17078_v12, 16 }
 0x59c   : > { %v11260_v27 = vrot.slane %v11258_v61, 1  ;;  %v11266_v21 = vshll.u32 %v17080_v5, 16 }
 0x59d   : > { %v10840_v2 = vor.u32 %v10839_v6, %v10836_v46 }
 0x59f   : > { %v10841_v34 = vsel %vm3274_vm4, %v20531_v9, %v10840_v2  ;;  %v11264_v2 = vor.u32 %v11262_v10, %v11260_v27 }
 0x5a0   : > { %16376 = vmatmul.mubr.msk.bf16.gmra.mxu0 %vm9849_vm7, %v20473_v7  ;;  %16474 = vmatmul.mubr.msk.bf16.gmra.mxu1 %vm9849_vm7, %v11983_v33  ;;  %v11207_v7 = vrot.slane %v11205_v30, 1  ;;  %v11248_v30 = vor.u32 %v11246_v29, %v11244_v47 }
 0x5a1   : > { %16379 = vmatprep.mubr.msk.bf16.mxu0 %vm9849_vm7, %v20492_v8  ;;  %v17075_v8 = vld [vmem:[#allocation5 + $0x24] sm:$0xff]  }
 0x5a2   : > { %v11208_v36 = vor.u32 %v11207_v7, %v11203_v40  ;;  %v11230_v18 = vshrl.u32 %v17075_v8, 16  ;;  %v11268_v40 = vrot.slane %v11266_v21, 1 }
 0x5a4   : > { %v11213_v22 = vsel %vm4189_vm5, %v11208_v36, %v11212_v15  ;;  %v11269_v15 = vsel %vm4189_vm5, %v11264_v2, %v11268_v40  ;;  %v14871_v36 = vcombine.low %v20453_v45, %v20462_v4 }
 0x5a8   : > { %16380 = vmatmul.mubr.msk.bf16.gmra.mxu0 %vm9849_vm7, %v20496_v49  ;;  %v11226_v49 = vshll.u32 %v17075_v8, 16  ;;  %v14869_v8 = vcombine.low %v20423_v56, %v20430_v57  ;;  %v14875_v57 = vcombine.low %v20526_v42, %v20535_v1 }
 0x5a9   : > { %16383 = vmatprep.mubr.msk.bf16.mxu0 %vm9849_vm7, %v20545_v39  ;;  %v17076_v39 = vld [vmem:[#allocation5 + $0x2c] sm:$0xff]  }
 0x5aa   : > { %v11228_v52 = vrot.slane %v11226_v49, 1  ;;  %v11234_v0 = vshll.u32 %v17076_v39, 16  ;;  %v11238_v35 = vshrl.u32 %v17076_v39, 16 }
 0x5ac   : > { %v11229_v9 = vsel %vm4189_vm5, %v11224_v50, %v11228_v52  ;;  %v11236_v28 = vrot.slane %v11234_v0, 1  ;;  %v11232_v17 = vor.u32 %v11230_v18, %v11228_v52 }
 0x5ae   : > { %v11240_v51 = vor.u32 %v11238_v35, %v11236_v28  ;;  %v11237_v38 = vsel %vm4189_vm5, %v11232_v17, %v11236_v28 }
 0x5b0   : > { %16384 = vmatmul.mubr.msk.bf16.gmra.mxu0 %vm9849_vm7, %v10841_v34  ;;  %v11245_v33 = vsel %vm4189_vm5, %v11240_v51, %v11244_v47  ;;  %v16319_v56 = vpop.f32.mrf.mxu0 }
 0x5b1   : > { %16407 = vmatprep.mubr.msk.bf16.mxu0 %vm9849_vm7, %v11213_v22 }
 0x5b2   : > { %v10144_v63 = vpop.f32.mrf.mxu0 }
 0x5b8   : > { %16408 = vmatmul.mubr.msk.bf16.vlgmr.msra.gmra.mxu0 %vm9849_vm7, %v11221_v53 }
 0x5b9   : > { %16442 = vmatpush3.bf16.msra.mxu0 %v17073_v54  ;;  %16411 = vmatprep.mubr.msk.bf16.mxu0 %vm9849_vm7, %v11229_v9  ;;  %v11252_v54 = vrot.slane %v11250_v58, 1 }
 0x5bb   : > { %v11256_v46 = vor.u32 %v11254_v25, %v11252_v54  ;;  %v11253_v6 = vsel %vm4189_vm5, %v11248_v30, %v11252_v54 }
 0x5bd   : > { %v11261_v7 = vsel %vm4189_vm5, %v11256_v46, %v11260_v27 }
 0x5c0   : > { %16412 = vmatmul.mubr.msk.bf16.gmra.mxu0 %vm9849_vm7, %v11237_v38  ;;  %v20695_v43 = vpop.f32.mrf.mxu1 }
 0x5c1   : > { %16415 = vmatprep.mubr.msk.bf16.mxu0 %vm9849_vm7, %v11245_v33 }
 0x5c2   : > { %v20697_v42 = vpop.f32.mrf.mxu1 }
 0x5c4   : > { %v20701_v1 = vpop.f32.mrf.mxu1 }
 0x5c6   : > { %v20703_v55 = vpop.f32.mrf.mxu1 }
 0x5c8   : > { %16416 = vmatmul.mubr.msk.bf16.gmra.mxu0 %vm9849_vm7, %v11253_v6 }
 0x5c9   : > { %16419 = vmatprep.mubr.msk.bf16.mxu0 %vm9849_vm7, %v11261_v7 }
 0x5d0   : > { %16420 = vmatmul.mubr.msk.bf16.gmra.mxu0 %vm9849_vm7, %v11269_v15  ;;  %v17089_v15 = vld [vmem:[%s21405_s7 + $0x18] sm:$0xff]  }
 0x5d1   : > { %16443 = vmatprep.mubr.msk.bf16.mxu0 %vm9849_vm7, %v14869_v8  ;;  %16477 = vmatprep.subr.bf16.mxu0 %v17089_v15 }
 0x5d8   : > { %16444 = vmatmul.mubr.msk.bf16.vlgmr.msra.gmra.mxu0 %vm9849_vm7, %v14870_v62  ;;  %v16320_v62 = vpop.f32.mrf.mxu0 }
 0x5d9   : > { %16447 = vmatprep.mubr.msk.bf16.mxu0 %vm9849_vm7, %v14871_v36  ;;  %16478 = vmatpush3.bf16.msra.mxu0 %v17089_v15 }
 0x5da   : > { %v20687_v45 = vpop.f32.mrf.mxu0 }
 0x5dc   : > { %v16323_v13 = vpop.f32.mrf.mxu0 }
 0x5de   : > { %v20689_v4 = vpop.f32.mrf.mxu0 }
 0x5e0   : > { %16448 = vmatmul.mubr.msk.bf16.gmra.mxu0 %vm9849_vm7, %v14872_v60  ;;  %v20691_v41 = vpop.f32.mrf.mxu0 }
 0x5e1   : > { %16451 = vmatprep.mubr.msk.bf16.mxu0 %vm9849_vm7, %v14873_v23  ;;  %v20707_v23 = vpop.f32.mrf.mxu1 }
 0x5e2   : > { %v20693_v37 = vpop.f32.mrf.mxu0 }
 0x5e3   : > { %v20711_v34 = vpop.f32.mrf.mxu1 }
 0x5e5   : > { %v20715_v3 = vpop.f32.mrf.mxu1 }
 0x5e7   : > { %v20717_v48 = vpop.f32.mrf.mxu1 }
 0x5e8   : > { %16452 = vmatmul.mubr.msk.bf16.gmra.mxu0 %vm9849_vm7, %v14874_v31 }
 0x5e9   : > { %16455 = vmatprep.mubr.msk.bf16.mxu0 %vm9849_vm7, %v14875_v57 }
 0x5f0   : > { %16456 = vmatmul.mubr.msk.bf16.gmra.mxu0 %vm9849_vm7, %v14876_v32  ;;  %v16327_v44 = vpop.f32.mrf.mxu0 }
 0x5f2   : > { %v20699_v16 = vpop.f32.mrf.mxu0 }
 0x5f4   : > { %v16328_v11 = vpop.f32.mrf.mxu0 }
 0x5f6   : > { %v20705_v60 = vpop.f32.mrf.mxu0 }
 0x600   : > { %v20719_v14 = vpop.f32.mrf.mxu1 }
 0x602   : > { %v20723_v0 = vpop.f32.mrf.mxu1 }
 0x603   : > { %21691 = vst [vmem:[#allocation76_spill] sm:$0xff] %v20723_v0 }
 0x604   : > { %v20725_v20 = vpop.f32.mrf.mxu1 }
 0x605   : > { %21692 = vst [vmem:[#allocation99_spill] sm:$0xff] %v20725_v20 }
 0x606   : > { %v20729_v35 = vpop.f32.mrf.mxu1 }
 0x607   : > { %21693 = vst [vmem:[#allocation55_spill] sm:$0xff] %v20729_v35 }
 0x610   : > { %v16331_v31 = vpop.f32.mrf.mxu0 }
 0x612   : > { %v20709_v26 = vpop.f32.mrf.mxu0 }
 0x614   : > { %v16332_v22 = vpop.f32.mrf.mxu0 }
 0x616   : > { %v20713_v49 = vpop.f32.mrf.mxu0 }
 0x618   : > { %v16337_v39 = vpop.f32.mrf.mxu0 }
 0x619   : > { %v10371_v30 = vadd.f32 %v16337_v39, %v16319_v56 }
 0x61a   : > { %v10362_v24 = vpop.f32.mrf.mxu0 }
 0x61b   : > { %v10363_v21 = vadd.f32 %v10362_v24, %v10144_v63 }
 0x61c   : > { %v16338_v52 = vpop.f32.mrf.mxu0 }
 0x61d   : > { %v10374_v2 = vadd.f32 %v16338_v52, %v16320_v62 }
 0x61e   : > { %v20721_v59 = vpop.f32.mrf.mxu0 }
 0x620   : > { %v16341_v50 = vpop.f32.mrf.mxu0  ;;  %v20731_v19 = vpop.f32.mrf.mxu1 }
 0x621   : > { %21694 = vst [vmem:[#allocation78_spill] sm:$0xff] %v20731_v19  ;;  %v10387_v63 = vadd.f32 %v16341_v50, %v16323_v13  ;;  %v17090_v13 = vld [vmem:[%s21405_s7 + $0x10] sm:$0xff]  }
 0x622   : > { %v10378_v53 = vpop.f32.mrf.mxu0  ;;  %v20737_v38 = vpop.f32.mrf.mxu1  ;;  %16479 = vmatprep.subr.bf16.mxu0 %v17090_v13 }
 0x623   : > { %21695 = vst [vmem:[#allocation100_spill] sm:$0xff] %v20737_v38  ;;  %v10379_v62 = vadd.f32 %v10378_v53, %v20689_v4  ;;  %16480 = vmatpush3.bf16.msra.mxu0 %v17090_v13 }
 0x624   : > { %v16342_v9 = vpop.f32.mrf.mxu0  ;;  %v20743_v29 = vpop.f32.mrf.mxu1 }
 0x625   : > { %21696 = vst [vmem:[#allocation56_spill] sm:$0xff] %v20743_v29 }
 0x626   : > { %v20727_v28 = vpop.f32.mrf.mxu0  ;;  %v20749_v46 = vpop.f32.mrf.mxu1 }
 0x627   : > { %21697 = vst [vmem:[#allocation80_spill] sm:$0xff] %v20749_v46 }
 0x628   : > { %v16345_v12 = vpop.f32.mrf.mxu0  ;;  %v20758_v8 = vpop.f32.mrf.mxu1 }
 0x629   : > { %v10403_v18 = vadd.f32 %v16345_v12, %v16327_v44 }
 0x62a   : > { %v10394_v47 = vpop.f32.mrf.mxu0  ;;  %v20764_v32 = vpop.f32.mrf.mxu1 }
 0x62b   : > { %v10395_v53 = vadd.f32 %v10394_v47, %v20699_v16  ;;  %v17103_v47 = vld [vmem:[%s21405_s7 + $0x20] sm:$0xff]  }
 0x62c   : > { %v16346_v17 = vpop.f32.mrf.mxu0  ;;  %v20772_v24 = vpop.f32.mrf.mxu1 }
 0x62d   : > { %v20733_v51 = vadd.f32 %v16346_v17, %v16328_v11 }
 0x62e   : > { %v20735_v58 = vpop.f32.mrf.mxu0  ;;  %v20781_v50 = vpop.f32.mrf.mxu1 }
 0x630   : > { %v16349_v33 = vpop.f32.mrf.mxu0 }
 0x631   : > { %v20739_v61 = vadd.f32 %v16349_v33, %v16331_v31 }
 0x632   : > { %v20741_v54 = vpop.f32.mrf.mxu0 }
 0x633   : > { %v10411_v15 = vadd.f32 %v20741_v54, %v20709_v26 }
 0x634   : > { %v16350_v5 = vpop.f32.mrf.mxu0 }
 0x635   : > { %v20745_v25 = vadd.f32 %v16350_v5, %v16332_v22  ;;  %v10390_v22 = vadd.f32 %v16342_v9, %v20691_v41  ;;  %v17091_v5 = vld [vmem:[%s21405_s7 + $0x28] sm:$0xff]  }
 0x636   : > { %v20747_v27 = vpop.f32.mrf.mxu0  ;;  %16501 = vmatprep.subr.bf16.mxu1 %v17091_v5 }
 0x637   : > { %16502 = vmatpush3.bf16.msra.mxu1 %v17091_v5  ;;  %v10414_v26 = vadd.f32 %v20747_v27, %v20713_v49  ;;  %v20865_v5 = vld [vmem:[%s21405_s7 + $0x48] sm:$0xff]  }
 0x638   : > { %v16355_v6 = vpop.f32.mrf.mxu0  ;;  %16503 = vmatprep.subr.bf16.mxu1 %v17103_v47  ;;  %21709 = vst [vmem:[#allocation35_spill] sm:$0xff] %v20865_v5 }
 0x639   : > { %v20751_v7 = vadd.f32 %v16355_v6, %v10371_v30  ;;  %v20791_v30 = vpop.f32.mrf.mxu1 }
 0x63a   : > { %v10620_v10 = vpop.f32.mrf.mxu0 }
 0x63b   : > { %v20753_v40 = vadd.f32 %v10620_v10, %v10363_v21  ;;  %v21698_v21 = vmov 0   ;;  %16504 = vmatpush3.bf16.msra.mxu1 %v17103_v47 }
 0x63c   : > { %v16356_v36 = vpop.f32.mrf.mxu0  ;;  %628 = vst.msk [vmem:[#allocation7] sm:$0xf] %vm627_vm8, %v21698_v21  ;;  %629 = vst.msk [vmem:[#allocation7 + $0x4] sm:$0xf] %vm627_vm8, %v21698_v21  ;;  %16525 = vmatprep.subr.bf16.mxu1 %v20865_v5 }
 0x63d   : > { %v20760_v57 = vadd.f32 %v16356_v36, %v10374_v2  ;;  %630 = vst.msk [vmem:[#allocation7 + $0x8] sm:$0xf] %vm627_vm8, %v21698_v21  ;;  %631 = vst.msk [vmem:[#allocation7 + $0xc] sm:$0xf] %vm627_vm8, %v21698_v21  ;;  %v20835_v2 = vpop.f32.mrf.mxu1 }
 0x63e   : > { %v20762_v56 = vpop.f32.mrf.mxu0  ;;  %632 = vst.msk [vmem:[#allocation7 + $0x10] sm:$0xf] %vm627_vm8, %v21698_v21  ;;  %633 = vst.msk [vmem:[#allocation7 + $0x14] sm:$0xf] %vm627_vm8, %v21698_v21 }
 0x63f   : > { %634 = vst.msk [vmem:[#allocation7 + $0x18] sm:$0xf] %vm627_vm8, %v21698_v21  ;;  %635 = vst.msk [vmem:[#allocation7 + $0x1c] sm:$0xf] %vm627_vm8, %v21698_v21 }
 0x640   : > { %v16359_v44 = vpop.f32.mrf.mxu0  ;;  %636 = vst.msk [vmem:[#allocation7 + $0x20] sm:$0xf] %vm627_vm8, %v21698_v21  ;;  %637 = vst.msk [vmem:[#allocation7 + $0x24] sm:$0xf] %vm627_vm8, %v21698_v21 }
 0x641   : > { %v20767_v11 = vadd.f32 %v16359_v44, %v10387_v63  ;;  %638 = vst.msk [vmem:[#allocation7 + $0x28] sm:$0xf] %vm627_vm8, %v21698_v21  ;;  %639 = vst.msk [vmem:[#allocation7 + $0x2c] sm:$0xf] %vm627_vm8, %v21698_v21 }
 0x642   : > { %v10636_v31 = vpop.f32.mrf.mxu0  ;;  %640 = vst.msk [vmem:[#allocation7 + $0x30] sm:$0xf] %vm627_vm8, %v21698_v21  ;;  %641 = vst.msk [vmem:[#allocation7 + $0x34] sm:$0xf] %vm627_vm8, %v21698_v21 }
 0x643   : > { %v20770_v39 = vadd.f32 %v10636_v31, %v10379_v62  ;;  %21700 = vst [vmem:[#allocation58_spill] sm:$0xff] %v20835_v2  ;;  %v20844_v62 = vld [vmem:[#allocation7 + $0x4] sm:$0xf] }
 0x644   : > { %v16360_v52 = vpop.f32.mrf.mxu0  ;;  %21703 = vst [vmem:[#allocation59_spill] sm:$0xff] %v20844_v62  ;;  %v20846_v31 = vld [vmem:[#allocation7 + $0x8] sm:$0xf] }
 0x645   : > { %v20774_v12 = vadd.f32 %v16360_v52, %v10390_v22  ;;  %21704 = vst [vmem:[#allocation60_spill] sm:$0xff] %v20846_v31  ;;  %v20848_v22 = vpop.f32.mrf.mxu1  ;;  %v14911_v13 = vcombine.low %v20844_v62, %v20846_v31 }
 0x646   : > { %v20776_v17 = vpop.f32.mrf.mxu0  ;;  %21705 = vst [vmem:[#allocation31_spill] sm:$0xff] %v20848_v22 }
 0x647   : > { %16481 = vmatprep.mubr.msk.bf16.mxu0 %vm1115_vm0, %v14911_v13 }
 0x648   : > { %v16363_v4 = vpop.f32.mrf.mxu0 }
 0x649   : > { %v20784_v41 = vadd.f32 %v16363_v4, %v10403_v18  ;;  %v20827_v18 = vld [vmem:[%s21405_s7 + $0x8] sm:$0xff]  }
 0x64a   : > { %v10652_v9 = vpop.f32.mrf.mxu0  ;;  %21699 = vst [vmem:[#allocation101_spill] sm:$0xff] %v20827_v18  ;;  %16489 = vmatprep.subr.bf16.mxu0 %v20827_v18 }
 0x64b   : > { %v20786_v33 = vadd.f32 %v10652_v9, %v10395_v53  ;;  %v20860_v53 = vpop.f32.mrf.mxu1 }
 0x64c   : > { %v16364_v6 = vpop.f32.mrf.mxu0  ;;  %21708 = vst [vmem:[#allocation61_spill] sm:$0xff] %v20860_v53 }
 0x64d   : > { %v20822_v16 = vadd.f32 %v16364_v6, %v20733_v51  ;;  %v20868_v49 = vpop.f32.mrf.mxu1 }
 0x64e   : > { %v20832_v10 = vpop.f32.mrf.mxu0  ;;  %21710 = vst [vmem:[#allocation37_spill] sm:$0xff] %v20868_v49 }
 0x64f   : > { %v20870_v21 = vpop.f32.mrf.mxu1 }
 0x650   : > { %v16367_v51 = vpop.f32.mrf.mxu0  ;;  %21711 = vst [vmem:[#allocation45_spill] sm:$0xff] %v20870_v21 }
 0x651   : > { %v20840_v36 = vadd.f32 %v16367_v51, %v20739_v61 }
 0x652   : > { %v10668_v63 = vpop.f32.mrf.mxu0 }
 0x653   : > { %21701 = vst [vmem:[#allocation82_spill] sm:$0xff] %v20840_v36  ;;  %v20842_v44 = vadd.f32 %v10668_v63, %v10411_v15  ;;  %v20872_v15 = vpop.f32.mrf.mxu1 }
 0x654   : > { %v16368_v52 = vpop.f32.mrf.mxu0  ;;  %21712 = vst [vmem:[#allocation26_spill] sm:$0xff] %v20872_v15 }
 0x655   : > { %21702 = vst [vmem:[#allocation102_spill] sm:$0xff] %v20842_v44  ;;  %v20855_v61 = vadd.f32 %v16368_v52, %v20745_v25  ;;  %v20876_v13 = vpop.f32.mrf.mxu1 }
 0x656   : > { %v10671_v54 = vpop.f32.mrf.mxu0  ;;  %21713 = vst [vmem:[#allocation39_spill] sm:$0xff] %v20876_v13 }
 0x657   : > { %21706 = vst [vmem:[#allocation33_spill] sm:$0xff] %v20855_v61  ;;  %v20858_v4 = vadd.f32 %v10671_v54, %v10414_v26  ;;  %v20880_v18 = vpop.f32.mrf.mxu1 }
 0x658   : > { %v16373_v9 = vpop.f32.mrf.mxu0  ;;  %21714 = vst [vmem:[#allocation42_spill] sm:$0xff] %v20880_v18 }
 0x659   : > { %21707 = vst [vmem:[#allocation20_spill] sm:$0xff] %v20858_v4  ;;  %v20886_v62 = vpop.f32.mrf.mxu1 }
 0x65a   : > { %v10906_v6 = vpop.f32.mrf.mxu0  ;;  %21716 = vst [vmem:[#allocation64_spill] sm:$0xff] %v20886_v62 }
 0x65b   : > { %v20892_v15 = vpop.f32.mrf.mxu1  ;;  %v10969_v2 = vadd.f32 %v10906_v6, %v20753_v40 }
 0x65c   : > { %v16374_v25 = vpop.f32.mrf.mxu0  ;;  %21719 = vst [vmem:[#allocation68_spill] sm:$0xff] %v20892_v15 }
 0x65d   : > { %v20898_v4 = vpop.f32.mrf.mxu1 }
 0x65e   : > { %v10909_v27 = vpop.f32.mrf.mxu0  ;;  %21722 = vst [vmem:[#allocation48_spill] sm:$0xff] %v20898_v4 }
 0x65f   : > { %v16463_v61 = vpop.f32.mrf.mxu1 }
 0x660   : > { %v16377_v47 = vpop.f32.mrf.mxu0 }
 0x661   : > { %v12048_v35 = vpop.f32.mrf.mxu1 }
 0x662   : > { %v10922_v51 = vpop.f32.mrf.mxu0 }
 0x663   : > { %v20900_v53 = vpop.f32.mrf.mxu1 }
 0x664   : > { %v16378_v63 = vpop.f32.mrf.mxu0 }
 0x665   : > { %v20904_v15 = vpop.f32.mrf.mxu1 }
 0x666   : > { %v20874_v52 = vpop.f32.mrf.mxu0  ;;  %21724 = vst [vmem:[#allocation49_spill] sm:$0xff] %v20904_v15 }
 0x667   : > { %v20910_v4 = vpop.f32.mrf.mxu1 }
 0x668   : > { %v16381_v26 = vpop.f32.mrf.mxu0  ;;  %21727 = vst [vmem:[#allocation57_spill] sm:$0xff] %v20910_v4 }
 0x669   : > { %v20920_v0 = vpop.f32.mrf.mxu1 }
 0x66a   : > { %v20878_v54 = vpop.f32.mrf.mxu0 }
 0x66c   : > { %v20882_v5 = vpop.f32.mrf.mxu0 }
 0x66e   : > { %v20884_v31 = vpop.f32.mrf.mxu0 }
 0x66f   : > { %21715 = vst [vmem:[#allocation63_spill] sm:$0xff] %v20884_v31  ;;  %v10366_v31 = vadd.f32 %v20721_v59, %v20687_v45  ;;  %v10975_v45 = vadd.f32 %v16377_v47, %v20767_v11 }
 0x670   : > { %v20888_v46 = vpop.f32.mrf.mxu0 }
 0x671   : > { %21717 = vst [vmem:[#allocation44_spill] sm:$0xff] %v20888_v46  ;;  %v10971_v46 = vadd.f32 %v16373_v9, %v20751_v7 }
 0x672   : > { %v20890_v29 = vpop.f32.mrf.mxu0 }
 0x673   : > { %21718 = vst [vmem:[#allocation47_spill] sm:$0xff] %v20890_v29  ;;  %v11125_v4 = vadd.f32 %v20695_v43, %v10971_v46  ;;  %v10973_v43 = vadd.f32 %v10922_v51, %v20770_v39 }
 0x674   : > { %v20894_v38 = vpop.f32.mrf.mxu0 }
 0x675   : > { %21720 = vst [vmem:[#allocation69_spill] sm:$0xff] %v20894_v38 }
 0x676   : > { %v20896_v13 = vpop.f32.mrf.mxu0 }
 0x677   : > { %21721 = vst [vmem:[#allocation16_spill] sm:$0xff] %v20896_v13 }
 0x678   : > { %v16409_v21 = vpop.f32.mrf.mxu0 }
 0x679   : > { %v11399_v9 = vadd.f32 %v16409_v21, %v11125_v4 }
 0x67a   : > { %v11334_v18 = vpop.f32.mrf.mxu0 }
 0x67c   : > { %v16410_v49 = vpop.f32.mrf.mxu0 }
 0x67e   : > { %v11337_v19 = vpop.f32.mrf.mxu0 }
 0x680   : > { %v16413_v44 = vpop.f32.mrf.mxu0 }
 0x682   : > { %v11350_v62 = vpop.f32.mrf.mxu0 }
 0x684   : > { %v16414_v20 = vpop.f32.mrf.mxu0 }
 0x686   : > { %v20902_v29 = vpop.f32.mrf.mxu0 }
 0x687   : > { %21723 = vst [vmem:[#allocation17_spill] sm:$0xff] %v20902_v29  ;;  %v20930_v29 = vpop.f32.mrf.mxu1 }
 0x688   : > { %v20906_v38 = vpop.f32.mrf.mxu0 }
 0x689   : > { %21725 = vst [vmem:[#allocation74_spill] sm:$0xff] %v20906_v38  ;;  %v10684_v38 = vadd.f32 %v20762_v56, %v10366_v31  ;;  %v20944_v11 = vpop.f32.mrf.mxu1 }
 0x68a   : > { %v20908_v13 = vpop.f32.mrf.mxu0 }
 0x68b   : > { %21726 = vst [vmem:[#allocation52_spill] sm:$0xff] %v20908_v13  ;;  %v10972_v13 = vadd.f32 %v16374_v25, %v20760_v57  ;;  %v10970_v7 = vadd.f32 %v10909_v27, %v10684_v38  ;;  %v10382_v57 = vadd.f32 %v20727_v28, %v20693_v37  ;;  %v10398_v37 = vadd.f32 %v20735_v58, %v20705_v60  ;;  %v20961_v58 = vpop.f32.mrf.mxu1 }
 0x68c   : > { %v20912_v22 = vpop.f32.mrf.mxu0 }
 0x68d   : > { %21728 = vst [vmem:[#allocation19_spill] sm:$0xff] %v20912_v22  ;;  %v11126_v6 = vadd.f32 %v20701_v1, %v10972_v13  ;;  %v11124_v56 = vadd.f32 %v20703_v55, %v10970_v7  ;;  %v11129_v1 = vadd.f32 %v20707_v23, %v10975_v45 }
 0x68e   : > { %v20915_v36 = vpop.f32.mrf.mxu0 }
 0x68f   : > { %21729 = vst [vmem:[#allocation23_spill] sm:$0xff] %v20915_v36  ;;  %v11123_v36 = vadd.f32 %v20697_v42, %v10969_v2  ;;  %v11400_v38 = vadd.f32 %v16410_v49, %v11126_v6  ;;  %v11685_v42 = vadd.f32 %v20758_v8, %v11399_v9  ;;  %v10688_v2 = vadd.f32 %v20776_v17, %v10382_v57  ;;  %v21734_v57 = vld [vmem:[#allocation63_spill] sm:$0xff] }
 0x690   : > { %v20922_v15 = vpop.f32.mrf.mxu0  ;;  %v11398_v28 = vadd.f32 %v11337_v19, %v11124_v56  ;;  %v10979_v8 = vadd.f32 %v16381_v26, %v20784_v41  ;;  %v11403_v4 = vadd.f32 %v16413_v44, %v11129_v1  ;;  %v11127_v17 = vadd.f32 %v20711_v34, %v10973_v43  ;;  %v20973_v26 = vpop.f32.mrf.mxu1  ;;  %v21736_v56 = vld [vmem:[#allocation44_spill] sm:$0xff] }
 0x691   : > { %v11397_v40 = vadd.f32 %v11334_v18, %v11123_v36  ;;  %v10976_v18 = vadd.f32 %v16378_v63, %v20774_v12  ;;  %v10974_v55 = vadd.f32 %v20874_v52, %v10688_v2  ;;  %v20957_v12 = vld [vmem:[%s21404_s6] ss:$0 sm:$0xff]  ;;  %v11686_v60 = vadd.f32 %v20772_v24, %v11400_v38  ;;  %v21735_v38 = vld [vmem:[#allocation82_spill] sm:$0xff] }
 0x692   : > { %v20927_v22 = vpop.f32.mrf.mxu0  ;;  %v10692_v19 = vadd.f32 %v20832_v10, %v10398_v37  ;;  %v11401_v41 = vadd.f32 %v11350_v62, %v11127_v17  ;;  %v11133_v10 = vadd.f32 %v20719_v14, %v10979_v8  ;;  %v11689_v52 = vadd.f32 %v20791_v30, %v11403_v4  ;;  %v21732_v14 = vld [vmem:[#allocation58_spill] sm:$0xff]  ;;  %v21740_v8 = vld [vmem:[#allocation52_spill] sm:$0xff]  ;;  %v21741_v17 = vld [vmem:[#allocation99_spill] sm:$0xff] }
 0x693   : > { %v11683_v31 = vadd.f32 %v20764_v32, %v11397_v40  ;;  %v10977_v32 = vadd.f32 %v20878_v54, %v20786_v33  ;;  %v11130_v34 = vadd.f32 %v20715_v3, %v10976_v18  ;;  %v11128_v24 = vadd.f32 %v20717_v48, %v10974_v55  ;;  %v21731_v54 = vld [vmem:[#allocation76_spill] sm:$0xff]  ;;  %v21733_v40 = vld [vmem:[#allocation49_spill] sm:$0xff]  ;;  %v21738_v18 = vld [vmem:[#allocation31_spill] sm:$0xff]  ;;  %v20991_v55 = vpop.f32.mrf.mxu1 }
 0x694   : > { %v20933_v59 = vpop.f32.mrf.mxu0  ;;  %v11687_v9 = vadd.f32 %v21732_v14, %v11401_v41  ;;  %v10978_v43 = vadd.f32 %v21734_v57, %v10692_v19  ;;  %v21753_v57 = vld [vmem:[#allocation20_spill] sm:$0xff] }
 0x695   : > { %v11404_v51 = vadd.f32 %v16414_v20, %v11130_v34  ;;  %v11131_v48 = vadd.f32 %v21731_v54, %v10977_v32  ;;  %v21750_v54 = vld [vmem:[#allocation19_spill] sm:$0xff] }
 0x696   : > { %v20939_v46 = vpop.f32.mrf.mxu0 }
 0x697   : > { %v11690_v1 = vadd.f32 %v21738_v18, %v11404_v51  ;;  %v11405_v4 = vadd.f32 %v21740_v8, %v11131_v48  ;;  %v21746_v51 = vld [vmem:[#allocation78_spill] sm:$0xff] }
 0x698   : > { %v16445_v36 = vpop.f32.mrf.mxu0 }
 0x699   : > { %v11839_v39 = vadd.f32 %v16445_v36, %v11685_v42 }
 0x69a   : > { %v11774_v23 = vpop.f32.mrf.mxu0 }
 0x69b   : > { %v12113_v49 = vadd.f32 %v16463_v61, %v11839_v39  ;;  %v11837_v25 = vadd.f32 %v11774_v23, %v11683_v31  ;;  %v11684_v61 = vadd.f32 %v20781_v50, %v11398_v28  ;;  %v21730_v50 = vld [vmem:[#allocation17_spill] sm:$0xff] }
 0x69c   : > { %v16446_v44 = vpop.f32.mrf.mxu0  ;;  %v11402_v20 = vadd.f32 %v21730_v50, %v11128_v24  ;;  %v21739_v28 = vld [vmem:[#allocation57_spill] sm:$0xff] }
 0x69d   : > { %v12136_v27 = vadd.f32 %v20957_v12, %v12113_v49  ;;  %v12111_v21 = vadd.f32 %v12048_v35, %v11837_v25  ;;  %v11840_v47 = vadd.f32 %v16446_v44, %v11686_v60  ;;  %v10980_v35 = vadd.f32 %v20882_v5, %v20822_v16  ;;  %v21737_v5 = vld [vmem:[#allocation74_spill] sm:$0xff]  ;;  %v21742_v25 = vld [vmem:[#allocation61_spill] sm:$0xff] }
 0x69e   : > { %v11777_v63 = vpop.f32.mrf.mxu0  ;;  %v10983_v16 = vadd.f32 %v21736_v56, %v21735_v38  ;;  %v11407_v42 = vadd.f32 %v21737_v5, %v11133_v10  ;;  %v11688_v60 = vadd.f32 %v21742_v25, %v11402_v20  ;;  %v21743_v44 = vld [vmem:[#allocation102_spill] sm:$0xff]  ;;  %v21749_v50 = vld [vmem:[#allocation69_spill] sm:$0xff] }
 0x69f   : > { %v12152_v13 = vmax.f32 %v12136_v27, 0.0  ;;  %v12134_v33 = vadd.f32 %v20957_v12, %v12111_v21  ;;  %v12114_v3 = vadd.f32 %v20900_v53, %v11840_v47  ;;  %v11838_v62 = vadd.f32 %v11777_v63, %v11684_v61  ;;  %v21744_v27 = vld [vmem:[#allocation47_spill] sm:$0xff]  ;;  %v21747_v63 = vld [vmem:[#allocation37_spill] sm:$0xff] }
 0x6a0   : > { %v16449_v7 = vpop.f32.mrf.mxu0  ;;  %v11134_v23 = vadd.f32 %v21741_v17, %v10980_v35  ;;  %v10981_v21 = vadd.f32 %v21744_v27, %v21743_v44  ;;  %v21745_v47 = vld [vmem:[#allocation55_spill] sm:$0xff]  ;;  %v11137_v24 = vadd.f32 %v21746_v51, %v10983_v16  ;;  %v21748_v35 = vld [vmem:[#allocation33_spill] sm:$0xff]  ;;  %v21755_v16 = vld [vmem:[#allocation100_spill] sm:$0xff] }
 0x6a1   : > { %12168 = vst.msk [vmem:[#allocation6 + $0x10] sm:$0xff] %vm1115_vm0, %v12152_v13  ;;  %v12150_v30 = vmax.f32 %v12134_v33, 0.0  ;;  %v12137_v45 = vadd.f32 %v20957_v12, %v12114_v3  ;;  %v12112_v53 = vadd.f32 %v21733_v40, %v11838_v62  ;;  %v11843_v6 = vadd.f32 %v16449_v7, %v11689_v52  ;;  %v21751_v7 = vld [vmem:[#allocation23_spill] sm:$0xff] }
 0x6a2   : > { %v11790_v2 = vpop.f32.mrf.mxu0  ;;  %v11132_v61 = vadd.f32 %v21745_v47, %v10978_v43  ;;  %v11693_v52 = vadd.f32 %v21747_v63, %v11407_v42  ;;  %v10984_v20 = vadd.f32 %v21749_v50, %v21748_v35  ;;  %v11408_v48 = vadd.f32 %v21750_v54, %v11134_v23  ;;  %v21754_v43 = vld [vmem:[#allocation16_spill] sm:$0xff] }
 0x6a3   : > { %12166 = vst.msk [vmem:[#allocation6] sm:$0xff] %vm1115_vm0, %v12150_v30  ;;  %v12153_v36 = vmax.f32 %v12137_v45, 0.0  ;;  %v12135_v37 = vadd.f32 %v20957_v12, %v12112_v53  ;;  %v12117_v39 = vadd.f32 %v21739_v28, %v11843_v6  ;;  %v11841_v31 = vadd.f32 %v11790_v2, %v11687_v9  ;;  %v21752_v30 = vld [vmem:[#allocation45_spill] sm:$0xff]  ;;  %v21756_v28 = vld [vmem:[#allocation56_spill] sm:$0xff] }
 0x6a4   : > { %v16450_v49 = vpop.f32.mrf.mxu0  ;;  %v11406_v14 = vadd.f32 %v21751_v7, %v11132_v61  ;;  %v11691_v45 = vadd.f32 %v21752_v30, %v11405_v4  ;;  %v10982_v38 = vadd.f32 %v21754_v43, %v21753_v57  ;;  %v11411_v56 = vadd.f32 %v20922_v15, %v11137_v24  ;;  %v21757_v4 = vld [vmem:[#allocation26_spill] sm:$0xff] }
 0x6a5   : > { %12169 = vst.msk [vmem:[#allocation6 + $0x18] sm:$0xff] %vm1115_vm0, %v12153_v36  ;;  %v12151_v19 = vmax.f32 %v12135_v37, 0.0  ;;  %v12140_v32 = vadd.f32 %v20957_v12, %v12117_v39  ;;  %v12115_v41 = vadd.f32 %v20920_v0, %v11841_v31  ;;  %v11844_v34 = vadd.f32 %v16450_v49, %v11690_v1  ;;  %v12083_v0 = vpop.f32.mrf.mxu1 }
 0x6a6   : > { %v11793_v10 = vpop.f32.mrf.mxu0  ;;  %v11135_v5 = vadd.f32 %v21755_v16, %v10981_v21  ;;  %v11138_v39 = vadd.f32 %v21756_v28, %v10984_v20  ;;  %v11694_v15 = vadd.f32 %v21757_v4, %v11408_v48  ;;  %v21760_v21 = vld [vmem:[#allocation42_spill] sm:$0xff] }
 0x6a7   : > { %12167 = vst.msk [vmem:[#allocation6 + $0x8] sm:$0xff] %vm1115_vm0, %v12151_v19  ;;  %v12156_v13 = vmax.f32 %v12140_v32, 0.0  ;;  %v12138_v33 = vadd.f32 %v20957_v12, %v12115_v41  ;;  %v12118_v3 = vadd.f32 %v20930_v29, %v11844_v34  ;;  %v11842_v62 = vadd.f32 %v11793_v10, %v11688_v60  ;;  %v16475_v2 = vpop.f32.mrf.mxu1  ;;  %v21758_v60 = vld [vmem:[#allocation39_spill] sm:$0xff] }
 0x6a8   : > { %v16453_v9 = vpop.f32.mrf.mxu0  ;;  %v11692_v19 = vadd.f32 %v21758_v60, %v11406_v14  ;;  %v11697_v47 = vadd.f32 %v21760_v21, %v11411_v56  ;;  %v21763_v56 = vld [vmem:[#allocation48_spill] sm:$0xff] }
 0x6a9   : > { %12172 = vst.msk [vmem:[#allocation6 + $0x30] sm:$0xff] %vm1115_vm0, %v12156_v13  ;;  %v12154_v40 = vmax.f32 %v12138_v33, 0.0  ;;  %v12141_v53 = vadd.f32 %v20957_v12, %v12118_v3  ;;  %v12116_v6 = vadd.f32 %v20944_v11, %v11842_v62  ;;  %v11847_v29 = vadd.f32 %v16453_v9, %v11693_v52  ;;  %v12096_v61 = vpop.f32.mrf.mxu1  ;;  %v21761_v3 = vld [vmem:[#allocation64_spill] sm:$0xff] }
 0x6aa   : > { %v11806_v42 = vpop.f32.mrf.mxu0  ;;  %v11409_v11 = vadd.f32 %v20927_v22, %v11135_v5  ;;  %v17096_v9 = vld [vmem:[#allocation7 + $0x4] sm:$0xff]  }
 0x6ab   : > { %12170 = vst.msk [vmem:[#allocation6 + $0x20] sm:$0xff] %vm1115_vm0, %v12154_v40  ;;  %v12157_v18 = vmax.f32 %v12141_v53, 0.0  ;;  %v12139_v1 = vadd.f32 %v20957_v12, %v12116_v6  ;;  %v12121_v36 = vadd.f32 %v20961_v58, %v11847_v29  ;;  %v11845_v37 = vadd.f32 %v11806_v42, %v11691_v45  ;;  %v21759_v58 = vld [vmem:[#allocation80_spill] sm:$0xff]  ;;  %v16476_v14 = vpop.f32.mrf.mxu1 }
 0x6ac   : > { %v12184_v31 = vld [vmem:[#allocation6 + $0x10] ss:$2 sm:$0xff]  ;;  %v12200_v8 = vld [vmem:[#allocation6 + $0x11] ss:$2 sm:$0xff]  ;;  %v16454_v17 = vpop.f32.mrf.mxu0  ;;  %v11136_v32 = vadd.f32 %v21759_v58, %v10982_v38  ;;  %v11695_v62 = vadd.f32 %v21761_v3, %v11409_v11  ;;  %v21762_v6 = vld [vmem:[#allocation68_spill] sm:$0xff]  ;;  %v12539_v60 = vshrl.u32 %v17096_v9, 16 }
 0x6ad   : > { %12173 = vst.msk [vmem:[#allocation6 + $0x38] sm:$0xff] %vm1115_vm0, %v12157_v18  ;;  %v12155_v23 = vmax.f32 %v12139_v1, 0.0  ;;  %v12144_v49 = vadd.f32 %v20957_v12, %v12121_v36  ;;  %v12119_v25 = vadd.f32 %v20973_v26, %v11845_v37  ;;  %v12214_v41 = vmax.f32 %v12184_v31, %v12200_v8  ;;  %v12099_v36 = vpop.f32.mrf.mxu1 }
 0x6ae   : > { %v12182_v22 = vld [vmem:[#allocation6] ss:$2 sm:$0xff]  ;;  %v12198_v34 = vld [vmem:[#allocation6 + $0x1] ss:$2 sm:$0xff]  ;;  %v11848_v44 = vadd.f32 %v16454_v17, %v11694_v15  ;;  %v11809_v27 = vpop.f32.mrf.mxu0  ;;  %v11412_v26 = vadd.f32 %v20933_v59, %v11138_v39  ;;  %v11410_v52 = vadd.f32 %v20939_v46, %v11136_v32  ;;  %v12541_v37 = vshll.u32 %v17096_v9, 16 }
 0x6af   : > { %v12213_v51 = vmax.f32 %v12182_v22, %v12198_v34  ;;  %12171 = vst.msk [vmem:[#allocation6 + $0x28] sm:$0xff] %vm1115_vm0, %v12155_v23  ;;  %v12160_v24 = vmax.f32 %v12144_v49, 0.0  ;;  %v12142_v10 = vadd.f32 %v20957_v12, %v12119_v25  ;;  %v11846_v63 = vadd.f32 %v11809_v27, %v11692_v19  ;;  %v12234_v49 = vld [vmem:[#allocation7] sm:$0x8]  ;;  %v12238_v25 = vld [vmem:[#allocation7 + $0x10] sm:$0xf] }
 0x6b0   : > { %v12122_v13 = vadd.f32 %v20991_v55, %v11848_v44  ;;  %v16457_v33 = vpop.f32.mrf.mxu0  ;;  %v11698_v29 = vadd.f32 %v21762_v6, %v11412_v26  ;;  %v11696_v16 = vadd.f32 %v21763_v56, %v11410_v52  ;;  %v12543_v19 = vrot.slane %v12541_v37, 1 }
 0x6b1   : > { %v12221_v35 = vmax.f32 %v12213_v51, %v12214_v41  ;;  %12176 = vst.msk [vmem:[#allocation6 + $0x50] sm:$0xff] %vm1115_vm0, %v12160_v24  ;;  %v12158_v50 = vmax.f32 %v12142_v10, 0.0  ;;  %v12120_v20 = vadd.f32 %v12083_v0, %v11846_v63  ;;  %v11851_v54 = vadd.f32 %v16457_v33, %v11697_v47  ;;  %v17105_v24 = vld [vmem:[%s21405_s7] sm:$0xff]  }
 0x6b2   : > { %v12145_v48 = vadd.f32 %v20957_v12, %v12122_v13  ;;  %v11822_v7 = vpop.f32.mrf.mxu0  ;;  %v21765_v33 = vld [vmem:[#allocation60_spill] sm:$0xff] }
 0x6b3   : > { %v12225_v59 = vpack.c.bf16 %v12221_v35, %v12221_v35  ;;  %12174 = vst.msk [vmem:[#allocation6 + $0x40] sm:$0xff] %vm1115_vm0, %v12158_v50  ;;  %v12143_v46 = vadd.f32 %v20957_v12, %v12120_v20  ;;  %v12125_v55 = vadd.f32 %v16475_v2, %v11851_v54  ;;  %v11849_v30 = vadd.f32 %v11822_v7, %v11695_v62  ;;  %v21766_v35 = vld [vmem:[#allocation101_spill] sm:$0xff] }
 0x6b4   : > { %v12188_v45 = vld [vmem:[#allocation6 + $0x30] ss:$2 sm:$0xff]  ;;  %v12204_v40 = vld [vmem:[#allocation6 + $0x31] ss:$2 sm:$0xff]  ;;  %v12161_v53 = vmax.f32 %v12145_v48, 0.0  ;;  %v16458_v0 = vpop.f32.mrf.mxu0 }
 0x6b5   : > { %v12159_v57 = vmax.f32 %v12143_v46, 0.0  ;;  %v12148_v43 = vadd.f32 %v20957_v12, %v12125_v55  ;;  %v12123_v38 = vadd.f32 %v12096_v61, %v11849_v30  ;;  %12227 = vst.msk [vmem:[#allocation7 + $0xc] sm:$0x3] %vm12226_vm9, %v12225_v59  ;;  %v12216_v5 = vmax.f32 %v12188_v45, %v12204_v40  ;;  %v21764_v61 = vld [vmem:[#allocation59_spill] sm:$0xff] }
 0x6b6   : > { %v12186_v42 = vld [vmem:[#allocation6 + $0x20] ss:$2 sm:$0xff]  ;;  %v12202_v18 = vld [vmem:[#allocation6 + $0x21] ss:$2 sm:$0xff]  ;;  %12177 = vst.msk [vmem:[#allocation6 + $0x58] sm:$0xff] %vm1115_vm0, %v12161_v53  ;;  %v11852_v2 = vadd.f32 %v16458_v0, %v11698_v29  ;;  %v11825_v1 = vpop.f32.mrf.mxu0  ;;  %v14921_v51 = vcombine.low %v12234_v49, %v21764_v61  ;;  %v21065_v48 = vld [vmem:[%s21405_s7 + $0x38] sm:$0xff]  }
 0x6b7   : > { %v12215_v11 = vmax.f32 %v12186_v42, %v12202_v18  ;;  %12175 = vst.msk [vmem:[#allocation6 + $0x48] sm:$0xff] %vm1115_vm0, %v12159_v57  ;;  %v12164_v28 = vmax.f32 %v12148_v43, 0.0  ;;  %v12146_v39 = vadd.f32 %v20957_v12, %v12123_v38  ;;  %v11850_v31 = vadd.f32 %v11825_v1, %v11696_v16  ;;  %v12242_v59 = vld [vmem:[#allocation7 + $0x20] sm:$0xf]  ;;  %v12671_v49 = vld [vmem:[#allocation7 + $0x8] sm:$0x8] }
 0x6b8   : > { %v12126_v8 = vadd.f32 %v16476_v14, %v11852_v2  ;;  %v12369_v20 = vshrl.u32 %v14921_v51, 16  ;;  %v12372_v54 = vshll.u32 %v14921_v51, 16  ;;  %v12240_v14 = vld [vmem:[#allocation7 + $0x18] sm:$0xf] }
 0x6b9   : > { %v12222_v4 = vmax.f32 %v12215_v11, %v12216_v5  ;;  %12180 = vst.msk [vmem:[#allocation6 + $0x70] sm:$0xff] %vm1115_vm0, %v12164_v28  ;;  %v12162_v15 = vmax.f32 %v12146_v39, 0.0  ;;  %v12124_v17 = vadd.f32 %v12099_v36, %v11850_v31  ;;  %v14925_v36 = vcombine.low %v12242_v59, %v12242_v59  ;;  %v17115_v28 = vld [vmem:[%s21405_s7 + $0x40] sm:$0xff]  }
 0x6ba   : > { %v12149_v23 = vadd.f32 %v20957_v12, %v12126_v8  ;;  %v12371_v29 = vrot.slane %v12369_v20, 3  ;;  %v12374_v0 = vrot.slane %v12372_v54, 4 }
 0x6bb   : > { %v12228_v58 = vpack.c.bf16 %v12222_v4, %v12222_v4  ;;  %12178 = vst.msk [vmem:[#allocation6 + $0x60] sm:$0xff] %vm1115_vm0, %v12162_v15  ;;  %v12147_v32 = vadd.f32 %v20957_v12, %v12124_v17  ;;  %v12544_v12 = vor.u32 %v12543_v19, %v12539_v60  ;;  %v21081_v60 = vld [vmem:[#allocation7 + $0x10] sm:$0xf] }
 0x6bc   : > { %v12165_v41 = vmax.f32 %v12149_v23, 0.0  ;;  %v12237_v22 = vld [vmem:[#allocation7 + $0xc] sm:$0xf]  ;;  %v12375_v17 = vor.u32 %v12374_v0, %v12371_v29 }
 0x6bd   : > { %v17097_v34 = vld [vmem:[#allocation7 + $0xc] sm:$0xff]   ;;  %v12163_v21 = vmax.f32 %v12147_v32, 0.0  ;;  %v14912_v47 = vcombine.low %v12237_v22, %v12238_v25  ;;  %12229 = vst.msk [vmem:[#allocation7 + $0x14] sm:$0x3] %vm12226_vm9, %v12228_v58  ;;  %v14922_v3 = vcombine.low %v21765_v33, %v12237_v22  ;;  %v21767_v32 = vld [vmem:[#allocation35_spill] sm:$0xff] }
 0x6be   : > { %v12192_v44 = vld [vmem:[#allocation6 + $0x50] ss:$2 sm:$0xff]  ;;  %v12208_v27 = vld [vmem:[#allocation6 + $0x51] ss:$2 sm:$0xff]  ;;  %v12190_v10 = vld [vmem:[#allocation6 + $0x40] ss:$2 sm:$0xff] }
 0x6bf   : > { %v12206_v63 = vld [vmem:[#allocation6 + $0x41] ss:$2 sm:$0xff]  ;;  %12181 = vst.msk [vmem:[#allocation6 + $0x78] sm:$0xff] %vm1115_vm0, %v12165_v41  ;;  %v12546_v26 = vshll.u32 %v17097_v34, 16  ;;  %v12218_v52 = vmax.f32 %v12192_v44, %v12208_v27  ;;  %12179 = vst.msk [vmem:[#allocation6 + $0x68] sm:$0xff] %vm1115_vm0, %v12163_v21  ;;  %16482 = vmatmul.mubr.msk.bf16.vlgmr.msra.gmra.mxu0 %vm1115_vm0, %v14912_v47  ;;  %v12377_v46 = vshrl.u32 %v14922_v3, 16 }
 0x6c0   : > { %v12217_v13 = vmax.f32 %v12190_v10, %v12206_v63  ;;  %16490 = vmatpush3.bf16.msra.mxu0 %v21766_v35  ;;  %v12380_v55 = vshll.u32 %v14922_v3, 16  ;;  %v12550_v38 = vshrl.u32 %v17097_v34, 16  ;;  %v12404_v41 = vshrl.u32 %v14925_v36, 16  ;;  %v21090_v21 = vld [vmem:[%s21405_s7 + $0x68] sm:$0xff]  }
 0x6c1   : > { %v12548_v62 = vrot.slane %v12546_v26, 1  ;;  %16491 = vmatprep.subr.bf16.mxu0 %v17105_v24  ;;  %v12379_v18 = vrot.slane %v12377_v46, 3  ;;  %v12407_v27 = vshll.u32 %v14925_v36, 16 }
 0x6c2   : > { %v12223_v50 = vmax.f32 %v12217_v13, %v12218_v52  ;;  %v12382_v2 = vrot.slane %v12380_v55, 4 }
 0x6c3   : > { %v12549_v7 = vsel %vm4189_vm5, %v12544_v12, %v12548_v62  ;;  %v12552_v1 = vor.u32 %v12550_v38, %v12548_v62 }
 0x6c4   : > { %v12230_v9 = vpack.c.bf16 %v12223_v50, %v12223_v50  ;;  %16505 = vmatprep.mubr.msk.bf16.mxu1 %vm1115_vm0, %v12549_v7  ;;  %v12239_v30 = vld [vmem:[#allocation7 + $0x14] sm:$0xf]  ;;  %16492 = vmatpush3.bf16.msra.mxu0 %v17105_v24  ;;  %v12383_v23 = vor.u32 %v12382_v2, %v12379_v18  ;;  %v21099_v7 = vld [vmem:[#allocation7 + $0x18] sm:$0xf] }
 0x6c5   : > { %v17104_v45 = vld [vmem:[#allocation7 + $0x14] sm:$0xff]   ;;  %v14913_v6 = vcombine.low %v12239_v30, %v12240_v14  ;;  %16513 = vmatprep.subr.bf16.mxu0 %v21065_v48  ;;  %v14923_v56 = vcombine.low %v12238_v25, %v12239_v30  ;;  %v21079_v25 = vld [vmem:[#allocation7 + $0xc] sm:$0xf] }
 0x6c6   : > { %v12196_v40 = vld [vmem:[#allocation6 + $0x70] ss:$2 sm:$0xff]  ;;  %v12212_v53 = vld [vmem:[#allocation6 + $0x71] ss:$2 sm:$0xff]  ;;  %12231 = vst.msk [vmem:[#allocation7 + $0x1c] sm:$0x3] %vm12226_vm9, %v12230_v9  ;;  %v12384_v10 = vsel %vm3274_vm4, %v12375_v17, %v12383_v23  ;;  %v14951_v26 = vcombine.low %v12671_v49, %v21079_v25  ;;  %v14966_v36 = vcombine.low %v21079_v25, %v21081_v60 }
 0x6c7   : > { %v12194_v57 = vld [vmem:[#allocation6 + $0x60] ss:$2 sm:$0xff]  ;;  %v12210_v43 = vld [vmem:[#allocation6 + $0x61] ss:$2 sm:$0xff]  ;;  %v12554_v16 = vshll.u32 %v17104_v45, 16  ;;  %v12220_v5 = vmax.f32 %v12196_v40, %v12212_v53  ;;  %16485 = vmatprep.mubr.msk.bf16.mxu0 %vm1115_vm0, %v14913_v6  ;;  %v12386_v39 = vshrl.u32 %v14923_v56, 16 }
 0x6c8   : > { %v12219_v42 = vmax.f32 %v12194_v57, %v12210_v43  ;;  %v12389_v31 = vshll.u32 %v14923_v56, 16  ;;  %v21076_v4 = vld [vmem:[#allocation7 + $0x14] sm:$0xf]  ;;  %v12558_v51 = vshrl.u32 %v17104_v45, 16  ;;  %v12406_v9 = vrot.slane %v12404_v41, 3 }
 0x6c9   : > { %v12556_v37 = vrot.slane %v12554_v16, 1  ;;  %v14952_v44 = vcombine.low %v21081_v60, %v21076_v4  ;;  %v12388_v47 = vrot.slane %v12386_v39, 3  ;;  %v12709_v46 = vshrl.u32 %v14951_v26, 16  ;;  %v21106_v6 = vld [vmem:[#allocation7 + $0x20] sm:$0xf] }
 0x6ca   : > { %v12224_v11 = vmax.f32 %v12219_v42, %v12220_v5  ;;  %v12391_v61 = vrot.slane %v12389_v31, 4  ;;  %v12712_v45 = vshll.u32 %v14951_v26, 16  ;;  %v21131_v17 = vld [vmem:[#allocation7 + $0x14] sm:$0xf] }
 0x6cb   : > { %v12557_v8 = vsel %vm4189_vm5, %v12552_v1, %v12556_v37  ;;  %v12560_v52 = vor.u32 %v12558_v51, %v12556_v37  ;;  %v12717_v62 = vshrl.u32 %v14952_v44, 16  ;;  %v12720_v35 = vshll.u32 %v14952_v44, 16 }
 0x6cc   : > { %v12232_v15 = vpack.c.bf16 %v12224_v11, %v12224_v11  ;;  %16506 = vmatmul.mubr.msk.bf16.vlgmr.msra.gmra.mxu1 %vm1115_vm0, %v12557_v8  ;;  %v12392_v50 = vor.u32 %v12391_v61, %v12388_v47  ;;  %v12711_v18 = vrot.slane %v12709_v46, 3  ;;  %v12714_v2 = vrot.slane %v12712_v45, 4  ;;  %v21123_v11 = vld [vmem:[#allocation7 + $0x28] sm:$0xf]  ;;  %v21147_v47 = vld [vmem:[#allocation7 + $0x2c] sm:$0xf] }
 0x6cd   : > { %v12241_v19 = vld [vmem:[#allocation7 + $0x1c] sm:$0xf]  ;;  %16526 = vmatpush3.bf16.msra.mxu1 %v21767_v32  ;;  %v12719_v40 = vrot.slane %v12717_v62, 3  ;;  %v12722_v53 = vrot.slane %v12720_v35, 4  ;;  %v17128_v62 = vld [vmem:[#allocation7 + $0xc] sm:$0xff]   ;;  %v17130_v35 = vld [vmem:[%s21405_s7 + $0x60] sm:$0xff]  }
 0x6ce   : > { %v17106_v58 = vld [vmem:[#allocation7 + $0x1c] sm:$0xff]   ;;  %12233 = vst.msk [vmem:[#allocation7 + $0x24] sm:$0x3] %vm12226_vm9, %v12232_v15  ;;  %v14914_v22 = vcombine.low %v12241_v19, %v12242_v59  ;;  %v14924_v34 = vcombine.low %v12240_v14, %v12241_v19  ;;  %16527 = vmatprep.subr.bf16.mxu1 %v17115_v28  ;;  %v17114_v14 = vld [vmem:[%s21405_s7 + $0x30] sm:$0xff]   ;;  %v12409_v59 = vrot.slane %v12407_v27, 4  ;;  %v12393_v57 = vsel %vm3274_vm4, %v12383_v23, %v12392_v50 }
 0x6cf   : > { %v12562_v24 = vshll.u32 %v17106_v58, 16  ;;  %v21104_v55 = vld [vmem:[#allocation7 + $0x1c] sm:$0xf]  ;;  %v12566_v0 = vshrl.u32 %v17106_v58, 16  ;;  %v12723_v31 = vor.u32 %v12722_v53, %v12719_v40  ;;  %v21133_v23 = vld [vmem:[#allocation7 + $0x18] sm:$0xf]  ;;  %v12715_v19 = vor.u32 %v12714_v2, %v12711_v18 }
 0x6d0   : > { %16486 = vmatmul.mubr.msk.bf16.gmra.mxu0 %vm1115_vm0, %v14914_v22  ;;  %v12395_v63 = vshrl.u32 %v14924_v34, 16  ;;  %v12398_v12 = vshll.u32 %v14924_v34, 16  ;;  %v14953_v38 = vcombine.low %v21099_v7, %v21104_v55  ;;  %v21119_v1 = vld [vmem:[#allocation7 + $0x1c] sm:$0xf]  ;;  %v12410_v37 = vor.u32 %v12409_v59, %v12406_v9  ;;  %v21145_v27 = vld [vmem:[#allocation7 + $0x28] sm:$0xf] }
 0x6d1   : > { %16493 = vmatprep.mubr.msk.bf16.mxu0 %vm1115_vm0, %v12384_v10  ;;  %v12564_v13 = vrot.slane %v12562_v24, 1  ;;  %16528 = vmatpush3.bf16.msra.mxu1 %v17115_v28  ;;  %v21128_v28 = vld [vmem:[%s21405_s7 + $0x58] sm:$0xff]   ;;  %v14996_v60 = vcombine.low %v21133_v23, %v21119_v1  ;;  %v14955_v58 = vcombine.low %v21123_v11, %v21123_v11  ;;  %v12724_v22 = vsel %vm3274_vm4, %v12715_v19, %v12723_v31  ;;  %v17127_v46 = vld [vmem:[%s21405_s7 + $0x50] sm:$0xff]  }
 0x6d2   : > { %v12397_v33 = vrot.slane %v12395_v63, 3  ;;  %v12400_v3 = vrot.slane %v12398_v12, 4  ;;  %16549 = vmatprep.subr.bf16.mxu1 %v21090_v21  ;;  %v12726_v8 = vshrl.u32 %v14953_v38, 16  ;;  %v12729_v15 = vshll.u32 %v14953_v38, 16  ;;  %v21153_v12 = vld [vmem:[#allocation7 + $0x20] sm:$0xf] }
 0x6d3   : > { %v12565_v20 = vsel %vm4189_vm5, %v12560_v52, %v12564_v13  ;;  %v12568_v5 = vor.u32 %v12566_v0, %v12564_v13  ;;  %v13171_v10 = vshrl.u32 %v14996_v60, 16  ;;  %v13174_v63 = vshll.u32 %v14996_v60, 16  ;;  %v21167_v59 = vld [vmem:[#allocation7 + $0x14] sm:$0xff]  }
 0x6d4   : > { %16509 = vmatprep.mubr.msk.bf16.mxu1 %vm1115_vm0, %v12565_v20  ;;  %v12401_v54 = vor.u32 %v12400_v3, %v12397_v33  ;;  %v12728_v34 = vrot.slane %v12726_v8, 3  ;;  %v12731_v44 = vrot.slane %v12729_v15, 4  ;;  %v12744_v26 = vshrl.u32 %v14955_v58, 16 }
 0x6d5   : > { %v17109_v30 = vld [vmem:[#allocation7 + $0x24] ss:$0 sps:$4 sm:$0x11]   ;;  %v14967_v52 = vcombine.low %v21076_v4, %v21099_v7  ;;  %v12747_v3 = vshll.u32 %v14955_v58, 16  ;;  %v14968_v20 = vcombine.low %v21104_v55, %v21106_v6  ;;  %v13173_v7 = vrot.slane %v13171_v10, 3 }
 0x6d6   : > { %v21108_v29 = vld [vmem:[#allocation7 + $0x24] sm:$0xf]  ;;  %v12570_v43 = vshll.u32 %v17109_v30, 16  ;;  %v12402_v56 = vsel %vm3274_vm4, %v12392_v50, %v12401_v54  ;;  %v12411_v41 = vsel %vm3274_vm4, %v12401_v54, %v12410_v37  ;;  %v12732_v50 = vor.u32 %v12731_v44, %v12728_v34 }
 0x6d7   : > { %v14954_v16 = vcombine.low %v21106_v6, %v21108_v29  ;;  %v21150_v24 = vld [vmem:[#allocation7 + $0x24] sm:$0xf]  ;;  %v13176_v9 = vrot.slane %v13174_v63, 4  ;;  %v12746_v55 = vrot.slane %v12744_v26, 3  ;;  %v12749_v40 = vrot.slane %v12747_v3, 4  ;;  %v17138_v63 = vld [vmem:[#allocation7 + $0x1c] sm:$0xff]  }
 0x6d8   : > { %16494 = vmatmul.mubr.msk.bf16.vlgmr.msra.gmra.mxu0 %vm1115_vm0, %v12393_v57  ;;  %v12572_v42 = vrot.slane %v12570_v43, 1  ;;  %v14997_v54 = vcombine.low %v21153_v12, %v21150_v24  ;;  %v12995_v53 = vshll.u32 %v17128_v62, 16  ;;  %v21174_v6 = vld [vmem:[#allocation7 + $0x30] sm:$0xf]  ;;  %v12733_v0 = vsel %vm3274_vm4, %v12723_v31, %v12732_v50  ;;  %v17134_v60 = vld [vmem:[#allocation7 + $0x24] sm:$0xff]  }
 0x6d9   : > { %16514 = vmatpush3.bf16.msra.mxu0 %v21065_v48  ;;  %16497 = vmatprep.mubr.msk.bf16.mxu0 %vm1115_vm0, %v12402_v56  ;;  %v13125_v48 = vld [vmem:[#allocation7 + $0x10] sm:$0x8]  ;;  %v12735_v49 = vshrl.u32 %v14954_v16, 16  ;;  %v12738_v25 = vshll.u32 %v14954_v16, 16  ;;  %v13177_v16 = vor.u32 %v13176_v9, %v13173_v7  ;;  %v14999_v18 = vcombine.low %v21174_v6, %v21174_v6  ;;  %v17142_v3 = vld [vmem:[%s21405_s7 + $0x80] sm:$0xff]  }
 0x6da   : > { %16515 = vmatprep.subr.bf16.mxu0 %v17114_v14  ;;  %v12573_v39 = vsel %vm4189_vm5, %v12568_v5, %v12572_v42  ;;  %v14995_v32 = vcombine.low %v13125_v48, %v21131_v17  ;;  %v13180_v57 = vshrl.u32 %v14997_v54, 16  ;;  %v13183_v43 = vshll.u32 %v14997_v54, 16  ;;  %v17132_v48 = vld [vmem:[%s21405_s7 + $0x78] sm:$0xff]   ;;  %v17143_v7 = vld [vmem:[#allocation7 + $0x24] sm:$0xff]  }
 0x6db   : > { %16510 = vmatmul.mubr.msk.bf16.gmra.mxu1 %vm1115_vm0, %v12573_v39  ;;  %v12737_v61 = vrot.slane %v12735_v49, 3  ;;  %v12740_v51 = vrot.slane %v12738_v25, 4  ;;  %v13000_v5 = vshll.u32 %v21167_v59, 16  ;;  %v14969_v2 = vcombine.low %v21108_v29, %v21123_v11  ;;  %v17133_v39 = vld [vmem:[#allocation7 + $0x1c] sm:$0xff]  }
 0x6dc   : > { %16529 = vmatprep.mubr.msk.bf16.mxu1 %vm1115_vm0, %v14966_v36  ;;  %v13163_v13 = vshrl.u32 %v14995_v32, 16  ;;  %v13166_v33 = vshll.u32 %v14995_v32, 16  ;;  %v12997_v37 = vrot.slane %v12995_v53, 1  ;;  %v12750_v31 = vor.u32 %v12749_v40, %v12746_v55 }
 0x6dd   : > { %16516 = vmatpush3.bf16.msra.mxu0 %v17114_v14  ;;  %v14998_v14 = vcombine.low %v21145_v27, %v21147_v47  ;;  %v12741_v4 = vor.u32 %v12740_v51, %v12737_v61  ;;  %v13182_v8 = vrot.slane %v13180_v57, 3  ;;  %v12993_v25 = vshrl.u32 %v17128_v62, 16 }
 0x6de   : > { %16537 = vmatprep.subr.bf16.mxu0 %v21128_v28  ;;  %v13165_v30 = vrot.slane %v13163_v13, 3  ;;  %v13168_v45 = vrot.slane %v13166_v33, 4  ;;  %v13002_v29 = vrot.slane %v13000_v5, 1  ;;  %v13198_v19 = vshrl.u32 %v14999_v18, 16 }
 0x6df   : > { %v13189_v38 = vshrl.u32 %v14998_v14, 16  ;;  %v12742_v56 = vsel %vm3274_vm4, %v12732_v50, %v12741_v4  ;;  %v13192_v42 = vshll.u32 %v14998_v14, 16  ;;  %v13201_v58 = vshll.u32 %v14999_v18, 16  ;;  %v17140_v50 = vld [vmem:[#allocation7 + $0x2c] ss:$0 sps:$4 sm:$0x11]  }
 0x6e0   : > { %16498 = vmatmul.mubr.msk.bf16.gmra.mxu0 %vm1115_vm0, %v12411_v41  ;;  %v13169_v36 = vor.u32 %v13168_v45, %v13165_v30  ;;  %v12998_v32 = vor.u32 %v12997_v37, %v12993_v25  ;;  %v13008_v41 = vshll.u32 %v17133_v39, 16  ;;  %v12751_v34 = vsel %vm3274_vm4, %v12741_v4, %v12750_v31  ;;  %v17146_v37 = vld [vmem:[#allocation7 + $0x34] ss:$0 sps:$4 sm:$0x11]  }
 0x6e1   : > { %16517 = vmatprep.mubr.msk.bf16.mxu0 %vm1115_vm0, %v12724_v22  ;;  %v13191_v15 = vrot.slane %v13189_v38, 3  ;;  %v13194_v11 = vrot.slane %v13192_v42, 4  ;;  %v17137_v22 = vld [vmem:[#allocation7 + $0x14] sm:$0xff]   ;;  %v13016_v10 = vshll.u32 %v17134_v60, 16  ;;  %v13200_v26 = vrot.slane %v13198_v19, 3  ;;  %v17144_v38 = vld [vmem:[#allocation7 + $0x2c] sm:$0xff]  }
 0x6e2   : > { %v13178_v49 = vsel %vm3274_vm4, %v13169_v36, %v13177_v16  ;;  %v13003_v61 = vsel %vm4189_vm5, %v12998_v32, %v13002_v29  ;;  %v13010_v13 = vrot.slane %v13008_v41, 1  ;;  %v13449_v33 = vshll.u32 %v17137_v22, 16 }
 0x6e3   : > { %16530 = vmatmul.mubr.msk.bf16.vlgmr.msra.gmra.mxu1 %vm1115_vm0, %v14967_v52  ;;  %v13195_v51 = vor.u32 %v13194_v11, %v13191_v15  ;;  %v13203_v52 = vrot.slane %v13201_v58, 4  ;;  %v13004_v62 = vshrl.u32 %v21167_v59, 16  ;;  %v13012_v54 = vshrl.u32 %v17133_v39, 16  ;;  %v17139_v59 = vld [vmem:[%s21405_s7 + $0x70] sm:$0xff]  }
 0x6e4   : > { %16533 = vmatprep.mubr.msk.bf16.mxu1 %vm1115_vm0, %v14968_v20  ;;  %16550 = vmatpush3.bf16.msra.mxu1 %v21090_v21  ;;  %v17135_v21 = vld [vmem:[%s21405_s7 + $0x88] sm:$0xff]   ;;  %v13018_v14 = vrot.slane %v13016_v10, 1  ;;  %v13454_v4 = vshll.u32 %v17138_v63, 16  ;;  %v13451_v30 = vrot.slane %v13449_v33, 1  ;;  %v13024_v40 = vshll.u32 %v17140_v50, 16 }
 0x6e5   : > { %16551 = vmatprep.subr.bf16.mxu1 %v17130_v35  ;;  %v13006_v9 = vor.u32 %v13004_v62, %v13002_v29  ;;  %v13014_v55 = vor.u32 %v13012_v54, %v13010_v13  ;;  %v13470_v36 = vshll.u32 %v17144_v38, 16  ;;  %v13458_v39 = vshrl.u32 %v17138_v63, 16 }
 0x6e6   : > { %v13456_v57 = vrot.slane %v13454_v4, 1  ;;  %v13026_v42 = vrot.slane %v13024_v40, 1  ;;  %v13474_v25 = vshrl.u32 %v17144_v38, 16  ;;  %v13478_v29 = vshll.u32 %v17146_v37, 16 }
 0x6e7   : > { %v13011_v45 = vsel %vm4189_vm5, %v13006_v9, %v13010_v13  ;;  %v13019_v53 = vsel %vm4189_vm5, %v13014_v55, %v13018_v14  ;;  %v13472_v15 = vrot.slane %v13470_v36, 1  ;;  %v15013_v41 = vcombine.low %v21147_v47, %v21174_v6  ;;  %v13657_v47 = vld [vmem:[%s21407_s9 + $0x28] sm:$0xff]  ;;  %v13655_v6 = vld [vmem:[%s21407_s9 + $0x18] sm:$0xff] }
 0x6e8   : > { %16518 = vmatmul.mubr.msk.bf16.vlgmr.msra.gmra.mxu0 %vm1115_vm0, %v12733_v0  ;;  %16552 = vmatpush3.bf16.msra.mxu1 %v17130_v35  ;;  %v13447_v0 = vshrl.u32 %v17137_v22, 16  ;;  %v13480_v58 = vrot.slane %v13478_v29, 1  ;;  %v13654_v22 = vld [vmem:[%s21407_s9 + $0x10] sm:$0xff] }
 0x6e9   : > { %16538 = vmatpush3.bf16.msra.mxu0 %v21128_v28  ;;  %16521 = vmatprep.mubr.msk.bf16.mxu0 %vm1115_vm0, %v12742_v56  ;;  %v13185_v28 = vrot.slane %v13183_v43, 4  ;;  %v13462_v43 = vshll.u32 %v17143_v7, 16  ;;  %v13476_v19 = vor.u32 %v13474_v25, %v13472_v15 }
 0x6ea   : > { %16539 = vmatprep.subr.bf16.mxu0 %v17127_v46  ;;  %16573 = vmatprep.subr.bf16.mxu1 %v17135_v21 }
 0x6eb   : > { %16534 = vmatmul.mubr.msk.bf16.gmra.mxu1 %vm1115_vm0, %v14969_v2  ;;  %v13186_v44 = vor.u32 %v13185_v28, %v13182_v8  ;;  %v13464_v2 = vrot.slane %v13462_v43, 1  ;;  %v15010_v8 = vcombine.low %v21131_v17, %v21133_v23  ;;  %v15011_v17 = vcombine.low %v21119_v1, %v21153_v12  ;;  %v13659_v1 = vld [vmem:[%s21407_s9 + $0x38] sm:$0xff] }
 0x6ec   : > { %16553 = vmatprep.mubr.msk.bf16.mxu1 %vm1115_vm0, %v13178_v49  ;;  %v13460_v49 = vor.u32 %v13458_v39, %v13456_v57  ;;  %v15012_v23 = vcombine.low %v21150_v24, %v21145_v27  ;;  %v13481_v32 = vsel %vm4189_vm5, %v13476_v19, %v13480_v58  ;;  %v17355_v12 = vmov 0.0   ;;  %v13658_v27 = vld [vmem:[%s21407_s9 + $0x30] sm:$0xff]  ;;  %v13656_v24 = vld [vmem:[%s21407_s9 + $0x20] sm:$0xff] }
 0x6ed   : > { %16540 = vmatpush3.bf16.msra.mxu0 %v17127_v46  ;;  %v13187_v35 = vsel %vm3274_vm4, %v13177_v16, %v13186_v44  ;;  %v13196_v20 = vsel %vm3274_vm4, %v13186_v44, %v13195_v51  ;;  %v13204_v46 = vor.u32 %v13203_v52, %v13200_v26  ;;  %v13452_v16 = vor.u32 %v13451_v30, %v13447_v0  ;;  %v13652_v44 = vld [vmem:[%s21407_s9] sm:$0xff] }
 0x6ee   : > { %16561 = vmatprep.subr.bf16.mxu0 %v17132_v48  ;;  %v13465_v11 = vsel %vm4189_vm5, %v13460_v49, %v13464_v2 }
 0x6ef   : > { %v13205_v56 = vsel %vm3274_vm4, %v13195_v51, %v13204_v46  ;;  %v13457_v18 = vsel %vm4189_vm5, %v13452_v16, %v13456_v57 }
 0x6f0   : > { %16522 = vmatmul.mubr.msk.bf16.gmra.mxu0 %vm1115_vm0, %v12751_v34  ;;  %v13653_v34 = vld [vmem:[%s21407_s9 + $0x8] sm:$0xff] }
 0x6f1   : > { %16541 = vmatprep.mubr.msk.bf16.mxu0 %vm1115_vm0, %v13003_v61 }
 0x6f3   : > { %16554 = vmatmul.mubr.msk.bf16.vlgmr.msra.gmra.mxu1 %vm1115_vm0, %v13187_v35 }
 0x6f4   : > { %16557 = vmatprep.mubr.msk.bf16.mxu1 %vm1115_vm0, %v13196_v20  ;;  %16574 = vmatpush3.bf16.msra.mxu1 %v17135_v21  ;;  %v13020_v21 = vshrl.u32 %v17134_v60, 16 }
 0x6f5   : > { %16575 = vmatprep.subr.bf16.mxu1 %v17142_v3 }
 0x6f6   : > { %v13022_v5 = vor.u32 %v13020_v21, %v13018_v14 }
 0x6f8   : > { %16542 = vmatmul.mubr.msk.bf16.vlgmr.msra.gmra.mxu0 %vm1115_vm0, %v13011_v45  ;;  %16576 = vmatpush3.bf16.msra.mxu1 %v17142_v3  ;;  %v13027_v31 = vsel %vm4189_vm5, %v13022_v5, %v13026_v42 }
 0x6f9   : > { %16562 = vmatpush3.bf16.msra.mxu0 %v17132_v48  ;;  %16545 = vmatprep.mubr.msk.bf16.mxu0 %vm1115_vm0, %v13019_v53  ;;  %v13466_v48 = vshrl.u32 %v17143_v7, 16 }
 0x6fa   : > { %16563 = vmatprep.subr.bf16.mxu0 %v17139_v59 }
 0x6fb   : > { %16558 = vmatmul.mubr.msk.bf16.gmra.mxu1 %vm1115_vm0, %v13205_v56  ;;  %v13468_v28 = vor.u32 %v13466_v48, %v13464_v2 }
 0x6fc   : > { %16577 = vmatprep.mubr.msk.bf16.mxu1 %vm1115_vm0, %v13457_v18 }
 0x6fd   : > { %16564 = vmatpush3.bf16.msra.mxu0 %v17139_v59  ;;  %v13473_v60 = vsel %vm4189_vm5, %v13468_v28, %v13472_v15 }
 0x6fe   : > { %16585 = vmatprep.subr.mxu0 %v17355_v12 }
 0x700   : > { %16546 = vmatmul.mubr.msk.bf16.gmra.mxu0 %vm1115_vm0, %v13027_v31 }
 0x701   : > { %16565 = vmatprep.mubr.msk.bf16.mxu0 %vm1115_vm0, %v15010_v8 }
 0x703   : > { %16578 = vmatmul.mubr.msk.bf16.vlgmr.msra.gmra.mxu1 %vm1115_vm0, %v13465_v11 }
 0x704   : > { %16581 = vmatprep.mubr.msk.bf16.mxu1 %vm1115_vm0, %v13473_v60 }
 0x708   : > { %16566 = vmatmul.mubr.msk.bf16.vlgmr.msra.gmra.mxu0 %vm1115_vm0, %v15011_v17 }
 0x709   : > { %16569 = vmatprep.mubr.msk.bf16.mxu0 %vm1115_vm0, %v15012_v23  ;;  %16586 = vmatpush3.msra.mxu0 %v13659_v1 }
 0x70a   : > { %16587 = vmatprep.subr.mxu0 %v17355_v12 }
 0x70b   : > { %16582 = vmatmul.mubr.msk.bf16.gmra.mxu1 %vm1115_vm0, %v13481_v32  ;;  %16588 = vmatpush3.msra.mxu0 %v13658_v27 }
 0x70c   : > { %16589 = vmatprep.subr.mxu0 %v17355_v12 }
 0x70d   : > { %16590 = vmatpush3.msra.mxu0 %v13657_v47 }
 0x70e   : > { %16591 = vmatprep.subr.mxu0 %v17355_v12 }
 0x70f   : > { %16592 = vmatpush3.msra.mxu0 %v13656_v24 }
 0x710   : > { %16570 = vmatmul.mubr.msk.bf16.gmra.mxu0 %vm1115_vm0, %v15013_v41  ;;  %16593 = vmatprep.subr.mxu0 %v17355_v12 }
 0x711   : > { %16601 = vmatprep.mubr.msk.f32.mxu0 %vm17356_vm10, %v17355_v12  ;;  %16594 = vmatpush3.msra.mxu0 %v13655_v6 }
 0x712   : > { %16595 = vmatprep.subr.mxu0 %v17355_v12 }
 0x713   : > { %16596 = vmatpush3.msra.mxu0 %v13654_v22 }
 0x714   : > { %16597 = vmatprep.subr.mxu0 %v17355_v12 }
 0x715   : > { %16598 = vmatpush3.msra.mxu0 %v13653_v34 }
 0x716   : > { %16599 = vmatprep.subr.mxu0 %v17355_v12 }
 0x717   : > { %16600 = vmatpush3.msra.mxu0 %v13652_v44 }
 0x718   : > { %16604 = vmatprep.subr.mxu0 %v17355_v12 }
 0x77f   : > { %v16483_v61 = vpop.f32.mrf.mxu0 }
 0x781   : > { %v12330_v51 = vpop.f32.mrf.mxu0 }
 0x783   : > { %v16484_v10 = vpop.f32.mrf.mxu0 }
 0x785   : > { %v12333_v63 = vpop.f32.mrf.mxu0 }
 0x78c   : > { %v16507_v26 = vpop.f32.mrf.mxu1 }
 0x78e   : > { %v12632_v13 = vpop.f32.mrf.mxu1 }
 0x790   : > { %v16487_v52 = vpop.f32.mrf.mxu0  ;;  %v16508_v62 = vpop.f32.mrf.mxu1 }
 0x792   : > { %v12346_v33 = vpop.f32.mrf.mxu0  ;;  %v12635_v20 = vpop.f32.mrf.mxu1 }
 0x794   : > { %v16488_v3 = vpop.f32.mrf.mxu0 }
 0x796   : > { %v21273_v35 = vpop.f32.mrf.mxu0 }
 0x798   : > { %v16495_v50 = vpop.f32.mrf.mxu0 }
 0x799   : > { %v12479_v28 = vadd.f32 %v16495_v50, %v16483_v61 }
 0x79a   : > { %v12470_v54 = vpop.f32.mrf.mxu0 }
 0x79b   : > { %v16511_v4 = vpop.f32.mrf.mxu1  ;;  %v12471_v25 = vadd.f32 %v12470_v54, %v12330_v51  ;;  %v12665_v19 = vadd.f32 %v16507_v26, %v12479_v28 }
 0x79c   : > { %v16496_v14 = vpop.f32.mrf.mxu0 }
 0x79d   : > { %v12648_v9 = vpop.f32.mrf.mxu1  ;;  %v12482_v60 = vadd.f32 %v16496_v14, %v16484_v10  ;;  %v12663_v41 = vadd.f32 %v12632_v13, %v12471_v25 }
 0x79e   : > { %v12473_v7 = vpop.f32.mrf.mxu0 }
 0x79f   : > { %v16512_v55 = vpop.f32.mrf.mxu1  ;;  %v12474_v23 = vadd.f32 %v12473_v7, %v12333_v63  ;;  %v12666_v6 = vadd.f32 %v16508_v62, %v12482_v60 }
 0x7a0   : > { %v16499_v46 = vpop.f32.mrf.mxu0 }
 0x7a1   : > { %v21275_v59 = vpop.f32.mrf.mxu1  ;;  %v12495_v1 = vadd.f32 %v16499_v46, %v16487_v52  ;;  %v12664_v51 = vadd.f32 %v12635_v20, %v12474_v23 }
 0x7a2   : > { %v12486_v30 = vpop.f32.mrf.mxu0 }
 0x7a3   : > { %v16531_v40 = vpop.f32.mrf.mxu1  ;;  %v12487_v22 = vadd.f32 %v12486_v30, %v12346_v33  ;;  %v12669_v50 = vadd.f32 %v16511_v4, %v12495_v1 }
 0x7a4   : > { %v16500_v45 = vpop.f32.mrf.mxu0 }
 0x7a5   : > { %v12916_v0 = vpop.f32.mrf.mxu1  ;;  %v12498_v26 = vadd.f32 %v16500_v45, %v16488_v3 }
 0x7a6   : > { %v12489_v53 = vpop.f32.mrf.mxu0 }
 0x7a7   : > { %v16532_v43 = vpop.f32.mrf.mxu1  ;;  %v12490_v7 = vadd.f32 %v12489_v53, %v21273_v35 }
 0x7a8   : > { %v16519_v57 = vpop.f32.mrf.mxu0 }
 0x7a9   : > { %v12919_v21 = vpop.f32.mrf.mxu1  ;;  %v12843_v32 = vadd.f32 %v16519_v57, %v12665_v19  ;;  %v12667_v57 = vadd.f32 %v12648_v9, %v12487_v22 }
 0x7aa   : > { %v12810_v38 = vpop.f32.mrf.mxu0 }
 0x7ab   : > { %v16535_v16 = vpop.f32.mrf.mxu1  ;;  %v12841_v24 = vadd.f32 %v12810_v38, %v12663_v41  ;;  %v12949_v10 = vadd.f32 %v16531_v40, %v12843_v32 }
 0x7ac   : > { %v16520_v56 = vpop.f32.mrf.mxu0 }
 0x7ad   : > { %v21277_v42 = vpop.f32.mrf.mxu1  ;;  %v12844_v61 = vadd.f32 %v16520_v56, %v12666_v6  ;;  %v12947_v52 = vadd.f32 %v12916_v0, %v12841_v24  ;;  %v12670_v56 = vadd.f32 %v16512_v55, %v12498_v26  ;;  %v15035_v55 = vld [vmem:[%s21406_s8] ss:$0 sm:$0xff] }
 0x7ae   : > { %v12813_v5 = vpop.f32.mrf.mxu0 }
 0x7af   : > { %v21279_v2 = vpop.f32.mrf.mxu1  ;;  %v12842_v63 = vadd.f32 %v12813_v5, %v12664_v51  ;;  %v12950_v38 = vadd.f32 %v16532_v43, %v12844_v61  ;;  %v12668_v5 = vadd.f32 %v21275_v59, %v12490_v7 }
 0x7b0   : > { %v16523_v18 = vpop.f32.mrf.mxu0 }
 0x7b1   : > { %v21281_v37 = vpop.f32.mrf.mxu1  ;;  %v12847_v46 = vadd.f32 %v16523_v18, %v12669_v50  ;;  %v12948_v4 = vadd.f32 %v12919_v21, %v12842_v63 }
 0x7b2   : > { %v12826_v36 = vpop.f32.mrf.mxu0 }
 0x7b3   : > { %v16555_v39 = vpop.f32.mrf.mxu1  ;;  %v12845_v28 = vadd.f32 %v12826_v36, %v12667_v57 }
 0x7b4   : > { %v16524_v48 = vpop.f32.mrf.mxu0 }
 0x7b5   : > { %v13264_v8 = vpop.f32.mrf.mxu1  ;;  %v12848_v25 = vadd.f32 %v16524_v48, %v12670_v56  ;;  %v12951_v43 = vadd.f32 %v21277_v42, %v12845_v28 }
 0x7b6   : > { %v12829_v31 = vpop.f32.mrf.mxu0 }
 0x7b7   : > { %v16556_v49 = vpop.f32.mrf.mxu1  ;;  %v12846_v18 = vadd.f32 %v12829_v31, %v12668_v5 }
 0x7b8   : > { %v16543_v15 = vpop.f32.mrf.mxu0 }
 0x7b9   : > { %v21283_v11 = vpop.f32.mrf.mxu1  ;;  %v13119_v13 = vadd.f32 %v16543_v15, %v12949_v10  ;;  %v12953_v15 = vadd.f32 %v16535_v16, %v12847_v46  ;;  %v12954_v16 = vadd.f32 %v21279_v2, %v12848_v25  ;;  %v12952_v1 = vadd.f32 %v21281_v37, %v12846_v18 }
 0x7ba   : > { %v13086_v29 = vpop.f32.mrf.mxu0 }
 0x7bb   : > { %v21285_v17 = vpop.f32.mrf.mxu1  ;;  %v13117_v30 = vadd.f32 %v13086_v29, %v12947_v52  ;;  %v13297_v45 = vadd.f32 %v16555_v39, %v13119_v13 }
 0x7bc   : > { %v16544_v58 = vpop.f32.mrf.mxu0 }
 0x7bd   : > { %v21287_v47 = vpop.f32.mrf.mxu1  ;;  %v13120_v3 = vadd.f32 %v16544_v58, %v12950_v38  ;;  %v13295_v9 = vadd.f32 %v13264_v8, %v13117_v30 }
 0x7be   : > { %v13089_v27 = vpop.f32.mrf.mxu0 }
 0x7bf   : > { %v21289_v44 = vpop.f32.mrf.mxu1  ;;  %v13118_v35 = vadd.f32 %v13089_v27, %v12948_v4  ;;  %v13298_v29 = vadd.f32 %v16556_v49, %v13120_v3 }
 0x7c0   : > { %v16547_v34 = vpop.f32.mrf.mxu0 }
 0x7c1   : > { %v21291_v14 = vpop.f32.mrf.mxu1  ;;  %v13123_v19 = vadd.f32 %v16547_v34, %v12953_v15  ;;  %v13296_v41 = vadd.f32 %v21283_v11, %v13118_v35 }
 0x7c2   : > { %v13102_v54 = vpop.f32.mrf.mxu0 }
 0x7c3   : > { %v16579_v33 = vpop.f32.mrf.mxu1  ;;  %v13121_v59 = vadd.f32 %v13102_v54, %v12951_v43  ;;  %v13301_v24 = vadd.f32 %v21285_v17, %v13123_v19 }
 0x7c4   : > { %v16548_v62 = vpop.f32.mrf.mxu0 }
 0x7c5   : > { %v13540_v40 = vpop.f32.mrf.mxu1  ;;  %v13124_v42 = vadd.f32 %v16548_v62, %v12954_v16  ;;  %v13299_v10 = vadd.f32 %v21287_v47, %v13121_v59 }
 0x7c6   : > { %v13105_v20 = vpop.f32.mrf.mxu0 }
 0x7c7   : > { %v16580_v60 = vpop.f32.mrf.mxu1  ;;  %v13122_v61 = vadd.f32 %v13105_v20, %v12952_v1  ;;  %v13302_v63 = vadd.f32 %v21289_v44, %v13124_v42 }
 0x7c8   : > { %v16567_v0 = vpop.f32.mrf.mxu0 }
 0x7c9   : > { %v13403_v53 = vadd.f32 %v16567_v0, %v13297_v45  ;;  %v13543_v21 = vpop.f32.mrf.mxu1  ;;  %v13300_v62 = vadd.f32 %v21291_v14, %v13122_v61  ;;  %v13738_v61 = vld [vmem:[%s21409_s11 + $0x18] sm:$0xff] }
 0x7ca   : > { %v13370_v36 = vpop.f32.mrf.mxu0 }
 0x7cb   : > { %v13573_v39 = vadd.f32 %v16579_v33, %v13403_v53  ;;  %v13401_v48 = vadd.f32 %v13370_v36, %v13295_v9  ;;  %v16583_v23 = vpop.f32.mrf.mxu1 }
 0x7cc   : > { %v16568_v58 = vpop.f32.mrf.mxu0 }
 0x7cd   : > { %v13588_v32 = vadd.f32 %v15035_v55, %v13573_v39  ;;  %v13571_v8 = vadd.f32 %v13540_v40, %v13401_v48  ;;  %v13404_v31 = vadd.f32 %v16568_v58, %v13298_v29  ;;  %v13556_v2 = vpop.f32.mrf.mxu1 }
 0x7ce   : > { %v13373_v27 = vpop.f32.mrf.mxu0 }
 0x7cf   : > { %v13596_v6 = vmax.f32 %v13588_v32, 0.0  ;;  %v13586_v22 = vadd.f32 %v15035_v55, %v13571_v8  ;;  %v13574_v49 = vadd.f32 %v16580_v60, %v13404_v31  ;;  %v13402_v34 = vadd.f32 %v13373_v27, %v13296_v41  ;;  %v16584_v46 = vpop.f32.mrf.mxu1 }
 0x7d0   : > { %v16571_v51 = vpop.f32.mrf.mxu0 }
 0x7d1   : > { %13605 = vst.msk [vmem:[#allocation8 + $0x10] sm:$0xff] %vm13602_vm11, %v13596_v6  ;;  %v13594_v26 = vmax.f32 %v13586_v22, 0.0  ;;  %v13589_v11 = vadd.f32 %v15035_v55, %v13574_v49  ;;  %v13572_v50 = vadd.f32 %v13543_v21, %v13402_v34  ;;  %v13407_v54 = vadd.f32 %v16571_v51, %v13301_v24  ;;  %v13559_v3 = vpop.f32.mrf.mxu1  ;;  %v13737_v51 = vld [vmem:[%s21409_s11 + $0x10] sm:$0xff] }
 0x7d2   : > { %v13386_v37 = vpop.f32.mrf.mxu0 }
 0x7d3   : > { %13603 = vst.msk [vmem:[#allocation8] sm:$0xff] %vm13602_vm11, %v13594_v26  ;;  %v13597_v17 = vmax.f32 %v13589_v11, 0.0  ;;  %v13587_v13 = vadd.f32 %v15035_v55, %v13572_v50  ;;  %v13577_v52 = vadd.f32 %v16583_v23, %v13407_v54  ;;  %v13405_v7 = vadd.f32 %v13386_v37, %v13299_v10  ;;  %v13736_v10 = vld [vmem:[%s21409_s11 + $0x8] sm:$0xff]  ;;  %v13735_v26 = vld [vmem:[%s21409_s11] sm:$0xff] }
 0x7d4   : > { %v16572_v57 = vpop.f32.mrf.mxu0  ;;  %v13660_v11 = vld [vmem:[%s21408_s10] sm:$0x1] }
 0x7d5   : > { %13606 = vst.msk [vmem:[#allocation8 + $0x18] sm:$0xff] %vm13602_vm11, %v13597_v17  ;;  %v13595_v47 = vmax.f32 %v13587_v13, 0.0  ;;  %v13592_v33 = vadd.f32 %v15035_v55, %v13577_v52  ;;  %v13575_v30 = vadd.f32 %v13556_v2, %v13405_v7  ;;  %v13408_v38 = vadd.f32 %v16572_v57, %v13302_v63  ;;  %v13815_v17 = vld [vmem:[%s21411_s13 + $0x8] sm:$0xff]  ;;  %v13814_v13 = vld [vmem:[%s21411_s13] sm:$0xff] }
 0x7d6   : > { %v13389_v28 = vpop.f32.mrf.mxu0  ;;  %v13739_v52 = vld [vmem:[%s21410_s12] sm:$0x1] }
 0x7d7   : > { %13604 = vst.msk [vmem:[#allocation8 + $0x8] sm:$0xff] %vm13602_vm11, %v13595_v47  ;;  %v13600_v44 = vmax.f32 %v13592_v33, 0.0  ;;  %v13590_v56 = vadd.f32 %v15035_v55, %v13575_v30  ;;  %v13578_v20 = vadd.f32 %v16584_v46, %v13408_v38  ;;  %v13406_v40 = vadd.f32 %v13389_v28, %v13300_v62  ;;  %v13816_v47 = vld [vmem:[%s21412_s14] sm:$0x1] }
 0x7d9   : > { %13609 = vst.msk [vmem:[#allocation8 + $0x30] sm:$0xff] %vm13602_vm11, %v13600_v44  ;;  %v13598_v4 = vmax.f32 %v13590_v56, 0.0  ;;  %v13593_v45 = vadd.f32 %v15035_v55, %v13578_v20  ;;  %v13576_v25 = vadd.f32 %v13559_v3, %v13406_v40 }
 0x7db   : > { %13607 = vst.msk [vmem:[#allocation8 + $0x20] sm:$0xff] %vm13602_vm11, %v13598_v4  ;;  %v13601_v14 = vmax.f32 %v13593_v45, 0.0  ;;  %v13591_v5 = vadd.f32 %v15035_v55, %v13576_v25 }
 0x7dc   : > { %v13613_v15 = vld [vmem:[#allocation8 + $0x10] ss:$2 sm:$0xff]  ;;  %v13621_v0 = vld [vmem:[#allocation8 + $0x11] ss:$2 sm:$0xff] }
 0x7dd   : > { %13610 = vst.msk [vmem:[#allocation8 + $0x38] sm:$0xff] %vm13602_vm11, %v13601_v14  ;;  %v13599_v60 = vmax.f32 %v13591_v5, 0.0  ;;  %v13627_v9 = vmax.f32 %v13613_v15, %v13621_v0 }
 0x7de   : > { %v13611_v35 = vld [vmem:[#allocation8] ss:$2 sm:$0xff]  ;;  %v13619_v53 = vld [vmem:[#allocation8 + $0x1] ss:$2 sm:$0xff] }
 0x7df   : > { %v13626_v18 = vmax.f32 %v13611_v35, %v13619_v53  ;;  %13608 = vst.msk [vmem:[#allocation8 + $0x28] sm:$0xff] %vm13602_vm11, %v13599_v60 }
 0x7e1   : > { %v13630_v19 = vmax.f32 %v13626_v18, %v13627_v9 }
 0x7e3   : > { %v13633_v43 = vsel %vm13632_vm12, %v13630_v19, 0.0 }
 0x7e4   : > { %v13634_v36 = vrot.slane %v13633_v43, 4  ;;  %v13617_v21 = vld [vmem:[#allocation8 + $0x30] ss:$2 sm:$0xff]  ;;  %v13625_v39 = vld [vmem:[#allocation8 + $0x31] ss:$2 sm:$0xff] }
 0x7e5   : > { %v13629_v59 = vmax.f32 %v13617_v21, %v13625_v39 }
 0x7e6   : > { %v13635_v48 = vadd.f32 %v13634_v36, %v13633_v43  ;;  %v13615_v29 = vld [vmem:[#allocation8 + $0x20] ss:$2 sm:$0xff]  ;;  %v13623_v55 = vld [vmem:[#allocation8 + $0x21] ss:$2 sm:$0xff] }
 0x7e7   : > { %v13628_v16 = vmax.f32 %v13615_v29, %v13623_v55 }
 0x7e8   : > { %v13636_v23 = vrot.slane %v13635_v48, 2 }
 0x7e9   : > { %v13631_v58 = vmax.f32 %v13628_v16, %v13629_v59 }
 0x7ea   : > { %v13637_v31 = vadd.f32 %v13636_v23, %v13635_v48 }
 0x7eb   : > { %v13640_v32 = vsel %vm13632_vm12, %v13631_v58, 0.0 }
 0x7ec   : > { %v13641_v8 = vrot.slane %v13640_v32, 4  ;;  %v13638_v1 = vrot.slane %v13637_v31, 1 }
 0x7ee   : > { %v13642_v41 = vadd.f32 %v13641_v8, %v13640_v32  ;;  %v13639_v6 = vadd.f32 %v13638_v1, %v13637_v31 }
 0x7f0   : > { %v13643_v42 = vrot.slane %v13642_v41, 2 }
 0x7f2   : > { %v13644_v27 = vadd.f32 %v13643_v42, %v13642_v41 }
 0x7f4   : > { %v13645_v24 = vrot.slane %v13644_v27, 1 }
 0x7f6   : > { %v13646_v22 = vadd.f32 %v13645_v24, %v13644_v27 }
 0x7f8   : > { %v13647_v49 = vadd.f32 %v13646_v22, %v13639_v6 }
 0x7fa   : > { %v13648_v34 = vmul.f32 0.25, %v13647_v49 }
 0x7fc   : > { %13650 = vst.msk [vmem:[#allocation9] sm:$0x1] %vm13649_vm13, %v13648_v34 }
 0x803   : > { %v13651_v2 = vld [vmem:[#allocation9] sm:$0x1] }
 0x804   : > { %16602 = vmatmul.mubr.msk.f32.vlgmr.msra.gmra.mxu0 %vm13602_vm11, %v13651_v2 }
 0x805   : > { %16605 = vmatpush3.msra.mxu0 %v13738_v61  ;;  %16612 = vmatprep.mubr.msk.f32.mxu0 %vm17356_vm10, %v17355_v12 }
 0x806   : > { %16606 = vmatprep.subr.mxu0 %v17355_v12 }
 0x807   : > { %16607 = vmatpush3.msra.mxu0 %v13737_v51 }
 0x808   : > { %16608 = vmatprep.subr.mxu0 %v17355_v12 }
 0x809   : > { %16609 = vmatpush3.msra.mxu0 %v13736_v10 }
 0x80a   : > { %16610 = vmatprep.subr.mxu0 %v17355_v12 }
 0x80b   : > { %16611 = vmatpush3.msra.mxu0 %v13735_v26 }
 0x80c   : > { %16615 = vmatprep.subr.mxu0 %v17355_v12 }
 0x8c4   : > { %v13730_v50 = vpop.f32.mrf.mxu0 }
 0x8c5   : > { %v13731_v54 = vadd.f32 %v13730_v50, %v13660_v11 }
 0x8c6   : > { %v16603_v37 = vpop.f32.mrf.mxu0 }
 0x8c7   : > { %v13734_v63 = vmax.f32 %v13731_v54, 0.0 }
 0x8c9   : > { %16613 = vmatmul.mubr.msk.f32.vlgmr.msra.gmra.mxu0 %vm1115_vm0, %v13734_v63 }
 0x8ca   : > { %16619 = vmatprep.mubr.msk.f32.mxu0 %vm17356_vm10, %v17355_v12  ;;  %16616 = vmatpush3.msra.mxu0 %v13815_v17 }
 0x8cb   : > { %16617 = vmatprep.subr.mxu0 %v17355_v12 }
 0x8cc   : > { %16618 = vmatpush3.msra.mxu0 %v13814_v13 }
 0x989   : > { %v13809_v7 = vpop.f32.mrf.mxu0 }
 0x98a   : > { %v13810_v46 = vadd.f32 %v13809_v7, %v13739_v52 }
 0x98b   : > { %v16614_v57 = vpop.f32.mrf.mxu0 }
 0x98c   : > { %v13813_v62 = vmax.f32 %v13810_v46, 0.0 }
 0x98e   : > { %16620 = vmatmul.mubr.msk.f32.vlgmr.msra.gmra.mxu0 %vm9849_vm7, %v13813_v62 }
 0xa4e   : > { %v13886_v12 = vpop.f32.mrf.mxu0 }
 0xa4f   : > { %v13887_v33 = vadd.f32 %v13886_v12, %v13816_v47 }
 0xa50   : > { %v16621_v30 = vpop.f32.mrf.mxu0 }
 0xa51   : > { %13891 = vst.msk [vmem:[%s506_s24] sm:$0x1] %vm13890_vm14, %v13887_v33 }
 0xa52   : > { %17289 = shalt.err (!%p17286_p5)
}
 0xa53   : > { %s17290_s17 = scalar_lea.hbm %s21358_s1, 16  ;;  %s17294_s29 = scalar_lea.hbm %s21769_s0, 32 }
 0xa54   : > { %p17291_p6 = scmp.ne.s32.totalorder %s21358_s1, %s17290_s17  ;;  %p17295_p10 = scmp.lt.s32.totalorder %s21358_s1, %s21769_s0 }
 0xa55   : > { %p17296_p11 = scmp.lt.s32.totalorder %s17294_s29, %s17290_s17 }
 0xa56   : > { %p17292_p7 = pnand %p17291_p6, %p17478_p4 }
 0xa57   : > { %p17297_p12 = por %p17296_p11, %p17295_p10 }
 0xa58   : > { %p17293_p9 = pneg %p17292_p7 }
 0xa5a   : > { %p17298_p13 = pnand %p17297_p12, %p17293_p9 }
 0xa5c   : > { %17301 = shalt.err (!%p17298_p13)
}
 0xa5d   : > { %16631 = dma.vmem_to_hbm [thread:$0]  (%p17478_p4), %s13907_s25, 16, %s21358_s1, %s13893_s2  }
 0xa5e PF: > { %s21770_s3 = sld [smem:[#allocation13_spill]]  ;;  %p16637_p0 = scmp.ge.s32.totalorder %s17352_s23, 2 }
 0xa60   : > { %p16634_p1 = pnand %p16637_p0, %p17485_p8 }
 0xa62   : > { %p16635_p2 = pneg %p16634_p1 }
 0xa64   : > { %s13918_s21 = sand.u32 1, %s21770_s3  }
 0xa65   : > { %s13919_s18 = scalar_lea.sflag [#allocation11], %s13918_s21 }
 0xa66   : > { %17327 = dma.done.wait (%p16635_p2), %s13919_s18, 16  }
 0xa67   : > { %17329 = vsyncadd (%p16635_p2), %s13919_s18, 4294967280  ;;  %s28_s23 = sadd.s32 1, %s17352_s23   ;;  %s21771_s21 = sld [smem:[#allocation14_spill]] }
 0xa68   : > { %p25_p3 = scmp.ge.s32.totalorder %s28_s23, 4   ;;  %s21772_s22 = sld [smem:[#allocation15_spill]] }
 0xa69   : > { %s21773_s18 = smov %s17336_s19  ;;  %s21774_s19 = smov %s17340_s20 }
 0xa6a   : > { %s21775_s20 = smov %s17491_s16  ;;  %27 = sbr.rel (!%p25_p3) target bundleno = 10 (0xa), region = 323 }
 0xa6f   :  { %13923 = vsyncpa [#allocation11], 1 }
 0xa70   :  { %13925 = vsyncpa [#allocation11 + $0x1], 1 }

</bundles_post_ra>
